<compile_context>
chip_gen: v7x
topology: tpu7x:2x2x1
jax: 0.10.0
libtpu: 0.0.40
codegen_flags: <defaults>
</compile_context>

<pallas_src>
import functools

import jax
import jax.numpy as jnp
from jax.experimental import pallas as pl
from jax.experimental.pallas import tpu as pltpu

_EPS = 1e-5
_VMEM_LIMIT = 48 * 1024 * 1024


# ---------------------------------------------------------------------------
# Pallas kernels
# ---------------------------------------------------------------------------
def conv1_bn_kernel(a_ref, w_ref, b_ref, g_ref, be_ref, o_ref, sum_ref, sq_ref,
                    *, m_valid, eps):
    """conv1: im2col-matmul + bias + ReLU + BatchNorm (batch stats), bf16 out.

    Grid axis 0 walks row tiles of the (M, 27) patch matrix ("arbitrary").
    The full (M, 64) bf16 output slab stays resident in VMEM; per-channel
    sum / sum-of-squares accumulate in f32 scratch; on the last step the
    batch-stat scale/shift is applied in place to the whole slab.
    """
    i = pl.program_id(0)
    tm = a_ref.shape[0]

    @pl.when(i == 0)
    def _():
        sum_ref[...] = jnp.zeros_like(sum_ref)
        sq_ref[...] = jnp.zeros_like(sq_ref)

    # bf16 operands on the MXU, f32 accumulate; epilogue kept in f32.
    y = jnp.dot(a_ref[...], w_ref[...], preferred_element_type=jnp.float32)
    y = jnp.maximum(y + b_ref[...], 0.0)

    sum_ref[...] += jnp.sum(y, axis=0, keepdims=True)
    sq_ref[...] += jnp.sum(y * y, axis=0, keepdims=True)

    start = pl.multiple_of(i * tm, tm)
    o_ref[pl.ds(start, tm), :] = y.astype(o_ref.dtype)

    @pl.when(i == pl.num_programs(0) - 1)
    def _():
        inv_m = 1.0 / m_valid
        mean = sum_ref[...] * inv_m
        # Biased variance (PyTorch train-mode normalization); clamp f32 cancellation.
        var = jnp.maximum(sq_ref[...] * inv_m - mean * mean, 0.0)
        scale = g_ref[...] * jax.lax.rsqrt(var + eps)
        shift = be_ref[...] - mean * scale
        o_ref[...] = (o_ref[...] * scale + shift).astype(o_ref.dtype)


def conv2_tap_kernel(x00, x01, x10, x11, w_ref, b_ref, o_ref, sum_ref, sq_ref,
                     *, ho, wo):
    """conv2: 9 tap matmuls over phase-decomposed padded input + bias + ReLU.

    Inputs are the 4 stride-2 phase grids of the zero-padded NHWC activation,
    one batch group per grid step.  Each 3x3 tap is a static (ho, wo) window
    of one phase grid -> no im2col patch slab in HBM.  BN2 statistics
    accumulate into small resident f32 outputs; the pre-BN ReLU activation
    streams out per tile in bf16 (BN2 itself is folded into the Linear).
    """
    g = pl.program_id(0)

    @pl.when(g == 0)
    def _():
        sum_ref[...] = jnp.zeros_like(sum_ref)
        sq_ref[...] = jnp.zeros_like(sq_ref)

    phases = ((x00, x01), (x10, x11))
    gb = x00.shape[0]
    cin = x00.shape[3]
    rows = gb * ho * wo

    acc = None
    for t in range(9):
        i, j = divmod(t, 3)
        ph = phases[i % 2][j % 2]
        xt = ph[:, pl.ds(i // 2, ho), pl.ds(j // 2, wo), :]      # (gb, ho, wo, cin)
        xt = xt.reshape(rows, cin)
        y_t = jnp.dot(xt, w_ref[t], preferred_element_type=jnp.float32)
        acc = y_t if acc is None else acc + y_t

    y = jnp.maximum(acc + b_ref[...], 0.0)                       # f32 (rows, cout)
    sum_ref[...] += jnp.sum(y, axis=0, keepdims=True)
    sq_ref[...] += jnp.sum(y * y, axis=0, keepdims=True)
    o_ref[...] = y.astype(o_ref.dtype)


def linear_bn_kernel(x_ref, s_ref, t_ref, w_ref, b_ref, o_ref, acc_ref):
    """K-tiled linear with BN2 folded in: o = (x*scale + shift) @ w + b."""
    k = pl.program_id(0)

    @pl.when(k == 0)
    def _():
        acc_ref[...] = jnp.zeros_like(acc_ref)

    xs = (x_ref[...].astype(jnp.float32) * s_ref[...] + t_ref[...]
          ).astype(jnp.bfloat16)
    acc_ref[...] += jnp.dot(xs, w_ref[...], preferred_element_type=jnp.float32)

    @pl.when(k == pl.num_programs(0) - 1)
    def _():
        o_ref[...] = (acc_ref[...] + b_ref[...]).astype(o_ref.dtype)


# ---------------------------------------------------------------------------
# Pallas wrappers
# ---------------------------------------------------------------------------
def _largest_divisor_leq(n, cap):
    g = 1
    for d in range(1, min(n, cap) + 1):
        if n % d == 0:
            g = d
    return g


def conv1_bn_layer(patches, w, b, gamma, beta, *, eps=_EPS):
    """patches:(M,27) bf16, w:(27,64) bf16 -> BN(ReLU(patches@w + b)) as (M,64) bf16."""
    m, k = patches.shape
    _, c = w.shape
    tm = 512 if m % 512 == 0 else 256       # M is always a multiple of 256 -> no pad
    grid = (m // tm,)
    kern = functools.partial(conv1_bn_kernel, m_valid=float(m), eps=eps)
    out = pl.pallas_call(
        kern,
        out_shape=jax.ShapeDtypeStruct((m, c), jnp.bfloat16),
        grid_spec=pltpu.PrefetchScalarGridSpec(
            num_scalar_prefetch=0,
            grid=grid,
            in_specs=[
                pl.BlockSpec((tm, k), lambda i: (i, 0)),
                pl.BlockSpec((k, c), lambda i: (0, 0)),
                pl.BlockSpec((1, c), lambda i: (0, 0)),
                pl.BlockSpec((1, c), lambda i: (0, 0)),
                pl.BlockSpec((1, c), lambda i: (0, 0)),
            ],
            out_specs=pl.BlockSpec((m, c), lambda i: (0, 0)),
            scratch_shapes=[pltpu.VMEM((1, c), jnp.float32),
                            pltpu.VMEM((1, c), jnp.float32)],
        ),
        compiler_params=pltpu.CompilerParams(
            dimension_semantics=("arbitrary",),
            vmem_limit_bytes=_VMEM_LIMIT),
    )(patches, w, b.reshape(1, c), gamma.reshape(1, c), beta.reshape(1, c))
    return out


def conv2_tap_layer(phases, w, b):
    """phases: 4x (N, Ho+1, Wo+1, Cin) bf16, w:(9, Cin, Cout) bf16.

    Returns (pre-BN ReLU activations (N*Ho*Wo, Cout) bf16, sum (1,Cout) f32,
    sumsq (1,Cout) f32)."""
    n, hop, wop, cin = phases[0].shape
    ho, wo = hop - 1, wop - 1
    cout = w.shape[-1]
    gsz = _largest_divisor_leq(n, 8)        # samples per grid step (divides N)
    rows = gsz * ho * wo
    grid = (n // gsz,)
    kern = functools.partial(conv2_tap_kernel, ho=ho, wo=wo)
    phase_spec = pl.BlockSpec((gsz, hop, wop, cin), lambda i: (i, 0, 0, 0))
    out, s, q = pl.pallas_call(
        kern,
        out_shape=(jax.ShapeDtypeStruct((n * ho * wo, cout), jnp.bfloat16),
                   jax.ShapeDtypeStruct((1, cout), jnp.float32),
                   jax.ShapeDtypeStruct((1, cout), jnp.float32)),
        grid_spec=pltpu.PrefetchScalarGridSpec(
            num_scalar_prefetch=0,
            grid=grid,
            in_specs=[phase_spec, phase_spec, phase_spec, phase_spec,
                      pl.BlockSpec((9, cin, cout), lambda i: (0, 0, 0)),
                      pl.BlockSpec((1, cout), lambda i: (0, 0))],
            out_specs=[pl.BlockSpec((rows, cout), lambda i: (i, 0)),
                       pl.BlockSpec((1, cout), lambda i: (0, 0)),
                       pl.BlockSpec((1, cout), lambda i: (0, 0))],
        ),
        compiler_params=pltpu.CompilerParams(
            dimension_semantics=("arbitrary",),
            vmem_limit_bytes=_VMEM_LIMIT),
    )(*phases, w, b.reshape(1, cout))
    return out, s, q


def linear_bn_fused(x, scale_k, shift_k, w, b, *, tk=8192):
    """x:(M,K) bf16, scale/shift:(1,K) f32, w:(K,Np) bf16 -> (M,Np) f32."""
    m, k = x.shape
    _, n = w.shape
    tk = min(tk, k)
    assert k % tk == 0, "K must be a multiple of the K tile"
    grid = (k // tk,)
    out = pl.pallas_call(
        linear_bn_kernel,
        out_shape=jax.ShapeDtypeStruct((m, n), jnp.float32),
        grid_spec=pltpu.PrefetchScalarGridSpec(
            num_scalar_prefetch=0,
            grid=grid,
            in_specs=[
                pl.BlockSpec((m, tk), lambda kk: (0, kk)),
                pl.BlockSpec((1, tk), lambda kk: (0, kk)),
                pl.BlockSpec((1, tk), lambda kk: (0, kk)),
                pl.BlockSpec((tk, n), lambda kk: (kk, 0)),
                pl.BlockSpec((1, n), lambda kk: (0, 0)),
            ],
            out_specs=pl.BlockSpec((m, n), lambda kk: (0, 0)),
            scratch_shapes=[pltpu.VMEM((m, n), jnp.float32)],
        ),
        compiler_params=pltpu.CompilerParams(
            dimension_semantics=("arbitrary",),
            vmem_limit_bytes=_VMEM_LIMIT),
    )(x, scale_k, shift_k, w, b.reshape(1, n))
    return out


# ---------------------------------------------------------------------------
# Glue: conv1 im2col, conv2 phase split, parameter init, full forward
# ---------------------------------------------------------------------------
def im2col(x_nhwc, kh, kw, stride, pad, dtype=jnp.bfloat16):
    # Only used for conv1 (Cin=3, K=27): the patch slab is tiny there.
    n, h, w, c = x_nhwc.shape
    xp = jnp.pad(x_nhwc, ((0, 0), (pad, pad), (pad, pad), (0, 0))).astype(dtype)
    ho = (h + 2 * pad - kh) // stride + 1
    wo = (w + 2 * pad - kw) // stride + 1
    taps = []
    for i in range(kh):
        for j in range(kw):
            taps.append(
                xp[:, i: i + stride * ho: stride, j: j + stride * wo: stride, :])
    p = jnp.stack(taps, axis=3)                    # (N, Ho, Wo, kh*kw, C)
    return p.reshape(n * ho * wo, kh * kw * c), ho, wo


def pad_and_phase_split(x_nhwc):
    """Zero-pad spatially by 1 and split into the 4 stride-2 phase grids."""
    xp = jnp.pad(x_nhwc, ((0, 0), (1, 1), (1, 1), (0, 0)))
    return (xp[:, 0::2, 0::2, :], xp[:, 0::2, 1::2, :],
            xp[:, 1::2, 0::2, :], xp[:, 1::2, 1::2, :])


def init_params(key):
    k = jax.random.split(key, 6)
    c2, h2, w2 = 256, 8, 8

    w1 = 0.1 * jax.random.normal(k[0], (3, 3, 3, 64), jnp.float32)
    w2_ = 0.05 * jax.random.normal(k[2], (3, 3, 64, 256), jnp.float32)

    # ff.Linear(16384, 10): weight generated in PyTorch NCHW-flatten row order
    # (as a checkpoint would store it), permuted ONCE to NHWC-flatten order so
    # the forward can flatten the NHWC conv output directly (no runtime
    # transpose), then zero-padded 10 -> 128 output lanes for lane-dense stores.
    wl_nchw = 0.02 * jax.random.normal(k[4], (c2 * h2 * w2, 10), jnp.float32)
    perm = jnp.transpose(
        jnp.arange(c2 * h2 * w2).reshape(c2, h2, w2), (1, 2, 0)).reshape(-1)
    wl = jnp.pad(wl_nchw[perm], ((0, 0), (0, 128 - 10)))
    bl = jnp.pad(0.01 * jax.random.normal(k[5], (10,), jnp.float32),
                 (0, 128 - 10))

    return {
        "w1": w1.reshape(27, 64).astype(jnp.bfloat16),         # (tap*cin, cout)
        "b1": 0.01 * jax.random.normal(k[1], (64,), jnp.float32),
        "g1": jnp.ones((64,), jnp.float32),
        "be1": jnp.zeros((64,), jnp.float32),
        "w2": w2_.reshape(9, 64, 256).astype(jnp.bfloat16),     # (tap, cin, cout)
        "b2": 0.01 * jax.random.normal(k[3], (256,), jnp.float32),
        "g2": jnp.ones((256,), jnp.float32),
        "be2": jnp.zeros((256,), jnp.float32),
        "wl": wl.astype(jnp.bfloat16),
        "bl": bl,
    }


def hebb3ff_forward(x_nchw, labels, params):
    # TODO(synk): ff.Linear's label-driven goodness / Hebbian weight update is
    # a training-time side effect with no inference-path compute; the forward
    # output is the plain affine projection (labels unused).
    # TODO(synk): BatchNorm running_mean/running_var buffers are not updated;
    # train-mode batch statistics are used for normalization (forward value
    # matches PyTorch train mode).
    del labels
    x = jnp.transpose(x_nchw, (0, 2, 3, 1)).astype(jnp.float32)   # NCHW -> NHWC
    n = x.shape[0]

    # conv1 + ReLU + BN1 (fused kernel, bf16 out, resident slab for BN apply)
    p1, h1, w1sp = im2col(x, 3, 3, 2, 1)                          # (N*256, 27) bf16
    y1 = conv1_bn_layer(p1, params["w1"], params["b1"],
                        params["g1"], params["be1"])              # (N*256, 64) bf16
    y1 = y1.reshape(n, h1, w1sp, 64)

    # conv2 + ReLU (taps folded in-kernel via phase-decomposed padded input).
    phases = pad_and_phase_split(y1)                              # 4x (N, 9, 9, 64) bf16
    y2, s2, q2 = conv2_tap_layer(phases, params["w2"], params["b2"])

    # BN2 (batch stats) folded into the Linear: per-channel scale/shift,
    # tiled across the NHWC flatten (channel = k % 256).
    m2 = float(n * 8 * 8)
    mean2 = s2 / m2
    var2 = jnp.maximum(q2 / m2 - mean2 * mean2, 0.0)
    scale2 = params["g2"] * jax.lax.rsqrt(var2 + _EPS)            # (1, 256)
    shift2 = params["be2"] - mean2 * scale2                       # (1, 256)
    scale_k = jnp.tile(scale2.reshape(1, 256), (1, 8 * 8))        # (1, 16384)
    shift_k = jnp.tile(shift2.reshape(1, 256), (1, 8 * 8))

    # NHWC flatten (Linear weight rows pre-permuted to match) + Linear(16384, 10)
    flat = y2.reshape(n, 256 * 8 * 8)                             # (N, 16384) bf16
    out = linear_bn_fused(flat, scale_k, shift_k,
                          params["wl"], params["bl"])             # (N, 128) f32
    return out[:, :10]


if __name__ == "__main__":
    key = jax.random.PRNGKey(0)
    kx, kp = jax.random.split(key)

    # Input must be 32x32 spatial so the flatten size is 256*8*8 = 16384.
    x = jax.random.normal(kx, (2, 3, 32, 32), jnp.float32)
    labels = jnp.array([1, 7], dtype=jnp.int32)
    params = init_params(kp)

    fwd = jax.jit(hebb3ff_forward)
    out = fwd(x, labels, params)
    jax.block_until_ready(out)

    assert out.shape == (2, 10) and out.dtype == jnp.float32
    print("KERNEL_OK")
</pallas_src>

<mosaic_0001>
module attributes {stable_mosaic.version = 11 : i64} {
  func.func @conv1_bn_kernel(%arg0: i32, %arg1: memref<512x27xbf16, #tpu.memory_space<vmem>>, %arg2: memref<27x64xbf16, #tpu.memory_space<vmem>>, %arg3: memref<1x64xf32, #tpu.memory_space<vmem>>, %arg4: memref<1x64xf32, #tpu.memory_space<vmem>>, %arg5: memref<1x64xf32, #tpu.memory_space<vmem>>, %arg6: memref<512x64xbf16, #tpu.memory_space<vmem>>, %arg7: memref<1x64xf32, #tpu.memory_space<vmem>>, %arg8: memref<1x64xf32, #tpu.memory_space<vmem>>) attributes {dimension_semantics = [#tpu.dimension_semantics<arbitrary>], iteration_bounds = array<i64: 1>, scalar_prefetch = 0 : i64, scratch_operands = 2 : i64, tpu.core_type = #tpu.core_type<tc>, window_params = [{transform_indices = @transform_0, window_bounds = array<i64: 512, 27>}, {pipeline_mode = #tpu.pipeline_mode<synchronous>, transform_indices = @transform_1, window_bounds = array<i64: 27, 64>}, {pipeline_mode = #tpu.pipeline_mode<synchronous>, transform_indices = @transform_2, window_bounds = array<i64: 1, 64>}, {pipeline_mode = #tpu.pipeline_mode<synchronous>, transform_indices = @transform_3, window_bounds = array<i64: 1, 64>}, {pipeline_mode = #tpu.pipeline_mode<synchronous>, transform_indices = @transform_4, window_bounds = array<i64: 1, 64>}, {pipeline_mode = #tpu.pipeline_mode<synchronous>, transform_indices = @transform_5, window_bounds = array<i64: 512, 64>}]} {
    %c0_i32 = arith.constant 0 : i32
    %0 = arith.cmpi eq, %arg0, %c0_i32 : i32
    %1 = arith.extui %0 : i1 to i32
    %c0_i32_0 = arith.constant 0 : i32
    %2 = arith.cmpi ne, %1, %c0_i32_0 : i32
    scf.if %2 {
      %cst_20 = arith.constant 0.000000e+00 : f32
      %30 = vector.broadcast %cst_20 : f32 to vector<1x64xf32>
      %c0_21 = arith.constant 0 : index
      %c0_22 = arith.constant 0 : index
      %31 = vector.load %arg7[%c0_21, %c0_22] : memref<1x64xf32, #tpu.memory_space<vmem>>, vector<1x64xf32>
      tpu.vector_store %arg7[%c0_21, %c0_22], %30 {strides = array<i32>} : memref<1x64xf32, #tpu.memory_space<vmem>>, vector<1x64xf32>,
      %cst_23 = arith.constant 0.000000e+00 : f32
      %32 = vector.broadcast %cst_23 : f32 to vector<1x64xf32>
      %c0_24 = arith.constant 0 : index
      %c0_25 = arith.constant 0 : index
      %33 = vector.load %arg8[%c0_24, %c0_25] : memref<1x64xf32, #tpu.memory_space<vmem>>, vector<1x64xf32>
      tpu.vector_store %arg8[%c0_24, %c0_25], %32 {strides = array<i32>} : memref<1x64xf32, #tpu.memory_space<vmem>>, vector<1x64xf32>,
    } else {
    }
    %c0 = arith.constant 0 : index
    %c0_1 = arith.constant 0 : index
    %3 = vector.load %arg1[%c0, %c0_1] : memref<512x27xbf16, #tpu.memory_space<vmem>>, vector<512x27xbf16>
    %c0_2 = arith.constant 0 : index
    %c0_3 = arith.constant 0 : index
    %4 = vector.load %arg2[%c0_2, %c0_3] : memref<27x64xbf16, #tpu.memory_space<vmem>>, vector<27x64xbf16>
    %cst = arith.constant dense<0.000000e+00> : vector<512x64xf32>
    %5 = tpu.matmul %3, %4, %cst {dimension_numbers = #tpu.dot_dimension_numbers<[1], [0], [0], [1], [0, 0, 1, 1], [], []>} : vector<512x27xbf16>, vector<27x64xbf16>, vector<512x64xf32> -> vector<512x64xf32>
    %c0_4 = arith.constant 0 : index
    %c0_5 = arith.constant 0 : index
    %6 = vector.load %arg3[%c0_4, %c0_5] : memref<1x64xf32, #tpu.memory_space<vmem>>, vector<1x64xf32>
    %7 = vector.broadcast %6 : vector<1x64xf32> to vector<512x64xf32>
    %8 = arith.addf %5, %7 : vector<512x64xf32>
    %cst_6 = arith.constant 0.000000e+00 : f32
    %9 = vector.broadcast %cst_6 : f32 to vector<512x64xf32>
    %10 = arith.maximumf %8, %9 : vector<512x64xf32>
    %c0_7 = arith.constant 0 : index
    %c0_8 = arith.constant 0 : index
    %11 = vector.load %arg7[%c0_7, %c0_8] : memref<1x64xf32, #tpu.memory_space<vmem>>, vector<1x64xf32>
    %cst_9 = arith.constant dense<0.000000e+00> : vector<64xf32>
    %12 = vector.multi_reduction <add>, %10, %cst_9 [0] : vector<512x64xf32> to vector<64xf32>
    %13 = vector.shape_cast %12 : vector<64xf32> to vector<1x64xf32>
    %14 = arith.addf %11, %13 : vector<1x64xf32>
    %c0_10 = arith.constant 0 : index
    %c0_11 = arith.constant 0 : index
    %15 = vector.load %arg7[%c0_10, %c0_11] : memref<1x64xf32, #tpu.memory_space<vmem>>, vector<1x64xf32>
    tpu.vector_store %arg7[%c0_10, %c0_11], %14 {strides = array<i32>} : memref<1x64xf32, #tpu.memory_space<vmem>>, vector<1x64xf32>,
    %c0_12 = arith.constant 0 : index
    %c0_13 = arith.constant 0 : index
    %16 = vector.load %arg8[%c0_12, %c0_13] : memref<1x64xf32, #tpu.memory_space<vmem>>, vector<1x64xf32>
    %17 = arith.mulf %10, %10 : vector<512x64xf32>
    %cst_14 = arith.constant dense<0.000000e+00> : vector<64xf32>
    %18 = vector.multi_reduction <add>, %17, %cst_14 [0] : vector<512x64xf32> to vector<64xf32>
    %19 = vector.shape_cast %18 : vector<64xf32> to vector<1x64xf32>
    %20 = arith.addf %16, %19 : vector<1x64xf32>
    %c0_15 = arith.constant 0 : index
    %c0_16 = arith.constant 0 : index
    %21 = vector.load %arg8[%c0_15, %c0_16] : memref<1x64xf32, #tpu.memory_space<vmem>>, vector<1x64xf32>
    tpu.vector_store %arg8[%c0_15, %c0_16], %20 {strides = array<i32>} : memref<1x64xf32, #tpu.memory_space<vmem>>, vector<1x64xf32>,
    %c512_i32 = arith.constant 512 : i32
    %22 = arith.muli %arg0, %c512_i32 : i32
    %23 = tpu.assume_multiple %22, 512 : i32
    %24 = arith.truncf %10 : vector<512x64xf32> to vector<512x64xbf16>
    %25 = arith.index_cast %23 : i32 to index
    %c0_17 = arith.constant 0 : index
    %26 = vector.load %arg6[%25, %c0_17] : memref<512x64xbf16, #tpu.memory_space<vmem>>, vector<512x64xbf16>
    tpu.vector_store %arg6[%25, %c0_17], %24 {strides = array<i32>} : memref<512x64xbf16, #tpu.memory_space<vmem>>, vector<512x64xbf16>,
    %c0_i32_18 = arith.constant 0 : i32
    %27 = arith.cmpi eq, %arg0, %c0_i32_18 : i32
    %28 = arith.extui %27 : i1 to i32
    %c0_i32_19 = arith.constant 0 : i32
    %29 = arith.cmpi ne, %28, %c0_i32_19 : i32
    scf.if %29 {
      %c0_20 = arith.constant 0 : index
      %c0_21 = arith.constant 0 : index
      %30 = vector.load %arg7[%c0_20, %c0_21] : memref<1x64xf32, #tpu.memory_space<vmem>>, vector<1x64xf32>
      %cst_22 = arith.constant 0.001953125 : f32
      %31 = vector.broadcast %cst_22 : f32 to vector<1x64xf32>
      %32 = arith.mulf %30, %31 : vector<1x64xf32>
      %c0_23 = arith.constant 0 : index
      %c0_24 = arith.constant 0 : index
      %33 = vector.load %arg8[%c0_23, %c0_24] : memref<1x64xf32, #tpu.memory_space<vmem>>, vector<1x64xf32>
      %cst_25 = arith.constant 0.001953125 : f32
      %34 = vector.broadcast %cst_25 : f32 to vector<1x64xf32>
      %35 = arith.mulf %33, %34 : vector<1x64xf32>
      %36 = arith.mulf %32, %32 : vector<1x64xf32>
      %37 = arith.subf %35, %36 : vector<1x64xf32>
      %cst_26 = arith.constant 0.000000e+00 : f32
      %38 = vector.broadcast %cst_26 : f32 to vector<1x64xf32>
      %39 = arith.maximumf %37, %38 : vector<1x64xf32>
      %c0_27 = arith.constant 0 : index
      %c0_28 = arith.constant 0 : index
      %40 = vector.load %arg4[%c0_27, %c0_28] : memref<1x64xf32, #tpu.memory_space<vmem>>, vector<1x64xf32>
      %cst_29 = arith.constant 9.99999974E-6 : f32
      %41 = vector.broadcast %cst_29 : f32 to vector<1x64xf32>
      %42 = arith.addf %39, %41 : vector<1x64xf32>
      %43 = math.rsqrt %42 : vector<1x64xf32>
      %44 = arith.mulf %40, %43 : vector<1x64xf32>
      %c0_30 = arith.constant 0 : index
      %c0_31 = arith.constant 0 : index
      %45 = vector.load %arg5[%c0_30, %c0_31] : memref<1x64xf32, #tpu.memory_space<vmem>>, vector<1x64xf32>
      %46 = arith.mulf %32, %44 : vector<1x64xf32>
      %47 = arith.subf %45, %46 : vector<1x64xf32>
      %c0_32 = arith.constant 0 : index
      %c0_33 = arith.constant 0 : index
      %48 = vector.load %arg6[%c0_32, %c0_33] : memref<512x64xbf16, #tpu.memory_space<vmem>>, vector<512x64xbf16>
      %49 = arith.extf %48 : vector<512x64xbf16> to vector<512x64xf32>
      %50 = vector.broadcast %44 : vector<1x64xf32> to vector<512x64xf32>
      %51 = arith.mulf %49, %50 : vector<512x64xf32>
      %52 = vector.broadcast %47 : vector<1x64xf32> to vector<512x64xf32>
      %53 = arith.addf %51, %52 : vector<512x64xf32>
      %54 = arith.truncf %53 : vector<512x64xf32> to vector<512x64xbf16>
      %c0_34 = arith.constant 0 : index
      %c0_35 = arith.constant 0 : index
      %55 = vector.load %arg6[%c0_34, %c0_35] : memref<512x64xbf16, #tpu.memory_space<vmem>>, vector<512x64xbf16>
      tpu.vector_store %arg6[%c0_34, %c0_35], %54 {strides = array<i32>} : memref<512x64xbf16, #tpu.memory_space<vmem>>, vector<512x64xbf16>,
    } else {
    }
    return
  }
  func.func @transform_0(%arg0: i32) -> (i32, i32) {
    %c0_i32 = arith.constant 0 : i32
    %c0_i32_0 = arith.constant 0 : i32
    return %arg0, %c0_i32 : i32, i32
  }
  func.func @transform_1(%arg0: i32) -> (i32, i32) {
    %c0_i32 = arith.constant 0 : i32
    %c0_i32_0 = arith.constant 0 : i32
    %c0_i32_1 = arith.constant 0 : i32
    return %c0_i32, %c0_i32_0 : i32, i32
  }
  func.func @transform_2(%arg0: i32) -> (i32, i32) {
    %c0_i32 = arith.constant 0 : i32
    %c0_i32_0 = arith.constant 0 : i32
    %c0_i32_1 = arith.constant 0 : i32
    return %c0_i32, %c0_i32_0 : i32, i32
  }
  func.func @transform_3(%arg0: i32) -> (i32, i32) {
    %c0_i32 = arith.constant 0 : i32
    %c0_i32_0 = arith.constant 0 : i32
    %c0_i32_1 = arith.constant 0 : i32
    return %c0_i32, %c0_i32_0 : i32, i32
  }
  func.func @transform_4(%arg0: i32) -> (i32, i32) {
    %c0_i32 = arith.constant 0 : i32
    %c0_i32_0 = arith.constant 0 : i32
    %c0_i32_1 = arith.constant 0 : i32
    return %c0_i32, %c0_i32_0 : i32, i32
  }
  func.func @transform_5(%arg0: i32) -> (i32, i32) {
    %c0_i32 = arith.constant 0 : i32
    %c0_i32_0 = arith.constant 0 : i32
    %c0_i32_1 = arith.constant 0 : i32
    return %c0_i32, %c0_i32_0 : i32, i32
  }
}

module attributes {stable_mosaic.version = 11 : i64} {
  func.func @conv2_tap_kernel(%arg0: i32, %arg1: memref<2x9x9x64xbf16, #tpu.memory_space<vmem>>, %arg2: memref<2x9x9x64xbf16, #tpu.memory_space<vmem>>, %arg3: memref<2x9x9x64xbf16, #tpu.memory_space<vmem>>, %arg4: memref<2x9x9x64xbf16, #tpu.memory_space<vmem>>, %arg5: memref<9x64x256xbf16, #tpu.memory_space<vmem>>, %arg6: memref<1x256xf32, #tpu.memory_space<vmem>>, %arg7: memref<128x256xbf16, #tpu.memory_space<vmem>>, %arg8: memref<1x256xf32, #tpu.memory_space<vmem>>, %arg9: memref<1x256xf32, #tpu.memory_space<vmem>>) attributes {dimension_semantics = [#tpu.dimension_semantics<arbitrary>], iteration_bounds = array<i64: 1>, scalar_prefetch = 0 : i64, scratch_operands = 0 : i64, tpu.core_type = #tpu.core_type<tc>, window_params = [{transform_indices = @transform_0, window_bounds = array<i64: 2, 9, 9, 64>}, {transform_indices = @transform_1, window_bounds = array<i64: 2, 9, 9, 64>}, {transform_indices = @transform_2, window_bounds = array<i64: 2, 9, 9, 64>}, {transform_indices = @transform_3, window_bounds = array<i64: 2, 9, 9, 64>}, {pipeline_mode = #tpu.pipeline_mode<synchronous>, transform_indices = @transform_4, window_bounds = array<i64: 9, 64, 256>}, {pipeline_mode = #tpu.pipeline_mode<synchronous>, transform_indices = @transform_5, window_bounds = array<i64: 1, 256>}, {transform_indices = @transform_6, window_bounds = array<i64: 128, 256>}, {pipeline_mode = #tpu.pipeline_mode<synchronous>, transform_indices = @transform_7, window_bounds = array<i64: 1, 256>}, {pipeline_mode = #tpu.pipeline_mode<synchronous>, transform_indices = @transform_8, window_bounds = array<i64: 1, 256>}]} {
    %c0_i32 = arith.constant 0 : i32
    %0 = arith.cmpi eq, %arg0, %c0_i32 : i32
    %1 = arith.extui %0 : i1 to i32
    %c0_i32_0 = arith.constant 0 : i32
    %2 = arith.cmpi ne, %1, %c0_i32_0 : i32
    scf.if %2 {
      %cst_78 = arith.constant 0.000000e+00 : f32
      %74 = vector.broadcast %cst_78 : f32 to vector<1x256xf32>
      %c0_79 = arith.constant 0 : index
      %c0_80 = arith.constant 0 : index
      %75 = vector.load %arg8[%c0_79, %c0_80] : memref<1x256xf32, #tpu.memory_space<vmem>>, vector<1x256xf32>
      tpu.vector_store %arg8[%c0_79, %c0_80], %74 {strides = array<i32>} : memref<1x256xf32, #tpu.memory_space<vmem>>, vector<1x256xf32>,
      %cst_81 = arith.constant 0.000000e+00 : f32
      %76 = vector.broadcast %cst_81 : f32 to vector<1x256xf32>
      %c0_82 = arith.constant 0 : index
      %c0_83 = arith.constant 0 : index
      %77 = vector.load %arg9[%c0_82, %c0_83] : memref<1x256xf32, #tpu.memory_space<vmem>>, vector<1x256xf32>
      tpu.vector_store %arg9[%c0_82, %c0_83], %76 {strides = array<i32>} : memref<1x256xf32, #tpu.memory_space<vmem>>, vector<1x256xf32>,
    } else {
    }
    %c0 = arith.constant 0 : index
    %c0_1 = arith.constant 0 : index
    %c0_2 = arith.constant 0 : index
    %c0_3 = arith.constant 0 : index
    %3 = vector.load %arg1[%c0, %c0_1, %c0_2, %c0_3] : memref<2x9x9x64xbf16, #tpu.memory_space<vmem>>, vector<2x8x8x64xbf16>
    %4 = vector.shape_cast %3 : vector<2x8x8x64xbf16> to vector<128x64xbf16>
    %c0_4 = arith.constant 0 : index
    %c0_5 = arith.constant 0 : index
    %c0_6 = arith.constant 0 : index
    %5 = vector.load %arg5[%c0_4, %c0_5, %c0_6] : memref<9x64x256xbf16, #tpu.memory_space<vmem>>, vector<1x64x256xbf16>
    %6 = vector.shape_cast %5 : vector<1x64x256xbf16> to vector<64x256xbf16>
    %cst = arith.constant dense<0.000000e+00> : vector<128x256xf32>
    %7 = tpu.matmul %4, %6, %cst {dimension_numbers = #tpu.dot_dimension_numbers<[1], [0], [0], [1], [0, 0, 1, 1], [], []>} : vector<128x64xbf16>, vector<64x256xbf16>, vector<128x256xf32> -> vector<128x256xf32>
    %c0_7 = arith.constant 0 : index
    %c0_8 = arith.constant 0 : index
    %c0_9 = arith.constant 0 : index
    %c0_10 = arith.constant 0 : index
    %8 = vector.load %arg2[%c0_7, %c0_8, %c0_9, %c0_10] : memref<2x9x9x64xbf16, #tpu.memory_space<vmem>>, vector<2x8x8x64xbf16>
    %9 = vector.shape_cast %8 : vector<2x8x8x64xbf16> to vector<128x64xbf16>
    %c1 = arith.constant 1 : index
    %c0_11 = arith.constant 0 : index
    %c0_12 = arith.constant 0 : index
    %10 = vector.load %arg5[%c1, %c0_11, %c0_12] : memref<9x64x256xbf16, #tpu.memory_space<vmem>>, vector<1x64x256xbf16>
    %11 = vector.shape_cast %10 : vector<1x64x256xbf16> to vector<64x256xbf16>
    %cst_13 = arith.constant dense<0.000000e+00> : vector<128x256xf32>
    %12 = tpu.matmul %9, %11, %cst_13 {dimension_numbers = #tpu.dot_dimension_numbers<[1], [0], [0], [1], [0, 0, 1, 1], [], []>} : vector<128x64xbf16>, vector<64x256xbf16>, vector<128x256xf32> -> vector<128x256xf32>
    %13 = arith.addf %7, %12 : vector<128x256xf32>
    %c0_14 = arith.constant 0 : index
    %c0_15 = arith.constant 0 : index
    %c1_16 = arith.constant 1 : index
    %c0_17 = arith.constant 0 : index
    %14 = vector.load %arg1[%c0_14, %c0_15, %c1_16, %c0_17] : memref<2x9x9x64xbf16, #tpu.memory_space<vmem>>, vector<2x8x8x64xbf16>
    %15 = vector.shape_cast %14 : vector<2x8x8x64xbf16> to vector<128x64xbf16>
    %c2 = arith.constant 2 : index
    %c0_18 = arith.constant 0 : index
    %c0_19 = arith.constant 0 : index
    %16 = vector.load %arg5[%c2, %c0_18, %c0_19] : memref<9x64x256xbf16, #tpu.memory_space<vmem>>, vector<1x64x256xbf16>
    %17 = vector.shape_cast %16 : vector<1x64x256xbf16> to vector<64x256xbf16>
    %cst_20 = arith.constant dense<0.000000e+00> : vector<128x256xf32>
    %18 = tpu.matmul %15, %17, %cst_20 {dimension_numbers = #tpu.dot_dimension_numbers<[1], [0], [0], [1], [0, 0, 1, 1], [], []>} : vector<128x64xbf16>, vector<64x256xbf16>, vector<128x256xf32> -> vector<128x256xf32>
    %19 = arith.addf %13, %18 : vector<128x256xf32>
    %c0_21 = arith.constant 0 : index
    %c0_22 = arith.constant 0 : index
    %c0_23 = arith.constant 0 : index
    %c0_24 = arith.constant 0 : index
    %20 = vector.load %arg3[%c0_21, %c0_22, %c0_23, %c0_24] : memref<2x9x9x64xbf16, #tpu.memory_space<vmem>>, vector<2x8x8x64xbf16>
    %21 = vector.shape_cast %20 : vector<2x8x8x64xbf16> to vector<128x64xbf16>
    %c3 = arith.constant 3 : index
    %c0_25 = arith.constant 0 : index
    %c0_26 = arith.constant 0 : index
    %22 = vector.load %arg5[%c3, %c0_25, %c0_26] : memref<9x64x256xbf16, #tpu.memory_space<vmem>>, vector<1x64x256xbf16>
    %23 = vector.shape_cast %22 : vector<1x64x256xbf16> to vector<64x256xbf16>
    %cst_27 = arith.constant dense<0.000000e+00> : vector<128x256xf32>
    %24 = tpu.matmul %21, %23, %cst_27 {dimension_numbers = #tpu.dot_dimension_numbers<[1], [0], [0], [1], [0, 0, 1, 1], [], []>} : vector<128x64xbf16>, vector<64x256xbf16>, vector<128x256xf32> -> vector<128x256xf32>
    %25 = arith.addf %19, %24 : vector<128x256xf32>
    %c0_28 = arith.constant 0 : index
    %c0_29 = arith.constant 0 : index
    %c0_30 = arith.constant 0 : index
    %c0_31 = arith.constant 0 : index
    %26 = vector.load %arg4[%c0_28, %c0_29, %c0_30, %c0_31] : memref<2x9x9x64xbf16, #tpu.memory_space<vmem>>, vector<2x8x8x64xbf16>
    %27 = vector.shape_cast %26 : vector<2x8x8x64xbf16> to vector<128x64xbf16>
    %c4 = arith.constant 4 : index
    %c0_32 = arith.constant 0 : index
    %c0_33 = arith.constant 0 : index
    %28 = vector.load %arg5[%c4, %c0_32, %c0_33] : memref<9x64x256xbf16, #tpu.memory_space<vmem>>, vector<1x64x256xbf16>
    %29 = vector.shape_cast %28 : vector<1x64x256xbf16> to vector<64x256xbf16>
    %cst_34 = arith.constant dense<0.000000e+00> : vector<128x256xf32>
    %30 = tpu.matmul %27, %29, %cst_34 {dimension_numbers = #tpu.dot_dimension_numbers<[1], [0], [0], [1], [0, 0, 1, 1], [], []>} : vector<128x64xbf16>, vector<64x256xbf16>, vector<128x256xf32> -> vector<128x256xf32>
    %31 = arith.addf %25, %30 : vector<128x256xf32>
    %c0_35 = arith.constant 0 : index
    %c0_36 = arith.constant 0 : index
    %c1_37 = arith.constant 1 : index
    %c0_38 = arith.constant 0 : index
    %32 = vector.load %arg3[%c0_35, %c0_36, %c1_37, %c0_38] : memref<2x9x9x64xbf16, #tpu.memory_space<vmem>>, vector<2x8x8x64xbf16>
    %33 = vector.shape_cast %32 : vector<2x8x8x64xbf16> to vector<128x64xbf16>
    %c5 = arith.constant 5 : index
    %c0_39 = arith.constant 0 : index
    %c0_40 = arith.constant 0 : index
    %34 = vector.load %arg5[%c5, %c0_39, %c0_40] : memref<9x64x256xbf16, #tpu.memory_space<vmem>>, vector<1x64x256xbf16>
    %35 = vector.shape_cast %34 : vector<1x64x256xbf16> to vector<64x256xbf16>
    %cst_41 = arith.constant dense<0.000000e+00> : vector<128x256xf32>
    %36 = tpu.matmul %33, %35, %cst_41 {dimension_numbers = #tpu.dot_dimension_numbers<[1], [0], [0], [1], [0, 0, 1, 1], [], []>} : vector<128x64xbf16>, vector<64x256xbf16>, vector<128x256xf32> -> vector<128x256xf32>
    %37 = arith.addf %31, %36 : vector<128x256xf32>
    %c0_42 = arith.constant 0 : index
    %c1_43 = arith.constant 1 : index
    %c0_44 = arith.constant 0 : index
    %c0_45 = arith.constant 0 : index
    %38 = vector.load %arg1[%c0_42, %c1_43, %c0_44, %c0_45] : memref<2x9x9x64xbf16, #tpu.memory_space<vmem>>, vector<2x8x8x64xbf16>
    %39 = vector.shape_cast %38 : vector<2x8x8x64xbf16> to vector<128x64xbf16>
    %c6 = arith.constant 6 : index
    %c0_46 = arith.constant 0 : index
    %c0_47 = arith.constant 0 : index
    %40 = vector.load %arg5[%c6, %c0_46, %c0_47] : memref<9x64x256xbf16, #tpu.memory_space<vmem>>, vector<1x64x256xbf16>
    %41 = vector.shape_cast %40 : vector<1x64x256xbf16> to vector<64x256xbf16>
    %cst_48 = arith.constant dense<0.000000e+00> : vector<128x256xf32>
    %42 = tpu.matmul %39, %41, %cst_48 {dimension_numbers = #tpu.dot_dimension_numbers<[1], [0], [0], [1], [0, 0, 1, 1], [], []>} : vector<128x64xbf16>, vector<64x256xbf16>, vector<128x256xf32> -> vector<128x256xf32>
    %43 = arith.addf %37, %42 : vector<128x256xf32>
    %c0_49 = arith.constant 0 : index
    %c1_50 = arith.constant 1 : index
    %c0_51 = arith.constant 0 : index
    %c0_52 = arith.constant 0 : index
    %44 = vector.load %arg2[%c0_49, %c1_50, %c0_51, %c0_52] : memref<2x9x9x64xbf16, #tpu.memory_space<vmem>>, vector<2x8x8x64xbf16>
    %45 = vector.shape_cast %44 : vector<2x8x8x64xbf16> to vector<128x64xbf16>
    %c7 = arith.constant 7 : index
    %c0_53 = arith.constant 0 : index
    %c0_54 = arith.constant 0 : index
    %46 = vector.load %arg5[%c7, %c0_53, %c0_54] : memref<9x64x256xbf16, #tpu.memory_space<vmem>>, vector<1x64x256xbf16>
    %47 = vector.shape_cast %46 : vector<1x64x256xbf16> to vector<64x256xbf16>
    %cst_55 = arith.constant dense<0.000000e+00> : vector<128x256xf32>
    %48 = tpu.matmul %45, %47, %cst_55 {dimension_numbers = #tpu.dot_dimension_numbers<[1], [0], [0], [1], [0, 0, 1, 1], [], []>} : vector<128x64xbf16>, vector<64x256xbf16>, vector<128x256xf32> -> vector<128x256xf32>
    %49 = arith.addf %43, %48 : vector<128x256xf32>
    %c0_56 = arith.constant 0 : index
    %c1_57 = arith.constant 1 : index
    %c1_58 = arith.constant 1 : index
    %c0_59 = arith.constant 0 : index
    %50 = vector.load %arg1[%c0_56, %c1_57, %c1_58, %c0_59] : memref<2x9x9x64xbf16, #tpu.memory_space<vmem>>, vector<2x8x8x64xbf16>
    %51 = vector.shape_cast %50 : vector<2x8x8x64xbf16> to vector<128x64xbf16>
    %c8 = arith.constant 8 : index
    %c0_60 = arith.constant 0 : index
    %c0_61 = arith.constant 0 : index
    %52 = vector.load %arg5[%c8, %c0_60, %c0_61] : memref<9x64x256xbf16, #tpu.memory_space<vmem>>, vector<1x64x256xbf16>
    %53 = vector.shape_cast %52 : vector<1x64x256xbf16> to vector<64x256xbf16>
    %cst_62 = arith.constant dense<0.000000e+00> : vector<128x256xf32>
    %54 = tpu.matmul %51, %53, %cst_62 {dimension_numbers = #tpu.dot_dimension_numbers<[1], [0], [0], [1], [0, 0, 1, 1], [], []>} : vector<128x64xbf16>, vector<64x256xbf16>, vector<128x256xf32> -> vector<128x256xf32>
    %55 = arith.addf %49, %54 : vector<128x256xf32>
    %c0_63 = arith.constant 0 : index
    %c0_64 = arith.constant 0 : index
    %56 = vector.load %arg6[%c0_63, %c0_64] : memref<1x256xf32, #tpu.memory_space<vmem>>, vector<1x256xf32>
    %57 = vector.broadcast %56 : vector<1x256xf32> to vector<128x256xf32>
    %58 = arith.addf %55, %57 : vector<128x256xf32>
    %cst_65 = arith.constant 0.000000e+00 : f32
    %59 = vector.broadcast %cst_65 : f32 to vector<128x256xf32>
    %60 = arith.maximumf %58, %59 : vector<128x256xf32>
    %c0_66 = arith.constant 0 : index
    %c0_67 = arith.constant 0 : index
    %61 = vector.load %arg8[%c0_66, %c0_67] : memref<1x256xf32, #tpu.memory_space<vmem>>, vector<1x256xf32>
    %cst_68 = arith.constant dense<0.000000e+00> : vector<256xf32>
    %62 = vector.multi_reduction <add>, %60, %cst_68 [0] : vector<128x256xf32> to vector<256xf32>
    %63 = vector.shape_cast %62 : vector<256xf32> to vector<1x256xf32>
    %64 = arith.addf %61, %63 : vector<1x256xf32>
    %c0_69 = arith.constant 0 : index
    %c0_70 = arith.constant 0 : index
    %65 = vector.load %arg8[%c0_69, %c0_70] : memref<1x256xf32, #tpu.memory_space<vmem>>, vector<1x256xf32>
    tpu.vector_store %arg8[%c0_69, %c0_70], %64 {strides = array<i32>} : memref<1x256xf32, #tpu.memory_space<vmem>>, vector<1x256xf32>,
    %c0_71 = arith.constant 0 : index
    %c0_72 = arith.constant 0 : index
    %66 = vector.load %arg9[%c0_71, %c0_72] : memref<1x256xf32, #tpu.memory_space<vmem>>, vector<1x256xf32>
    %67 = arith.mulf %60, %60 : vector<128x256xf32>
    %cst_73 = arith.constant dense<0.000000e+00> : vector<256xf32>
    %68 = vector.multi_reduction <add>, %67, %cst_73 [0] : vector<128x256xf32> to vector<256xf32>
    %69 = vector.shape_cast %68 : vector<256xf32> to vector<1x256xf32>
    %70 = arith.addf %66, %69 : vector<1x256xf32>
    %c0_74 = arith.constant 0 : index
    %c0_75 = arith.constant 0 : index
    %71 = vector.load %arg9[%c0_74, %c0_75] : memref<1x256xf32, #tpu.memory_space<vmem>>, vector<1x256xf32>
    tpu.vector_store %arg9[%c0_74, %c0_75], %70 {strides = array<i32>} : memref<1x256xf32, #tpu.memory_space<vmem>>, vector<1x256xf32>,
    %72 = arith.truncf %60 : vector<128x256xf32> to vector<128x256xbf16>
    %c0_76 = arith.constant 0 : index
    %c0_77 = arith.constant 0 : index
    %73 = vector.load %arg7[%c0_76, %c0_77] : memref<128x256xbf16, #tpu.memory_space<vmem>>, vector<128x256xbf16>
    tpu.vector_store %arg7[%c0_76, %c0_77], %72 {strides = array<i32>} : memref<128x256xbf16, #tpu.memory_space<vmem>>, vector<128x256xbf16>,
    return
  }
  func.func @transform_0(%arg0: i32) -> (i32, i32, i32, i32) {
    %c0_i32 = arith.constant 0 : i32
    %c0_i32_0 = arith.constant 0 : i32
    %c0_i32_1 = arith.constant 0 : i32
    %c0_i32_2 = arith.constant 0 : i32
    return %arg0, %c0_i32, %c0_i32_0, %c0_i32_1 : i32, i32, i32, i32
  }
  func.func @transform_1(%arg0: i32) -> (i32, i32, i32, i32) {
    %c0_i32 = arith.constant 0 : i32
    %c0_i32_0 = arith.constant 0 : i32
    %c0_i32_1 = arith.constant 0 : i32
    %c0_i32_2 = arith.constant 0 : i32
    return %arg0, %c0_i32, %c0_i32_0, %c0_i32_1 : i32, i32, i32, i32
  }
  func.func @transform_2(%arg0: i32) -> (i32, i32, i32, i32) {
    %c0_i32 = arith.constant 0 : i32
    %c0_i32_0 = arith.constant 0 : i32
    %c0_i32_1 = arith.constant 0 : i32
    %c0_i32_2 = arith.constant 0 : i32
    return %arg0, %c0_i32, %c0_i32_0, %c0_i32_1 : i32, i32, i32, i32
  }
  func.func @transform_3(%arg0: i32) -> (i32, i32, i32, i32) {
    %c0_i32 = arith.constant 0 : i32
    %c0_i32_0 = arith.constant 0 : i32
    %c0_i32_1 = arith.constant 0 : i32
    %c0_i32_2 = arith.constant 0 : i32
    return %arg0, %c0_i32, %c0_i32_0, %c0_i32_1 : i32, i32, i32, i32
  }
  func.func @transform_4(%arg0: i32) -> (i32, i32, i32) {
    %c0_i32 = arith.constant 0 : i32
    %c0_i32_0 = arith.constant 0 : i32
    %c0_i32_1 = arith.constant 0 : i32
    %c0_i32_2 = arith.constant 0 : i32
    return %c0_i32, %c0_i32_0, %c0_i32_1 : i32, i32, i32
  }
  func.func @transform_5(%arg0: i32) -> (i32, i32) {
    %c0_i32 = arith.constant 0 : i32
    %c0_i32_0 = arith.constant 0 : i32
    %c0_i32_1 = arith.constant 0 : i32
    return %c0_i32, %c0_i32_0 : i32, i32
  }
  func.func @transform_6(%arg0: i32) -> (i32, i32) {
    %c0_i32 = arith.constant 0 : i32
    %c0_i32_0 = arith.constant 0 : i32
    return %arg0, %c0_i32 : i32, i32
  }
  func.func @transform_7(%arg0: i32) -> (i32, i32) {
    %c0_i32 = arith.constant 0 : i32
    %c0_i32_0 = arith.constant 0 : i32
    %c0_i32_1 = arith.constant 0 : i32
    return %c0_i32, %c0_i32_0 : i32, i32
  }
  func.func @transform_8(%arg0: i32) -> (i32, i32) {
    %c0_i32 = arith.constant 0 : i32
    %c0_i32_0 = arith.constant 0 : i32
    %c0_i32_1 = arith.constant 0 : i32
    return %c0_i32, %c0_i32_0 : i32, i32
  }
}

module attributes {stable_mosaic.version = 11 : i64} {
  func.func @linear_bn_kernel(%arg0: i32, %arg1: memref<2x8192xbf16, #tpu.memory_space<vmem>>, %arg2: memref<1x8192xf32, #tpu.memory_space<vmem>>, %arg3: memref<1x8192xf32, #tpu.memory_space<vmem>>, %arg4: memref<8192x128xbf16, #tpu.memory_space<vmem>>, %arg5: memref<1x128xf32, #tpu.memory_space<vmem>>, %arg6: memref<2x128xf32, #tpu.memory_space<vmem>>, %arg7: memref<2x128xf32, #tpu.memory_space<vmem>>) attributes {dimension_semantics = [#tpu.dimension_semantics<arbitrary>], iteration_bounds = array<i64: 2>, scalar_prefetch = 0 : i64, scratch_operands = 1 : i64, tpu.core_type = #tpu.core_type<tc>, window_params = [{transform_indices = @transform_0, window_bounds = array<i64: 2, 8192>}, {transform_indices = @transform_1, window_bounds = array<i64: 1, 8192>}, {transform_indices = @transform_2, window_bounds = array<i64: 1, 8192>}, {transform_indices = @transform_3, window_bounds = array<i64: 8192, 128>}, {pipeline_mode = #tpu.pipeline_mode<synchronous>, transform_indices = @transform_4, window_bounds = array<i64: 1, 128>}, {pipeline_mode = #tpu.pipeline_mode<synchronous>, transform_indices = @transform_5, window_bounds = array<i64: 2, 128>}]} {
    %c0_i32 = arith.constant 0 : i32
    %0 = arith.cmpi eq, %arg0, %c0_i32 : i32
    %1 = arith.extui %0 : i1 to i32
    %c0_i32_0 = arith.constant 0 : i32
    %2 = arith.cmpi ne, %1, %c0_i32_0 : i32
    scf.if %2 {
      %cst_13 = arith.constant 0.000000e+00 : f32
      %20 = vector.broadcast %cst_13 : f32 to vector<2x128xf32>
      %c0_14 = arith.constant 0 : index
      %c0_15 = arith.constant 0 : index
      %21 = vector.load %arg7[%c0_14, %c0_15] : memref<2x128xf32, #tpu.memory_space<vmem>>, vector<2x128xf32>
      tpu.vector_store %arg7[%c0_14, %c0_15], %20 {strides = array<i32>} : memref<2x128xf32, #tpu.memory_space<vmem>>, vector<2x128xf32>,
    } else {
    }
    %c0 = arith.constant 0 : index
    %c0_1 = arith.constant 0 : index
    %3 = vector.load %arg1[%c0, %c0_1] : memref<2x8192xbf16, #tpu.memory_space<vmem>>, vector<2x8192xbf16>
    %4 = arith.extf %3 : vector<2x8192xbf16> to vector<2x8192xf32>
    %c0_2 = arith.constant 0 : index
    %c0_3 = arith.constant 0 : index
    %5 = vector.load %arg2[%c0_2, %c0_3] : memref<1x8192xf32, #tpu.memory_space<vmem>>, vector<1x8192xf32>
    %6 = vector.broadcast %5 : vector<1x8192xf32> to vector<2x8192xf32>
    %7 = arith.mulf %4, %6 : vector<2x8192xf32>
    %c0_4 = arith.constant 0 : index
    %c0_5 = arith.constant 0 : index
    %8 = vector.load %arg3[%c0_4, %c0_5] : memref<1x8192xf32, #tpu.memory_space<vmem>>, vector<1x8192xf32>
    %9 = vector.broadcast %8 : vector<1x8192xf32> to vector<2x8192xf32>
    %10 = arith.addf %7, %9 : vector<2x8192xf32>
    %11 = arith.truncf %10 : vector<2x8192xf32> to vector<2x8192xbf16>
    %c0_6 = arith.constant 0 : index
    %c0_7 = arith.constant 0 : index
    %12 = vector.load %arg7[%c0_6, %c0_7] : memref<2x128xf32, #tpu.memory_space<vmem>>, vector<2x128xf32>
    %c0_8 = arith.constant 0 : index
    %c0_9 = arith.constant 0 : index
    %13 = vector.load %arg4[%c0_8, %c0_9] : memref<8192x128xbf16, #tpu.memory_space<vmem>>, vector<8192x128xbf16>
    %cst = arith.constant dense<0.000000e+00> : vector<2x128xf32>
    %14 = tpu.matmul %11, %13, %cst {dimension_numbers = #tpu.dot_dimension_numbers<[1], [0], [0], [1], [0, 0, 1, 1], [], []>} : vector<2x8192xbf16>, vector<8192x128xbf16>, vector<2x128xf32> -> vector<2x128xf32>
    %15 = arith.addf %12, %14 : vector<2x128xf32>
    %c0_10 = arith.constant 0 : index
    %c0_11 = arith.constant 0 : index
    %16 = vector.load %arg7[%c0_10, %c0_11] : memref<2x128xf32, #tpu.memory_space<vmem>>, vector<2x128xf32>
    tpu.vector_store %arg7[%c0_10, %c0_11], %15 {strides = array<i32>} : memref<2x128xf32, #tpu.memory_space<vmem>>, vector<2x128xf32>,
    %c1_i32 = arith.constant 1 : i32
    %17 = arith.cmpi eq, %arg0, %c1_i32 : i32
    %18 = arith.extui %17 : i1 to i32
    %c0_i32_12 = arith.constant 0 : i32
    %19 = arith.cmpi ne, %18, %c0_i32_12 : i32
    scf.if %19 {
      %c0_13 = arith.constant 0 : index
      %c0_14 = arith.constant 0 : index
      %20 = vector.load %arg7[%c0_13, %c0_14] : memref<2x128xf32, #tpu.memory_space<vmem>>, vector<2x128xf32>
      %c0_15 = arith.constant 0 : index
      %c0_16 = arith.constant 0 : index
      %21 = vector.load %arg5[%c0_15, %c0_16] : memref<1x128xf32, #tpu.memory_space<vmem>>, vector<1x128xf32>
      %22 = vector.broadcast %21 : vector<1x128xf32> to vector<2x128xf32>
      %23 = arith.addf %20, %22 : vector<2x128xf32>
      %c0_17 = arith.constant 0 : index
      %c0_18 = arith.constant 0 : index
      %24 = vector.load %arg6[%c0_17, %c0_18] : memref<2x128xf32, #tpu.memory_space<vmem>>, vector<2x128xf32>
      tpu.vector_store %arg6[%c0_17, %c0_18], %23 {strides = array<i32>} : memref<2x128xf32, #tpu.memory_space<vmem>>, vector<2x128xf32>,
    } else {
    }
    return
  }
  func.func @transform_0(%arg0: i32) -> (i32, i32) {
    %c0_i32 = arith.constant 0 : i32
    %c0_i32_0 = arith.constant 0 : i32
    return %c0_i32, %arg0 : i32, i32
  }
  func.func @transform_1(%arg0: i32) -> (i32, i32) {
    %c0_i32 = arith.constant 0 : i32
    %c0_i32_0 = arith.constant 0 : i32
    return %c0_i32, %arg0 : i32, i32
  }
  func.func @transform_2(%arg0: i32) -> (i32, i32) {
    %c0_i32 = arith.constant 0 : i32
    %c0_i32_0 = arith.constant 0 : i32
    return %c0_i32, %arg0 : i32, i32
  }
  func.func @transform_3(%arg0: i32) -> (i32, i32) {
    %c0_i32 = arith.constant 0 : i32
    %c0_i32_0 = arith.constant 0 : i32
    return %arg0, %c0_i32 : i32, i32
  }
  func.func @transform_4(%arg0: i32) -> (i32, i32) {
    %c0_i32 = arith.constant 0 : i32
    %c0_i32_0 = arith.constant 0 : i32
    %c0_i32_1 = arith.constant 0 : i32
    return %c0_i32, %c0_i32_0 : i32, i32
  }
  func.func @transform_5(%arg0: i32) -> (i32, i32) {
    %c0_i32 = arith.constant 0 : i32
    %c0_i32_0 = arith.constant 0 : i32
    %c0_i32_1 = arith.constant 0 : i32
    return %c0_i32, %c0_i32_0 : i32, i32
  }
}

</mosaic_0001>

<bundles_post_ra>
// kernel: hebb3ff_forward.3
= control target key start
LH: loop header
LB: loop body
LE: loop exit
PB: predicated region body
PF: predicated region fallthrough
CT: control target
= control target key end

     0   :  { %10 = vsyncpa [#allocation5], 0  ;;  %s4771_s0 = inlined_call_operand.vmem [shape: bf16[512,27], index: 0, kind: input, shape index: {}]   ;;  %s4772_s1 = inlined_call_operand.hbm [shape: bf16[27,64], index: 1, kind: input, shape index: {}]   ;;  %s4773_s2 = inlined_call_operand.hbm [shape: f32[1,64], index: 2, kind: input, shape index: {}]   ;;  %s4774_s3 = inlined_call_operand.hbm [shape: f32[1,64], index: 3, kind: input, shape index: {}]   ;;  %s4775_s4 = inlined_call_operand.hbm [shape: f32[1,64], index: 4, kind: input, shape index: {}]   ;;  %s4776_s5 = inlined_call_operand.vmem [shape: bf16[512,64], index: 5, kind: output, shape index: {}]  }
   0x1   :  { %11 = vsyncpa [#allocation7], 0 }
   0x2   :  { %12 = vsyncpa [#allocation10], 0  ;;  %s2785_s18 = smov [#allocation6]   ;;  %s2786_s20 = smov [#allocation4]  }
   0x3   :  { %s33_s19 = sshll.u32 %s2785_s18, 4  ;;  %s20_s21 = sshll.u32 %s2786_s20, 4  ;;  %s34_s19 = int_to_ptr.vmem [resolvable:$true] %s33_s19  ;;  %s2823_s21 = int_to_ptr.vmem [resolvable:$true] %s20_s21 }
   0x4   :  { %s2691_s24 = scalar_lea.hbm %s4773_s2, 16 }
   0x5   :  { %p2692_p0 = scmp.ne.s32.totalorder %s4773_s2, %s2691_s24  ;;  %p2695_p1 = scmp.lt.u32.totalorder %s2691_s24, %s4773_s2 }
   0x7   :  { %p2697_p2 = pnand %p2695_p1, %p2692_p0 }
   0x9   :  { %2700 = shalt.err (!%p2697_p2)
}
   0xa   :  { %s2701_s29 = scalar_lea.vmem %s34_s19, 16  ;;  %s2705_s30 = scalar_lea.vmem %s34_s19, 32 }
   0xb   :  { %p2702_p3 = scmp.ne.s32.totalorder %s34_s19, %s2701_s29  ;;  %p2706_p4 = scmp.lt.s32.totalorder %s34_s19, %s34_s19 }
   0xc   :  { %p2707_p5 = scmp.lt.s32.totalorder %s2705_s30, %s2701_s29 }
   0xe   :  { %p2708_p6 = por %p2707_p5, %p2706_p4 }
  0x10   :  { %p2709_p7 = pnand %p2708_p6, %p2702_p3 }
  0x12   :  { %2712 = shalt.err (!%p2709_p7)
}
  0x13   :  { %36 = dma.hbm_to_vmem [thread:$0]  %s4773_s2, 16, %s34_s19, [#allocation7]  }
  0x14   :  { %s2713_s10 = scalar_lea.hbm %s4772_s1, 256 }
  0x15   :  { %p2714_p8 = scmp.ne.s32.totalorder %s4772_s1, %s2713_s10  ;;  %p2717_p9 = scmp.lt.u32.totalorder %s2713_s10, %s4772_s1 }
  0x17   :  { %p2719_p10 = pnand %p2717_p9, %p2714_p8 }
  0x19   :  { %2722 = shalt.err (!%p2719_p10)
}
  0x1a   :  { %s2723_s15 = scalar_lea.vmem %s2823_s21, 256  ;;  %p2728_p12 = scmp.lt.s32.totalorder %s2823_s21, %s2823_s21 }
  0x1b   :  { %p2724_p11 = scmp.ne.s32.totalorder %s2823_s21, %s2723_s15  ;;  %p2729_p13 = scmp.lt.s32.totalorder %s2723_s15, %s2723_s15 }
  0x1d   :  { %p2730_p0 = por %p2729_p13, %p2728_p12 }
  0x1f   :  { %p2731_p1 = pnand %p2730_p0, %p2724_p11 }
  0x21   :  { %2734 = shalt.err (!%p2731_p1)
}
  0x22   :  { %s2787_s2 = smov 64   ;;  %s2788_s16 = smov 4  }
  0x23   :  { %26 = dma.hbm_to_vmem [thread:$0]  %s4772_s1, 256, %s2823_s21, [#allocation5], %s2787_s2, %s2787_s2, %s2788_s16  }
  0x24   :  { %s2789_s19 = smov [#allocation8]   ;;  %s2790_s22 = smov [#allocation9]  }
  0x25   :  { %s43_s20 = sshll.u32 %s2789_s19, 4  ;;  %s53_s23 = sshll.u32 %s2790_s22, 4  ;;  %s44_s20 = int_to_ptr.vmem [resolvable:$true] %s43_s20  ;;  %s54_s23 = int_to_ptr.vmem [resolvable:$true] %s53_s23 }
  0x26   :  { %s2735_s26 = scalar_lea.hbm %s4774_s3, 16 }
  0x27   :  { %p2736_p2 = scmp.ne.s32.totalorder %s4774_s3, %s2735_s26  ;;  %p2739_p3 = scmp.lt.u32.totalorder %s2735_s26, %s4774_s3 }
  0x29   :  { %p2741_p4 = pnand %p2739_p3, %p2736_p2 }
  0x2b   :  { %2744 = shalt.err (!%p2741_p4)
}
  0x2c   :  { %s2745_s1 = scalar_lea.vmem %s44_s20, 16  ;;  %s2749_s21 = scalar_lea.vmem %s44_s20, 32 }
  0x2d   :  { %p2746_p5 = scmp.ne.s32.totalorder %s44_s20, %s2745_s1  ;;  %p2750_p6 = scmp.lt.s32.totalorder %s44_s20, %s44_s20 }
  0x2e   :  { %p2751_p7 = scmp.lt.s32.totalorder %s2749_s21, %s2745_s1 }
  0x30   :  { %p2752_p8 = por %p2751_p7, %p2750_p6 }
  0x32   :  { %p2753_p9 = pnand %p2752_p8, %p2746_p5 }
  0x34   :  { %2756 = shalt.err (!%p2753_p9)
}
  0x35   :  { %46 = dma.hbm_to_vmem [thread:$0]  %s4774_s3, 16, %s44_s20, [#allocation7]  }
  0x36   :  { %s2757_s10 = scalar_lea.hbm %s4775_s4, 16 }
  0x37   :  { %p2758_p10 = scmp.ne.s32.totalorder %s4775_s4, %s2757_s10  ;;  %p2761_p11 = scmp.lt.u32.totalorder %s2757_s10, %s4775_s4 }
  0x39   :  { %p2763_p12 = pnand %p2761_p11, %p2758_p10 }
  0x3b   :  { %2766 = shalt.err (!%p2763_p12)
}
  0x3c   :  { %s2767_s15 = scalar_lea.vmem %s54_s23, 16  ;;  %s2771_s2 = scalar_lea.vmem %s54_s23, 32 }
  0x3d   :  { %p2768_p13 = scmp.ne.s32.totalorder %s54_s23, %s2767_s15  ;;  %p2772_p0 = scmp.lt.s32.totalorder %s54_s23, %s54_s23 }
  0x3e   :  { %p2773_p1 = scmp.lt.s32.totalorder %s2771_s2, %s2767_s15 }
  0x40   :  { %p2774_p2 = por %p2773_p1, %p2772_p0 }
  0x42   :  { %p2775_p3 = pnand %p2774_p2, %p2768_p13 }
  0x44   :  { %2778 = shalt.err (!%p2775_p3)
}
  0x45   :  { %56 = dma.hbm_to_vmem [thread:$0]  %s4775_s4, 16, %s54_s23, [#allocation10]  }
  0x46   :  { %2779 = dma.done.wait [#allocation5], 256  }
  0x47   :  { %2780 = vsyncadd [#allocation5], 4294967040 }
  0x48   :  { %2781 = dma.done.wait [#allocation7], 32  }
  0x49   :  { %2782 = vsyncadd [#allocation7], 4294967264 }
  0x4a   :  { %2783 = dma.done.wait [#allocation10], 16  }
  0x4b   :  { %2784 = vsyncadd [#allocation10], 4294967280  ;;  %vm420_vm0 = vcmask 1044480   ;;  %vm421_vm1 = vcmask 1045504   ;;  %v2791_v0 = vmov 65535   ;;  %vm323_vm2 = vcmask 220160  }
  0x4c   :  { %v422_v1 = vsel %vm420_vm0, 4294967295, %v2791_v0  ;;  %v2654_v2 = vld [vmem:[#allocation4] sm:$0xff]   ;;  %v2655_v4 = vld [vmem:[#allocation4 + $0x8] sm:$0x3f]   ;;  %v2658_v8 = vld [vmem:[%s4771_s0 + $0x10] sm:$0xff]   ;;  %vm1379_vm3 = vcmask 519168  }
  0x4d   :  { %v423_v3 = vsel %vm421_vm1, %v422_v1, 0  ;;  %2574 = vmatprep.subr.bf16.mxu0 %v2654_v2  ;;  %v2656_v5 = vld [vmem:[%s4771_s0] sm:$0xff]   ;;  %2642 = vmatprep.subr.bf16.mxu1 %v2654_v2  ;;  %v2657_v7 = vld [vmem:[%s4771_s0 + $0x8] sm:$0xff]   ;;  %v2659_v9 = vld [vmem:[%s4771_s0 + $0x18] sm:$0xff]   ;;  %vm781_vm4 = vcmask 523264   ;;  %vm74_vm5 = vcmask 516096  }
  0x4e   :  { %2575 = vmatpush3.bf16.msra.mxu0 %v2654_v2  ;;  %v425_v6 = vand.u32 %v2655_v4, %v423_v3  ;;  %2644 = vmatpush3.bf16.msra.mxu1 %v2654_v2  ;;  %v2660_v10 = vld [vmem:[%s4771_s0 + $0x20] sm:$0xff]   ;;  %v2673_v12 = vld [vmem:[%s4771_s0 + $0x88] sm:$0xff]   ;;  %v2674_v13 = vld [vmem:[%s4771_s0 + $0x90] sm:$0xff]  }
  0x4f   :  { %2578 = vmatprep.mubr.msk.bf16.mxu0 %vm323_vm2, %v2656_v5  ;;  %v2672_v11 = vld [vmem:[%s4771_s0 + $0x80] sm:$0xff]   ;;  %v2661_v14 = vld [vmem:[%s4771_s0 + $0x28] sm:$0xff]   ;;  %v2662_v15 = vld [vmem:[%s4771_s0 + $0x30] sm:$0xff]  }
  0x50   :  { %2576 = vmatprep.subr.bf16.mxu0 %v425_v6  ;;  %2643 = vmatprep.subr.bf16.mxu1 %v425_v6  ;;  %v2675_v16 = vld [vmem:[%s4771_s0 + $0x98] sm:$0xff]   ;;  %v2676_v17 = vld [vmem:[%s4771_s0 + $0xa0] sm:$0xff]   ;;  %v2677_v20 = vld [vmem:[%s4771_s0 + $0xa8] sm:$0xff]  }
  0x51   :  { %2610 = vmatprep.mubr.msk.bf16.mxu1 %vm323_vm2, %v2672_v11  ;;  %v2663_v18 = vld [vmem:[%s4771_s0 + $0x38] sm:$0xff]   ;;  %v2664_v19 = vld [vmem:[%s4771_s0 + $0x40] sm:$0xff]   ;;  %v2678_v21 = vld [vmem:[%s4771_s0 + $0xb0] sm:$0xff]  }
  0x52   :  { %2577 = vmatpush3.bf16.msra.mxu0 %v425_v6  ;;  %2645 = vmatpush3.bf16.msra.mxu1 %v425_v6  ;;  %v2665_v22 = vld [vmem:[%s4771_s0 + $0x48] sm:$0xff]   ;;  %v2666_v23 = vld [vmem:[%s4771_s0 + $0x50] sm:$0xff]   ;;  %v2679_v24 = vld [vmem:[%s4771_s0 + $0xb8] sm:$0xff]  }
  0x53   :  { %v2680_v25 = vld [vmem:[%s4771_s0 + $0xc0] sm:$0xff]   ;;  %v2667_v26 = vld [vmem:[%s4771_s0 + $0x58] sm:$0xff]   ;;  %v2681_v28 = vld [vmem:[%s4771_s0 + $0xc8] sm:$0xff]  }
  0x54   :  { %v2668_v27 = vld [vmem:[%s4771_s0 + $0x60] sm:$0xff]   ;;  %v2682_v29 = vld [vmem:[%s4771_s0 + $0xd0] sm:$0xff]   ;;  %v2669_v30 = vld [vmem:[%s4771_s0 + $0x68] sm:$0xff]  }
  0x55   :  { %2579 = vmatmul.mubr.msk.bf16.vlgmr.msra.gmra.mrb[0].mxu0 %vm323_vm2, %v2657_v7  ;;  %2611 = vmatmul.mubr.msk.bf16.vlgmr.msra.gmra.mrb[0].mxu1 %vm323_vm2, %v2673_v12  ;;  %v2670_v31 = vld [vmem:[%s4771_s0 + $0x70] sm:$0xff]   ;;  %v2683_v32 = vld [vmem:[%s4771_s0 + $0xd8] sm:$0xff]   ;;  %v2684_v33 = vld [vmem:[%s4771_s0 + $0xe0] sm:$0xff]  }
  0x56   :  { %2582 = vmatprep.mubr.msk.bf16.mxu0 %vm323_vm2, %v2658_v8  ;;  %2614 = vmatprep.mubr.msk.bf16.mxu1 %vm323_vm2, %v2674_v13  ;;  %v2671_v34 = vld [vmem:[%s4771_s0 + $0x78] sm:$0xff]   ;;  %v2685_v35 = vld [vmem:[%s4771_s0 + $0xe8] sm:$0xff]   ;;  %v2686_v36 = vld [vmem:[%s4771_s0 + $0xf0] sm:$0xff]  }
  0x57   :  { %v2687_v37 = vld [vmem:[%s4771_s0 + $0xf8] sm:$0xff]   ;;  %v3006_v38 = vld [vmem:[#allocation6] ss:$0 sm:$0xff] }
  0x5d   :  { %2583 = vmatmul.mubr.msk.bf16.gmra.mrb[4].mxu0 %vm323_vm2, %v2659_v9  ;;  %2615 = vmatmul.mubr.msk.bf16.gmra.mrb[4].mxu1 %vm323_vm2, %v2675_v16 }
  0x5e   :  { %2586 = vmatprep.mubr.msk.bf16.mxu0 %vm323_vm2, %v2660_v10  ;;  %2618 = vmatprep.mubr.msk.bf16.mxu1 %vm323_vm2, %v2676_v17 }
  0x65   :  { %2587 = vmatmul.mubr.msk.bf16.gmra.mrb[8].mxu0 %vm323_vm2, %v2661_v14  ;;  %2619 = vmatmul.mubr.msk.bf16.gmra.mrb[8].mxu1 %vm323_vm2, %v2677_v20 }
  0x66   :  { %2590 = vmatprep.mubr.msk.bf16.mxu0 %vm323_vm2, %v2662_v15  ;;  %2622 = vmatprep.mubr.msk.bf16.mxu1 %vm323_vm2, %v2678_v21 }
  0x6d   :  { %2591 = vmatmul.mubr.msk.bf16.gmra.mrb[12].mxu0 %vm323_vm2, %v2663_v18  ;;  %2623 = vmatmul.mubr.msk.bf16.gmra.mrb[12].mxu1 %vm323_vm2, %v2679_v24 }
  0x6e   :  { %2594 = vmatprep.mubr.msk.bf16.mxu0 %vm323_vm2, %v2664_v19  ;;  %2626 = vmatprep.mubr.msk.bf16.mxu1 %vm323_vm2, %v2680_v25 }
  0x75   :  { %2595 = vmatmul.mubr.msk.bf16.gmra.mrb[16].mxu0 %vm323_vm2, %v2665_v22  ;;  %2627 = vmatmul.mubr.msk.bf16.gmra.mrb[16].mxu1 %vm323_vm2, %v2681_v28 }
  0x76   :  { %2598 = vmatprep.mubr.msk.bf16.mxu0 %vm323_vm2, %v2666_v23  ;;  %2630 = vmatprep.mubr.msk.bf16.mxu1 %vm323_vm2, %v2682_v29 }
  0x7d   :  { %2599 = vmatmul.mubr.msk.bf16.gmra.mrb[20].mxu0 %vm323_vm2, %v2667_v26  ;;  %2631 = vmatmul.mubr.msk.bf16.gmra.mrb[20].mxu1 %vm323_vm2, %v2683_v32 }
  0x7e   :  { %2602 = vmatprep.mubr.msk.bf16.mxu0 %vm323_vm2, %v2668_v27  ;;  %2634 = vmatprep.mubr.msk.bf16.mxu1 %vm323_vm2, %v2684_v33 }
  0x85   :  { %2603 = vmatmul.mubr.msk.bf16.gmra.mrb[24].mxu0 %vm323_vm2, %v2669_v30  ;;  %2635 = vmatmul.mubr.msk.bf16.gmra.mrb[24].mxu1 %vm323_vm2, %v2685_v35 }
  0x86   :  { %2606 = vmatprep.mubr.msk.bf16.mxu0 %vm323_vm2, %v2670_v31  ;;  %2638 = vmatprep.mubr.msk.bf16.mxu1 %vm323_vm2, %v2686_v36 }
  0x8d   :  { %2607 = vmatmul.mubr.msk.bf16.gmra.mrb[28].mxu0 %vm323_vm2, %v2671_v34  ;;  %2639 = vmatmul.mubr.msk.bf16.gmra.mrb[28].mxu1 %vm323_vm2, %v2687_v37 }
 0x128   :  { %v2580_v39 = vpop.f32.mrb[0].mxu0  ;;  %v2612_v11 = vpop.f32.mrb[0].mxu1 }
 0x129   :  { %v470_v40 = vadd.f32 %v2580_v39, %v3006_v38  ;;  %v461_v41 = vpop.f32.mrb[1].mxu0  ;;  %v3038_v15 = vpop.f32.mrb[1].mxu1  ;;  %v598_v37 = vadd.f32 %v2612_v11, %v3006_v38 }
 0x12a   :  { %v462_v42 = vadd.f32 %v3006_v38, %v461_v41  ;;  %v2581_v43 = vpop.f32.mrb[2].mxu0  ;;  %v3042_v20 = vpop.f32.mrb[2].mxu1 }
 0x12b   :  { %v718_v44 = vmax.f32 %v470_v40, 0.0  ;;  %v473_v45 = vadd.f32 %v2581_v43, %v3006_v38  ;;  %v464_v46 = vpop.f32.mrb[3].mxu0  ;;  %v3045_v25 = vpop.f32.mrb[3].mxu1 }
 0x12c   :  { %v716_v47 = vmax.f32 %v462_v42, 0.0  ;;  %v465_v48 = vadd.f32 %v3006_v38, %v464_v46 }
 0x12d   :  { %v2255_v49 = vpack.c.bf16 %v718_v44, %v718_v44  ;;  %v719_v50 = vmax.f32 %v473_v45, 0.0  ;;  %v921_v54 = vmul.f32 %v718_v44, %v718_v44  ;;  %v785_v1 = vsel %vm781_vm4, %v718_v44, 0.0 }
 0x12e   :  { %v919_v51 = vmul.f32 %v716_v47, %v716_v47  ;;  %v2253_v52 = vpack.c.bf16 %v716_v47, %v716_v47  ;;  %v717_v53 = vmax.f32 %v465_v48, 0.0  ;;  %v782_v56 = vsel %vm781_vm4, %v716_v47, 0.0 }
 0x12f   :  { %1382 = vst.msk [vmem:[%s4776_s5 + $0x8] sm:$0xf] %vm1379_vm3, %v2255_v49  ;;  %v2256_v55 = vpack.c.bf16 %v719_v50, %v719_v50  ;;  %v922_v61 = vmul.f32 %v719_v50, %v719_v50  ;;  %v986_v12 = vsel %vm781_vm4, %v921_v54, 0.0  ;;  %v787_v16 = vsel %vm781_vm4, %v719_v50, 0.0 }
 0x130   :  { %1380 = vst.msk [vmem:[%s4776_s5] sm:$0xf] %vm1379_vm3, %v2253_v52  ;;  %v783_v57 = vsel %vm781_vm4, %v717_v53, 0.0  ;;  %v920_v58 = vmul.f32 %v717_v53, %v717_v53  ;;  %v2254_v59 = vpack.c.bf16 %v717_v53, %v717_v53  ;;  %v2584_v60 = vpop.f32.mrb[4].mxu0  ;;  %v983_v2 = vsel %vm781_vm4, %v919_v51, 0.0  ;;  %v3059_v44 = vpop.f32.mrb[4].mxu1 }
 0x131   :  { %1383 = vst.msk [vmem:[%s4776_s5 + $0xc] sm:$0xf] %vm1379_vm3, %v2256_v55  ;;  %v784_v62 = vadd.f32 %v783_v57, %v782_v56  ;;  %v486_v63 = vadd.f32 %v2584_v60, %v3006_v38  ;;  %v477_v0 = vpop.f32.mrb[5].mxu0  ;;  %v988_v17 = vsel %vm781_vm4, %v922_v61, 0.0  ;;  %v3068_v49 = vpop.f32.mrb[5].mxu1 }
 0x132   :  { %v984_v3 = vsel %vm781_vm4, %v920_v58, 0.0  ;;  %1381 = vst.msk [vmem:[%s4776_s5 + $0x4] sm:$0xf] %vm1379_vm3, %v2254_v59  ;;  %v478_v4 = vadd.f32 %v3006_v38, %v477_v0  ;;  %v2585_v5 = vpop.f32.mrb[6].mxu0  ;;  %v3076_v54 = vpop.f32.mrb[6].mxu1 }
 0x133   :  { %v786_v6 = vadd.f32 %v785_v1, %v784_v62  ;;  %v985_v7 = vadd.f32 %v984_v3, %v983_v2  ;;  %v722_v8 = vmax.f32 %v486_v63, 0.0  ;;  %v489_v9 = vadd.f32 %v2585_v5, %v3006_v38  ;;  %v480_v10 = vpop.f32.mrb[7].mxu0  ;;  %v3078_v59 = vpop.f32.mrb[7].mxu1 }
 0x134   :  { %v720_v13 = vmax.f32 %v478_v4, 0.0  ;;  %v481_v14 = vadd.f32 %v3006_v38, %v480_v10 }
 0x135   :  { %v987_v18 = vadd.f32 %v986_v12, %v985_v7  ;;  %v2259_v19 = vpack.c.bf16 %v722_v8, %v722_v8  ;;  %v788_v21 = vadd.f32 %v787_v16, %v786_v6  ;;  %v723_v27 = vmax.f32 %v489_v9, 0.0 }
 0x136   :  { %v789_v22 = vsel %vm781_vm4, %v720_v13, 0.0  ;;  %v923_v23 = vmul.f32 %v720_v13, %v720_v13  ;;  %v2257_v24 = vpack.c.bf16 %v720_v13, %v720_v13  ;;  %v721_v28 = vmax.f32 %v481_v14, 0.0 }
 0x137   :  { %1386 = vst.msk [vmem:[%s4776_s5 + $0x18] sm:$0xf] %vm1379_vm3, %v2259_v19  ;;  %v989_v26 = vadd.f32 %v988_v17, %v987_v18  ;;  %v790_v29 = vadd.f32 %v789_v22, %v788_v21  ;;  %v925_v34 = vmul.f32 %v722_v8, %v722_v8  ;;  %v2260_v35 = vpack.c.bf16 %v723_v27, %v723_v27 }
 0x138   :  { %v990_v30 = vsel %vm781_vm4, %v923_v23, 0.0  ;;  %1384 = vst.msk [vmem:[%s4776_s5 + $0x10] sm:$0xf] %vm1379_vm3, %v2257_v24  ;;  %v2588_v31 = vpop.f32.mrb[8].mxu0  ;;  %v791_v39 = vsel %vm781_vm4, %v721_v28, 0.0  ;;  %v924_v40 = vmul.f32 %v721_v28, %v721_v28  ;;  %v2258_v41 = vpack.c.bf16 %v721_v28, %v721_v28  ;;  %v3096_v21 = vpop.f32.mrb[8].mxu1 }
 0x139   :  { %v991_v32 = vadd.f32 %v990_v30, %v989_v26  ;;  %v493_v33 = vpop.f32.mrb[9].mxu0  ;;  %v502_v42 = vadd.f32 %v2588_v31, %v3006_v38  ;;  %v793_v45 = vsel %vm781_vm4, %v722_v8, 0.0  ;;  %1387 = vst.msk [vmem:[%s4776_s5 + $0x1c] sm:$0xf] %vm1379_vm3, %v2260_v35  ;;  %v792_v46 = vadd.f32 %v791_v39, %v790_v29  ;;  %v3103_v26 = vpop.f32.mrb[9].mxu1 }
 0x13a   :  { %v2589_v36 = vpop.f32.mrb[10].mxu0  ;;  %v494_v47 = vadd.f32 %v3006_v38, %v493_v33  ;;  %v926_v50 = vmul.f32 %v723_v27, %v723_v27  ;;  %v992_v51 = vsel %vm781_vm4, %v924_v40, 0.0  ;;  %1385 = vst.msk [vmem:[%s4776_s5 + $0x14] sm:$0xf] %vm1379_vm3, %v2258_v41  ;;  %v994_v60 = vsel %vm781_vm4, %v925_v34, 0.0  ;;  %v3112_v31 = vpop.f32.mrb[10].mxu1 }
 0x13b   :  { %v496_v43 = vpop.f32.mrb[11].mxu0  ;;  %v505_v48 = vadd.f32 %v2589_v36, %v3006_v38  ;;  %v726_v52 = vmax.f32 %v502_v42, 0.0  ;;  %v794_v55 = vadd.f32 %v793_v45, %v792_v46  ;;  %v993_v56 = vadd.f32 %v992_v51, %v991_v32  ;;  %v3116_v36 = vpop.f32.mrb[11].mxu1 }
 0x13c   :  { %v497_v53 = vadd.f32 %v3006_v38, %v496_v43  ;;  %v724_v57 = vmax.f32 %v494_v47, 0.0  ;;  %v795_v61 = vsel %vm781_vm4, %v723_v27, 0.0  ;;  %v996_v5 = vsel %vm781_vm4, %v926_v50, 0.0 }
 0x13d   :  { %v727_v58 = vmax.f32 %v505_v48, 0.0  ;;  %v2263_v62 = vpack.c.bf16 %v726_v52, %v726_v52  ;;  %v995_v0 = vadd.f32 %v994_v60, %v993_v56  ;;  %v796_v1 = vadd.f32 %v795_v61, %v794_v55 }
 0x13e   :  { %v725_v63 = vmax.f32 %v497_v53, 0.0  ;;  %v797_v2 = vsel %vm781_vm4, %v724_v57, 0.0  ;;  %v927_v3 = vmul.f32 %v724_v57, %v724_v57  ;;  %v929_v6 = vmul.f32 %v726_v52, %v726_v52 }
 0x13f   :  { %1390 = vst.msk [vmem:[%s4776_s5 + $0x28] sm:$0xf] %vm1379_vm3, %v2263_v62  ;;  %v2261_v7 = vpack.c.bf16 %v724_v57, %v724_v57  ;;  %v798_v9 = vadd.f32 %v797_v2, %v796_v1  ;;  %v997_v10 = vadd.f32 %v996_v5, %v995_v0  ;;  %v2264_v12 = vpack.c.bf16 %v727_v58, %v727_v58 }
 0x140   :  { %v2592_v4 = vpop.f32.mrb[12].mxu0  ;;  %v998_v11 = vsel %vm781_vm4, %v927_v3, 0.0  ;;  %v799_v14 = vsel %vm781_vm4, %v725_v63, 0.0  ;;  %v928_v16 = vmul.f32 %v725_v63, %v725_v63  ;;  %v2262_v17 = vpack.c.bf16 %v725_v63, %v725_v63  ;;  %v3132_v62 = vpop.f32.mrb[12].mxu1 }
 0x141   :  { %v509_v8 = vpop.f32.mrb[13].mxu0  ;;  %1388 = vst.msk [vmem:[%s4776_s5 + $0x20] sm:$0xf] %vm1379_vm3, %v2261_v7  ;;  %v3094_v19 = vmax.f32 %v598_v37, 0.0  ;;  %v801_v22 = vsel %vm781_vm4, %v726_v52, 0.0  ;;  %v999_v23 = vadd.f32 %v998_v11, %v997_v10  ;;  %v800_v24 = vadd.f32 %v799_v14, %v798_v9  ;;  %v3139_v1 = vpop.f32.mrb[13].mxu1 }
 0x142   :  { %v2593_v13 = vpop.f32.mrb[14].mxu0  ;;  %1391 = vst.msk [vmem:[%s4776_s5 + $0x2c] sm:$0xf] %vm1379_vm3, %v2264_v12  ;;  %v1002_v27 = vsel %vm781_vm4, %v929_v6, 0.0  ;;  %v930_v28 = vmul.f32 %v727_v58, %v727_v58  ;;  %v1000_v29 = vsel %vm781_vm4, %v928_v16, 0.0  ;;  %v518_v30 = vadd.f32 %v2592_v4, %v3006_v38  ;;  %v3141_v4 = vpop.f32.mrb[14].mxu1 }
 0x143   :  { %v512_v18 = vpop.f32.mrb[15].mxu0  ;;  %1389 = vst.msk [vmem:[%s4776_s5 + $0x24] sm:$0xf] %vm1379_vm3, %v2262_v17  ;;  %v802_v32 = vadd.f32 %v801_v22, %v800_v24  ;;  %v1001_v33 = vadd.f32 %v1000_v29, %v999_v23  ;;  %v510_v34 = vadd.f32 %v3006_v38, %v509_v8  ;;  %v521_v35 = vadd.f32 %v2593_v13, %v3006_v38  ;;  %v3149_v9 = vpop.f32.mrb[15].mxu1 }
 0x144   :  { %v803_v37 = vsel %vm781_vm4, %v727_v58, 0.0  ;;  %v730_v39 = vmax.f32 %v518_v30, 0.0  ;;  %v513_v40 = vadd.f32 %v3006_v38, %v512_v18  ;;  %v2287_v41 = vpack.c.bf16 %v3094_v19, %v3094_v19 }
 0x145   :  { %v1003_v42 = vadd.f32 %v1002_v27, %v1001_v33  ;;  %v728_v43 = vmax.f32 %v510_v34, 0.0  ;;  %v804_v45 = vadd.f32 %v803_v37, %v802_v32  ;;  %v731_v46 = vmax.f32 %v521_v35, 0.0 }
 0x146   :  { %v1004_v48 = vsel %vm781_vm4, %v930_v28, 0.0  ;;  %v2267_v50 = vpack.c.bf16 %v730_v39, %v730_v39  ;;  %v729_v51 = vmax.f32 %v513_v40, 0.0  ;;  %1414 = vst.msk [vmem:[%s4776_s5 + $0x88] sm:$0xf] %vm1379_vm3, %v2287_v41  ;;  %v933_v2 = vmul.f32 %v730_v39, %v730_v39 }
 0x147   :  { %v805_v53 = vsel %vm781_vm4, %v728_v43, 0.0  ;;  %v931_v55 = vmul.f32 %v728_v43, %v728_v43  ;;  %v1005_v56 = vadd.f32 %v1004_v48, %v1003_v42  ;;  %v2265_v57 = vpack.c.bf16 %v728_v43, %v728_v43 }
 0x148   :  { %v2596_v47 = vpop.f32.mrb[16].mxu0  ;;  %1394 = vst.msk [vmem:[%s4776_s5 + $0x38] sm:$0xf] %vm1379_vm3, %v2267_v50  ;;  %v806_v60 = vadd.f32 %v805_v53, %v804_v45  ;;  %v2268_v0 = vpack.c.bf16 %v731_v46, %v731_v46  ;;  %v807_v5 = vsel %vm781_vm4, %v729_v51, 0.0  ;;  %v932_v6 = vmul.f32 %v729_v51, %v729_v51  ;;  %v3163_v43 = vpop.f32.mrb[16].mxu1 }
 0x149   :  { %v525_v52 = vpop.f32.mrb[17].mxu0  ;;  %v1006_v63 = vsel %vm781_vm4, %v931_v55, 0.0  ;;  %1392 = vst.msk [vmem:[%s4776_s5 + $0x30] sm:$0xf] %vm1379_vm3, %v2265_v57  ;;  %v2266_v7 = vpack.c.bf16 %v729_v51, %v729_v51  ;;  %v534_v8 = vadd.f32 %v2596_v47, %v3006_v38  ;;  %v809_v14 = vsel %vm781_vm4, %v730_v39, 0.0 }
 0x14a   :  { %v2597_v58 = vpop.f32.mrb[18].mxu0  ;;  %v1007_v3 = vadd.f32 %v1006_v63, %v1005_v56  ;;  %1395 = vst.msk [vmem:[%s4776_s5 + $0x3c] sm:$0xf] %vm1379_vm3, %v2268_v0  ;;  %v808_v10 = vadd.f32 %v807_v5, %v806_v60  ;;  %v526_v11 = vadd.f32 %v3006_v38, %v525_v52  ;;  %v934_v16 = vmul.f32 %v731_v46, %v731_v46 }
 0x14b   :  { %v528_v61 = vpop.f32.mrb[19].mxu0  ;;  %v537_v12 = vadd.f32 %v2597_v58, %v3006_v38  ;;  %v1008_v17 = vsel %vm781_vm4, %v932_v6, 0.0  ;;  %1393 = vst.msk [vmem:[%s4776_s5 + $0x34] sm:$0xf] %vm1379_vm3, %v2266_v7  ;;  %v734_v18 = vmax.f32 %v534_v8, 0.0  ;;  %v1010_v30 = vsel %vm781_vm4, %v933_v2, 0.0 }
 0x14c   :  { %v529_v13 = vadd.f32 %v3006_v38, %v528_v61  ;;  %v810_v23 = vadd.f32 %v809_v14, %v808_v10  ;;  %v1009_v24 = vadd.f32 %v1008_v17, %v1007_v3  ;;  %v732_v27 = vmax.f32 %v526_v11, 0.0 }
 0x14d   :  { %v735_v28 = vmax.f32 %v537_v12, 0.0  ;;  %v811_v32 = vsel %vm781_vm4, %v731_v46, 0.0  ;;  %v2271_v33 = vpack.c.bf16 %v734_v18, %v734_v18  ;;  %v1012_v45 = vsel %vm781_vm4, %v934_v16, 0.0  ;;  %v3170_v46 = vpop.f32.mrb[17].mxu1 }
 0x14e   :  { %v733_v34 = vmax.f32 %v529_v13, 0.0  ;;  %v1011_v37 = vadd.f32 %v1010_v30, %v1009_v24  ;;  %v812_v39 = vadd.f32 %v811_v32, %v810_v23  ;;  %v813_v40 = vsel %vm781_vm4, %v732_v27, 0.0  ;;  %v3173_v53 = vpop.f32.mrb[18].mxu1 }
 0x14f   :  { %v935_v41 = vmul.f32 %v732_v27, %v732_v27  ;;  %1398 = vst.msk [vmem:[%s4776_s5 + $0x48] sm:$0xf] %vm1379_vm3, %v2271_v33  ;;  %v2269_v47 = vpack.c.bf16 %v732_v27, %v732_v27  ;;  %v2272_v52 = vpack.c.bf16 %v735_v28, %v735_v28  ;;  %v937_v55 = vmul.f32 %v734_v18, %v734_v18  ;;  %v3180_v57 = vpop.f32.mrb[19].mxu1 }
 0x150   :  { %v2600_v22 = vpop.f32.mrb[20].mxu0  ;;  %v814_v48 = vadd.f32 %v813_v40, %v812_v39  ;;  %v1013_v50 = vadd.f32 %v1012_v45, %v1011_v37  ;;  %v815_v56 = vsel %vm781_vm4, %v733_v34, 0.0  ;;  %v936_v61 = vmul.f32 %v733_v34, %v733_v34 }
 0x151   :  { %v541_v29 = vpop.f32.mrb[21].mxu0  ;;  %v1014_v51 = vsel %vm781_vm4, %v935_v41, 0.0  ;;  %1396 = vst.msk [vmem:[%s4776_s5 + $0x40] sm:$0xf] %vm1379_vm3, %v2269_v47  ;;  %1399 = vst.msk [vmem:[%s4776_s5 + $0x4c] sm:$0xf] %vm1379_vm3, %v2272_v52  ;;  %v2270_v63 = vpack.c.bf16 %v733_v34, %v733_v34  ;;  %v938_v2 = vmul.f32 %v735_v28, %v735_v28  ;;  %v550_v3 = vadd.f32 %v2600_v22, %v3006_v38 }
 0x152   :  { %v2601_v35 = vpop.f32.mrb[22].mxu0  ;;  %v1015_v58 = vadd.f32 %v1014_v51, %v1013_v50  ;;  %v816_v60 = vadd.f32 %v815_v56, %v814_v48  ;;  %v817_v0 = vsel %vm781_vm4, %v734_v18, 0.0  ;;  %v542_v5 = vadd.f32 %v3006_v38, %v541_v29  ;;  %v3198_v29 = vpop.f32.mrb[20].mxu1 }
 0x153   :  { %v544_v42 = vpop.f32.mrb[23].mxu0  ;;  %v1016_v8 = vsel %vm781_vm4, %v936_v61, 0.0  ;;  %1397 = vst.msk [vmem:[%s4776_s5 + $0x44] sm:$0xf] %vm1379_vm3, %v2270_v63  ;;  %v553_v10 = vadd.f32 %v2601_v35, %v3006_v38  ;;  %v819_v13 = vsel %vm781_vm4, %v735_v28, 0.0  ;;  %v738_v16 = vmax.f32 %v550_v3, 0.0 }
 0x154   :  { %v818_v7 = vadd.f32 %v817_v0, %v816_v60  ;;  %v545_v11 = vadd.f32 %v3006_v38, %v544_v42  ;;  %v1017_v14 = vadd.f32 %v1016_v8, %v1015_v58  ;;  %v736_v17 = vmax.f32 %v542_v5, 0.0  ;;  %v3200_v34 = vpop.f32.mrb[21].mxu1 }
 0x155   :  { %v1018_v22 = vsel %vm781_vm4, %v937_v55, 0.0  ;;  %v739_v24 = vmax.f32 %v553_v10, 0.0  ;;  %v2275_v32 = vpack.c.bf16 %v738_v16, %v738_v16  ;;  %v1020_v35 = vsel %vm781_vm4, %v938_v2, 0.0  ;;  %v3204_v40 = vpop.f32.mrb[22].mxu1 }
 0x156   :  { %v820_v23 = vadd.f32 %v819_v13, %v818_v7  ;;  %v1019_v30 = vadd.f32 %v1018_v22, %v1017_v14  ;;  %v737_v33 = vmax.f32 %v545_v11, 0.0  ;;  %v821_v28 = vsel %vm781_vm4, %v736_v17, 0.0  ;;  %v3212_v48 = vpop.f32.mrb[23].mxu1 }
 0x157   :  { %v939_v37 = vmul.f32 %v736_v17, %v736_v17  ;;  %v2273_v39 = vpack.c.bf16 %v736_v17, %v736_v17  ;;  %1402 = vst.msk [vmem:[%s4776_s5 + $0x58] sm:$0xf] %vm1379_vm3, %v2275_v32  ;;  %v2276_v51 = vpack.c.bf16 %v739_v24, %v739_v24  ;;  %v941_v52 = vmul.f32 %v738_v16, %v738_v16 }
 0x158   :  { %v2604_v6 = vpop.f32.mrb[24].mxu0  ;;  %v822_v41 = vadd.f32 %v821_v28, %v820_v23  ;;  %v1021_v42 = vadd.f32 %v1020_v35, %v1019_v30  ;;  %v823_v56 = vsel %vm781_vm4, %v737_v33, 0.0  ;;  %v940_v58 = vmul.f32 %v737_v33, %v737_v33  ;;  %v3233_v17 = vpop.f32.mrb[24].mxu1 }
 0x159   :  { %v557_v12 = vpop.f32.mrb[25].mxu0  ;;  %v566_v45 = vadd.f32 %v2604_v6, %v3006_v38  ;;  %v1022_v50 = vsel %vm781_vm4, %v939_v37, 0.0  ;;  %1400 = vst.msk [vmem:[%s4776_s5 + $0x50] sm:$0xf] %vm1379_vm3, %v2273_v39  ;;  %v825_v61 = vsel %vm781_vm4, %v738_v16, 0.0  ;;  %v942_v63 = vmul.f32 %v739_v24, %v739_v24 }
 0x15a   :  { %v2605_v18 = vpop.f32.mrb[26].mxu0  ;;  %v558_v47 = vadd.f32 %v3006_v38, %v557_v12  ;;  %v1023_v55 = vadd.f32 %v1022_v50, %v1021_v42  ;;  %1403 = vst.msk [vmem:[%s4776_s5 + $0x5c] sm:$0xf] %vm1379_vm3, %v2276_v51  ;;  %v824_v0 = vadd.f32 %v823_v56, %v822_v41  ;;  %v2274_v2 = vpack.c.bf16 %v737_v33, %v737_v33 }
 0x15b   :  { %v560_v27 = vpop.f32.mrb[27].mxu0  ;;  %v1024_v5 = vsel %vm781_vm4, %v940_v58, 0.0  ;;  %v742_v6 = vmax.f32 %v566_v45, 0.0  ;;  %v569_v8 = vadd.f32 %v2605_v18, %v3006_v38  ;;  %v827_v11 = vsel %vm781_vm4, %v739_v24, 0.0  ;;  %v3238_v24 = vpop.f32.mrb[25].mxu1 }
 0x15c   :  { %v740_v7 = vmax.f32 %v558_v47, 0.0  ;;  %v826_v12 = vadd.f32 %v825_v61, %v824_v0  ;;  %v1025_v13 = vadd.f32 %v1024_v5, %v1023_v55  ;;  %1401 = vst.msk [vmem:[%s4776_s5 + $0x54] sm:$0xf] %vm1379_vm3, %v2274_v2  ;;  %v561_v14 = vadd.f32 %v3006_v38, %v560_v27  ;;  %v3240_v37 = vpop.f32.mrb[26].mxu1 }
 0x15d   :  { %v1026_v22 = vsel %vm781_vm4, %v941_v52, 0.0  ;;  %v2279_v23 = vpack.c.bf16 %v742_v6, %v742_v6  ;;  %v1028_v27 = vsel %vm781_vm4, %v942_v63, 0.0  ;;  %v743_v39 = vmax.f32 %v569_v8, 0.0  ;;  %v3247_v42 = vpop.f32.mrb[27].mxu1 }
 0x15e   :  { %v829_v18 = vsel %vm781_vm4, %v740_v7, 0.0  ;;  %v1027_v32 = vadd.f32 %v1026_v22, %v1025_v13  ;;  %v828_v33 = vadd.f32 %v827_v11, %v826_v12  ;;  %v943_v35 = vmul.f32 %v740_v7, %v740_v7 }
 0x15f   :  { %v2277_v28 = vpack.c.bf16 %v740_v7, %v740_v7  ;;  %1406 = vst.msk [vmem:[%s4776_s5 + $0x68] sm:$0xf] %vm1379_vm3, %v2279_v23  ;;  %v741_v41 = vmax.f32 %v561_v14, 0.0  ;;  %v2280_v51 = vpack.c.bf16 %v743_v39, %v743_v39  ;;  %v945_v58 = vmul.f32 %v742_v6, %v742_v6 }
 0x160   :  { %v2608_v60 = vpop.f32.mrb[28].mxu0  ;;  %v830_v45 = vadd.f32 %v829_v18, %v828_v33  ;;  %v1029_v47 = vadd.f32 %v1028_v27, %v1027_v32  ;;  %v1030_v50 = vsel %vm781_vm4, %v943_v35, 0.0  ;;  %v833_v63 = vsel %vm781_vm4, %v742_v6, 0.0 }
 0x161   :  { %v573_v3 = vpop.f32.mrb[29].mxu0  ;;  %v582_v30 = vadd.f32 %v2608_v60, %v3006_v38  ;;  %1404 = vst.msk [vmem:[%s4776_s5 + $0x60] sm:$0xf] %vm1379_vm3, %v2277_v28  ;;  %v831_v52 = vsel %vm781_vm4, %v741_v41, 0.0  ;;  %1407 = vst.msk [vmem:[%s4776_s5 + $0x6c] sm:$0xf] %vm1379_vm3, %v2280_v51  ;;  %v944_v0 = vmul.f32 %v741_v41, %v741_v41  ;;  %v2278_v2 = vpack.c.bf16 %v741_v41, %v741_v41 }
 0x162   :  { %v2609_v10 = vpop.f32.mrb[30].mxu0  ;;  %v574_v56 = vadd.f32 %v3006_v38, %v573_v3  ;;  %v1031_v60 = vadd.f32 %v1030_v50, %v1029_v47  ;;  %v832_v61 = vadd.f32 %v831_v52, %v830_v45  ;;  %v835_v5 = vsel %vm781_vm4, %v743_v39, 0.0  ;;  %v3264_v3 = vpop.f32.mrb[28].mxu1 }
 0x163   :  { %v576_v16 = vpop.f32.mrb[31].mxu0  ;;  %v746_v55 = vmax.f32 %v582_v30, 0.0  ;;  %v946_v7 = vmul.f32 %v743_v39, %v743_v39  ;;  %v590_v11 = vadd.f32 %v3006_v38, %v3038_v15  ;;  %v1032_v12 = vsel %vm781_vm4, %v944_v0, 0.0  ;;  %1405 = vst.msk [vmem:[%s4776_s5 + $0x64] sm:$0xf] %vm1379_vm3, %v2278_v2  ;;  %v3272_v22 = vpop.f32.mrb[29].mxu1 }
 0x164   :  { %v834_v8 = vadd.f32 %v833_v63, %v832_v61  ;;  %v744_v13 = vmax.f32 %v574_v56, 0.0  ;;  %v585_v14 = vadd.f32 %v2609_v10, %v3006_v38  ;;  %v1034_v23 = vsel %vm781_vm4, %v945_v58, 0.0  ;;  %v3276_v32 = vpop.f32.mrb[30].mxu1 }
 0x165   :  { %v2283_v6 = vpack.c.bf16 %v746_v55, %v746_v55  ;;  %v1033_v18 = vadd.f32 %v1032_v12, %v1031_v60  ;;  %v577_v15 = vadd.f32 %v3006_v38, %v576_v16  ;;  %v3283_v27 = vpop.f32.mrb[31].mxu1  ;;  %v748_v47 = vmax.f32 %v590_v11, 0.0 }
 0x166   :  { %v836_v30 = vadd.f32 %v835_v5, %v834_v8  ;;  %v837_v33 = vsel %vm781_vm4, %v744_v13, 0.0  ;;  %v947_v35 = vmul.f32 %v744_v13, %v744_v13  ;;  %v2281_v28 = vpack.c.bf16 %v744_v13, %v744_v13 }
 0x167   :  { %1410 = vst.msk [vmem:[%s4776_s5 + $0x78] sm:$0xf] %vm1379_vm3, %v2283_v6  ;;  %v747_v10 = vmax.f32 %v585_v14, 0.0  ;;  %v1035_v39 = vadd.f32 %v1034_v23, %v1033_v18  ;;  %v745_v45 = vmax.f32 %v577_v15, 0.0  ;;  %v1036_v16 = vsel %vm781_vm4, %v946_v7, 0.0 }
 0x168   :  { %v838_v41 = vadd.f32 %v837_v33, %v836_v30  ;;  %v949_v50 = vmul.f32 %v746_v55, %v746_v55  ;;  %v1038_v51 = vsel %vm781_vm4, %v947_v35, 0.0  ;;  %1408 = vst.msk [vmem:[%s4776_s5 + $0x70] sm:$0xf] %vm1379_vm3, %v2281_v28  ;;  %v841_v63 = vsel %vm781_vm4, %v746_v55, 0.0 }
 0x169   :  { %v2284_v52 = vpack.c.bf16 %v747_v10, %v747_v10  ;;  %v1037_v56 = vadd.f32 %v1036_v16, %v1035_v39  ;;  %v839_v58 = vsel %vm781_vm4, %v745_v45, 0.0  ;;  %v948_v60 = vmul.f32 %v745_v45, %v745_v45 }
 0x16a   :  { %v2282_v61 = vpack.c.bf16 %v745_v45, %v745_v45  ;;  %v950_v0 = vmul.f32 %v747_v10, %v747_v10  ;;  %v840_v2 = vadd.f32 %v839_v58, %v838_v41  ;;  %v951_v8 = vmul.f32 %v748_v47, %v748_v47 }
 0x16b   :  { %1411 = vst.msk [vmem:[%s4776_s5 + $0x7c] sm:$0xf] %vm1379_vm3, %v2284_v52  ;;  %v1039_v5 = vadd.f32 %v1038_v51, %v1037_v56  ;;  %v1040_v7 = vsel %vm781_vm4, %v948_v60, 0.0  ;;  %v2285_v11 = vpack.c.bf16 %v748_v47, %v748_v47  ;;  %v1042_v12 = vsel %vm781_vm4, %v949_v50, 0.0 }
 0x16c   :  { %1409 = vst.msk [vmem:[%s4776_s5 + $0x74] sm:$0xf] %vm1379_vm3, %v2282_v61  ;;  %v842_v55 = vadd.f32 %v841_v63, %v840_v2  ;;  %v845_v6 = vsel %vm781_vm4, %v748_v47, 0.0  ;;  %v601_v13 = vadd.f32 %v3042_v20, %v3006_v38  ;;  %v843_v14 = vsel %vm781_vm4, %v747_v10, 0.0 }
 0x16d   :  { %v1041_v23 = vadd.f32 %v1040_v7, %v1039_v5  ;;  %1412 = vst.msk [vmem:[%s4776_s5 + $0x80] sm:$0xf] %vm1379_vm3, %v2285_v11  ;;  %v593_v18 = vadd.f32 %v3006_v38, %v3045_v25  ;;  %v614_v30 = vadd.f32 %v3059_v44, %v3006_v38  ;;  %v1044_v15 = vsel %vm781_vm4, %v950_v0, 0.0 }
 0x16e   :  { %v844_v33 = vadd.f32 %v843_v14, %v842_v55  ;;  %v1046_v35 = vsel %vm781_vm4, %v951_v8, 0.0  ;;  %v751_v20 = vmax.f32 %v601_v13, 0.0  ;;  %v606_v39 = vadd.f32 %v3006_v38, %v3068_v49 }
 0x16f   :  { %v1043_v28 = vadd.f32 %v1042_v12, %v1041_v23  ;;  %v749_v10 = vmax.f32 %v593_v18, 0.0  ;;  %v617_v41 = vadd.f32 %v3076_v54, %v3006_v38  ;;  %v754_v25 = vmax.f32 %v614_v30, 0.0 }
 0x170   :  { %v846_v45 = vadd.f32 %v845_v6, %v844_v33  ;;  %v2288_v47 = vpack.c.bf16 %v751_v20, %v751_v20  ;;  %v609_v44 = vadd.f32 %v3006_v38, %v3078_v59  ;;  %v953_v56 = vmul.f32 %v3094_v19, %v3094_v19 }
 0x171   :  { %v1045_v16 = vadd.f32 %v1044_v15, %v1043_v28  ;;  %v847_v50 = vsel %vm781_vm4, %v749_v10, 0.0  ;;  %v952_v51 = vmul.f32 %v749_v10, %v749_v10  ;;  %v2286_v52 = vpack.c.bf16 %v749_v10, %v749_v10 }
 0x172   :  { %v954_v58 = vmul.f32 %v751_v20, %v751_v20  ;;  %1415 = vst.msk [vmem:[%s4776_s5 + $0x8c] sm:$0xf] %vm1379_vm3, %v2288_v47  ;;  %v848_v49 = vadd.f32 %v847_v50, %v846_v45  ;;  %v849_v54 = vsel %vm781_vm4, %v3094_v19, 0.0  ;;  %v851_v59 = vsel %vm781_vm4, %v751_v20, 0.0 }
 0x173   :  { %v1047_v60 = vadd.f32 %v1046_v35, %v1045_v16  ;;  %1413 = vst.msk [vmem:[%s4776_s5 + $0x84] sm:$0xf] %vm1379_vm3, %v2286_v52  ;;  %v1048_v63 = vsel %vm781_vm4, %v952_v51, 0.0  ;;  %v2291_v0 = vpack.c.bf16 %v754_v25, %v754_v25  ;;  %v752_v5 = vmax.f32 %v606_v39, 0.0 }
 0x174   :  { %v850_v61 = vadd.f32 %v849_v54, %v848_v49  ;;  %v755_v7 = vmax.f32 %v617_v41, 0.0  ;;  %v753_v8 = vmax.f32 %v609_v44, 0.0  ;;  %v1050_v11 = vsel %vm781_vm4, %v953_v56, 0.0 }
 0x175   :  { %v1049_v2 = vadd.f32 %v1048_v63, %v1047_v60  ;;  %v1052_v19 = vsel %vm781_vm4, %v954_v58, 0.0  ;;  %1418 = vst.msk [vmem:[%s4776_s5 + $0x98] sm:$0xf] %vm1379_vm3, %v2291_v0  ;;  %v853_v6 = vsel %vm781_vm4, %v752_v5, 0.0  ;;  %v955_v13 = vmul.f32 %v752_v5, %v752_v5 }
 0x176   :  { %v852_v12 = vadd.f32 %v851_v59, %v850_v61  ;;  %v2289_v14 = vpack.c.bf16 %v752_v5, %v752_v5  ;;  %v2292_v18 = vpack.c.bf16 %v755_v7, %v755_v7  ;;  %v630_v30 = vadd.f32 %v3096_v21, %v3006_v38 }
 0x177   :  { %v1051_v55 = vadd.f32 %v1050_v11, %v1049_v2  ;;  %v622_v15 = vadd.f32 %v3006_v38, %v3103_v26  ;;  %v1054_v35 = vsel %vm781_vm4, %v955_v13, 0.0  ;;  %v855_v20 = vsel %vm781_vm4, %v753_v8, 0.0 }
 0x178   :  { %v854_v23 = vadd.f32 %v853_v6, %v852_v12  ;;  %1416 = vst.msk [vmem:[%s4776_s5 + $0x90] sm:$0xf] %vm1379_vm3, %v2289_v14  ;;  %v956_v28 = vmul.f32 %v753_v8, %v753_v8  ;;  %v857_v10 = vsel %vm781_vm4, %v754_v25, 0.0  ;;  %v957_v39 = vmul.f32 %v754_v25, %v754_v25  ;;  %1419 = vst.msk [vmem:[%s4776_s5 + $0x9c] sm:$0xf] %vm1379_vm3, %v2292_v18 }
 0x179   :  { %v1053_v33 = vadd.f32 %v1052_v19, %v1051_v55  ;;  %v859_v41 = vsel %vm781_vm4, %v755_v7, 0.0  ;;  %v958_v45 = vmul.f32 %v755_v7, %v755_v7  ;;  %v2290_v16 = vpack.c.bf16 %v753_v8, %v753_v8 }
 0x17a   :  { %v856_v21 = vadd.f32 %v855_v20, %v854_v23  ;;  %v1056_v47 = vsel %vm781_vm4, %v956_v28, 0.0  ;;  %v758_v50 = vmax.f32 %v630_v30, 0.0  ;;  %v756_v51 = vmax.f32 %v622_v15, 0.0 }
 0x17b   :  { %v1055_v26 = vadd.f32 %v1054_v35, %v1053_v33  ;;  %v633_v25 = vadd.f32 %v3112_v31, %v3006_v38  ;;  %v625_v56 = vadd.f32 %v3006_v38, %v3116_v36  ;;  %v646_v58 = vadd.f32 %v3132_v62, %v3006_v38  ;;  %1417 = vst.msk [vmem:[%s4776_s5 + $0x94] sm:$0xf] %vm1379_vm3, %v2290_v16 }
 0x17c   :  { %v858_v44 = vadd.f32 %v857_v10, %v856_v21  ;;  %v1058_v49 = vsel %vm781_vm4, %v957_v39, 0.0  ;;  %v2295_v54 = vpack.c.bf16 %v758_v50, %v758_v50  ;;  %v861_v61 = vsel %vm781_vm4, %v756_v51, 0.0 }
 0x17d   :  { %v1057_v52 = vadd.f32 %v1056_v47, %v1055_v26  ;;  %v959_v63 = vmul.f32 %v756_v51, %v756_v51  ;;  %v2293_v31 = vpack.c.bf16 %v756_v51, %v756_v51  ;;  %v1060_v0 = vsel %vm781_vm4, %v958_v45, 0.0 }
 0x17e   :  { %v860_v60 = vadd.f32 %v859_v41, %v858_v44  ;;  %1422 = vst.msk [vmem:[%s4776_s5 + $0xa8] sm:$0xf] %vm1379_vm3, %v2295_v54  ;;  %v759_v62 = vmax.f32 %v633_v25, 0.0  ;;  %v757_v2 = vmax.f32 %v625_v56, 0.0  ;;  %v762_v8 = vmax.f32 %v646_v58, 0.0 }
 0x17f   :  { %v1059_v59 = vadd.f32 %v1058_v49, %v1057_v52  ;;  %v1062_v7 = vsel %vm781_vm4, %v959_v63, 0.0  ;;  %1420 = vst.msk [vmem:[%s4776_s5 + $0xa0] sm:$0xf] %vm1379_vm3, %v2293_v31  ;;  %v638_v11 = vadd.f32 %v3006_v38, %v3139_v1  ;;  %v961_v19 = vmul.f32 %v758_v50, %v758_v50 }
 0x180   :  { %v862_v36 = vadd.f32 %v861_v61, %v860_v60  ;;  %v962_v12 = vmul.f32 %v759_v62, %v759_v62  ;;  %v2296_v6 = vpack.c.bf16 %v759_v62, %v759_v62  ;;  %v863_v13 = vsel %vm781_vm4, %v757_v2, 0.0 }
 0x181   :  { %v1061_v5 = vadd.f32 %v1060_v0, %v1059_v59  ;;  %v960_v14 = vmul.f32 %v757_v2, %v757_v2  ;;  %v2294_v18 = vpack.c.bf16 %v757_v2, %v757_v2  ;;  %v865_v30 = vsel %vm781_vm4, %v758_v50, 0.0 }
 0x182   :  { %v864_v23 = vadd.f32 %v863_v13, %v862_v36  ;;  %1423 = vst.msk [vmem:[%s4776_s5 + $0xac] sm:$0xf] %vm1379_vm3, %v2296_v6  ;;  %v2299_v33 = vpack.c.bf16 %v762_v8, %v762_v8  ;;  %v760_v1 = vmax.f32 %v638_v11, 0.0  ;;  %v1066_v35 = vsel %vm781_vm4, %v961_v19, 0.0 }
 0x183   :  { %v1063_v55 = vadd.f32 %v1062_v7, %v1061_v5  ;;  %v1064_v15 = vsel %vm781_vm4, %v960_v14, 0.0  ;;  %v867_v20 = vsel %vm781_vm4, %v759_v62, 0.0  ;;  %1421 = vst.msk [vmem:[%s4776_s5 + $0xa4] sm:$0xf] %vm1379_vm3, %v2294_v18  ;;  %v1068_v39 = vsel %vm781_vm4, %v962_v12, 0.0 }
 0x184   :  { %v866_v28 = vadd.f32 %v865_v30, %v864_v23  ;;  %1426 = vst.msk [vmem:[%s4776_s5 + $0xb8] sm:$0xf] %vm1379_vm3, %v2299_v33  ;;  %v869_v21 = vsel %vm781_vm4, %v760_v1, 0.0  ;;  %v963_v26 = vmul.f32 %v760_v1, %v760_v1  ;;  %v2297_v41 = vpack.c.bf16 %v760_v1, %v760_v1 }
 0x185   :  { %v1065_v10 = vadd.f32 %v1064_v15, %v1063_v55  ;;  %v649_v44 = vadd.f32 %v3141_v4, %v3006_v38  ;;  %v641_v16 = vadd.f32 %v3006_v38, %v3149_v9  ;;  %v662_v51 = vadd.f32 %v3163_v43, %v3006_v38  ;;  %v3446_v15 = vld [vmem:[#allocation6] ss:$0 sm:$0xff] }
 0x186   :  { %v868_v47 = vadd.f32 %v867_v20, %v866_v28  ;;  %v1070_v50 = vsel %vm781_vm4, %v963_v26, 0.0  ;;  %1424 = vst.msk [vmem:[%s4776_s5 + $0xb0] sm:$0xf] %vm1379_vm3, %v2297_v41  ;;  %v654_v52 = vadd.f32 %v3006_v38, %v3170_v46  ;;  %v665_v25 = vadd.f32 %v3173_v53, %v3006_v38 }
 0x187   :  { %v1067_v45 = vadd.f32 %v1066_v35, %v1065_v10  ;;  %v763_v58 = vmax.f32 %v649_v44, 0.0  ;;  %v761_v9 = vmax.f32 %v641_v16, 0.0  ;;  %v965_v49 = vmul.f32 %v762_v8, %v762_v8 }
 0x188   :  { %v870_v4 = vadd.f32 %v869_v21, %v868_v47  ;;  %v766_v59 = vmax.f32 %v662_v51, 0.0  ;;  %v764_v31 = vmax.f32 %v654_v52, 0.0  ;;  %v767_v46 = vmax.f32 %v665_v25, 0.0 }
 0x189   :  { %v1069_v56 = vadd.f32 %v1068_v39, %v1067_v45  ;;  %v2300_v60 = vpack.c.bf16 %v763_v58, %v763_v58  ;;  %v871_v61 = vsel %vm781_vm4, %v761_v9, 0.0  ;;  %v964_v63 = vmul.f32 %v761_v9, %v761_v9 }
 0x18a   :  { %v966_v0 = vmul.f32 %v763_v58, %v763_v58  ;;  %v872_v43 = vadd.f32 %v871_v61, %v870_v4  ;;  %v873_v53 = vsel %vm781_vm4, %v762_v8, 0.0  ;;  %v2298_v62 = vpack.c.bf16 %v761_v9, %v761_v9 }
 0x18b   :  { %v1071_v54 = vadd.f32 %v1070_v50, %v1069_v56  ;;  %1427 = vst.msk [vmem:[%s4776_s5 + $0xbc] sm:$0xf] %vm1379_vm3, %v2300_v60  ;;  %v1072_v36 = vsel %vm781_vm4, %v964_v63, 0.0  ;;  %v657_v2 = vadd.f32 %v3006_v38, %v3180_v57  ;;  %v1074_v5 = vsel %vm781_vm4, %v965_v49, 0.0 }
 0x18c   :  { %v874_v7 = vadd.f32 %v873_v53, %v872_v43  ;;  %v2303_v19 = vpack.c.bf16 %v766_v59, %v766_v59  ;;  %v875_v12 = vsel %vm781_vm4, %v763_v58, 0.0  ;;  %1425 = vst.msk [vmem:[%s4776_s5 + $0xb4] sm:$0xf] %vm1379_vm3, %v2298_v62  ;;  %v877_v8 = vsel %vm781_vm4, %v764_v31, 0.0 }
 0x18d   :  { %v1073_v11 = vadd.f32 %v1072_v36, %v1071_v54  ;;  %v967_v55 = vmul.f32 %v764_v31, %v764_v31  ;;  %v2301_v6 = vpack.c.bf16 %v764_v31, %v764_v31  ;;  %v1076_v13 = vsel %vm781_vm4, %v966_v0, 0.0 }
 0x18e   :  { %1430 = vst.msk [vmem:[%s4776_s5 + $0xc8] sm:$0xf] %vm1379_vm3, %v2303_v19  ;;  %v876_v38 = vadd.f32 %v875_v12, %v874_v7  ;;  %v2304_v57 = vpack.c.bf16 %v767_v46, %v767_v46  ;;  %v969_v23 = vmul.f32 %v766_v59, %v766_v59  ;;  %v765_v30 = vmax.f32 %v657_v2, 0.0 }
 0x18f   :  { %v1075_v14 = vadd.f32 %v1074_v5, %v1073_v11  ;;  %v1078_v18 = vsel %vm781_vm4, %v967_v55, 0.0  ;;  %1428 = vst.msk [vmem:[%s4776_s5 + $0xc0] sm:$0xf] %vm1379_vm3, %v2301_v6  ;;  %v678_v33 = vadd.f32 %v3446_v15, %v3198_v29  ;;  %v670_v20 = vadd.f32 %v3446_v15, %v3200_v34 }
 0x190   :  { %v878_v1 = vadd.f32 %v877_v8, %v876_v38  ;;  %1431 = vst.msk [vmem:[%s4776_s5 + $0xcc] sm:$0xf] %vm1379_vm3, %v2304_v57  ;;  %v681_v28 = vadd.f32 %v3446_v15, %v3204_v40  ;;  %v879_v10 = vsel %vm781_vm4, %v765_v30, 0.0  ;;  %v968_v39 = vmul.f32 %v765_v30, %v765_v30 }
 0x191   :  { %v1077_v35 = vadd.f32 %v1076_v13, %v1075_v14  ;;  %v2302_v21 = vpack.c.bf16 %v765_v30, %v765_v30  ;;  %v770_v26 = vmax.f32 %v678_v33, 0.0  ;;  %v881_v45 = vsel %vm781_vm4, %v766_v59, 0.0 }
 0x192   :  { %v880_v29 = vadd.f32 %v879_v10, %v878_v1  ;;  %v970_v47 = vmul.f32 %v767_v46, %v767_v46  ;;  %v1080_v44 = vsel %vm781_vm4, %v968_v39, 0.0  ;;  %v768_v50 = vmax.f32 %v670_v20, 0.0 }
 0x193   :  { %v1079_v41 = vadd.f32 %v1078_v18, %v1077_v35  ;;  %1429 = vst.msk [vmem:[%s4776_s5 + $0xc4] sm:$0xf] %vm1379_vm3, %v2302_v21  ;;  %v2307_v34 = vpack.c.bf16 %v770_v26, %v770_v26  ;;  %v771_v51 = vmax.f32 %v681_v28, 0.0  ;;  %v1082_v52 = vsel %vm781_vm4, %v969_v23, 0.0 }
 0x194   :  { %v882_v16 = vadd.f32 %v881_v45, %v880_v29  ;;  %v883_v25 = vsel %vm781_vm4, %v767_v46, 0.0  ;;  %v673_v4 = vadd.f32 %v3446_v15, %v3212_v48  ;;  %v885_v9 = vsel %vm781_vm4, %v768_v50, 0.0 }
 0x195   :  { %v1081_v40 = vadd.f32 %v1080_v44, %v1079_v41  ;;  %1434 = vst.msk [vmem:[%s4776_s5 + $0xd8] sm:$0xf] %vm1379_vm3, %v2307_v34  ;;  %v971_v49 = vmul.f32 %v768_v50, %v768_v50  ;;  %v1084_v54 = vsel %vm781_vm4, %v970_v47, 0.0  ;;  %v973_v60 = vmul.f32 %v770_v26, %v770_v26 }
 0x196   :  { %v884_v58 = vadd.f32 %v883_v25, %v882_v16  ;;  %v2305_v59 = vpack.c.bf16 %v768_v50, %v768_v50  ;;  %v2308_v61 = vpack.c.bf16 %v771_v51, %v771_v51  ;;  %v769_v48 = vmax.f32 %v673_v4, 0.0 }
 0x197   :  { %v1083_v56 = vadd.f32 %v1082_v52, %v1081_v40  ;;  %v1086_v0 = vsel %vm781_vm4, %v971_v49, 0.0  ;;  %v694_v43 = vadd.f32 %v3446_v15, %v3233_v17  ;;  %v686_v53 = vadd.f32 %v3446_v15, %v3238_v24 }
 0x198   :  { %v886_v63 = vadd.f32 %v885_v9, %v884_v58  ;;  %1432 = vst.msk [vmem:[%s4776_s5 + $0xd0] sm:$0xf] %vm1379_vm3, %v2305_v59  ;;  %1435 = vst.msk [vmem:[%s4776_s5 + $0xdc] sm:$0xf] %vm1379_vm3, %v2308_v61  ;;  %v697_v36 = vadd.f32 %v3446_v15, %v3240_v37  ;;  %v689_v62 = vadd.f32 %v3446_v15, %v3247_v42  ;;  %v889_v2 = vsel %vm781_vm4, %v770_v26, 0.0 }
 0x199   :  { %v1085_v31 = vadd.f32 %v1084_v54, %v1083_v56  ;;  %v1090_v5 = vsel %vm781_vm4, %v973_v60, 0.0  ;;  %v887_v7 = vsel %vm781_vm4, %v769_v48, 0.0  ;;  %v972_v11 = vmul.f32 %v769_v48, %v769_v48 }
 0x19a   :  { %v888_v19 = vadd.f32 %v887_v7, %v886_v63  ;;  %v2306_v12 = vpack.c.bf16 %v769_v48, %v769_v48  ;;  %v774_v17 = vmax.f32 %v694_v43, 0.0  ;;  %v772_v8 = vmax.f32 %v686_v53, 0.0 }
 0x19b   :  { %v1087_v46 = vadd.f32 %v1086_v0, %v1085_v31  ;;  %v891_v55 = vsel %vm781_vm4, %v771_v51, 0.0  ;;  %v974_v24 = vmul.f32 %v771_v51, %v771_v51  ;;  %v1088_v6 = vsel %vm781_vm4, %v972_v11, 0.0 }
 0x19c   :  { %v775_v37 = vmax.f32 %v697_v36, 0.0  ;;  %v890_v13 = vadd.f32 %v889_v2, %v888_v19  ;;  %1433 = vst.msk [vmem:[%s4776_s5 + $0xd4] sm:$0xf] %vm1379_vm3, %v2306_v12  ;;  %v773_v42 = vmax.f32 %v689_v62, 0.0  ;;  %v710_v38 = vadd.f32 %v3446_v15, %v3264_v3 }
 0x19d   :  { %v1089_v14 = vadd.f32 %v1088_v6, %v1087_v46  ;;  %v2311_v57 = vpack.c.bf16 %v774_v17, %v774_v17  ;;  %v893_v23 = vsel %vm781_vm4, %v772_v8, 0.0  ;;  %v975_v18 = vmul.f32 %v772_v8, %v772_v8 }
 0x19e   :  { %v2309_v30 = vpack.c.bf16 %v772_v8, %v772_v8  ;;  %v892_v1 = vadd.f32 %v891_v55, %v890_v13  ;;  %v1092_v35 = vsel %vm781_vm4, %v974_v24, 0.0  ;;  %v977_v3 = vmul.f32 %v774_v17, %v774_v17 }
 0x19f   :  { %v1091_v33 = vadd.f32 %v1090_v5, %v1089_v14  ;;  %1438 = vst.msk [vmem:[%s4776_s5 + $0xe8] sm:$0xf] %vm1379_vm3, %v2311_v57  ;;  %v1094_v20 = vsel %vm781_vm4, %v975_v18, 0.0  ;;  %v2312_v39 = vpack.c.bf16 %v775_v37, %v775_v37  ;;  %v895_v21 = vsel %vm781_vm4, %v773_v42, 0.0 }
 0x1a0   :  { %1436 = vst.msk [vmem:[%s4776_s5 + $0xe0] sm:$0xf] %vm1379_vm3, %v2309_v30  ;;  %v894_v28 = vadd.f32 %v893_v23, %v892_v1  ;;  %v976_v26 = vmul.f32 %v773_v42, %v773_v42  ;;  %v2310_v41 = vpack.c.bf16 %v773_v42, %v773_v42  ;;  %v778_v29 = vmax.f32 %v710_v38, 0.0 }
 0x1a1   :  { %v1093_v10 = vadd.f32 %v1092_v35, %v1091_v33  ;;  %1439 = vst.msk [vmem:[%s4776_s5 + $0xec] sm:$0xf] %vm1379_vm3, %v2312_v39  ;;  %v702_v44 = vadd.f32 %v3446_v15, %v3272_v22  ;;  %v713_v34 = vadd.f32 %v3446_v15, %v3276_v32  ;;  %v897_v16 = vsel %vm781_vm4, %v774_v17, 0.0 }
 0x1a2   :  { %v896_v47 = vadd.f32 %v895_v21, %v894_v28  ;;  %v978_v40 = vmul.f32 %v775_v37, %v775_v37  ;;  %v1096_v50 = vsel %vm781_vm4, %v976_v26, 0.0  ;;  %1437 = vst.msk [vmem:[%s4776_s5 + $0xe4] sm:$0xf] %vm1379_vm3, %v2310_v41  ;;  %v2315_v51 = vpack.c.bf16 %v778_v29, %v778_v29 }
 0x1a3   :  { %v1095_v45 = vadd.f32 %v1094_v20, %v1093_v10  ;;  %v1098_v52 = vsel %vm781_vm4, %v977_v3, 0.0  ;;  %v899_v22 = vsel %vm781_vm4, %v775_v37, 0.0  ;;  %v776_v32 = vmax.f32 %v702_v44, 0.0  ;;  %v3569_v44 = vld [vmem:[%s4776_s5 + $0x8] sm:$0xff]  }
 0x1a4   :  { %v898_v25 = vadd.f32 %v897_v16, %v896_v47  ;;  %1442 = vst.msk [vmem:[%s4776_s5 + $0xf8] sm:$0xf] %vm1379_vm3, %v2315_v51  ;;  %v779_v56 = vmax.f32 %v713_v34, 0.0  ;;  %v705_v49 = vadd.f32 %v3446_v15, %v3283_v27  ;;  %v1100_v54 = vsel %vm781_vm4, %v978_v40, 0.0  ;;  %v3574_v34 = vld [vmem:[%s4776_s5] sm:$0xff]   ;;  %v3579_v16 = vld [vmem:[%s4776_s5 + $0x18] sm:$0xff]  }
 0x1a5   :  { %v1097_v4 = vadd.f32 %v1096_v50, %v1095_v45  ;;  %v901_v60 = vsel %vm781_vm4, %v776_v32, 0.0  ;;  %v979_v59 = vmul.f32 %v776_v32, %v776_v32  ;;  %v2313_v61 = vpack.c.bf16 %v776_v32, %v776_v32  ;;  %v3584_v50 = vld [vmem:[%s4776_s5 + $0x10] sm:$0xff]  }
 0x1a6   :  { %v900_v9 = vadd.f32 %v899_v22, %v898_v25  ;;  %v2792_v63 = vmov 0.0   ;;  %v2316_v48 = vpack.c.bf16 %v779_v56, %v779_v56  ;;  %v777_v27 = vmax.f32 %v705_v49, 0.0  ;;  %v3595_v25 = vld [vmem:[%s4776_s5 + $0x20] sm:$0xff]   ;;  %v3609_v49 = vld [vmem:[%s4776_s5 + $0x30] sm:$0xff]  }
 0x1a7   :  { %v1099_v58 = vadd.f32 %v1098_v52, %v1097_v4  ;;  %75 = vst.msk [vmem:[#allocation2] sm:$0x1] %vm74_vm5, %v2792_v63  ;;  %76 = vst.msk [vmem:[#allocation3] sm:$0x1] %vm74_vm5, %v2792_v63  ;;  %v1102_v43 = vsel %vm781_vm4, %v979_v59, 0.0  ;;  %v981_v46 = vmul.f32 %v778_v29, %v778_v29  ;;  %v905_v5 = vsel %vm781_vm4, %v778_v29, 0.0 }
 0x1a8   :  { %v902_v31 = vadd.f32 %v901_v60, %v900_v9  ;;  %1440 = vst.msk [vmem:[%s4776_s5 + $0xf0] sm:$0xf] %vm1379_vm3, %v2313_v61  ;;  %1443 = vst.msk [vmem:[%s4776_s5 + $0xfc] sm:$0xf] %vm1379_vm3, %v2316_v48  ;;  %v903_v53 = vsel %vm781_vm4, %v777_v27, 0.0  ;;  %v980_v36 = vmul.f32 %v777_v27, %v777_v27  ;;  %v2314_v2 = vpack.c.bf16 %v777_v27, %v777_v27  ;;  %v3590_v52 = vld [vmem:[%s4776_s5 + $0x28] sm:$0xff]  }
 0x1a9   :  { %v1101_v0 = vadd.f32 %v1100_v54, %v1099_v58  ;;  %v982_v7 = vmul.f32 %v779_v56, %v779_v56  ;;  %v1106_v17 = vsel %vm781_vm4, %v981_v46, 0.0  ;;  %v907_v8 = vsel %vm781_vm4, %v779_v56, 0.0  ;;  %v3604_v9 = vld [vmem:[%s4776_s5 + $0x38] sm:$0xff]   ;;  %v3617_v61 = vld [vmem:[%s4776_s5 + $0x48] sm:$0xff]   ;;  %v3622_v63 = vld [vmem:[%s4776_s5 + $0x40] sm:$0xff]  }
 0x1aa   :  { %v904_v62 = vadd.f32 %v903_v53, %v902_v31  ;;  %v1104_v11 = vsel %vm781_vm4, %v980_v36, 0.0  ;;  %1441 = vst.msk [vmem:[%s4776_s5 + $0xf4] sm:$0xf] %vm1379_vm3, %v2314_v2  ;;  %v2387_v51 = vunpack.c.l.bf16 %v3569_v44  ;;  %v2388_v22 = vunpack.c.h.bf16 %v3569_v44  ;;  %v3635_v27 = vld [vmem:[%s4776_s5 + $0x50] sm:$0xff]   ;;  %v3644_v2 = vld [vmem:[%s4776_s5 + $0x68] sm:$0xff]  }
 0x1ab   :  { %v1103_v15 = vadd.f32 %v1102_v43, %v1101_v0  ;;  %v1108_v6 = vsel %vm781_vm4, %v982_v7, 0.0  ;;  %v2383_v32 = vunpack.c.l.bf16 %v3574_v34  ;;  %v2384_v56 = vunpack.c.h.bf16 %v3574_v34  ;;  %v3630_v43 = vld [vmem:[%s4776_s5 + $0x58] sm:$0xff]  }
 0x1ac   :  { %v906_v19 = vadd.f32 %v905_v5, %v904_v62  ;;  %v2395_v58 = vunpack.c.l.bf16 %v3579_v16  ;;  %v2396_v54 = vunpack.c.h.bf16 %v3579_v16  ;;  %v2391_v60 = vunpack.c.l.bf16 %v3584_v50 }
 0x1ad   :  { %v1105_v12 = vadd.f32 %v1104_v11, %v1103_v15  ;;  %v2392_v59 = vunpack.c.h.bf16 %v3584_v50  ;;  %v2403_v31 = vunpack.c.l.bf16 %v3590_v52  ;;  %v2404_v0 = vunpack.c.h.bf16 %v3590_v52 }
 0x1ae   :  { %v908_v55 = vadd.f32 %v907_v8, %v906_v19  ;;  %v780_v1 = vld [vmem:[#allocation2] sm:$0x1]  ;;  %v918_v3 = vld [vmem:[#allocation3] sm:$0x1]  ;;  %v2399_v48 = vunpack.c.l.bf16 %v3595_v25  ;;  %v1590_v15 = vlaneseq  ;;  %v2400_v46 = vunpack.c.h.bf16 %v3595_v25 }
 0x1af   :  { %v1107_v24 = vadd.f32 %v1106_v17, %v1105_v12  ;;  %v2411_v53 = vunpack.c.l.bf16 %v3604_v9  ;;  %v2412_v36 = vunpack.c.h.bf16 %v3604_v9  ;;  %v2407_v62 = vunpack.c.l.bf16 %v3609_v49  ;;  %v3653_v12 = vld [vmem:[%s4776_s5 + $0x60] sm:$0xff]   ;;  %v3658_v17 = vld [vmem:[%s4776_s5 + $0x78] sm:$0xff]  }
 0x1b0   :  { %v909_v37 = vrot.slane %v908_v55, 4  ;;  %v2408_v5 = vunpack.c.h.bf16 %v3609_v49  ;;  %v2415_v19 = vunpack.c.l.bf16 %v3622_v63  ;;  %v2416_v8 = vunpack.c.h.bf16 %v3622_v63 }
 0x1b1   :  { %v1109_v13 = vadd.f32 %v1108_v6, %v1107_v24  ;;  %v3774_v24 = vld [vmem:[%s4776_s5 + $0xf8] sm:$0xff]   ;;  %v4779_v9 = vunpack.c.h.bf16 %v3617_v61  ;;  %v4781_v63 = vunpack.c.h.bf16 %v3635_v27 }
 0x1b2   :  { %v910_v14 = vadd.f32 %v909_v37, %v908_v55  ;;  %v3667_v37 = vld [vmem:[%s4776_s5 + $0x70] sm:$0xff]  }
 0x1b3   :  { %v1110_v42 = vrot.slane %v1109_v13, 4 }
 0x1b4   :  { %v911_v38 = vrot.slane %v910_v14, 2 }
 0x1b5   :  { %v1111_v57 = vadd.f32 %v1110_v42, %v1109_v13  ;;  %v3672_v13 = vld [vmem:[%s4776_s5 + $0x88] sm:$0xff]   ;;  %v3786_v42 = vld [vmem:[%s4776_s5 + $0xf0] sm:$0xff]  }
 0x1b6   :  { %v912_v23 = vadd.f32 %v911_v38, %v910_v14 }
 0x1b7   :  { %v1112_v18 = vrot.slane %v1111_v57, 2 }
 0x1b8   :  { %v913_v30 = vrot.slane %v912_v23, 1 }
 0x1b9   :  { %v1113_v33 = vadd.f32 %v1112_v18, %v1111_v57  ;;  %v3680_v57 = vld [vmem:[%s4776_s5 + $0x80] sm:$0xff]   ;;  %v3687_v18 = vshrl.u32 %v1590_v15, 7  ;;  %v3724_v15 = vld [vmem:[%s4776_s5 + $0xb0] sm:$0xff]  }
 0x1ba   :  { %v914_v35 = vadd.f32 %v913_v30, %v912_v23  ;;  %v3685_v23 = vld [vmem:[%s4776_s5 + $0x98] sm:$0xff]   ;;  %v4792_v55 = vunpack.c.l.bf16 %v3680_v57 }
 0x1bb   :  { %v1114_v20 = vrot.slane %v1113_v33, 1  ;;  %v4798_v6 = vunpack.c.l.bf16 %v3685_v23 }
 0x1bc   :  { %v915_v28 = vadd.f32 %v914_v35, %v780_v1  ;;  %v3760_v1 = vld [vmem:[%s4776_s5 + $0xe8] sm:$0xff]  }
 0x1bd   :  { %v1115_v10 = vadd.f32 %v1114_v20, %v1113_v33  ;;  %v3696_v20 = vld [vmem:[%s4776_s5 + $0x90] sm:$0xff]   ;;  %v3769_v33 = vld [vmem:[%s4776_s5 + $0xe0] sm:$0xff]  }
 0x1be   :  { %917 = vst.msk [vmem:[#allocation2] sm:$0x1] %vm74_vm5, %v915_v28  ;;  %v3747_v28 = vld [vmem:[%s4776_s5 + $0xd8] sm:$0xff]  }
 0x1bf   :  { %v1116_v39 = vadd.f32 %v1115_v10, %v918_v3  ;;  %v3701_v3 = vld [vmem:[%s4776_s5 + $0xa8] sm:$0xff]   ;;  %v3755_v10 = vld [vmem:[%s4776_s5 + $0xd0] sm:$0xff]  }
 0x1c1   :  { %1117 = vst.msk [vmem:[#allocation3] sm:$0x1] %vm74_vm5, %v1116_v39  ;;  %v3778_v39 = vld [vmem:[#allocation9] sm:$0x1] }
 0x1c5   :  { %v1447_v21 = vld [vmem:[#allocation2] sm:$0x1] }
 0x1c6   :  { %v3562_v26 = vmul.f32 0.001953125, %v1447_v21  ;;  %v1454_v21 = vld [vmem:[#allocation8] sm:$0x1] }
 0x1c8   :  { %v1449_v41 = vld [vmem:[#allocation3] sm:$0x1]  ;;  %v1451_v45 = vmul.f32 %v3562_v26, %v3562_v26 }
 0x1c9   :  { %v1450_v29 = vmul.f32 0.001953125, %v1449_v41  ;;  %v3710_v41 = vld [vmem:[%s4776_s5 + $0xa0] sm:$0xff]  }
 0x1cb   :  { %v1452_v47 = vsub.f32 %v1450_v29, %v1451_v45  ;;  %v3715_v29 = vld [vmem:[%s4776_s5 + $0xb8] sm:$0xff]  }
 0x1cd   :  { %v1453_v40 = vmax.f32 %v1452_v47, 0.0  ;;  %v3732_v47 = vld [vmem:[%s4776_s5 + $0xc8] sm:$0xff]  }
 0x1cf   :  { %v1455_v4 = vadd.f32 1e-05, %v1453_v40  ;;  %v4777_v40 = vsub.s32 0, %v3687_v18 }
 0x1d1   :  { %2688 = vrsqrt.f32 %v1455_v4  ;;  %v3737_v4 = vld [vmem:[%s4776_s5 + $0xc0] sm:$0xff]  }
 0x1db   :  { %v2689_v45 = vpop.eup %2688 }
 0x1dc   :  { %v1457_v35 = vmul.f32 %v2689_v45, %v1454_v21  ;;  %v4804_v21 = vunpack.c.l.bf16 %v3701_v3 }
 0x1de   :  { %v3781_v30 = vmul.f32 %v1457_v35, %v3562_v26  ;;  %v3790_v38 = vrot.slane %v1457_v35, %v4777_v40  ;;  %v4794_v40 = vunpack.c.l.bf16 %v3672_v13  ;;  %v4796_v35 = vunpack.c.l.bf16 %v3696_v20 }
 0x1df   :  { %v4801_v26 = vunpack.c.l.bf16 %v3710_v41 }
 0x1e0   :  { %v3807_v45 = vmul.f32 %v2383_v32, %v3790_v38  ;;  %v3812_v14 = vmul.f32 %v2384_v56, %v3790_v38  ;;  %v3817_v7 = vmul.f32 %v2387_v51, %v3790_v38  ;;  %v3822_v11 = vmul.f32 %v2388_v22, %v3790_v38 }
 0x1e1   :  { %v3827_v32 = vmul.f32 %v2391_v60, %v3790_v38  ;;  %v3832_v34 = vmul.f32 %v2392_v59, %v3790_v38  ;;  %v3837_v51 = vmul.f32 %v2395_v58, %v3790_v38  ;;  %v3842_v44 = vmul.f32 %v2396_v54, %v3790_v38 }
 0x1e2   :  { %v3847_v22 = vmul.f32 %v2399_v48, %v3790_v38  ;;  %v3852_v50 = vmul.f32 %v2400_v46, %v3790_v38  ;;  %v3857_v56 = vmul.f32 %v2403_v31, %v3790_v38  ;;  %v3862_v16 = vmul.f32 %v2404_v0, %v3790_v38 }
 0x1e3   :  { %v3867_v58 = vmul.f32 %v2407_v62, %v3790_v38  ;;  %v3872_v25 = vmul.f32 %v2408_v5, %v3790_v38  ;;  %v3877_v54 = vmul.f32 %v2411_v53, %v3790_v38  ;;  %v3882_v52 = vmul.f32 %v2412_v36, %v3790_v38 }
 0x1e4   :  { %v3887_v60 = vmul.f32 %v2415_v19, %v3790_v38  ;;  %v3892_v49 = vmul.f32 %v2416_v8, %v3790_v38  ;;  %v4778_v59 = vunpack.c.l.bf16 %v3617_v61  ;;  %v3902_v0 = vmul.f32 %v4779_v9, %v3790_v38 }
 0x1e5   :  { %v4780_v48 = vunpack.c.l.bf16 %v3635_v27  ;;  %v3912_v53 = vmul.f32 %v4781_v63, %v3790_v38  ;;  %v4782_v36 = vunpack.c.l.bf16 %v3630_v43  ;;  %v4783_v61 = vunpack.c.h.bf16 %v3630_v43 }
 0x1e6   :  { %v3897_v31 = vmul.f32 %v4778_v59, %v3790_v38  ;;  %v4784_v19 = vunpack.c.l.bf16 %v3653_v12  ;;  %v4785_v27 = vunpack.c.h.bf16 %v3653_v12  ;;  %v4786_v9 = vunpack.c.l.bf16 %v3644_v2 }
 0x1e7   :  { %v3907_v46 = vmul.f32 %v4780_v48, %v3790_v38  ;;  %v3917_v62 = vmul.f32 %v4782_v36, %v3790_v38  ;;  %v3922_v5 = vmul.f32 %v4783_v61, %v3790_v38  ;;  %v4787_v43 = vunpack.c.h.bf16 %v3644_v2 }
 0x1e8   :  { %v3927_v8 = vmul.f32 %v4784_v19, %v3790_v38  ;;  %v3932_v59 = vmul.f32 %v4785_v27, %v3790_v38  ;;  %v3937_v48 = vmul.f32 %v4786_v9, %v3790_v38  ;;  %v4788_v36 = vunpack.c.l.bf16 %v3667_v37 }
 0x1e9   :  { %v3942_v63 = vmul.f32 %v4787_v43, %v3790_v38  ;;  %v4789_v12 = vunpack.c.h.bf16 %v3667_v37  ;;  %v4790_v27 = vunpack.c.l.bf16 %v3658_v17  ;;  %v4791_v2 = vunpack.c.h.bf16 %v3658_v17 }
 0x1ea   :  { %v3947_v61 = vmul.f32 %v4788_v36, %v3790_v38  ;;  %v3967_v36 = vmul.f32 %v4792_v55, %v3790_v38  ;;  %v4793_v37 = vunpack.c.h.bf16 %v3680_v57  ;;  %v4795_v17 = vunpack.c.h.bf16 %v3672_v13 }
 0x1eb   :  { %v3952_v19 = vmul.f32 %v4789_v12, %v3790_v38  ;;  %v3957_v9 = vmul.f32 %v4790_v27, %v3790_v38  ;;  %v3962_v43 = vmul.f32 %v4791_v2, %v3790_v38  ;;  %v3977_v27 = vmul.f32 %v4794_v40, %v3790_v38 }
 0x1ec   :  { %v3972_v12 = vmul.f32 %v4793_v37, %v3790_v38  ;;  %v3982_v2 = vmul.f32 %v4795_v17, %v3790_v38  ;;  %v3987_v55 = vmul.f32 %v4796_v35, %v3790_v38  ;;  %v4797_v57 = vunpack.c.h.bf16 %v3696_v20 }
 0x1ed   :  { %v3997_v40 = vmul.f32 %v4798_v6, %v3790_v38  ;;  %v4799_v13 = vunpack.c.h.bf16 %v3685_v23  ;;  %v4007_v35 = vmul.f32 %v4801_v26, %v3790_v38  ;;  %v4802_v20 = vunpack.c.h.bf16 %v3710_v41 }
 0x1ee   :  { %v3992_v37 = vmul.f32 %v4797_v57, %v3790_v38  ;;  %v4017_v6 = vmul.f32 %v4804_v21, %v3790_v38  ;;  %v4805_v23 = vunpack.c.h.bf16 %v3701_v3  ;;  %v4808_v41 = vunpack.c.h.bf16 %v3724_v15 }
 0x1ef   :  { %v4002_v17 = vmul.f32 %v4799_v13, %v3790_v38  ;;  %v4012_v57 = vmul.f32 %v4802_v20, %v3790_v38  ;;  %v4811_v3 = vunpack.c.h.bf16 %v3715_v29 }
 0x1f0   :  { %v4022_v13 = vmul.f32 %v4805_v23, %v3790_v38  ;;  %v4032_v20 = vmul.f32 %v4808_v41, %v3790_v38 }
 0x1f1   :  { %4800 = vst [vmem:[#allocation14_spill] sm:$0xff] %v4002_v17  ;;  %4803 = vst [vmem:[#allocation15_spill] sm:$0xff] %v4012_v57  ;;  %v4807_v17 = vunpack.c.l.bf16 %v3724_v15  ;;  %v4810_v57 = vunpack.c.l.bf16 %v3715_v29  ;;  %v4042_v23 = vmul.f32 %v4811_v3, %v3790_v38  ;;  %v4814_v15 = vunpack.c.h.bf16 %v3737_v4 }
 0x1f2   :  { %4806 = vst [vmem:[#allocation16_spill] sm:$0xff] %v4022_v13  ;;  %4809 = vst [vmem:[#allocation17_spill] sm:$0xff] %v4032_v20  ;;  %v4813_v13 = vunpack.c.l.bf16 %v3737_v4  ;;  %v4816_v20 = vunpack.c.l.bf16 %v3732_v47  ;;  %v4817_v29 = vunpack.c.h.bf16 %v3732_v47  ;;  %v4820_v4 = vunpack.c.h.bf16 %v3755_v10 }
 0x1f3   :  { %v4027_v26 = vmul.f32 %v4807_v17, %v3790_v38  ;;  %v4037_v21 = vmul.f32 %v4810_v57, %v3790_v38  ;;  %4812 = vst [vmem:[#allocation18_spill] sm:$0xff] %v4042_v23  ;;  %v4052_v41 = vmul.f32 %v4814_v15, %v3790_v38  ;;  %v4819_v23 = vunpack.c.l.bf16 %v3755_v10 }
 0x1f4   :  { %v4047_v17 = vmul.f32 %v4813_v13, %v3790_v38  ;;  %v4057_v57 = vmul.f32 %v4816_v20, %v3790_v38  ;;  %v4062_v3 = vmul.f32 %v4817_v29, %v3790_v38  ;;  %v4072_v15 = vmul.f32 %v4820_v4, %v3790_v38 }
 0x1f5   :  { %4815 = vst [vmem:[#allocation19_spill] sm:$0xff] %v4052_v41  ;;  %v4067_v13 = vmul.f32 %v4819_v23, %v3790_v38  ;;  %v4822_v41 = vunpack.c.l.bf16 %v3747_v28  ;;  %v4823_v47 = vunpack.c.h.bf16 %v3747_v28  ;;  %v4827_v10 = vunpack.c.h.bf16 %v3769_v33 }
 0x1f6   :  { %4818 = vst [vmem:[#allocation20_spill] sm:$0xff] %v4062_v3  ;;  %4821 = vst [vmem:[#allocation21_spill] sm:$0xff] %v4072_v15  ;;  %v4825_v3 = vunpack.c.l.bf16 %v3769_v33  ;;  %v4828_v15 = vunpack.c.l.bf16 %v3760_v1  ;;  %v4830_v28 = vunpack.c.h.bf16 %v3760_v1  ;;  %v4833_v33 = vunpack.c.l.bf16 %v3786_v42 }
 0x1f7   :  { %v4077_v20 = vmul.f32 %v4822_v41, %v3790_v38  ;;  %v4082_v29 = vmul.f32 %v4823_v47, %v3790_v38  ;;  %v4092_v4 = vmul.f32 %v4827_v10, %v3790_v38  ;;  %v4835_v1 = vunpack.c.l.bf16 %v3774_v24 }
 0x1f8   :  { %v4087_v23 = vmul.f32 %v4825_v3, %v3790_v38  ;;  %v4097_v41 = vmul.f32 %v4828_v15, %v3790_v38  ;;  %v4102_v47 = vmul.f32 %v4830_v28, %v3790_v38  ;;  %v4832_v3 = vsub.f32 %v3778_v39, %v3781_v30 }
 0x1f9   :  { %4824 = vst [vmem:[#allocation22_spill] sm:$0xff] %v4082_v29  ;;  %v4831_v29 = vsub.s32 0, %v3687_v18  ;;  %v4114_v10 = vmul.f32 %v4833_v33, %v3790_v38  ;;  %v4834_v15 = vunpack.c.h.bf16 %v3786_v42  ;;  %v4124_v28 = vmul.f32 %v4835_v1, %v3790_v38  ;;  %v4838_v33 = vld [vmem:[#allocation15_spill] sm:$0xff] }
 0x1fa   :  { %4826 = vst [vmem:[#allocation23_spill] sm:$0xff] %v4087_v23  ;;  %4829 = vst [vmem:[#allocation24_spill] sm:$0xff] %v4097_v41  ;;  %v4836_v18 = vunpack.c.h.bf16 %v3774_v24 }
 0x1fb   :  { %v4109_v23 = vrot.slane %v4832_v3, %v4831_v29  ;;  %v4119_v41 = vmul.f32 %v4834_v15, %v3790_v38  ;;  %v4839_v15 = vld [vmem:[#allocation16_spill] sm:$0xff] }
 0x1fc   :  { %v4129_v30 = vmul.f32 %v4836_v18, %v3790_v38  ;;  %v4841_v18 = vld [vmem:[#allocation17_spill] sm:$0xff] }
 0x1fd   :  { %v4133_v39 = vadd.f32 %v4109_v23, %v3807_v45  ;;  %v4137_v29 = vadd.f32 %v4109_v23, %v3812_v14  ;;  %v4141_v42 = vadd.f32 %v4109_v23, %v3817_v7  ;;  %v4145_v3 = vadd.f32 %v4109_v23, %v3822_v11 }
 0x1fe   :  { %v4149_v24 = vadd.f32 %v4109_v23, %v3827_v32  ;;  %v4153_v38 = vadd.f32 %v4109_v23, %v3832_v34  ;;  %v4157_v14 = vadd.f32 %v4109_v23, %v3837_v51  ;;  %v4161_v7 = vadd.f32 %v4109_v23, %v3842_v44 }
 0x1ff   :  { %v4165_v11 = vadd.f32 %v4109_v23, %v3847_v22  ;;  %v4169_v45 = vadd.f32 %v4109_v23, %v3852_v50  ;;  %v4173_v32 = vadd.f32 %v4109_v23, %v3857_v56  ;;  %v4177_v34 = vadd.f32 %v4109_v23, %v3862_v16 }
 0x200   :  { %v4181_v51 = vadd.f32 %v4109_v23, %v3867_v58  ;;  %v4185_v44 = vadd.f32 %v4109_v23, %v3872_v25  ;;  %v4189_v22 = vadd.f32 %v4109_v23, %v3877_v54  ;;  %v4193_v50 = vadd.f32 %v4109_v23, %v3882_v52 }
 0x201   :  { %v4197_v56 = vadd.f32 %v4109_v23, %v3887_v60  ;;  %v4201_v16 = vadd.f32 %v4109_v23, %v3892_v49  ;;  %v4205_v58 = vadd.f32 %v4109_v23, %v3897_v31  ;;  %v4209_v25 = vadd.f32 %v4109_v23, %v3902_v0 }
 0x202   :  { %v4213_v54 = vadd.f32 %v4109_v23, %v3907_v46  ;;  %v4217_v52 = vadd.f32 %v4109_v23, %v3912_v53  ;;  %v4221_v60 = vadd.f32 %v4109_v23, %v3917_v62  ;;  %v4225_v49 = vadd.f32 %v4109_v23, %v3922_v5 }
 0x203   :  { %v4229_v31 = vadd.f32 %v4109_v23, %v3927_v8  ;;  %v4233_v0 = vadd.f32 %v4109_v23, %v3932_v59  ;;  %v4237_v46 = vadd.f32 %v4109_v23, %v3937_v48  ;;  %v4241_v53 = vadd.f32 %v4109_v23, %v3942_v63 }
 0x204   :  { %v4245_v62 = vadd.f32 %v4109_v23, %v3947_v61  ;;  %v4249_v5 = vadd.f32 %v4109_v23, %v3952_v19  ;;  %v4253_v8 = vadd.f32 %v4109_v23, %v3957_v9  ;;  %v4257_v59 = vadd.f32 %v4109_v23, %v3962_v43 }
 0x205   :  { %v4261_v48 = vadd.f32 %v4109_v23, %v3967_v36  ;;  %v4265_v63 = vadd.f32 %v4109_v23, %v3972_v12  ;;  %v4269_v61 = vadd.f32 %v4109_v23, %v3977_v27  ;;  %v4273_v19 = vadd.f32 %v4109_v23, %v3982_v2  ;;  %v4837_v12 = vld [vmem:[#allocation14_spill] sm:$0xff] }
 0x206   :  { %v4277_v9 = vadd.f32 %v4109_v23, %v3987_v55  ;;  %v4281_v43 = vadd.f32 %v4109_v23, %v3992_v37  ;;  %v4285_v36 = vadd.f32 %v4109_v23, %v3997_v40  ;;  %v4289_v27 = vadd.f32 %v4109_v23, %v4837_v12 }
 0x207   :  { %v4293_v2 = vadd.f32 %v4109_v23, %v4007_v35  ;;  %v4297_v55 = vadd.f32 %v4109_v23, %v4838_v33  ;;  %v4301_v37 = vadd.f32 %v4109_v23, %v4017_v6  ;;  %v4305_v40 = vadd.f32 %v4109_v23, %v4839_v15  ;;  %v4843_v33 = vld [vmem:[#allocation18_spill] sm:$0xff] }
 0x208   :  { %v4309_v1 = vadd.f32 %v4109_v23, %v4027_v26  ;;  %v4313_v35 = vadd.f32 %v4109_v23, %v4841_v18  ;;  %v4317_v12 = vadd.f32 %v4109_v23, %v4037_v21  ;;  %v4321_v6 = vadd.f32 %v4109_v23, %v4843_v33 }
 0x209   :  { %4840 = vst [vmem:[#allocation14_spill] sm:$0xff] %v4305_v40  ;;  %v4325_v15 = vadd.f32 %v4109_v23, %v4047_v17  ;;  %v4845_v40 = vld [vmem:[#allocation19_spill] sm:$0xff]  ;;  %v4333_v18 = vadd.f32 %v4109_v23, %v4057_v57  ;;  %v4341_v33 = vadd.f32 %v4109_v23, %v4067_v13  ;;  %v4361_v13 = vadd.f32 %v4109_v23, %v4092_v4 }
 0x20a   :  { %4842 = vst [vmem:[#allocation15_spill] sm:$0xff] %v4313_v35  ;;  %4844 = vst [vmem:[#allocation16_spill] sm:$0xff] %v4321_v6  ;;  %v4329_v26 = vadd.f32 %v4109_v23, %v4845_v40  ;;  %v4848_v35 = vld [vmem:[#allocation20_spill] sm:$0xff]  ;;  %v4850_v6 = vld [vmem:[#allocation21_spill] sm:$0xff]  ;;  %v4349_v40 = vadd.f32 %v4109_v23, %v4077_v20  ;;  %v4369_v20 = vadd.f32 %v4109_v23, %v4102_v47 }
 0x20b   :  { %4847 = vst [vmem:[#allocation18_spill] sm:$0xff] %v4333_v18  ;;  %v4337_v21 = vadd.f32 %v4109_v23, %v4848_v35  ;;  %4849 = vst [vmem:[#allocation19_spill] sm:$0xff] %v4341_v33  ;;  %v4345_v17 = vadd.f32 %v4109_v23, %v4850_v6  ;;  %v4852_v18 = vld [vmem:[#allocation23_spill] sm:$0xff]  ;;  %v4853_v33 = vld [vmem:[#allocation24_spill] sm:$0xff]  ;;  %v4381_v4 = vadd.f32 %v4109_v23, %v4124_v28 }
 0x20c   :  { %4846 = vst [vmem:[#allocation17_spill] sm:$0xff] %v4329_v26  ;;  %v4851_v26 = vld [vmem:[#allocation22_spill] sm:$0xff]  ;;  %v4357_v35 = vadd.f32 %v4109_v23, %v4852_v18  ;;  %v4365_v6 = vadd.f32 %v4109_v23, %v4853_v33  ;;  %4854 = vst [vmem:[#allocation20_spill] sm:$0xff] %v4369_v20  ;;  %v4377_v18 = vadd.f32 %v4109_v23, %v4119_v41 }
 0x20d   :  { %v4353_v57 = vadd.f32 %v4109_v23, %v4851_v26  ;;  %v4373_v26 = vadd.f32 %v4109_v23, %v4114_v10  ;;  %4855 = vst [vmem:[#allocation21_spill] sm:$0xff] %v4381_v4  ;;  %v4385_v33 = vadd.f32 %v4109_v23, %v4129_v30  ;;  %v2317_v47 = vpack.c.bf16 %v4133_v39, %v4133_v39 }
 0x20e   :  { %v2318_v20 = vpack.c.bf16 %v4137_v29, %v4137_v29  ;;  %v2319_v10 = vpack.c.bf16 %v4141_v42, %v4141_v42  ;;  %v2320_v41 = vpack.c.bf16 %v4145_v3, %v4145_v3  ;;  %v2321_v28 = vpack.c.bf16 %v4149_v24, %v4149_v24 }
 0x20f   :  { %v2322_v4 = vpack.c.bf16 %v4153_v38, %v4153_v38  ;;  %v2323_v23 = vpack.c.bf16 %v4157_v14, %v4157_v14  ;;  %v2324_v30 = vpack.c.bf16 %v4161_v7, %v4161_v7  ;;  %v2325_v39 = vpack.c.bf16 %v4165_v11, %v4165_v11  ;;  %1985 = vst.msk [vmem:[%s4776_s5] sm:$0xf] %vm1379_vm3, %v2317_v47 }
 0x210   :  { %v2326_v29 = vpack.c.bf16 %v4169_v45, %v4169_v45  ;;  %v2327_v42 = vpack.c.bf16 %v4173_v32, %v4173_v32  ;;  %v2328_v3 = vpack.c.bf16 %v4177_v34, %v4177_v34  ;;  %1986 = vst.msk [vmem:[%s4776_s5 + $0x4] sm:$0xf] %vm1379_vm3, %v2318_v20  ;;  %1987 = vst.msk [vmem:[%s4776_s5 + $0x8] sm:$0xf] %vm1379_vm3, %v2319_v10 }
 0x211   :  { %1988 = vst.msk [vmem:[%s4776_s5 + $0xc] sm:$0xf] %vm1379_vm3, %v2320_v41  ;;  %v2329_v24 = vpack.c.bf16 %v4181_v51, %v4181_v51  ;;  %v2330_v38 = vpack.c.bf16 %v4185_v44, %v4185_v44  ;;  %v2331_v14 = vpack.c.bf16 %v4189_v22, %v4189_v22  ;;  %v2332_v7 = vpack.c.bf16 %v4193_v50, %v4193_v50 }
 0x212   :  { %1989 = vst.msk [vmem:[%s4776_s5 + $0x10] sm:$0xf] %vm1379_vm3, %v2321_v28  ;;  %1990 = vst.msk [vmem:[%s4776_s5 + $0x14] sm:$0xf] %vm1379_vm3, %v2322_v4  ;;  %v2333_v11 = vpack.c.bf16 %v4197_v56, %v4197_v56  ;;  %v2334_v45 = vpack.c.bf16 %v4201_v16, %v4201_v16  ;;  %v2335_v32 = vpack.c.bf16 %v4205_v58, %v4205_v58  ;;  %v4860_v4 = vld [vmem:[#allocation18_spill] sm:$0xff] }
 0x213   :  { %1991 = vst.msk [vmem:[%s4776_s5 + $0x18] sm:$0xf] %vm1379_vm3, %v2323_v23  ;;  %1992 = vst.msk [vmem:[%s4776_s5 + $0x1c] sm:$0xf] %vm1379_vm3, %v2324_v30  ;;  %v2336_v34 = vpack.c.bf16 %v4209_v25, %v4209_v25  ;;  %v2337_v51 = vpack.c.bf16 %v4213_v54, %v4213_v54  ;;  %v2338_v44 = vpack.c.bf16 %v4217_v52, %v4217_v52  ;;  %v4862_v30 = vld [vmem:[#allocation20_spill] sm:$0xff] }
 0x214   :  { %1993 = vst.msk [vmem:[%s4776_s5 + $0x20] sm:$0xf] %vm1379_vm3, %v2325_v39  ;;  %1994 = vst.msk [vmem:[%s4776_s5 + $0x24] sm:$0xf] %vm1379_vm3, %v2326_v29  ;;  %v2339_v22 = vpack.c.bf16 %v4221_v60, %v4221_v60  ;;  %v2340_v50 = vpack.c.bf16 %v4225_v49, %v4225_v49  ;;  %v2341_v56 = vpack.c.bf16 %v4229_v31, %v4229_v31 }
 0x215   :  { %1995 = vst.msk [vmem:[%s4776_s5 + $0x28] sm:$0xf] %vm1379_vm3, %v2327_v42  ;;  %1996 = vst.msk [vmem:[%s4776_s5 + $0x2c] sm:$0xf] %vm1379_vm3, %v2328_v3  ;;  %v2342_v16 = vpack.c.bf16 %v4233_v0, %v4233_v0  ;;  %v2343_v58 = vpack.c.bf16 %v4237_v46, %v4237_v46  ;;  %v2344_v25 = vpack.c.bf16 %v4241_v53, %v4241_v53 }
 0x216   :  { %1997 = vst.msk [vmem:[%s4776_s5 + $0x30] sm:$0xf] %vm1379_vm3, %v2329_v24  ;;  %1998 = vst.msk [vmem:[%s4776_s5 + $0x34] sm:$0xf] %vm1379_vm3, %v2330_v38  ;;  %v2345_v54 = vpack.c.bf16 %v4245_v62, %v4245_v62  ;;  %v2346_v52 = vpack.c.bf16 %v4249_v5, %v4249_v5  ;;  %v2347_v60 = vpack.c.bf16 %v4253_v8, %v4253_v8 }
 0x217   :  { %1999 = vst.msk [vmem:[%s4776_s5 + $0x38] sm:$0xf] %vm1379_vm3, %v2331_v14  ;;  %2000 = vst.msk [vmem:[%s4776_s5 + $0x3c] sm:$0xf] %vm1379_vm3, %v2332_v7  ;;  %v2348_v49 = vpack.c.bf16 %v4257_v59, %v4257_v59  ;;  %v2349_v31 = vpack.c.bf16 %v4261_v48, %v4261_v48  ;;  %v2350_v0 = vpack.c.bf16 %v4265_v63, %v4265_v63 }
 0x218   :  { %2001 = vst.msk [vmem:[%s4776_s5 + $0x40] sm:$0xf] %vm1379_vm3, %v2333_v11  ;;  %2002 = vst.msk [vmem:[%s4776_s5 + $0x44] sm:$0xf] %vm1379_vm3, %v2334_v45  ;;  %v2351_v46 = vpack.c.bf16 %v4269_v61, %v4269_v61  ;;  %v2352_v53 = vpack.c.bf16 %v4273_v19, %v4273_v19  ;;  %v2353_v62 = vpack.c.bf16 %v4277_v9, %v4277_v9  ;;  %v4856_v19 = vld [vmem:[#allocation14_spill] sm:$0xff] }
 0x219   :  { %2003 = vst.msk [vmem:[%s4776_s5 + $0x48] sm:$0xf] %vm1379_vm3, %v2335_v32  ;;  %2004 = vst.msk [vmem:[%s4776_s5 + $0x4c] sm:$0xf] %vm1379_vm3, %v2336_v34  ;;  %v2354_v5 = vpack.c.bf16 %v4281_v43, %v4281_v43  ;;  %v2355_v8 = vpack.c.bf16 %v4285_v36, %v4285_v36  ;;  %v2356_v59 = vpack.c.bf16 %v4289_v27, %v4289_v27  ;;  %v4857_v36 = vld [vmem:[#allocation15_spill] sm:$0xff] }
 0x21a   :  { %2005 = vst.msk [vmem:[%s4776_s5 + $0x50] sm:$0xf] %vm1379_vm3, %v2337_v51  ;;  %2006 = vst.msk [vmem:[%s4776_s5 + $0x54] sm:$0xf] %vm1379_vm3, %v2338_v44  ;;  %v2357_v48 = vpack.c.bf16 %v4293_v2, %v4293_v2  ;;  %v2358_v63 = vpack.c.bf16 %v4297_v55, %v4297_v55  ;;  %v2359_v61 = vpack.c.bf16 %v4301_v37, %v4301_v37  ;;  %v4858_v55 = vld [vmem:[#allocation16_spill] sm:$0xff] }
 0x21b   :  { %2007 = vst.msk [vmem:[%s4776_s5 + $0x58] sm:$0xf] %vm1379_vm3, %v2339_v22  ;;  %2008 = vst.msk [vmem:[%s4776_s5 + $0x5c] sm:$0xf] %vm1379_vm3, %v2340_v50  ;;  %v2360_v9 = vpack.c.bf16 %v4856_v19, %v4856_v19  ;;  %v2361_v43 = vpack.c.bf16 %v4309_v1, %v4309_v1  ;;  %v2362_v27 = vpack.c.bf16 %v4857_v36, %v4857_v36 }
 0x21c   :  { %2009 = vst.msk [vmem:[%s4776_s5 + $0x60] sm:$0xf] %vm1379_vm3, %v2341_v56  ;;  %2010 = vst.msk [vmem:[%s4776_s5 + $0x64] sm:$0xf] %vm1379_vm3, %v2342_v16  ;;  %v2363_v2 = vpack.c.bf16 %v4317_v12, %v4317_v12  ;;  %v2364_v37 = vpack.c.bf16 %v4858_v55, %v4858_v55  ;;  %v2365_v1 = vpack.c.bf16 %v4325_v15, %v4325_v15  ;;  %v4859_v12 = vld [vmem:[#allocation17_spill] sm:$0xff]  ;;  %v4861_v15 = vld [vmem:[#allocation19_spill] sm:$0xff] }
 0x21d   :  { %2011 = vst.msk [vmem:[%s4776_s5 + $0x68] sm:$0xf] %vm1379_vm3, %v2343_v58  ;;  %2012 = vst.msk [vmem:[%s4776_s5 + $0x6c] sm:$0xf] %vm1379_vm3, %v2344_v25  ;;  %v2366_v20 = vpack.c.bf16 %v4859_v12, %v4859_v12  ;;  %v2367_v47 = vpack.c.bf16 %v4860_v4, %v4860_v4  ;;  %v2368_v10 = vpack.c.bf16 %v4337_v21, %v4337_v21 }
 0x21e   :  { %2013 = vst.msk [vmem:[%s4776_s5 + $0x70] sm:$0xf] %vm1379_vm3, %v2345_v54  ;;  %2014 = vst.msk [vmem:[%s4776_s5 + $0x74] sm:$0xf] %vm1379_vm3, %v2346_v52  ;;  %v2369_v21 = vpack.c.bf16 %v4861_v15, %v4861_v15  ;;  %v2370_v41 = vpack.c.bf16 %v4345_v17, %v4345_v17  ;;  %v2371_v28 = vpack.c.bf16 %v4349_v40, %v4349_v40 }
 0x21f   :  { %2015 = vst.msk [vmem:[%s4776_s5 + $0x78] sm:$0xf] %vm1379_vm3, %v2347_v60  ;;  %2016 = vst.msk [vmem:[%s4776_s5 + $0x7c] sm:$0xf] %vm1379_vm3, %v2348_v49  ;;  %v2372_v23 = vpack.c.bf16 %v4353_v57, %v4353_v57  ;;  %v2373_v17 = vpack.c.bf16 %v4357_v35, %v4357_v35  ;;  %v2374_v40 = vpack.c.bf16 %v4361_v13, %v4361_v13 }
 0x220   :  { %2017 = vst.msk [vmem:[%s4776_s5 + $0x80] sm:$0xf] %vm1379_vm3, %v2349_v31  ;;  %2018 = vst.msk [vmem:[%s4776_s5 + $0x84] sm:$0xf] %vm1379_vm3, %v2350_v0  ;;  %v2375_v57 = vpack.c.bf16 %v4365_v6, %v4365_v6  ;;  %v2376_v39 = vpack.c.bf16 %v4862_v30, %v4862_v30  ;;  %v2377_v35 = vpack.c.bf16 %v4373_v26, %v4373_v26  ;;  %v4863_v6 = vld [vmem:[#allocation21_spill] sm:$0xff] }
 0x221   :  { %2019 = vst.msk [vmem:[%s4776_s5 + $0x88] sm:$0xf] %vm1379_vm3, %v2351_v46  ;;  %2020 = vst.msk [vmem:[%s4776_s5 + $0x8c] sm:$0xf] %vm1379_vm3, %v2352_v53  ;;  %v2378_v13 = vpack.c.bf16 %v4377_v18, %v4377_v18  ;;  %v2379_v29 = vpack.c.bf16 %v4863_v6, %v4863_v6  ;;  %v2380_v42 = vpack.c.bf16 %v4385_v33, %v4385_v33 }
 0x222   :  { %2021 = vst.msk [vmem:[%s4776_s5 + $0x90] sm:$0xf] %vm1379_vm3, %v2353_v62  ;;  %2022 = vst.msk [vmem:[%s4776_s5 + $0x94] sm:$0xf] %vm1379_vm3, %v2354_v5 }
 0x223   :  { %2023 = vst.msk [vmem:[%s4776_s5 + $0x98] sm:$0xf] %vm1379_vm3, %v2355_v8  ;;  %2024 = vst.msk [vmem:[%s4776_s5 + $0x9c] sm:$0xf] %vm1379_vm3, %v2356_v59 }
 0x224   :  { %2025 = vst.msk [vmem:[%s4776_s5 + $0xa0] sm:$0xf] %vm1379_vm3, %v2357_v48  ;;  %2026 = vst.msk [vmem:[%s4776_s5 + $0xa4] sm:$0xf] %vm1379_vm3, %v2358_v63 }
 0x225   :  { %2027 = vst.msk [vmem:[%s4776_s5 + $0xa8] sm:$0xf] %vm1379_vm3, %v2359_v61  ;;  %2028 = vst.msk [vmem:[%s4776_s5 + $0xac] sm:$0xf] %vm1379_vm3, %v2360_v9 }
 0x226   :  { %2029 = vst.msk [vmem:[%s4776_s5 + $0xb0] sm:$0xf] %vm1379_vm3, %v2361_v43  ;;  %2030 = vst.msk [vmem:[%s4776_s5 + $0xb4] sm:$0xf] %vm1379_vm3, %v2362_v27 }
 0x227   :  { %2031 = vst.msk [vmem:[%s4776_s5 + $0xb8] sm:$0xf] %vm1379_vm3, %v2363_v2  ;;  %2032 = vst.msk [vmem:[%s4776_s5 + $0xbc] sm:$0xf] %vm1379_vm3, %v2364_v37 }
 0x228   :  { %2033 = vst.msk [vmem:[%s4776_s5 + $0xc0] sm:$0xf] %vm1379_vm3, %v2365_v1  ;;  %2034 = vst.msk [vmem:[%s4776_s5 + $0xc4] sm:$0xf] %vm1379_vm3, %v2366_v20 }
 0x229   :  { %2035 = vst.msk [vmem:[%s4776_s5 + $0xc8] sm:$0xf] %vm1379_vm3, %v2367_v47  ;;  %2036 = vst.msk [vmem:[%s4776_s5 + $0xcc] sm:$0xf] %vm1379_vm3, %v2368_v10 }
 0x22a   :  { %2037 = vst.msk [vmem:[%s4776_s5 + $0xd0] sm:$0xf] %vm1379_vm3, %v2369_v21  ;;  %2038 = vst.msk [vmem:[%s4776_s5 + $0xd4] sm:$0xf] %vm1379_vm3, %v2370_v41 }
 0x22b   :  { %2039 = vst.msk [vmem:[%s4776_s5 + $0xd8] sm:$0xf] %vm1379_vm3, %v2371_v28  ;;  %2040 = vst.msk [vmem:[%s4776_s5 + $0xdc] sm:$0xf] %vm1379_vm3, %v2372_v23 }
 0x22c   :  { %2041 = vst.msk [vmem:[%s4776_s5 + $0xe0] sm:$0xf] %vm1379_vm3, %v2373_v17  ;;  %2042 = vst.msk [vmem:[%s4776_s5 + $0xe4] sm:$0xf] %vm1379_vm3, %v2374_v40 }
 0x22d   :  { %2043 = vst.msk [vmem:[%s4776_s5 + $0xe8] sm:$0xf] %vm1379_vm3, %v2375_v57  ;;  %2044 = vst.msk [vmem:[%s4776_s5 + $0xec] sm:$0xf] %vm1379_vm3, %v2376_v39 }
 0x22e   :  { %2045 = vst.msk [vmem:[%s4776_s5 + $0xf0] sm:$0xf] %vm1379_vm3, %v2377_v35  ;;  %2046 = vst.msk [vmem:[%s4776_s5 + $0xf4] sm:$0xf] %vm1379_vm3, %v2378_v13 }
 0x22f   :  { %2047 = vst.msk [vmem:[%s4776_s5 + $0xf8] sm:$0xf] %vm1379_vm3, %v2379_v29  ;;  %2048 = vst.msk [vmem:[%s4776_s5 + $0xfc] sm:$0xf] %vm1379_vm3, %v2380_v42 }
 0x230   :  { %2053 = vsyncpa [#allocation5], 1 }
 0x231   :  { %2054 = vsyncpa [#allocation7], 1 }
 0x232   :  { %2055 = vsyncpa [#allocation10], 1 }

// kernel: hebb3ff_forward.4
= control target key start
LH: loop header
LB: loop body
LE: loop exit
PB: predicated region body
PF: predicated region fallthrough
CT: control target
= control target key end

     0   :  { %14 = vsyncpa [#allocation3], 0  ;;  %s5198_s0 = inlined_call_operand.vmem [shape: bf16[2,9,9,64], index: 0, kind: input, shape index: {}]   ;;  %s5199_s1 = inlined_call_operand.vmem [shape: bf16[2,9,9,64], index: 1, kind: input, shape index: {}]   ;;  %s5200_s2 = inlined_call_operand.vmem [shape: bf16[2,9,9,64], index: 2, kind: input, shape index: {}]   ;;  %s5201_s3 = inlined_call_operand.vmem [shape: bf16[2,9,9,64], index: 3, kind: input, shape index: {}]   ;;  %s5202_s4 = inlined_call_operand.hbm [shape: bf16[9,64,256], index: 4, kind: input, shape index: {}]   ;;  %s5203_s5 = inlined_call_operand.hbm [shape: f32[1,256], index: 5, kind: input, shape index: {}]   ;;  %s5204_s6 = inlined_call_operand.vmem [shape: bf16[128,256], index: 6, kind: output, shape index: {0}]   ;;  %s5205_s7 = inlined_call_operand.vmem [shape: f32[1,256], index: 7, kind: output, shape index: {1}]   ;;  %s5206_s8 = inlined_call_operand.vmem [shape: f32[1,256], index: 8, kind: output, shape index: {2}]  }
   0x1   :  { %15 = vsyncpa [#allocation5], 0  ;;  %s4301_s27 = smov [#allocation2]   ;;  %s4253_s9 = scalar_lea.hbm %s5202_s4, 9216 }
   0x2   :  { %s29_s28 = sshll.u32 %s4301_s27, 4  ;;  %p4254_p0 = scmp.ne.s32.totalorder %s5202_s4, %s4253_s9  ;;  %s30_s28 = int_to_ptr.vmem [resolvable:$true] %s29_s28 }
   0x3   :  { %p4257_p1 = scmp.lt.u32.totalorder %s4253_s9, %s5202_s4 }
   0x5   :  { %p4259_p2 = pnand %p4257_p1, %p4254_p0 }
   0x7   :  { %4262 = shalt.err (!%p4259_p2)
}
   0x8   :  { %s4263_s14 = scalar_lea.vmem %s30_s28, 9216  ;;  %p4268_p4 = scmp.lt.s32.totalorder %s30_s28, %s30_s28 }
   0x9   :  { %p4264_p3 = scmp.ne.s32.totalorder %s30_s28, %s4263_s14  ;;  %p4269_p5 = scmp.lt.s32.totalorder %s4263_s14, %s4263_s14 }
   0xb   :  { %p4270_p6 = por %p4269_p5, %p4268_p4 }
   0xd   :  { %p4271_p7 = pnand %p4270_p6, %p4264_p3 }
   0xf   :  { %4274 = shalt.err (!%p4271_p7)
}
  0x10   :  { %s4302_s15 = smov 128   ;;  %s4303_s16 = smov 8  }
  0x11   :  { %35 = dma.hbm_to_vmem [thread:$0]  %s5202_s4, 9216, %s30_s28, [#allocation3], %s4302_s15, %s4302_s15, %s4303_s16  }
  0x12   :  { %s4304_s19 = smov [#allocation4]   ;;  %s4275_s23 = scalar_lea.hbm %s5203_s5, 32 }
  0x13   :  { %s42_s20 = sshll.u32 %s4304_s19, 4  ;;  %p4276_p8 = scmp.ne.s32.totalorder %s5203_s5, %s4275_s23  ;;  %s43_s20 = int_to_ptr.vmem [resolvable:$true] %s42_s20 }
  0x14   :  { %p4279_p9 = scmp.lt.u32.totalorder %s4275_s23, %s5203_s5 }
  0x16   :  { %p4281_p10 = pnand %p4279_p9, %p4276_p8 }
  0x18   :  { %4284 = shalt.err (!%p4281_p10)
}
  0x19   :  { %s4285_s29 = scalar_lea.vmem %s43_s20, 32  ;;  %p4290_p12 = scmp.lt.s32.totalorder %s43_s20, %s43_s20 }
  0x1a   :  { %p4286_p11 = scmp.ne.s32.totalorder %s43_s20, %s4285_s29  ;;  %p4291_p13 = scmp.lt.s32.totalorder %s4285_s29, %s4285_s29 }
  0x1c   :  { %p4292_p0 = por %p4291_p13, %p4290_p12 }
  0x1e   :  { %p4293_p1 = pnand %p4292_p0, %p4286_p11 }
  0x20   :  { %4296 = shalt.err (!%p4293_p1)
}
  0x21   :  { %45 = dma.hbm_to_vmem [thread:$0]  %s5203_s5, 32, %s43_s20, [#allocation5]  }
  0x22   :  { %4297 = dma.done.wait [#allocation3], 9216  }
  0x23   :  { %4298 = vsyncadd [#allocation3], 4294958080 }
  0x24   :  { %4299 = dma.done.wait [#allocation5], 32  }
  0x25   :  { %4300 = vsyncadd [#allocation5], 4294967264  ;;  %v4305_v0 = vmov 0   ;;  %v4089_v1 = vld [vmem:[#allocation2 + $0x44] ss:$8 sps:$4 sm:$0xff]   ;;  %vm192_vm0 = vcmask 523264  }
  0x26   :  { %249 = vmatprep.mubr.bf16.mxu1 %v4305_v0  ;;  %1483 = vmatprep.mubr.bf16.mxu0 %v4305_v0  ;;  %v4091_v2 = vld [vmem:[#allocation2 + $0x104] ss:$8 sps:$4 sm:$0xff]   ;;  %v4093_v3 = vld [vmem:[#allocation2 + $0x40] ss:$8 sps:$4 sm:$0xff]   ;;  %v4095_v5 = vld [vmem:[#allocation2 + $0x54] ss:$8 sps:$4 sm:$0xff]  }
  0x27   :  { %217 = vmatprep.subr.bf16.mxu1 %v4089_v1  ;;  %v4094_v4 = vld [vmem:[#allocation2 + $0x100] ss:$8 sps:$4 sm:$0xff]   ;;  %1451 = vmatprep.subr.bf16.mxu0 %v4091_v2  ;;  %v4097_v6 = vld [vmem:[#allocation2 + $0x114] ss:$8 sps:$4 sm:$0xff]   ;;  %v4099_v7 = vld [vmem:[#allocation2 + $0x50] ss:$8 sps:$4 sm:$0xff]  }
  0x28   :  { %218 = vmatpush1.bf16.msra.mxu1 %v4093_v3  ;;  %1452 = vmatpush1.bf16.msra.mxu0 %v4094_v4  ;;  %v4100_v8 = vld [vmem:[#allocation2 + $0x110] ss:$8 sps:$4 sm:$0xff]   ;;  %v4101_v9 = vld [vmem:[#allocation2 + $0x64] ss:$8 sps:$4 sm:$0xff]   ;;  %v4105_v11 = vld [vmem:[#allocation2 + $0x60] ss:$8 sps:$4 sm:$0xff]  }
  0x29   :  { %219 = vmatprep.subr.bf16.mxu1 %v4095_v5  ;;  %1453 = vmatprep.subr.bf16.mxu0 %v4097_v6  ;;  %v4103_v10 = vld [vmem:[#allocation2 + $0x124] ss:$8 sps:$4 sm:$0xff]   ;;  %v4106_v12 = vld [vmem:[#allocation2 + $0x120] ss:$8 sps:$4 sm:$0xff]   ;;  %v4107_v13 = vld [vmem:[#allocation2 + $0x74] ss:$8 sps:$4 sm:$0xff]  }
  0x2a   :  { %v4109_v14 = vld [vmem:[#allocation2 + $0x134] ss:$8 sps:$4 sm:$0xff]   ;;  %v4111_v15 = vld [vmem:[#allocation2 + $0x70] ss:$8 sps:$4 sm:$0xff]   ;;  %v4113_v17 = vld [vmem:[%s5199_s1] ss:$8 sps:$4 sm:$0xff]  }
  0x2b   :  { %v4112_v16 = vld [vmem:[#allocation2 + $0x130] ss:$8 sps:$4 sm:$0xff]   ;;  %v4116_v18 = vld [vmem:[#allocation2 + $0x4] ss:$8 sps:$4 sm:$0xff]   ;;  %v4114_v19 = vld [vmem:[#allocation2] ss:$8 sps:$4 sm:$0xff]  }
  0x2c   :  { %220 = vmatpush1.bf16.msra.mxu1 %v4099_v7  ;;  %1454 = vmatpush1.bf16.msra.mxu0 %v4100_v8  ;;  %v4117_v20 = vld [vmem:[%s5201_s3] ss:$8 sps:$4 sm:$0xff]   ;;  %v4120_v21 = vld [vmem:[#allocation2 + $0x144] ss:$8 sps:$4 sm:$0xff]   ;;  %v4125_v23 = vld [vmem:[#allocation2 + $0x154] ss:$8 sps:$4 sm:$0xff]  }
  0x2d   :  { %221 = vmatprep.subr.bf16.mxu1 %v4101_v9  ;;  %1455 = vmatprep.subr.bf16.mxu0 %v4103_v10  ;;  %v4118_v22 = vld [vmem:[#allocation2 + $0x140] ss:$8 sps:$4 sm:$0xff]   ;;  %v4123_v24 = vld [vmem:[#allocation2 + $0x150] ss:$8 sps:$4 sm:$0xff]   ;;  %v4129_v26 = vld [vmem:[#allocation2 + $0x14] ss:$8 sps:$4 sm:$0xff]  }
  0x2e   :  { %v4127_v25 = vld [vmem:[#allocation2 + $0x10] ss:$8 sps:$4 sm:$0xff]   ;;  %v4133_v29 = vld [vmem:[#allocation2 + $0x164] ss:$8 sps:$4 sm:$0xff]   ;;  %v4131_v30 = vld [vmem:[#allocation2 + $0x160] ss:$8 sps:$4 sm:$0xff]  }
  0x2f   :  { %v4121_v27 = vld [vmem:[%s5199_s1 + $0x10] ss:$8 sps:$4 sm:$0xff]   ;;  %v4138_v31 = vld [vmem:[#allocation2 + $0x174] ss:$8 sps:$4 sm:$0xff]   ;;  %v4140_v33 = vld [vmem:[#allocation2 + $0x20] ss:$8 sps:$4 sm:$0xff]  }
  0x30   :  { %222 = vmatpush1.bf16.msra.mxu1 %v4105_v11  ;;  %1456 = vmatpush1.bf16.msra.mxu0 %v4106_v12  ;;  %v4122_v28 = vld [vmem:[%s5201_s3 + $0x10] ss:$8 sps:$4 sm:$0xff]   ;;  %v4142_v34 = vld [vmem:[#allocation2 + $0x24] ss:$8 sps:$4 sm:$0xff]   ;;  %v4126_v35 = vld [vmem:[%s5199_s1 + $0x20] ss:$8 sps:$4 sm:$0xff]  }
  0x31   :  { %223 = vmatprep.subr.bf16.mxu1 %v4107_v13  ;;  %1457 = vmatprep.subr.bf16.mxu0 %v4109_v14  ;;  %v4136_v32 = vld [vmem:[#allocation2 + $0x170] ss:$8 sps:$4 sm:$0xff]   ;;  %v1596_v36 = vld [vmem:[%s5200_s2] sm:$0xf]  ;;  %v1597_v37 = vld [vmem:[%s5200_s2 + $0x4] sm:$0x1] }
  0x32   :  { %v1598_v38 = vld [vmem:[%s5200_s2 + $0x8] sm:$0xf]  ;;  %v1599_v39 = vld [vmem:[%s5200_s2 + $0xc] sm:$0x1]  ;;  %v1629_v40 = vshrl.u32 %v1596_v36, 16  ;;  %v1632_v41 = vshll.u32 %v1596_v36, 16 }
  0x33   :  { %v1643_v42 = vshrl.u32 %v1598_v38, 16  ;;  %v4130_v43 = vld [vmem:[%s5201_s3 + $0x20] ss:$8 sps:$4 sm:$0xff]   ;;  %v1646_v44 = vshll.u32 %v1598_v38, 16  ;;  %v1638_v47 = vshll.u32 %v1597_v37, 16  ;;  %v1652_v51 = vshll.u32 %v1599_v39, 16 }
  0x34   :  { %224 = vmatpush1.bf16.msra.mxu1 %v4111_v15  ;;  %1458 = vmatpush1.bf16.msra.mxu0 %v4112_v16  ;;  %v1631_v45 = vrot.slane %v1629_v40, 4  ;;  %v1634_v46 = vrot.slane %v1632_v41, 5  ;;  %v4145_v49 = vld [vmem:[#allocation2 + $0x184] ss:$8 sps:$4 sm:$0xff]   ;;  %vm579_vm1 = vsmask.f32 3328 }
  0x35   :  { %434 = vmatprep.subr.bf16.mxu1 %v4116_v18  ;;  %1949 = vmatprep.subr.bf16.mxu0 %v4120_v21  ;;  %v1645_v48 = vrot.slane %v1643_v42, 4  ;;  %v1648_v50 = vrot.slane %v1646_v44, 5  ;;  %v1600_v52 = vld [vmem:[%s5200_s2 + $0x10] sm:$0xf]  ;;  %vm580_vm2 = vsmask.f32 7440 }
  0x36   :  { %v1602_v53 = vld [vmem:[%s5200_s2 + $0x18] sm:$0xf]  ;;  %v1657_v54 = vshrl.u32 %v1600_v52, 16  ;;  %v1660_v55 = vshll.u32 %v1600_v52, 16  ;;  %v1635_v56 = vor.u32 %v1634_v46, %v1631_v45  ;;  %v1640_v62 = vrot.slane %v1638_v47, 5  ;;  %vm4447_vm3 = vmor %vm579_vm1, %vm580_vm2 }
  0x37   :  { %3522 = vmatmul.mubr.msk.bf16.vlgmr.msra.gmra.mrb[0].mxu1 %vm192_vm0, %v4113_v17  ;;  %3618 = vmatmul.mubr.msk.bf16.vlgmr.msra.gmra.mrb[0].mxu0 %vm192_vm0, %v4117_v20  ;;  %v1649_v57 = vor.u32 %v1648_v50, %v1645_v48  ;;  %v1671_v58 = vshrl.u32 %v1602_v53, 16  ;;  %v1674_v59 = vshll.u32 %v1602_v53, 16  ;;  %v4134_v60 = vld [vmem:[%s5199_s1 + $0x30] ss:$8 sps:$4 sm:$0xff]   ;;  %v1654_v63 = vrot.slane %v1652_v51, 5 }
  0x38   :  { %435 = vmatpush1.bf16.msra.mxu1 %v4114_v19  ;;  %1950 = vmatpush1.bf16.msra.mxu0 %v4118_v22  ;;  %v4135_v61 = vld [vmem:[%s5201_s3 + $0x30] ss:$8 sps:$4 sm:$0xff]   ;;  %v1601_v1 = vld [vmem:[%s5200_s2 + $0x14] sm:$0x1]  ;;  %v1603_v2 = vld [vmem:[%s5200_s2 + $0x1c] sm:$0x1] }
  0x39   :  { %259 = vmatprep.mubr.bf16.mxu1 %v4305_v0  ;;  %1493 = vmatprep.mubr.bf16.mxu0 %v4305_v0  ;;  %v1659_v3 = vrot.slane %v1657_v54, 4  ;;  %v1662_v4 = vrot.slane %v1660_v55, 5  ;;  %v1673_v5 = vrot.slane %v1671_v58, 4  ;;  %v1676_v6 = vrot.slane %v1674_v59, 5  ;;  %v4148_v7 = vld [vmem:[#allocation2 + $0x30] ss:$8 sps:$4 sm:$0xff]  }
  0x3a   :  { %1951 = vmatprep.subr.bf16.mxu0 %v4125_v23  ;;  %436 = vmatprep.subr.bf16.mxu1 %v4129_v26  ;;  %v4150_v8 = vld [vmem:[#allocation2 + $0x34] ss:$8 sps:$4 sm:$0xff]   ;;  %v1636_v9 = vrot.slane %v1635_v56, 4  ;;  %v1650_v10 = vrot.slane %v1649_v57, 4  ;;  %v1604_v11 = vld [vmem:[%s5200_s2 + $0x20] sm:$0xf] }
  0x3b   :  { %v1606_v12 = vld [vmem:[%s5200_s2 + $0x28] sm:$0xf]  ;;  %v1666_v14 = vshll.u32 %v1601_v1, 16  ;;  %v1680_v15 = vshll.u32 %v1603_v2, 16  ;;  %v1685_v16 = vshrl.u32 %v1604_v11, 16  ;;  %v1688_v17 = vshll.u32 %v1604_v11, 16 }
  0x3c   :  { %1952 = vmatpush1.bf16.msra.mxu0 %v4123_v24  ;;  %437 = vmatpush1.bf16.msra.mxu1 %v4127_v25  ;;  %v1699_v18 = vshrl.u32 %v1606_v12, 16  ;;  %v1702_v19 = vshll.u32 %v1606_v12, 16  ;;  %v1663_v20 = vor.u32 %v1662_v4, %v1659_v3  ;;  %v1677_v21 = vor.u32 %v1676_v6, %v1673_v5  ;;  %v1605_v24 = vld [vmem:[%s5200_s2 + $0x24] sm:$0x1]  ;;  %v4139_v25 = vld [vmem:[%s5199_s1 + $0x48] ss:$8 sps:$4 sm:$0xff]  }
  0x3d   :  { %1953 = vmatprep.subr.bf16.mxu0 %v4133_v29  ;;  %438 = vmatprep.subr.bf16.mxu1 %v4142_v34  ;;  %v1641_v22 = vsel %vm4447_vm3, %v1636_v9, %v1640_v62  ;;  %v1655_v23 = vsel %vm4447_vm3, %v1650_v10, %v1654_v63  ;;  %v1668_v26 = vrot.slane %v1666_v14, 5  ;;  %v1687_v29 = vrot.slane %v1685_v16, 4  ;;  %v4143_v34 = vld [vmem:[#allocation2 + $0x180] ss:$8 sps:$4 sm:$0xff]   ;;  %v1608_v38 = vld [vmem:[%s5200_s2 + $0x30] sm:$0xf] }
  0x3e   :  { %v1678_v36 = vrot.slane %v1677_v21, 4  ;;  %v1694_v37 = vshll.u32 %v1605_v24, 16  ;;  %v1610_v39 = vld [vmem:[%s5200_s2 + $0x38] sm:$0xf]  ;;  %v4153_v41 = vld [vmem:[#allocation2 + $0x194] ss:$8 sps:$4 sm:$0xff]  }
  0x3f   :  { %3523 = vmatmul.mubr.msk.bf16.gmra.mrb[4].mxu1 %vm192_vm0, %v4121_v27  ;;  %3619 = vmatmul.mubr.msk.bf16.gmra.mrb[4].mxu0 %vm192_vm0, %v4122_v28  ;;  %v1682_v27 = vrot.slane %v1680_v15, 5  ;;  %v1607_v28 = vld [vmem:[%s5200_s2 + $0x2c] sm:$0x1]  ;;  %v1713_v44 = vshrl.u32 %v1608_v38, 16  ;;  %v1716_v45 = vshll.u32 %v1608_v38, 16  ;;  %v1727_v46 = vshrl.u32 %v1610_v39, 16 }
  0x40   :  { %269 = vmatprep.mubr.bf16.mxu1 %v4305_v0  ;;  %1503 = vmatprep.mubr.bf16.mxu0 %v4305_v0  ;;  %v1708_v40 = vshll.u32 %v1607_v28, 16  ;;  %v4158_v47 = vld [vmem:[#allocation2 + $0x84] ss:$8 sps:$4 sm:$0xff]   ;;  %v4151_v50 = vld [vmem:[#allocation2 + $0x190] ss:$8 sps:$4 sm:$0xff]   ;;  %v1730_v51 = vshll.u32 %v1610_v39, 16 }
  0x41   :  { %1954 = vmatpush1.bf16.msra.mxu0 %v4131_v30  ;;  %439 = vmatpush1.bf16.msra.mxu1 %v4140_v33  ;;  %v1690_v30 = vrot.slane %v1688_v17, 5  ;;  %v3626_v33 = vcombine.low %v1641_v22, %v1655_v23  ;;  %v4146_v52 = vld [vmem:[%s5199_s1 + $0x58] ss:$8 sps:$4 sm:$0xff]   ;;  %v1696_v53 = vrot.slane %v1694_v37, 5  ;;  %v1612_v55 = vld [vmem:[%s5200_s2 + $0x48] sm:$0xf] }
  0x42   :  { %1955 = vmatprep.subr.bf16.mxu0 %v4138_v31  ;;  %440 = vmatprep.subr.bf16.mxu1 %v4150_v8  ;;  %v1701_v31 = vrot.slane %v1699_v18, 4  ;;  %v1710_v54 = vrot.slane %v1708_v40, 5  ;;  %v1609_v58 = vld [vmem:[%s5200_s2 + $0x34] sm:$0x1]  ;;  %v1611_v59 = vld [vmem:[%s5200_s2 + $0x3c] sm:$0x1] }
  0x43   :  { %v1691_v42 = vor.u32 %v1690_v30, %v1687_v29  ;;  %v1715_v63 = vrot.slane %v1713_v44, 4  ;;  %v1718_v1 = vrot.slane %v1716_v45, 5  ;;  %v1729_v2 = vrot.slane %v1727_v46, 4  ;;  %v4159_v8 = vld [vmem:[#allocation2 + $0x1a0] ss:$8 sps:$4 sm:$0xff]  }
  0x44   :  { %v1732_v3 = vrot.slane %v1730_v51, 5  ;;  %v1741_v4 = vshrl.u32 %v1612_v55, 16  ;;  %v1744_v5 = vshll.u32 %v1612_v55, 16  ;;  %v1722_v11 = vshll.u32 %v1609_v58, 16  ;;  %v1613_v16 = vld [vmem:[%s5200_s2 + $0x4c] sm:$0x1] }
  0x45   :  { %1956 = vmatpush1.bf16.msra.mxu0 %v4136_v32  ;;  %441 = vmatpush1.bf16.msra.mxu1 %v4148_v7  ;;  %v1704_v32 = vrot.slane %v1702_v19, 5  ;;  %v1692_v56 = vrot.slane %v1691_v42, 4  ;;  %v1719_v10 = vor.u32 %v1718_v1, %v1715_v63  ;;  %v1736_v12 = vshll.u32 %v1611_v59, 16  ;;  %v1615_v19 = vld [vmem:[%s5200_s2 + $0x54] sm:$0x1] }
  0x46   :  { %2224 = vmatprep.subr.bf16.mxu0 %v4145_v49  ;;  %v1683_v49 = vsel %vm4447_vm3, %v1678_v36, %v1682_v27  ;;  %903 = vmatprep.subr.bf16.mxu1 %v4158_v47  ;;  %v1733_v15 = vor.u32 %v1732_v3, %v1729_v2  ;;  %v1743_v17 = vrot.slane %v1741_v4, 4  ;;  %v1746_v18 = vrot.slane %v1744_v5, 5  ;;  %v1616_v22 = vld [vmem:[%s5200_s2 + $0x58] sm:$0xf]  ;;  %v1618_v23 = vld [vmem:[%s5200_s2 + $0x60] sm:$0xf] }
  0x47   :  { %3524 = vmatmul.mubr.msk.bf16.gmra.mrb[8].mxu1 %vm192_vm0, %v4126_v35  ;;  %3620 = vmatmul.mubr.msk.bf16.gmra.mrb[8].mxu0 %vm192_vm0, %v4130_v43  ;;  %v1664_v35 = vrot.slane %v1663_v20, 4  ;;  %v1705_v43 = vor.u32 %v1704_v32, %v1701_v31  ;;  %v1697_v9 = vsel %vm4447_vm3, %v1692_v56, %v1696_v53  ;;  %v4147_v24 = vld [vmem:[%s5199_s1 + $0x68] ss:$8 sps:$4 sm:$0xff]   ;;  %v1724_v27 = vrot.slane %v1722_v11, 5  ;;  %v4169_v39 = vld [vmem:[#allocation2 + $0x1b4] ss:$8 sps:$4 sm:$0xff]  }
  0x48   :  { %279 = vmatprep.mubr.bf16.mxu1 %v4305_v0  ;;  %1513 = vmatprep.mubr.bf16.mxu0 %v4305_v0  ;;  %v1738_v28 = vrot.slane %v1736_v12, 5  ;;  %v1734_v29 = vrot.slane %v1733_v15, 4  ;;  %v1747_v30 = vor.u32 %v1746_v18, %v1743_v17  ;;  %v1750_v31 = vshll.u32 %v1613_v16, 16  ;;  %v4167_v38 = vld [vmem:[#allocation2 + $0x1b0] ss:$8 sps:$4 sm:$0xff]  }
  0x49   :  { %v1669_v48 = vsel %vm4447_vm3, %v1664_v35, %v1668_v26  ;;  %v1706_v57 = vrot.slane %v1705_v43, 4  ;;  %v1720_v26 = vrot.slane %v1719_v10, 4  ;;  %v1764_v32 = vshll.u32 %v1615_v19, 16  ;;  %v1617_v46 = vld [vmem:[%s5200_s2 + $0x5c] sm:$0x1] }
  0x4a   :  { %v3627_v62 = vcombine.low %v1669_v48, %v1683_v49  ;;  %v1772_v35 = vshll.u32 %v1616_v22, 16  ;;  %v1783_v36 = vshrl.u32 %v1618_v23, 16  ;;  %v1786_v37 = vshll.u32 %v1618_v23, 16  ;;  %v1619_v47 = vld [vmem:[%s5200_s2 + $0x64] sm:$0x1] }
  0x4b   :  { %v1711_v14 = vsel %vm4447_vm3, %v1706_v57, %v1710_v54  ;;  %v1725_v40 = vsel %vm4447_vm3, %v1720_v26, %v1724_v27  ;;  %v1752_v42 = vrot.slane %v1750_v31, 5  ;;  %v1766_v43 = vrot.slane %v1764_v32, 5  ;;  %v1620_v55 = vld [vmem:[%s5200_s2 + $0x68] sm:$0xf]  ;;  %v1622_v56 = vld [vmem:[%s5200_s2 + $0x70] sm:$0xf] }
  0x4c   :  { %v1748_v44 = vrot.slane %v1747_v30, 4  ;;  %v1774_v49 = vrot.slane %v1772_v35, 5  ;;  %v1788_v51 = vrot.slane %v1786_v37, 5  ;;  %v1778_v54 = vshll.u32 %v1617_v46, 16  ;;  %v4178_v3 = vld [vmem:[#allocation2 + $0x1c4] ss:$8 sps:$4 sm:$0xff]  }
  0x4d   :  { %v1792_v57 = vshll.u32 %v1619_v47, 16  ;;  %v1800_v63 = vshll.u32 %v1620_v55, 16  ;;  %v1811_v1 = vshrl.u32 %v1622_v56, 16  ;;  %v1814_v2 = vshll.u32 %v1622_v56, 16  ;;  %v4155_v5 = vld [vmem:[%s5198_s0] ss:$8 sps:$4 sm:$0xff]  }
  0x4e   :  { %v1753_v58 = vsel %vm4447_vm3, %v1748_v44, %v1752_v42  ;;  %v1780_v4 = vrot.slane %v1778_v54, 5  ;;  %v1623_v12 = vld [vmem:[%s5200_s2 + $0x74] sm:$0x1]  ;;  %v1624_v19 = vld [vmem:[%s5200_s2 + $0x78] sm:$0xf] }
  0x4f   :  { %3525 = vmatmul.mubr.msk.bf16.gmra.mrb[12].mxu1 %vm192_vm0, %v4134_v60  ;;  %3621 = vmatmul.mubr.msk.bf16.gmra.mrb[12].mxu0 %vm192_vm0, %v4135_v61  ;;  %v1614_v60 = vld [vmem:[%s5200_s2 + $0x50] sm:$0xf]  ;;  %v4161_v61 = vld [vmem:[#allocation2 + $0x1a4] ss:$8 sps:$4 sm:$0xff]   ;;  %v1802_v16 = vrot.slane %v1800_v63, 5  ;;  %v1813_v17 = vrot.slane %v1811_v1, 4 }
  0x50   :  { %289 = vmatprep.mubr.bf16.mxu1 %v4305_v0  ;;  %1981 = vmatprep.mubr.bf16.mxu0 %v4305_v0  ;;  %v1755_v6 = vshrl.u32 %v1614_v60, 16  ;;  %v1758_v7 = vshll.u32 %v1614_v60, 16  ;;  %v1816_v18 = vrot.slane %v1814_v2, 5  ;;  %v1820_v27 = vshll.u32 %v1623_v12, 16  ;;  %v4174_v32 = vld [vmem:[#allocation2 + $0xa4] ss:$8 sps:$4 sm:$0xff]  }
  0x51   :  { %v1627_v44 = vld [vmem:[%s5200_s2 + $0x84] sm:$0x1]  ;;  %v4184_v46 = vld [vmem:[#allocation2 + $0xb4] ss:$8 sps:$4 sm:$0xff]   ;;  %v4170_v63 = vld [vmem:[%s5198_s0 + $0x30] ss:$8 sps:$4 sm:$0xff]  }
  0x52   :  { %v1757_v20 = vrot.slane %v1755_v6, 4  ;;  %v1760_v21 = vrot.slane %v1758_v7, 5  ;;  %v1794_v6 = vrot.slane %v1792_v57, 5  ;;  %v1621_v7 = vld [vmem:[%s5200_s2 + $0x6c] sm:$0x1]  ;;  %v1817_v26 = vor.u32 %v1816_v18, %v1813_v17 }
  0x53   :  { %v1806_v23 = vshll.u32 %v1621_v7, 16  ;;  %v4193_v54 = vld [vmem:[#allocation2 + $0xc4] ss:$8 sps:$4 sm:$0xff]   ;;  %v4171_v2 = vld [vmem:[%s5198_s0 + $0x48] ss:$8 sps:$4 sm:$0xff]  }
  0x54   :  { %v1818_v37 = vrot.slane %v1817_v26, 4  ;;  %v547_v7 = vld [vmem:[%s5198_s0] sm:$0xf]  ;;  %v4205_v17 = vld [vmem:[#allocation2 + $0x1f4] ss:$8 sps:$4 sm:$0xff]  }
  0x55   :  { %v583_v12 = vshrl.u32 %v547_v7, 16  ;;  %v550_v18 = vld [vmem:[%s5198_s0 + $0xc] sm:$0x1]  ;;  %v4203_v26 = vld [vmem:[#allocation2 + $0x1f0] ss:$8 sps:$4 sm:$0xff]  }
  0x57   :  { %3526 = vmatmul.mubr.msk.bf16.gmra.mrb[16].mxu1 %vm192_vm0, %v4139_v25  ;;  %3642 = vmatmul.mubr.msk.bf16.vlgmr.msra.gmra.mrb[0].mxu0 %vm192_vm0, %v3626_v33  ;;  %v3628_v25 = vcombine.low %v1697_v9, %v1711_v14  ;;  %v1761_v33 = vor.u32 %v1760_v21, %v1757_v20  ;;  %v4166_v14 = vld [vmem:[#allocation2 + $0x94] ss:$8 sps:$4 sm:$0xff]   ;;  %v1626_v20 = vld [vmem:[%s5200_s2 + $0x80] sm:$0xf] }
  0x58   :  { %2225 = vmatpush1.bf16.msra.mxu0 %v4143_v34  ;;  %299 = vmatprep.mubr.bf16.mxu1 %v4305_v0  ;;  %v1769_v34 = vshrl.u32 %v1616_v22, 16  ;;  %v4164_v22 = vld [vmem:[#allocation2 + $0x90] ss:$8 sps:$4 sm:$0xff]   ;;  %v1839_v30 = vshrl.u32 %v1626_v20, 16  ;;  %v1842_v31 = vshll.u32 %v1626_v20, 16  ;;  %v585_v20 = vrot.slane %v583_v12, 4 }
  0x59   :  { %1991 = vmatprep.mubr.bf16.mxu0 %v4305_v0  ;;  %2226 = vmatprep.subr.bf16.mxu0 %v4153_v41  ;;  %v1739_v41 = vsel %vm4447_vm3, %v1734_v29, %v1738_v28  ;;  %v1762_v45 = vrot.slane %v1761_v33, 4  ;;  %v1825_v28 = vshrl.u32 %v1624_v19, 16  ;;  %v1828_v29 = vshll.u32 %v1624_v19, 16  ;;  %v4162_v33 = vld [vmem:[%s5198_s0 + $0x10] ss:$8 sps:$4 sm:$0xff]  }
  0x5a   :  { %v1771_v48 = vrot.slane %v1769_v34, 4  ;;  %v3629_v53 = vcombine.low %v1725_v40, %v1739_v41  ;;  %v1808_v34 = vrot.slane %v1806_v23, 5  ;;  %v1841_v42 = vrot.slane %v1839_v30, 4  ;;  %v4181_v23 = vld [vmem:[%s5198_s0 + $0x68] ss:$8 sps:$4 sm:$0xff]  }
  0x5b   :  { %v1767_v59 = vsel %vm4447_vm3, %v1762_v45, %v1766_v43  ;;  %v1827_v40 = vrot.slane %v1825_v28, 4  ;;  %v1830_v41 = vrot.slane %v1828_v29, 5  ;;  %v1844_v43 = vrot.slane %v1842_v31, 5  ;;  %v4172_v45 = vld [vmem:[#allocation2 + $0xa0] ss:$8 sps:$4 sm:$0xff]  }
  0x5c   :  { %2227 = vmatpush1.bf16.msra.mxu0 %v4151_v50  ;;  %v1785_v50 = vrot.slane %v1783_v36, 4  ;;  %v1775_v60 = vor.u32 %v1774_v49, %v1771_v48  ;;  %v3630_v9 = vcombine.low %v1753_v58, %v1767_v59  ;;  %v553_v28 = vld [vmem:[%s5198_s0 + $0x18] sm:$0xf]  ;;  %v4213_v29 = vld [vmem:[#allocation2 + $0x204] ss:$8 sps:$4 sm:$0xff]  }
  0x5d   :  { %2228 = vmatprep.subr.bf16.mxu0 %v4161_v61  ;;  %v4185_v30 = vld [vmem:[%s5198_s0 + $0x28] ss:$8 sps:$4 sm:$0xff]  }
  0x5e   :  { %v1789_v61 = vor.u32 %v1788_v51, %v1785_v50  ;;  %v1776_v10 = vrot.slane %v1775_v60, 4  ;;  %v1831_v50 = vor.u32 %v1830_v41, %v1827_v40  ;;  %v1845_v51 = vor.u32 %v1844_v43, %v1841_v42  ;;  %v552_v40 = vld [vmem:[%s5198_s0 + $0x14] sm:$0x1]  ;;  %v554_v43 = vld [vmem:[%s5198_s0 + $0x1c] sm:$0x1] }
  0x5f   :  { %3527 = vmatmul.mubr.msk.bf16.gmra.mrb[20].mxu1 %vm192_vm0, %v4146_v52  ;;  %3643 = vmatmul.mubr.msk.bf16.gmra.mrb[4].mxu0 %vm192_vm0, %v3627_v62  ;;  %v4154_v52 = vld [vmem:[%s5199_s1 + $0x78] ss:$8 sps:$4 sm:$0xff]   ;;  %v1797_v62 = vshrl.u32 %v1620_v55, 16 }
  0x60   :  { %309 = vmatprep.mubr.bf16.mxu1 %v4305_v0  ;;  %2001 = vmatprep.mubr.bf16.mxu0 %v4305_v0  ;;  %v1790_v11 = vrot.slane %v1789_v61, 4  ;;  %v1781_v21 = vsel %vm4447_vm3, %v1776_v10, %v1780_v4  ;;  %v4163_v55 = vld [vmem:[%s5198_s0 + $0x20] ss:$8 sps:$4 sm:$0xff]   ;;  %v1832_v57 = vrot.slane %v1831_v50, 4  ;;  %v1846_v59 = vrot.slane %v1845_v51, 4 }
  0x61   :  { %2229 = vmatpush1.bf16.msra.mxu0 %v4159_v8  ;;  %v4156_v8 = vld [vmem:[#allocation2 + $0x80] ss:$8 sps:$4 sm:$0xff]   ;;  %v1799_v15 = vrot.slane %v1797_v62, 4  ;;  %v4194_v12 = vld [vmem:[%s5198_s0 + $0x50] ss:$8 sps:$4 sm:$0xff]  }
  0x62   :  { %2230 = vmatprep.subr.bf16.mxu0 %v4169_v39  ;;  %v1625_v39 = vld [vmem:[%s5200_s2 + $0x7c] sm:$0x1]  ;;  %v4176_v4 = vld [vmem:[#allocation2 + $0x1c0] ss:$8 sps:$4 sm:$0xff]  }
  0x63   :  { %v1834_v48 = vshll.u32 %v1625_v39, 16  ;;  %v4180_v10 = vld [vmem:[%s5198_s0 + $0x18] ss:$8 sps:$4 sm:$0xff]   ;;  %v628_v39 = vshll.u32 %v553_v28, 16  ;;  %v557_v51 = vld [vmem:[%s5198_s0 + $0x28] sm:$0xf] }
  0x64   :  { %v555_v50 = vld [vmem:[%s5198_s0 + $0x20] sm:$0xf] }
  0x65   :  { %2231 = vmatpush1.bf16.msra.mxu0 %v4167_v38  ;;  %v1822_v38 = vrot.slane %v1820_v27, 5  ;;  %v1836_v58 = vrot.slane %v1834_v48, 5  ;;  %v606_v27 = vshll.u32 %v550_v18, 16  ;;  %v4201_v18 = vld [vmem:[#allocation2 + $0xd4] ss:$8 sps:$4 sm:$0xff]  }
  0x66   :  { %2499 = vmatprep.subr.bf16.mxu0 %v4178_v3  ;;  %v4175_v3 = vld [vmem:[%s5198_s0 + $0x8] ss:$8 sps:$4 sm:$0xff]  }
  0x67   :  { %3528 = vmatmul.mubr.msk.bf16.gmra.mrb[24].mxu1 %vm192_vm0, %v4147_v24  ;;  %3644 = vmatmul.mubr.msk.bf16.gmra.mrb[8].mxu0 %vm192_vm0, %v3628_v25  ;;  %v1795_v24 = vsel %vm4447_vm3, %v1790_v11, %v1794_v6  ;;  %v1803_v25 = vor.u32 %v1802_v16, %v1799_v15  ;;  %v1823_v49 = vsel %vm4447_vm3, %v1818_v37, %v1822_v38  ;;  %v4186_v6 = vld [vmem:[#allocation2 + $0x1d0] ss:$8 sps:$4 sm:$0xff]   ;;  %v549_v11 = vld [vmem:[%s5198_s0 + $0x8] sm:$0xf]  ;;  %v548_v16 = vld [vmem:[%s5198_s0 + $0x4] sm:$0x1] }
  0x68   :  { %319 = vmatprep.mubr.bf16.mxu1 %v4305_v0  ;;  %2011 = vmatprep.mubr.bf16.mxu0 %v4305_v0  ;;  %v3631_v35 = vcombine.low %v1781_v21, %v1795_v24  ;;  %v1837_v61 = vsel %vm4447_vm3, %v1832_v57, %v1836_v58  ;;  %v4195_v15 = vld [vmem:[#allocation2 + $0x1e0] ss:$8 sps:$4 sm:$0xff]   ;;  %v597_v19 = vshrl.u32 %v549_v11, 16  ;;  %v592_v24 = vshll.u32 %v548_v16, 16 }
  0x69   :  { %v1804_v36 = vrot.slane %v1803_v25, 4  ;;  %v551_v25 = vld [vmem:[%s5198_s0 + $0x10] sm:$0xf]  ;;  %v625_v37 = vshrl.u32 %v553_v28, 16  ;;  %v608_v38 = vrot.slane %v606_v27, 5  ;;  %v642_v57 = vshll.u32 %v555_v50, 16 }
  0x6a   :  { %v599_v31 = vrot.slane %v597_v19, 4  ;;  %v4199_v27 = vld [vmem:[#allocation2 + $0xd0] ss:$8 sps:$4 sm:$0xff]   ;;  %v4198_v28 = vld [vmem:[%s5198_s0 + $0x60] ss:$8 sps:$4 sm:$0xff]  }
  0x6b   :  { %v1809_v47 = vsel %vm4447_vm3, %v1804_v36, %v1808_v34  ;;  %v611_v34 = vshrl.u32 %v551_v25, 16  ;;  %v594_v36 = vrot.slane %v592_v24, 5  ;;  %v627_v48 = vrot.slane %v625_v37, 4 }
  0x6c   :  { %v3632_v56 = vcombine.low %v1809_v47, %v1823_v49  ;;  %v4190_v47 = vld [vmem:[%s5198_s0 + $0x38] ss:$8 sps:$4 sm:$0xff]   ;;  %v630_v49 = vrot.slane %v628_v39, 5 }
  0x6e   :  { %v631_v58 = vor.u32 %v630_v49, %v627_v48 }
  0x6f   :  { %3529 = vmatmul.mubr.msk.bf16.gmra.mrb[28].mxu1 %vm192_vm0, %v4154_v52  ;;  %3645 = vmatmul.mubr.msk.bf16.gmra.mrb[12].mxu0 %vm192_vm0, %v3629_v53  ;;  %v1848_v52 = vshll.u32 %v1627_v44, 16  ;;  %v4182_v53 = vld [vmem:[#allocation2 + $0xb0] ss:$8 sps:$4 sm:$0xff]   ;;  %v613_v44 = vrot.slane %v611_v34, 4 }
  0x70   :  { %466 = vmatprep.mubr.bf16.mxu1 %v4305_v0  ;;  %2021 = vmatprep.mubr.bf16.mxu0 %v4305_v0 }
  0x71   :  { %v1850_v60 = vrot.slane %v1848_v52, 5 }
  0x73   :  { %v1851_v62 = vsel %vm4447_vm3, %v1846_v59, %v1850_v60  ;;  %v653_v59 = vshrl.u32 %v557_v51, 16  ;;  %v656_v60 = vshll.u32 %v557_v51, 16 }
  0x74   :  { %v3633_v1 = vcombine.low %v1837_v61, %v1851_v62 }
  0x77   :  { %3546 = vmatmul.mubr.msk.bf16.vlgmr.msra.gmra.mrb[0].mxu1 %vm192_vm0, %v4155_v5  ;;  %3646 = vmatmul.mubr.msk.bf16.gmra.mrb[16].mxu0 %vm192_vm0, %v3630_v9  ;;  %v4188_v5 = vld [vmem:[#allocation2 + $0x1d4] ss:$8 sps:$4 sm:$0xff]   ;;  %v4179_v9 = vld [vmem:[%s5198_s0 + $0x58] ss:$8 sps:$4 sm:$0xff]  }
  0x78   :  { %904 = vmatpush1.bf16.msra.mxu1 %v4156_v8  ;;  %476 = vmatprep.mubr.bf16.mxu1 %v4305_v0  ;;  %v4197_v8 = vld [vmem:[#allocation2 + $0x1e4] ss:$8 sps:$4 sm:$0xff]  }
  0x79   :  { %2031 = vmatprep.mubr.bf16.mxu0 %v4305_v0  ;;  %905 = vmatprep.subr.bf16.mxu1 %v4166_v14  ;;  %v586_v14 = vshll.u32 %v547_v7, 16  ;;  %v644_v7 = vrot.slane %v642_v57, 5 }
  0x7b   :  { %v588_v21 = vrot.slane %v586_v14, 5  ;;  %v559_v14 = vld [vmem:[%s5198_s0 + $0x30] sm:$0xf] }
  0x7c   :  { %906 = vmatpush1.bf16.msra.mxu1 %v4164_v22  ;;  %v600_v22 = vshll.u32 %v549_v11, 16  ;;  %v4191_v11 = vld [vmem:[#allocation2 + $0xc0] ss:$8 sps:$4 sm:$0xff]   ;;  %v670_v24 = vshll.u32 %v559_v14, 16 }
  0x7d   :  { %907 = vmatprep.subr.bf16.mxu1 %v4174_v32  ;;  %v589_v32 = vor.u32 %v588_v21, %v585_v20 }
  0x7e   :  { %v672_v37 = vrot.slane %v670_v24, 5 }
  0x7f   :  { %3547 = vmatmul.mubr.msk.bf16.gmra.mrb[4].mxu1 %vm192_vm0, %v4162_v33  ;;  %3647 = vmatmul.mubr.msk.bf16.gmra.mrb[20].mxu0 %vm192_vm0, %v3631_v35  ;;  %v602_v33 = vrot.slane %v600_v22, 5  ;;  %v614_v35 = vshll.u32 %v551_v25, 16  ;;  %v590_v41 = vrot.slane %v589_v32, 4 }
  0x80   :  { %486 = vmatprep.mubr.bf16.mxu1 %v4305_v0  ;;  %2041 = vmatprep.mubr.bf16.mxu0 %v4305_v0 }
  0x81   :  { %908 = vmatpush1.bf16.msra.mxu1 %v4172_v45  ;;  %v603_v42 = vor.u32 %v602_v33, %v599_v31  ;;  %v616_v45 = vrot.slane %v614_v35, 5  ;;  %v595_v61 = vsel %vm4447_vm3, %v590_v41, %v594_v36  ;;  %v560_v35 = vld [vmem:[%s5198_s0 + $0x34] sm:$0x1]  ;;  %v565_v41 = vld [vmem:[%s5198_s0 + $0x50] sm:$0xf] }
  0x82   :  { %909 = vmatprep.subr.bf16.mxu1 %v4184_v46  ;;  %v4189_v46 = vld [vmem:[%s5198_s0 + $0x78] ss:$8 sps:$4 sm:$0xff]   ;;  %v712_v51 = vshll.u32 %v565_v41, 16 }
  0x83   :  { %v604_v52 = vrot.slane %v603_v42, 4  ;;  %v562_v42 = vld [vmem:[%s5198_s0 + $0x3c] sm:$0x1] }
  0x85   :  { %910 = vmatpush1.bf16.msra.mxu1 %v4182_v53  ;;  %v620_v53 = vshll.u32 %v552_v40, 16  ;;  %v609_v62 = vsel %vm4447_vm3, %v604_v52, %v608_v38  ;;  %v563_v40 = vld [vmem:[%s5198_s0 + $0x48] sm:$0xf] }
  0x86   :  { %1177 = vmatprep.subr.bf16.mxu1 %v4193_v54  ;;  %v617_v54 = vor.u32 %v616_v45, %v613_v44  ;;  %v695_v48 = vshrl.u32 %v563_v40, 16  ;;  %v698_v49 = vshll.u32 %v563_v40, 16 }
  0x87   :  { %3548 = vmatmul.mubr.msk.bf16.gmra.mrb[8].mxu1 %vm192_vm0, %v4163_v55  ;;  %3648 = vmatmul.mubr.msk.bf16.gmra.mrb[24].mxu0 %vm192_vm0, %v3632_v56  ;;  %v634_v55 = vshll.u32 %v554_v43, 16  ;;  %v639_v56 = vshrl.u32 %v555_v50, 16  ;;  %v4207_v43 = vld [vmem:[#allocation2 + $0xe0] ss:$8 sps:$4 sm:$0xff]   ;;  %v709_v50 = vshrl.u32 %v565_v41, 16 }
  0x88   :  { %496 = vmatprep.mubr.bf16.mxu1 %v4305_v0  ;;  %2051 = vmatprep.mubr.bf16.mxu0 %v4305_v0 }
  0x8f   :  { %3549 = vmatmul.mubr.msk.bf16.gmra.mrb[12].mxu1 %vm192_vm0, %v4170_v63  ;;  %3649 = vmatmul.mubr.msk.bf16.gmra.mrb[28].mxu0 %vm192_vm0, %v3633_v1  ;;  %v618_v63 = vrot.slane %v617_v54, 4  ;;  %v622_v1 = vrot.slane %v620_v53, 5  ;;  %v690_v54 = vshll.u32 %v562_v42, 16 }
  0x90   :  { %506 = vmatprep.mubr.bf16.mxu1 %v4305_v0  ;;  %2256 = vmatprep.mubr.bf16.mxu0 %v4305_v0 }
  0x91   :  { %v623_v19 = vsel %vm4447_vm3, %v618_v63, %v622_v1  ;;  %v711_v63 = vrot.slane %v709_v50, 4  ;;  %v714_v1 = vrot.slane %v712_v51, 5 }
  0x97   :  { %3550 = vmatmul.mubr.msk.bf16.gmra.mrb[16].mxu1 %vm192_vm0, %v4171_v2  ;;  %3682 = vmatmul.mubr.msk.bf16.vlgmr.msra.gmra.mrb[0].mxu0 %vm192_vm0, %v4175_v3  ;;  %v636_v2 = vrot.slane %v634_v55, 5  ;;  %v556_v3 = vld [vmem:[%s5198_s0 + $0x24] sm:$0x1]  ;;  %v564_v55 = vld [vmem:[%s5198_s0 + $0x4c] sm:$0x1] }
  0x98   :  { %2500 = vmatpush1.bf16.msra.mxu0 %v4176_v4  ;;  %516 = vmatprep.mubr.bf16.mxu1 %v4305_v0  ;;  %v641_v4 = vrot.slane %v639_v56, 4  ;;  %v648_v16 = vshll.u32 %v556_v3, 16  ;;  %v4215_v56 = vld [vmem:[#allocation2 + $0xf0] ss:$8 sps:$4 sm:$0xff]  }
  0x99   :  { %2266 = vmatprep.mubr.bf16.mxu0 %v4305_v0  ;;  %2501 = vmatprep.subr.bf16.mxu0 %v4188_v5  ;;  %v632_v5 = vrot.slane %v631_v58, 4  ;;  %v4202_v58 = vld [vmem:[%s5198_s0 + $0x70] ss:$8 sps:$4 sm:$0xff]  }
  0x9a   :  { %v645_v21 = vor.u32 %v644_v7, %v641_v4  ;;  %v704_v7 = vshll.u32 %v564_v55, 16  ;;  %v574_v55 = vld [vmem:[%s5198_s0 + $0x74] sm:$0x1] }
  0x9b   :  { %v637_v20 = vsel %vm4447_vm3, %v632_v5, %v636_v2  ;;  %v569_v2 = vld [vmem:[%s5198_s0 + $0x60] sm:$0xf]  ;;  %v692_v5 = vrot.slane %v690_v54, 5 }
  0x9c   :  { %2502 = vmatpush1.bf16.msra.mxu0 %v4186_v6  ;;  %v558_v6 = vld [vmem:[%s5198_s0 + $0x2c] sm:$0x1]  ;;  %v3555_v31 = vcombine.low %v623_v19, %v637_v20  ;;  %v646_v32 = vrot.slane %v645_v21, 4  ;;  %v706_v19 = vrot.slane %v704_v7, 5  ;;  %v4206_v20 = vld [vmem:[%s5198_s0 + $0x80] ss:$8 sps:$4 sm:$0xff]  }
  0x9d   :  { %2503 = vmatprep.subr.bf16.mxu0 %v4197_v8  ;;  %v655_v8 = vrot.slane %v653_v59, 4  ;;  %v568_v21 = vld [vmem:[%s5198_s0 + $0x5c] sm:$0x1]  ;;  %v4211_v54 = vld [vmem:[#allocation2 + $0x200] ss:$8 sps:$4 sm:$0xff]  }
  0x9e   :  { %v4227_v7 = vld [vmem:[#allocation2 + $0x224] ss:$8 sps:$4 sm:$0xff]  }
  0x9f   :  { %3551 = vmatmul.mubr.msk.bf16.gmra.mrb[20].mxu1 %vm192_vm0, %v4179_v9  ;;  %3683 = vmatmul.mubr.msk.bf16.gmra.mrb[4].mxu0 %vm192_vm0, %v4180_v10  ;;  %v658_v9 = vrot.slane %v656_v60, 5  ;;  %v3554_v10 = vcombine.low %v595_v61, %v609_v62  ;;  %v567_v60 = vld [vmem:[%s5198_s0 + $0x58] sm:$0xf]  ;;  %v697_v61 = vrot.slane %v695_v48, 4  ;;  %v700_v62 = vrot.slane %v698_v49, 5 }
  0xa0   :  { %526 = vmatprep.mubr.bf16.mxu1 %v4305_v0  ;;  %2276 = vmatprep.mubr.bf16.mxu0 %v4305_v0  ;;  %v572_v49 = vld [vmem:[%s5198_s0 + $0x6c] sm:$0x1] }
  0xa1   :  { %2504 = vmatpush1.bf16.msra.mxu0 %v4195_v15  ;;  %v561_v15 = vld [vmem:[%s5198_s0 + $0x38] sm:$0xf]  ;;  %v659_v22 = vor.u32 %v658_v9, %v655_v8  ;;  %v723_v8 = vshrl.u32 %v567_v60, 16  ;;  %v726_v9 = vshll.u32 %v567_v60, 16  ;;  %v760_v60 = vshll.u32 %v572_v49, 16 }
  0xa2   :  { %2505 = vmatprep.subr.bf16.mxu0 %v4205_v17  ;;  %v662_v17 = vshll.u32 %v558_v6, 16  ;;  %v681_v25 = vshrl.u32 %v561_v15, 16  ;;  %v566_v6 = vld [vmem:[%s5198_s0 + $0x54] sm:$0x1]  ;;  %v4249_v49 = vld [vmem:[#allocation2 + $0x124] ss:$8 sps:$4 sm:$0xff]  }
  0xa3   :  { %v660_v33 = vrot.slane %v659_v22, 4  ;;  %v570_v22 = vld [vmem:[%s5198_s0 + $0x64] sm:$0x1]  ;;  %v728_v24 = vrot.slane %v726_v9, 5 }
  0xa4   :  { %v664_v34 = vrot.slane %v662_v17, 5  ;;  %v683_v38 = vrot.slane %v681_v25, 4 }
  0xa5   :  { %2506 = vmatpush1.bf16.msra.mxu0 %v4203_v26  ;;  %v684_v26 = vshll.u32 %v561_v15, 16  ;;  %v715_v15 = vor.u32 %v714_v1, %v711_v63  ;;  %v774_v1 = vshll.u32 %v574_v55, 16  ;;  %v4230_v55 = vld [vmem:[%s5200_s2 + $0x20] ss:$8 sps:$4 sm:$0xff]  }
  0xa6   :  { %2997 = vmatprep.subr.bf16.mxu0 %v4213_v29  ;;  %v650_v29 = vrot.slane %v648_v16, 5  ;;  %v665_v45 = vsel %vm4447_vm3, %v660_v33, %v664_v34  ;;  %v718_v16 = vshll.u32 %v566_v6, 16  ;;  %v732_v33 = vshll.u32 %v568_v21, 16  ;;  %v4225_v21 = vld [vmem:[#allocation2 + $0x220] ss:$8 sps:$4 sm:$0xff]  }
  0xa7   :  { %3552 = vmatmul.mubr.msk.bf16.gmra.mrb[24].mxu1 %vm192_vm0, %v4181_v23  ;;  %3684 = vmatmul.mubr.msk.bf16.gmra.mrb[8].mxu0 %vm192_vm0, %v4185_v30  ;;  %v667_v23 = vshrl.u32 %v559_v14, 16  ;;  %v4209_v30 = vld [vmem:[#allocation2 + $0xe4] ss:$8 sps:$4 sm:$0xff]   ;;  %v686_v39 = vrot.slane %v684_v26, 5  ;;  %v701_v14 = vor.u32 %v700_v62, %v697_v61  ;;  %v746_v34 = vshll.u32 %v570_v22, 16 }
  0xa8   :  { %536 = vmatprep.mubr.bf16.mxu1 %v4305_v0  ;;  %2286 = vmatprep.mubr.bf16.mxu0 %v4305_v0  ;;  %v651_v44 = vsel %vm4447_vm3, %v646_v32, %v650_v29  ;;  %v716_v29 = vrot.slane %v715_v15, 4  ;;  %v573_v32 = vld [vmem:[%s5198_s0 + $0x70] sm:$0xf]  ;;  %v576_v15 = vld [vmem:[%s5198_s0 + $0x7c] sm:$0x1] }
  0xa9   :  { %v669_v36 = vrot.slane %v667_v23, 4  ;;  %v687_v53 = vor.u32 %v686_v39, %v683_v38  ;;  %v3556_v57 = vcombine.low %v651_v44, %v665_v45  ;;  %v725_v23 = vrot.slane %v723_v8, 4  ;;  %v4210_v45 = vld [vmem:[%s5199_s1 + $0x8] ss:$8 sps:$4 sm:$0xff]   ;;  %v4234_v22 = vld [vmem:[#allocation2 + $0x234] ss:$8 sps:$4 sm:$0xff]  }
  0xaa   :  { %v765_v41 = vshrl.u32 %v573_v32, 16  ;;  %v768_v42 = vshll.u32 %v573_v32, 16  ;;  %v748_v48 = vrot.slane %v746_v34, 5  ;;  %v762_v8 = vrot.slane %v760_v60, 5  ;;  %v4251_v60 = vld [vmem:[#allocation2 + $0x134] ss:$8 sps:$4 sm:$0xff]  }
  0xab   :  { %v673_v52 = vor.u32 %v672_v37, %v669_v36  ;;  %v688_v4 = vrot.slane %v687_v53, 4 }
  0xac   :  { %v770_v53 = vrot.slane %v768_v42, 5  ;;  %v4246_v42 = vld [vmem:[#allocation2 + $0x100] ss:$8 sps:$4 sm:$0xff]  }
  0xad   :  { %v674_v3 = vrot.slane %v673_v52, 4  ;;  %v767_v52 = vrot.slane %v765_v41, 4  ;;  %v4224_v41 = vld [vmem:[%s5199_s1 + $0x50] ss:$8 sps:$4 sm:$0xff]  }
  0xaf   :  { %3553 = vmatmul.mubr.msk.bf16.gmra.mrb[28].mxu1 %vm192_vm0, %v4189_v46  ;;  %3685 = vmatmul.mubr.msk.bf16.gmra.mrb[12].mxu0 %vm192_vm0, %v4190_v47  ;;  %v676_v46 = vshll.u32 %v560_v35, 16  ;;  %v4217_v47 = vld [vmem:[#allocation2 + $0xf4] ss:$8 sps:$4 sm:$0xff]   ;;  %v729_v35 = vor.u32 %v728_v24, %v725_v23  ;;  %v771_v63 = vor.u32 %v770_v53, %v767_v52  ;;  %v788_v24 = vshll.u32 %v576_v15, 16 }
  0xb0   :  { %935 = vmatprep.mubr.bf16.mxu1 %v4305_v0  ;;  %2296 = vmatprep.mubr.bf16.mxu0 %v4305_v0 }
  0xb1   :  { %v678_v59 = vrot.slane %v676_v46, 5  ;;  %v730_v46 = vrot.slane %v729_v35, 4 }
  0xb3   :  { %v679_v17 = vsel %vm4447_vm3, %v674_v3, %v678_v59 }
  0xb7   :  { %3570 = vmatmul.mubr.msk.bf16.vlgmr.msra.gmra.mrb[0].mxu1 %vm192_vm0, %v3554_v10  ;;  %3686 = vmatmul.mubr.msk.bf16.gmra.mrb[16].mxu0 %vm192_vm0, %v4194_v12  ;;  %v737_v10 = vshrl.u32 %v569_v2, 16  ;;  %v4245_v12 = vld [vmem:[#allocation2 + $0x104] ss:$8 sps:$4 sm:$0xff]  }
  0xb8   :  { %1178 = vmatpush1.bf16.msra.mxu1 %v4191_v11  ;;  %945 = vmatprep.mubr.bf16.mxu1 %v4305_v0  ;;  %v740_v11 = vshll.u32 %v569_v2, 16  ;;  %v4219_v2 = vld [vmem:[#allocation2 + $0x210] ss:$8 sps:$4 sm:$0xff]  }
  0xb9   :  { %2306 = vmatprep.mubr.bf16.mxu0 %v4305_v0  ;;  %1179 = vmatprep.subr.bf16.mxu1 %v4201_v18  ;;  %v693_v18 = vsel %vm4447_vm3, %v688_v4, %v692_v5  ;;  %v739_v25 = vrot.slane %v737_v10, 4  ;;  %v4214_v10 = vld [vmem:[%s5199_s1 + $0x18] ss:$8 sps:$4 sm:$0xff]  }
  0xba   :  { %v742_v26 = vrot.slane %v740_v11, 5 }
  0xbc   :  { %1180 = vmatpush1.bf16.msra.mxu1 %v4199_v27  ;;  %v3557_v27 = vcombine.low %v679_v17, %v693_v18  ;;  %v743_v36 = vor.u32 %v742_v26, %v739_v25 }
  0xbd   :  { %1181 = vmatprep.subr.bf16.mxu1 %v4209_v30  ;;  %v720_v30 = vrot.slane %v718_v16, 5 }
  0xbf   :  { %3571 = vmatmul.mubr.msk.bf16.gmra.mrb[4].mxu1 %vm192_vm0, %v3555_v31  ;;  %3687 = vmatmul.mubr.msk.bf16.gmra.mrb[20].mxu0 %vm192_vm0, %v4198_v28  ;;  %v702_v28 = vrot.slane %v701_v14, 4  ;;  %v571_v31 = vld [vmem:[%s5198_s0 + $0x68] sm:$0xf]  ;;  %v721_v40 = vsel %vm4447_vm3, %v716_v29, %v720_v30  ;;  %v776_v14 = vrot.slane %v774_v1, 5  ;;  %v4232_v29 = vld [vmem:[#allocation2 + $0x230] ss:$8 sps:$4 sm:$0xff]  }
  0xc0   :  { %955 = vmatprep.mubr.bf16.mxu1 %v4305_v0  ;;  %2316 = vmatprep.mubr.bf16.mxu0 %v4305_v0  ;;  %v751_v37 = vshrl.u32 %v571_v31, 16  ;;  %v754_v38 = vshll.u32 %v571_v31, 16  ;;  %v4218_v31 = vld [vmem:[%s5199_s1 + $0x28] ss:$8 sps:$4 sm:$0xff]   ;;  %v3734_v1 = vld [vmem:[%s5198_s0 + $0x18] sm:$0xf] }
  0xc1   :  { %1182 = vmatpush1.bf16.msra.mxu1 %v4207_v43  ;;  %v707_v39 = vsel %vm4447_vm3, %v702_v28, %v706_v19  ;;  %v734_v43 = vrot.slane %v732_v33, 5  ;;  %v790_v33 = vrot.slane %v788_v24, 5 }
  0xc2   :  { %1183 = vmatprep.subr.bf16.mxu1 %v4217_v47  ;;  %v3558_v44 = vcombine.low %v707_v39, %v721_v40  ;;  %v744_v47 = vrot.slane %v743_v36, 4  ;;  %v753_v50 = vrot.slane %v751_v37, 4  ;;  %v756_v51 = vrot.slane %v754_v38, 5  ;;  %v4222_v39 = vld [vmem:[%s5199_s1 + $0x38] ss:$8 sps:$4 sm:$0xff]  }
  0xc3   :  { %v735_v59 = vsel %vm4447_vm3, %v730_v46, %v734_v43  ;;  %v4223_v40 = vld [vmem:[%s5200_s2] ss:$8 sps:$4 sm:$0xff]   ;;  %v4247_v43 = vld [vmem:[#allocation2 + $0x114] ss:$8 sps:$4 sm:$0xff]  }
  0xc4   :  { %v749_v61 = vsel %vm4447_vm3, %v744_v47, %v748_v48  ;;  %v757_v62 = vor.u32 %v756_v51, %v753_v50  ;;  %v3730_v46 = vld [vmem:[%s5198_s0 + $0x8] sm:$0xf]  ;;  %v3732_v47 = vld [vmem:[%s5198_s0 + $0x10] sm:$0xf] }
  0xc5   :  { %1184 = vmatpush1.bf16.msra.mxu1 %v4215_v56  ;;  %v4221_v56 = vld [vmem:[#allocation2 + $0x214] ss:$8 sps:$4 sm:$0xff]   ;;  %v3559_v9 = vcombine.low %v735_v59, %v749_v61  ;;  %v4248_v48 = vld [vmem:[#allocation2 + $0x110] ss:$8 sps:$4 sm:$0xff]   ;;  %v2677_v50 = vshrl.u32 %v3730_v46, 16  ;;  %v2680_v51 = vshll.u32 %v3730_v46, 16 }
  0xc6   :  { %3818 = vmatprep.subr.bf16.mxu1 %v4245_v12  ;;  %v758_v11 = vrot.slane %v757_v62, 4  ;;  %v772_v12 = vrot.slane %v771_v63, 4  ;;  %v2691_v52 = vshrl.u32 %v3732_v47, 16  ;;  %v2694_v53 = vshll.u32 %v3732_v47, 16  ;;  %v4231_v61 = vld [vmem:[%s5199_s1 + $0x70] ss:$8 sps:$4 sm:$0xff]  }
  0xc7   :  { %3572 = vmatmul.mubr.msk.bf16.gmra.mrb[8].mxu1 %vm192_vm0, %v3556_v57  ;;  %3688 = vmatmul.mubr.msk.bf16.gmra.mrb[24].mxu0 %vm192_vm0, %v4202_v58  ;;  %v575_v57 = vld [vmem:[%s5198_s0 + $0x78] sm:$0xf]  ;;  %v577_v58 = vld [vmem:[%s5198_s0 + $0x80] sm:$0xf]  ;;  %v3731_v62 = vld [vmem:[%s5198_s0 + $0xc] sm:$0x1] }
  0xc8   :  { %965 = vmatprep.mubr.bf16.mxu1 %v4305_v0  ;;  %2326 = vmatprep.mubr.bf16.mxu0 %v4305_v0  ;;  %v779_v3 = vshrl.u32 %v575_v57, 16  ;;  %v782_v4 = vshll.u32 %v575_v57, 16  ;;  %v793_v5 = vshrl.u32 %v577_v58, 16  ;;  %v796_v6 = vshll.u32 %v577_v58, 16  ;;  %v3733_v63 = vld [vmem:[%s5198_s0 + $0x14] sm:$0x1] }
  0xc9   :  { %v763_v23 = vsel %vm4447_vm3, %v758_v11, %v762_v8  ;;  %v777_v25 = vsel %vm4447_vm3, %v772_v12, %v776_v14  ;;  %v2682_v57 = vrot.slane %v2680_v51, 5  ;;  %v2693_v58 = vrot.slane %v2691_v52, 4  ;;  %v4235_v12 = vld [vmem:[%s5200_s2 + $0x30] ss:$8 sps:$4 sm:$0xff]   ;;  %v4236_v14 = vld [vmem:[%s5199_s1 + $0x80] ss:$8 sps:$4 sm:$0xff]  }
  0xca   :  { %v781_v16 = vrot.slane %v779_v3, 4  ;;  %v784_v17 = vrot.slane %v782_v4, 5  ;;  %v795_v18 = vrot.slane %v793_v5, 4  ;;  %v798_v19 = vrot.slane %v796_v6, 5  ;;  %v4252_v3 = vld [vmem:[#allocation2 + $0x130] ss:$8 sps:$4 sm:$0xff]  }
  0xcb   :  { %v3560_v30 = vcombine.low %v763_v23, %v777_v25  ;;  %v2696_v59 = vrot.slane %v2694_v53, 5  ;;  %v2686_v5 = vshll.u32 %v3731_v62, 16  ;;  %v2705_v8 = vshrl.u32 %v3734_v1, 16  ;;  %v3738_v25 = vld [vmem:[%s5198_s0 + $0x28] sm:$0xf] }
  0xcc   :  { %v785_v26 = vor.u32 %v784_v17, %v781_v16  ;;  %v3745_v62 = vld [vmem:[%s5198_s0 + $0x44] sm:$0x1] }
  0xcd   :  { %v2697_v6 = vor.u32 %v2696_v59, %v2693_v58  ;;  %v2688_v16 = vrot.slane %v2686_v5, 5 }
  0xce   :  { %v786_v32 = vrot.slane %v785_v26, 4  ;;  %v3740_v26 = vld [vmem:[%s5198_s0 + $0x30] sm:$0xf] }
  0xcf   :  { %3573 = vmatmul.mubr.msk.bf16.gmra.mrb[12].mxu1 %vm192_vm0, %v3557_v27  ;;  %3689 = vmatmul.mubr.msk.bf16.gmra.mrb[28].mxu0 %vm192_vm0, %v4206_v20  ;;  %v578_v20 = vld [vmem:[%s5198_s0 + $0x84] sm:$0x1]  ;;  %v799_v27 = vor.u32 %v798_v19, %v795_v18  ;;  %v2698_v17 = vrot.slane %v2697_v6, 4  ;;  %v3735_v19 = vld [vmem:[%s5198_s0 + $0x1c] sm:$0x1] }
  0xd0   :  { %975 = vmatprep.mubr.bf16.mxu1 %v4305_v0  ;;  %2531 = vmatprep.mubr.bf16.mxu0 %v4305_v0  ;;  %v802_v28 = vshll.u32 %v578_v20, 16  ;;  %v791_v36 = vsel %vm4447_vm3, %v786_v32, %v790_v33  ;;  %v3737_v20 = vld [vmem:[%s5198_s0 + $0x24] sm:$0x1]  ;;  %v2733_v33 = vshrl.u32 %v3738_v25, 16  ;;  %v3746_v6 = vld [vmem:[%s5198_s0 + $0x50] sm:$0xf] }
  0xd1   :  { %v800_v34 = vrot.slane %v799_v27, 4 }
  0xd2   :  { %v804_v35 = vrot.slane %v802_v28, 5  ;;  %v2714_v28 = vshll.u32 %v3735_v19, 16  ;;  %v2735_v46 = vrot.slane %v2733_v33, 4 }
  0xd4   :  { %v805_v37 = vsel %vm4447_vm3, %v800_v34, %v804_v35  ;;  %v2736_v34 = vshll.u32 %v3738_v25, 16  ;;  %v2747_v35 = vshrl.u32 %v3740_v26, 16  ;;  %v3747_v25 = vld [vmem:[%s5198_s0 + $0x54] sm:$0x1] }
  0xd5   :  { %v3561_v38 = vcombine.low %v791_v36, %v805_v37  ;;  %v2750_v36 = vshll.u32 %v3740_v26, 16  ;;  %v4237_v37 = vld [vmem:[%s5200_s2 + $0x48] ss:$8 sps:$4 sm:$0xff]  }
  0xd6   :  { %v2738_v47 = vrot.slane %v2736_v34, 5 }
  0xd7   :  { %3574 = vmatmul.mubr.msk.bf16.gmra.mrb[16].mxu1 %vm192_vm0, %v3558_v44  ;;  %3722 = vmatmul.mubr.msk.bf16.vlgmr.msra.gmra.mrb[0].mxu0 %vm192_vm0, %v4210_v45  ;;  %v4228_v44 = vld [vmem:[%s5200_s2 + $0x10] ss:$8 sps:$4 sm:$0xff]   ;;  %v4229_v45 = vld [vmem:[%s5199_s1 + $0x60] ss:$8 sps:$4 sm:$0xff]  }
  0xd8   :  { %2998 = vmatpush1.bf16.msra.mxu0 %v4211_v54  ;;  %985 = vmatprep.mubr.bf16.mxu1 %v4305_v0  ;;  %v4250_v54 = vld [vmem:[#allocation2 + $0x120] ss:$8 sps:$4 sm:$0xff]   ;;  %v2739_v58 = vor.u32 %v2738_v47, %v2735_v46 }
  0xd9   :  { %2541 = vmatprep.mubr.bf16.mxu0 %v4305_v0  ;;  %2999 = vmatprep.subr.bf16.mxu0 %v4221_v56  ;;  %v2679_v56 = vrot.slane %v2677_v50, 4  ;;  %v3741_v50 = vld [vmem:[%s5198_s0 + $0x34] sm:$0x1]  ;;  %v4240_v47 = vld [vmem:[%s5200_s2 + $0x78] ss:$8 sps:$4 sm:$0xff]  }
  0xdb   :  { %v2683_v4 = vor.u32 %v2682_v57, %v2679_v56 }
  0xdc   :  { %3000 = vmatpush1.bf16.msra.mxu0 %v4219_v2  ;;  %v3736_v2 = vld [vmem:[%s5198_s0 + $0x20] sm:$0xf] }
  0xdd   :  { %3001 = vmatprep.subr.bf16.mxu0 %v4227_v7  ;;  %v2700_v7 = vshll.u32 %v3733_v63, 16  ;;  %v2722_v11 = vshll.u32 %v3736_v2, 16  ;;  %v2684_v15 = vrot.slane %v2683_v4, 4  ;;  %v4238_v4 = vld [vmem:[%s5200_s2 + $0x58] ss:$8 sps:$4 sm:$0xff]  }
  0xdf   :  { %3575 = vmatmul.mubr.msk.bf16.gmra.mrb[20].mxu1 %vm192_vm0, %v3559_v9  ;;  %3723 = vmatmul.mubr.msk.bf16.gmra.mrb[4].mxu0 %vm192_vm0, %v4214_v10  ;;  %v2708_v9 = vshll.u32 %v3734_v1, 16  ;;  %v2719_v10 = vshrl.u32 %v3736_v2, 16  ;;  %v2702_v18 = vrot.slane %v2700_v7, 5  ;;  %v2724_v24 = vrot.slane %v2722_v11, 5  ;;  %v3748_v11 = vld [vmem:[%s5198_s0 + $0x58] sm:$0xf] }
  0xe0   :  { %995 = vmatprep.mubr.bf16.mxu1 %v4305_v0  ;;  %2551 = vmatprep.mubr.bf16.mxu0 %v4305_v0  ;;  %v2689_v27 = vsel %vm4447_vm3, %v2684_v15, %v2688_v16  ;;  %v2740_v7 = vrot.slane %v2739_v58, 4  ;;  %v2803_v19 = vshrl.u32 %v3748_v11, 16 }
  0xe1   :  { %3002 = vmatpush1.bf16.msra.mxu0 %v4225_v21  ;;  %v2707_v21 = vrot.slane %v2705_v8, 4  ;;  %v2721_v23 = vrot.slane %v2719_v10, 4 }
  0xe2   :  { %3003 = vmatprep.subr.bf16.mxu0 %v4234_v22  ;;  %v2710_v22 = vrot.slane %v2708_v9, 5  ;;  %v2805_v33 = vrot.slane %v2803_v19, 4 }
  0xe3   :  { %v2725_v32 = vor.u32 %v2724_v24, %v2721_v23 }
  0xe5   :  { %3004 = vmatpush1.bf16.msra.mxu0 %v4232_v29  ;;  %v2728_v29 = vshll.u32 %v3737_v20, 16  ;;  %v2806_v20 = vshll.u32 %v3748_v11, 16 }
  0xe7   :  { %3576 = vmatmul.mubr.msk.bf16.gmra.mrb[24].mxu1 %vm192_vm0, %v3560_v30  ;;  %3724 = vmatmul.mubr.msk.bf16.gmra.mrb[8].mxu0 %vm192_vm0, %v4218_v31  ;;  %v2703_v30 = vsel %vm4447_vm3, %v2698_v17, %v2702_v18  ;;  %v2711_v31 = vor.u32 %v2710_v22, %v2707_v21  ;;  %v2789_v17 = vshrl.u32 %v3746_v6, 16  ;;  %v2792_v18 = vshll.u32 %v3746_v6, 16 }
  0xe8   :  { %1005 = vmatprep.mubr.bf16.mxu1 %v4305_v0  ;;  %2561 = vmatprep.mubr.bf16.mxu0 %v4305_v0  ;;  %v2808_v34 = vrot.slane %v2806_v20, 5 }
  0xef   :  { %3577 = vmatmul.mubr.msk.bf16.gmra.mrb[28].mxu1 %vm192_vm0, %v3561_v38  ;;  %3725 = vmatmul.mubr.msk.bf16.gmra.mrb[12].mxu0 %vm192_vm0, %v4222_v39  ;;  %v2716_v38 = vrot.slane %v2714_v28, 5  ;;  %v2730_v39 = vrot.slane %v2728_v29, 5  ;;  %v3749_v28 = vld [vmem:[%s5198_s0 + $0x5c] sm:$0x1]  ;;  %v2791_v29 = vrot.slane %v2789_v17, 4 }
  0xf0   :  { %1209 = vmatprep.mubr.bf16.mxu1 %v4305_v0  ;;  %2571 = vmatprep.mubr.bf16.mxu0 %v4305_v0 }
  0xf7   :  { %3594 = vmatmul.mubr.msk.bf16.vlgmr.msra.gmra.mrb[0].mxu1 %vm192_vm0, %v4223_v40  ;;  %3726 = vmatmul.mubr.msk.bf16.gmra.mrb[16].mxu0 %vm192_vm0, %v4224_v41  ;;  %v3762_v40 = vcombine.low %v2689_v27, %v2703_v30  ;;  %v2712_v41 = vrot.slane %v2711_v31, 4  ;;  %v2794_v30 = vrot.slane %v2792_v18, 5  ;;  %v4239_v31 = vld [vmem:[%s5200_s2 + $0x68] ss:$8 sps:$4 sm:$0xff]  }
  0xf8   :  { %3822 = vmatpush1.bf16.msra.mxu1 %v4246_v42  ;;  %1219 = vmatprep.mubr.bf16.mxu1 %v4305_v0  ;;  %v2726_v42 = vrot.slane %v2725_v32, 4 }
  0xf9   :  { %2581 = vmatprep.mubr.bf16.mxu0 %v4305_v0  ;;  %3819 = vmatprep.subr.bf16.mxu1 %v4247_v43  ;;  %v3742_v43 = vld [vmem:[%s5198_s0 + $0x38] sm:$0xf] }
  0xfa   :  { %v2761_v51 = vshrl.u32 %v3742_v43, 16  ;;  %v2764_v52 = vshll.u32 %v3742_v43, 16  ;;  %v2731_v57 = vsel %vm4447_vm3, %v2726_v42, %v2730_v39  ;;  %v2809_v43 = vor.u32 %v2808_v34, %v2805_v33  ;;  %v4242_v34 = vld [vmem:[%s5201_s3 + $0x58] ss:$8 sps:$4 sm:$0xff]  }
  0xfc   :  { %3823 = vmatpush1.bf16.msra.mxu1 %v4248_v48  ;;  %v2749_v48 = vrot.slane %v2747_v35, 4  ;;  %v2763_v63 = vrot.slane %v2761_v51, 4  ;;  %v2766_v1 = vrot.slane %v2764_v52, 5  ;;  %v3750_v35 = vld [vmem:[%s5198_s0 + $0x60] sm:$0xf] }
  0xfd   :  { %3820 = vmatprep.subr.bf16.mxu1 %v4249_v49  ;;  %v2752_v49 = vrot.slane %v2750_v36, 5  ;;  %v3752_v36 = vld [vmem:[%s5198_s0 + $0x68] sm:$0xf]  ;;  %v2817_v42 = vshrl.u32 %v3750_v35, 16 }
  0xfe   :  { %v2767_v15 = vor.u32 %v2766_v1, %v2763_v63  ;;  %v2834_v46 = vshll.u32 %v3752_v36, 16 }
  0xff   :  { %3595 = vmatmul.mubr.msk.bf16.gmra.mrb[4].mxu1 %vm192_vm0, %v4228_v44  ;;  %3727 = vmatmul.mubr.msk.bf16.gmra.mrb[20].mxu0 %vm192_vm0, %v4229_v45  ;;  %v3744_v44 = vld [vmem:[%s5198_s0 + $0x40] sm:$0xf]  ;;  %v3739_v45 = vld [vmem:[%s5198_s0 + $0x2c] sm:$0x1]  ;;  %v2753_v59 = vor.u32 %v2752_v49, %v2749_v48  ;;  %v3751_v49 = vld [vmem:[%s5198_s0 + $0x64] sm:$0x1] }
 0x100   :  { %1229 = vmatprep.mubr.bf16.mxu1 %v4305_v0  ;;  %2591 = vmatprep.mubr.bf16.mxu0 %v4305_v0  ;;  %v2775_v53 = vshrl.u32 %v3744_v44, 16  ;;  %v2742_v56 = vshll.u32 %v3739_v45, 16  ;;  %v2768_v26 = vrot.slane %v2767_v15, 4  ;;  %v2831_v45 = vshrl.u32 %v3752_v36, 16 }
 0x101   :  { %3824 = vmatpush1.bf16.msra.mxu1 %v4250_v54  ;;  %v2778_v54 = vshll.u32 %v3744_v44, 16  ;;  %v2754_v9 = vrot.slane %v2753_v59, 4  ;;  %v2820_v44 = vshll.u32 %v3750_v35, 16  ;;  %v2836_v58 = vrot.slane %v2834_v46, 5  ;;  %v3754_v59 = vld [vmem:[%s5198_s0 + $0x70] sm:$0xf] }
 0x102   :  { %3821 = vmatprep.subr.bf16.mxu1 %v4251_v60  ;;  %v2756_v60 = vshll.u32 %v3741_v50, 16  ;;  %v2777_v2 = vrot.slane %v2775_v53, 4  ;;  %v2744_v8 = vrot.slane %v2742_v56, 5  ;;  %v3753_v53 = vld [vmem:[%s5198_s0 + $0x6c] sm:$0x1]  ;;  %v2845_v1 = vshrl.u32 %v3754_v59, 16 }
 0x103   :  { %v2822_v56 = vrot.slane %v2820_v44, 5  ;;  %v2840_v63 = vshll.u32 %v3753_v53, 16  ;;  %v3761_v44 = vld [vmem:[%s5198_s0 + $0x8c] sm:$0x1] }
 0x104   :  { %v2758_v10 = vrot.slane %v2756_v60, 5  ;;  %v2745_v21 = vsel %vm4447_vm3, %v2740_v7, %v2744_v8  ;;  %v3756_v60 = vld [vmem:[%s5198_s0 + $0x78] sm:$0xf]  ;;  %v4241_v8 = vld [vmem:[%s5201_s3 + $0x48] ss:$8 sps:$4 sm:$0xff]   ;;  %v2847_v17 = vrot.slane %v2845_v1, 4 }
 0x105   :  { %3825 = vmatpush1.bf16.msra.mxu1 %v4252_v3  ;;  %v2780_v3 = vrot.slane %v2778_v54, 5  ;;  %v2819_v54 = vrot.slane %v2817_v42, 4  ;;  %v2859_v6 = vshrl.u32 %v3756_v60, 16  ;;  %v2862_v7 = vshll.u32 %v3756_v60, 16 }
 0x106   :  { %v2759_v22 = vsel %vm4447_vm3, %v2754_v9, %v2758_v10  ;;  %v2842_v11 = vrot.slane %v2840_v63, 5 }
 0x107   :  { %3596 = vmatmul.mubr.msk.bf16.gmra.mrb[8].mxu1 %vm192_vm0, %v4230_v55  ;;  %3728 = vmatmul.mubr.msk.bf16.gmra.mrb[24].mxu0 %vm192_vm0, %v4231_v61  ;;  %v2717_v55 = vsel %vm4447_vm3, %v2712_v41, %v2716_v38  ;;  %v3743_v61 = vld [vmem:[%s5198_s0 + $0x3c] sm:$0x1]  ;;  %v2781_v16 = vor.u32 %v2780_v3, %v2777_v2  ;;  %v3764_v32 = vcombine.low %v2745_v21, %v2759_v22  ;;  %v2812_v38 = vshll.u32 %v3749_v28, 16  ;;  %v3758_v21 = vld [vmem:[%s5198_s0 + $0x80] sm:$0xf] }
 0x108   :  { %1239 = vmatprep.mubr.bf16.mxu1 %v4305_v0  ;;  %2601 = vmatprep.mubr.bf16.mxu0 %v4305_v0  ;;  %v3763_v5 = vcombine.low %v2717_v55, %v2731_v57  ;;  %v2795_v41 = vor.u32 %v2794_v30, %v2791_v29  ;;  %v2810_v55 = vrot.slane %v2809_v43, 4  ;;  %v2833_v57 = vrot.slane %v2831_v45, 4  ;;  %v3760_v22 = vld [vmem:[%s5198_s0 + $0x88] sm:$0xf] }
 0x109   :  { %v2782_v27 = vrot.slane %v2781_v16, 4  ;;  %v2814_v52 = vrot.slane %v2812_v38, 5  ;;  %v2823_v3 = vor.u32 %v2822_v56, %v2819_v54  ;;  %v3757_v16 = vld [vmem:[%s5198_s0 + $0x7c] sm:$0x1]  ;;  %v2861_v19 = vrot.slane %v2859_v6, 4 }
 0x10a   :  { %v2796_v51 = vrot.slane %v2795_v41, 4  ;;  %v2864_v20 = vrot.slane %v2862_v7, 5  ;;  %v2873_v28 = vshrl.u32 %v3758_v21, 16  ;;  %v2876_v30 = vshll.u32 %v3758_v21, 16 }
 0x10b   :  { %v2815_v2 = vsel %vm4447_vm3, %v2810_v55, %v2814_v52 }
 0x10c   :  { %v2865_v29 = vor.u32 %v2864_v20, %v2861_v19  ;;  %v2875_v38 = vrot.slane %v2873_v28, 4  ;;  %v2878_v41 = vrot.slane %v2876_v30, 5 }
 0x10f   :  { %3597 = vmatmul.mubr.msk.bf16.gmra.mrb[12].mxu1 %vm192_vm0, %v4235_v12  ;;  %3729 = vmatmul.mubr.msk.bf16.gmra.mrb[28].mxu0 %vm192_vm0, %v4236_v14  ;;  %v2770_v12 = vshll.u32 %v3743_v61, 16  ;;  %v2784_v14 = vshll.u32 %v3745_v62, 16  ;;  %v2826_v62 = vshll.u32 %v3751_v49, 16 }
 0x110   :  { %1249 = vmatprep.mubr.bf16.mxu1 %v4305_v0  ;;  %3029 = vmatprep.mubr.bf16.mxu0 %v4305_v0 }
 0x111   :  { %v2772_v23 = vrot.slane %v2770_v12, 5  ;;  %v2786_v24 = vrot.slane %v2784_v14, 5  ;;  %v2828_v10 = vrot.slane %v2826_v62, 5  ;;  %v3755_v12 = vld [vmem:[%s5198_s0 + $0x74] sm:$0x1]  ;;  %v2824_v14 = vrot.slane %v2823_v3, 4 }
 0x113   :  { %v2773_v39 = vsel %vm4447_vm3, %v2768_v26, %v2772_v23  ;;  %v2854_v23 = vshll.u32 %v3755_v12, 16 }
 0x115   :  { %v2856_v33 = vrot.slane %v2854_v23, 5 }
 0x117   :  { %3598 = vmatmul.mubr.msk.bf16.gmra.mrb[16].mxu1 %vm192_vm0, %v4237_v37  ;;  %3778 = vmatmul.mubr.msk.bf16.vlgmr.msra.gmra.mrb[0].mxu0 %vm192_vm0, %v3762_v40  ;;  %v2798_v37 = vshll.u32 %v3747_v25, 16  ;;  %v2787_v40 = vsel %vm4447_vm3, %v2782_v27, %v2786_v24  ;;  %v2868_v24 = vshll.u32 %v3757_v16, 16  ;;  %v2829_v25 = vsel %vm4447_vm3, %v2824_v14, %v2828_v10 }
 0x118   :  { %1259 = vmatprep.mubr.bf16.mxu1 %v4305_v0  ;;  %3039 = vmatprep.mubr.bf16.mxu0 %v4305_v0  ;;  %v3765_v50 = vcombine.low %v2773_v39, %v2787_v40  ;;  %v2866_v39 = vrot.slane %v2865_v29, 4  ;;  %v3759_v40 = vld [vmem:[%s5198_s0 + $0x84] sm:$0x1] }
 0x119   :  { %v2800_v48 = vrot.slane %v2798_v37, 5  ;;  %v2870_v37 = vrot.slane %v2868_v24, 5  ;;  %v2882_v46 = vshll.u32 %v3759_v40, 16 }
 0x11b   :  { %v2801_v61 = vsel %vm4447_vm3, %v2796_v51, %v2800_v48  ;;  %v2879_v48 = vor.u32 %v2878_v41, %v2875_v38  ;;  %v4243_v51 = vld [vmem:[%s5201_s3 + $0x68] ss:$8 sps:$4 sm:$0xff]   ;;  %v2884_v54 = vrot.slane %v2882_v46, 5 }
 0x11c   :  { %v3766_v9 = vcombine.low %v2801_v61, %v2815_v2  ;;  %v57_v61 = vlaneseq }
 0x11d   :  { %v2880_v53 = vrot.slane %v2879_v48, 4 }
 0x11e   :  { %vm5055_vm4 = vcmp.lt.s32.totalorder %v57_v61, 256 }
 0x11f   :  { %3599 = vmatmul.mubr.msk.bf16.gmra.mrb[20].mxu1 %vm192_vm0, %v4238_v4  ;;  %3779 = vmatmul.mubr.msk.bf16.gmra.mrb[4].mxu0 %vm192_vm0, %v3763_v5  ;;  %v2837_v4 = vor.u32 %v2836_v58, %v2833_v57  ;;  %v2848_v5 = vshll.u32 %v3754_v59, 16  ;;  %v2885_v57 = vsel %vm4447_vm3, %v2880_v53, %v2884_v54  ;;  %v4244_v59 = vld [vmem:[%s5201_s3 + $0x78] ss:$8 sps:$4 sm:$0xff]  }
 0x120   :  { %1269 = vmatprep.mubr.bf16.mxu1 %v4305_v0  ;;  %3049 = vmatprep.mubr.bf16.mxu0 %v4305_v0 }
 0x121   :  { %v2838_v15 = vrot.slane %v2837_v4, 4  ;;  %v2850_v18 = vrot.slane %v2848_v5, 5 }
 0x123   :  { %v2843_v26 = vsel %vm4447_vm3, %v2838_v15, %v2842_v11  ;;  %v2851_v27 = vor.u32 %v2850_v18, %v2847_v17  ;;  %v5077_v11 = vshrl.u32 %v57_v61, 7  ;;  %v3142_v18 = vld [vmem:[#allocation4] sm:$0x3] }
 0x124   :  { %v3767_v35 = vcombine.low %v2829_v25, %v2843_v26 }
 0x125   :  { %v2852_v36 = vrot.slane %v2851_v27, 4  ;;  %v3146_v17 = vsub.s32 0, %v5077_v11  ;;  %v3150_v19 = vsub.s32 1, %v5077_v11 }
 0x127   :  { %3600 = vmatmul.mubr.msk.bf16.gmra.mrb[24].mxu1 %vm192_vm0, %v4239_v31  ;;  %3780 = vmatmul.mubr.msk.bf16.gmra.mrb[8].mxu0 %vm192_vm0, %v3764_v32  ;;  %v2887_v31 = vshrl.u32 %v3760_v22, 16  ;;  %v2890_v32 = vshll.u32 %v3760_v22, 16  ;;  %v2857_v45 = vsel %vm4447_vm3, %v2852_v36, %v2856_v33  ;;  %v5089_v20 = vrot.slane %v3142_v18, %v3146_v17 }
 0x128   :  { %1279 = vmatprep.mubr.bf16.mxu1 %v4305_v0  ;;  %3059 = vmatprep.mubr.bf16.mxu0 %v4305_v0  ;;  %v5091_v22 = vrot.slane %v3142_v18, %v3150_v19 }
 0x129   :  { %v2889_v42 = vrot.slane %v2887_v31, 4  ;;  %v2892_v43 = vrot.slane %v2890_v32, 5 }
 0x12b   :  { %v2893_v49 = vor.u32 %v2892_v43, %v2889_v42 }
 0x12d   :  { %v2894_v55 = vrot.slane %v2893_v49, 4 }
 0x12f   :  { %3601 = vmatmul.mubr.msk.bf16.gmra.mrb[28].mxu1 %vm192_vm0, %v4240_v47  ;;  %3781 = vmatmul.mubr.msk.bf16.gmra.mrb[12].mxu0 %vm192_vm0, %v3765_v50  ;;  %v2871_v47 = vsel %vm4447_vm3, %v2866_v39, %v2870_v37  ;;  %v2896_v50 = vshll.u32 %v3761_v44, 16 }
 0x130   :  { %1523 = vmatprep.mubr.bf16.mxu1 %v4305_v0  ;;  %3069 = vmatprep.mubr.bf16.mxu0 %v4305_v0  ;;  %v3768_v52 = vcombine.low %v2857_v45, %v2871_v47 }
 0x131   :  { %v2898_v56 = vrot.slane %v2896_v50, 5 }
 0x133   :  { %v2899_v58 = vsel %vm4447_vm3, %v2894_v55, %v2898_v56 }
 0x134   :  { %v3769_v60 = vcombine.low %v2885_v57, %v2899_v58 }
 0x137   :  { %3622 = vmatmul.mubr.msk.bf16.vlgmr.msra.gmra.mrb[16].mxu1 %vm192_vm0, %v4241_v8  ;;  %3782 = vmatmul.mubr.msk.bf16.gmra.mrb[16].mxu0 %vm192_vm0, %v3766_v9 }
 0x138   :  { %1533 = vmatprep.mubr.bf16.mxu1 %v4305_v0  ;;  %3079 = vmatprep.mubr.bf16.mxu0 %v4305_v0 }
 0x13f   :  { %3623 = vmatmul.mubr.msk.bf16.gmra.mrb[20].mxu1 %vm192_vm0, %v4242_v34  ;;  %3783 = vmatmul.mubr.msk.bf16.gmra.mrb[20].mxu0 %vm192_vm0, %v3767_v35 }
 0x140   :  { %1543 = vmatprep.mubr.bf16.mxu1 %v4305_v0  ;;  %3089 = vmatprep.mubr.bf16.mxu0 %v4305_v0 }
 0x147   :  { %3624 = vmatmul.mubr.msk.bf16.gmra.mrb[24].mxu1 %vm192_vm0, %v4243_v51  ;;  %3784 = vmatmul.mubr.msk.bf16.gmra.mrb[24].mxu0 %vm192_vm0, %v3768_v52 }
 0x148   :  { %1553 = vmatprep.mubr.bf16.mxu1 %v4305_v0  ;;  %3099 = vmatprep.mubr.bf16.mxu0 %v4305_v0  ;;  %v4306_v0 = vmov 0.0  }
 0x149   :  { %61 = vst.msk [vmem:[%s5205_s7] sm:$0x3] %vm5055_vm4, %v4306_v0  ;;  %62 = vst.msk [vmem:[%s5206_s8] sm:$0x3] %vm5055_vm4, %v4306_v0 }
 0x14f   :  { %3625 = vmatmul.mubr.msk.bf16.gmra.mrb[28].mxu1 %vm192_vm0, %v4244_v59  ;;  %3785 = vmatmul.mubr.msk.bf16.gmra.mrb[28].mxu0 %vm192_vm0, %v3769_v60 }
 0x1ca   :  { %v1211_v13 = vpop.f32.mrb[0].mxu1 }
 0x1cb   :  { %v1213_v63 = vpop.f32.mrb[1].mxu1 }
 0x1cc   :  { %v1215_v1 = vpop.f32.mrb[2].mxu1 }
 0x1cd   :  { %v1217_v2 = vpop.f32.mrb[3].mxu1 }
 0x1d2   :  { %v1221_v3 = vpop.f32.mrb[4].mxu1 }
 0x1d3   :  { %v1223_v4 = vpop.f32.mrb[5].mxu1 }
 0x1d4   :  { %v1225_v5 = vpop.f32.mrb[6].mxu1 }
 0x1d5   :  { %v1227_v6 = vpop.f32.mrb[7].mxu1 }
 0x1da   :  { %v5069_v7 = vpop.f32.mrb[8].mxu1 }
 0x1db   :  { %v5071_v8 = vpop.f32.mrb[9].mxu1 }
 0x1dc   :  { %v5073_v9 = vpop.f32.mrb[10].mxu1 }
 0x1dd   :  { %v5075_v10 = vpop.f32.mrb[11].mxu1 }
 0x1e2   :  { %v5079_v12 = vpop.f32.mrb[12].mxu1 }
 0x1e3   :  { %v5081_v14 = vpop.f32.mrb[13].mxu1 }
 0x1e4   :  { %v5083_v15 = vpop.f32.mrb[14].mxu1 }
 0x1e5   :  { %v5085_v16 = vpop.f32.mrb[15].mxu1 }
 0x1ea   :  { %v3031_v21 = vpop.f32.mrb[0].mxu0 }
 0x1eb   :  { %v3826_v23 = vadd.f32 %v3031_v21, %v1211_v13  ;;  %v3033_v24 = vpop.f32.mrb[1].mxu0 }
 0x1ec   :  { %v3827_v25 = vadd.f32 %v3033_v24, %v1213_v63  ;;  %v3035_v26 = vpop.f32.mrb[2].mxu0 }
 0x1ed   :  { %v3154_v27 = vadd.f32 %v3826_v23, %v5089_v20  ;;  %v3828_v28 = vadd.f32 %v3035_v26, %v1215_v1  ;;  %v3037_v29 = vpop.f32.mrb[3].mxu0 }
 0x1ee   :  { %v3155_v30 = vadd.f32 %v3827_v25, %v5091_v22  ;;  %v3829_v31 = vadd.f32 %v3037_v29, %v1217_v2 }
 0x1ef   :  { %v3186_v32 = vmax.f32 %v3154_v27, 0.0  ;;  %v3156_v33 = vadd.f32 %v3828_v28, %v5089_v20 }
 0x1f0   :  { %v3187_v34 = vmax.f32 %v3155_v30, 0.0  ;;  %v3157_v35 = vadd.f32 %v3829_v31, %v5091_v22 }
 0x1f1   :  { %v3188_v36 = vmax.f32 %v3156_v33, 0.0  ;;  %v3286_v37 = vmul.f32 %v3186_v32, %v3186_v32 }
 0x1f2   :  { %v3802_v38 = vpack.c.bf16 %v3187_v34, %v3186_v32  ;;  %v3189_v39 = vmax.f32 %v3157_v35, 0.0  ;;  %v3041_v40 = vpop.f32.mrb[4].mxu0  ;;  %v3287_v41 = vmul.f32 %v3187_v34, %v3187_v34 }
 0x1f3   :  { %v3219_v42 = vadd.f32 %v3188_v36, %v3186_v32  ;;  %v3288_v43 = vmul.f32 %v3188_v36, %v3188_v36  ;;  %v3830_v44 = vadd.f32 %v3041_v40, %v1221_v3  ;;  %v3043_v45 = vpop.f32.mrb[5].mxu0 }
 0x1f4   :  { %3476 = vst [vmem:[%s5204_s6] sm:$0xff] %v3802_v38  ;;  %v3240_v46 = vadd.f32 %v3189_v39, %v3187_v34  ;;  %v3289_v47 = vmul.f32 %v3189_v39, %v3189_v39  ;;  %v3803_v48 = vpack.c.bf16 %v3189_v39, %v3188_v36  ;;  %v3831_v49 = vadd.f32 %v3043_v45, %v1223_v4  ;;  %v3045_v50 = vpop.f32.mrb[6].mxu0 }
 0x1f5   :  { %v3318_v51 = vadd.f32 %v3288_v43, %v3286_v37  ;;  %v3158_v52 = vadd.f32 %v3830_v44, %v5089_v20  ;;  %v3832_v53 = vadd.f32 %v3045_v50, %v1225_v5  ;;  %v3047_v54 = vpop.f32.mrb[7].mxu0 }
 0x1f6   :  { %v3339_v55 = vadd.f32 %v3289_v47, %v3287_v41  ;;  %3477 = vst [vmem:[%s5204_s6 + $0x8] sm:$0xff] %v3803_v48  ;;  %v3159_v56 = vadd.f32 %v3831_v49, %v5091_v22  ;;  %v3833_v57 = vadd.f32 %v3047_v54, %v1227_v6 }
 0x1f7   :  { %v3190_v58 = vmax.f32 %v3158_v52, 0.0  ;;  %v3160_v59 = vadd.f32 %v3832_v53, %v5089_v20 }
 0x1f8   :  { %v3191_v60 = vmax.f32 %v3159_v56, 0.0  ;;  %v3161_v61 = vadd.f32 %v3833_v57, %v5091_v22 }
 0x1f9   :  { %v3220_v0 = vadd.f32 %v3219_v42, %v3190_v58  ;;  %v3290_v13 = vmul.f32 %v3190_v58, %v3190_v58  ;;  %v3192_v63 = vmax.f32 %v3160_v59, 0.0 }
 0x1fa   :  { %v3241_v1 = vadd.f32 %v3240_v46, %v3191_v60  ;;  %v3291_v2 = vmul.f32 %v3191_v60, %v3191_v60  ;;  %v3804_v3 = vpack.c.bf16 %v3191_v60, %v3190_v58  ;;  %v3193_v4 = vmax.f32 %v3161_v61, 0.0  ;;  %v3051_v5 = vpop.f32.mrb[8].mxu0 }
 0x1fb   :  { %v3319_v17 = vadd.f32 %v3318_v51, %v3290_v13  ;;  %v3221_v18 = vadd.f32 %v3220_v0, %v3192_v63  ;;  %v3292_v19 = vmul.f32 %v3192_v63, %v3192_v63  ;;  %v3834_v21 = vadd.f32 %v3051_v5, %v5069_v7  ;;  %v3053_v6 = vpop.f32.mrb[9].mxu0 }
 0x1fc   :  { %v3340_v23 = vadd.f32 %v3339_v55, %v3291_v2  ;;  %3478 = vst [vmem:[%s5204_s6 + $0x10] sm:$0xff] %v3804_v3  ;;  %v3242_v24 = vadd.f32 %v3241_v1, %v3193_v4  ;;  %v3293_v25 = vmul.f32 %v3193_v4, %v3193_v4  ;;  %v3805_v26 = vpack.c.bf16 %v3193_v4, %v3192_v63  ;;  %v3055_v27 = vpop.f32.mrb[10].mxu0 }
 0x1fd   :  { %v3320_v28 = vadd.f32 %v3319_v17, %v3292_v19  ;;  %v3162_v29 = vadd.f32 %v3834_v21, %v5089_v20  ;;  %v3835_v30 = vadd.f32 %v3053_v6, %v5071_v8  ;;  %v3836_v31 = vadd.f32 %v3055_v27, %v5073_v9  ;;  %v3057_v32 = vpop.f32.mrb[11].mxu0 }
 0x1fe   :  { %v3341_v33 = vadd.f32 %v3340_v23, %v3293_v25  ;;  %3479 = vst [vmem:[%s5204_s6 + $0x18] sm:$0xff] %v3805_v26  ;;  %v3837_v7 = vadd.f32 %v3057_v32, %v5075_v10 }
 0x1ff   :  { %v3194_v34 = vmax.f32 %v3162_v29, 0.0  ;;  %v3163_v35 = vadd.f32 %v3835_v30, %v5091_v22  ;;  %v3164_v36 = vadd.f32 %v3836_v31, %v5089_v20 }
 0x200   :  { %v3165_v37 = vadd.f32 %v3837_v7, %v5091_v22 }
 0x201   :  { %v3222_v38 = vadd.f32 %v3221_v18, %v3194_v34  ;;  %v3294_v39 = vmul.f32 %v3194_v34, %v3194_v34  ;;  %v3195_v8 = vmax.f32 %v3163_v35, 0.0  ;;  %v3196_v40 = vmax.f32 %v3164_v36, 0.0 }
 0x202   :  { %v3197_v9 = vmax.f32 %v3165_v37, 0.0  ;;  %v3061_v41 = vpop.f32.mrb[12].mxu0 }
 0x203   :  { %v3321_v42 = vadd.f32 %v3320_v28, %v3294_v39  ;;  %v3243_v43 = vadd.f32 %v3242_v24, %v3195_v8  ;;  %v3295_v44 = vmul.f32 %v3195_v8, %v3195_v8  ;;  %v3806_v45 = vpack.c.bf16 %v3195_v8, %v3194_v34  ;;  %v3063_v46 = vpop.f32.mrb[13].mxu0 }
 0x204   :  { %v3223_v47 = vadd.f32 %v3222_v38, %v3196_v40  ;;  %v3296_v10 = vmul.f32 %v3196_v40, %v3196_v40  ;;  %v3297_v48 = vmul.f32 %v3197_v9, %v3197_v9  ;;  %v3807_v49 = vpack.c.bf16 %v3197_v9, %v3196_v40  ;;  %v3065_v50 = vpop.f32.mrb[14].mxu0 }
 0x205   :  { %v3342_v51 = vadd.f32 %v3341_v33, %v3295_v44  ;;  %3480 = vst [vmem:[%s5204_s6 + $0x20] sm:$0xff] %v3806_v45  ;;  %v3244_v52 = vadd.f32 %v3243_v43, %v3197_v9  ;;  %v3838_v53 = vadd.f32 %v3061_v41, %v5079_v12  ;;  %v3839_v54 = vadd.f32 %v3063_v46, %v5081_v14  ;;  %v3067_v55 = vpop.f32.mrb[15].mxu0 }
 0x206   :  { %v3322_v56 = vadd.f32 %v3321_v42, %v3296_v10  ;;  %3481 = vst [vmem:[%s5204_s6 + $0x28] sm:$0xff] %v3807_v49  ;;  %v3840_v57 = vadd.f32 %v3065_v50, %v5083_v15  ;;  %v3841_v58 = vadd.f32 %v3067_v55, %v5085_v16 }
 0x207   :  { %v3343_v59 = vadd.f32 %v3342_v51, %v3297_v48  ;;  %v3166_v60 = vadd.f32 %v3838_v53, %v5089_v20  ;;  %v3167_v61 = vadd.f32 %v3839_v54, %v5091_v22 }
 0x208   :  { %v3168_v0 = vadd.f32 %v3840_v57, %v5089_v20  ;;  %v3169_v12 = vadd.f32 %v3841_v58, %v5091_v22 }
 0x209   :  { %v3198_v14 = vmax.f32 %v3166_v60, 0.0  ;;  %v3199_v13 = vmax.f32 %v3167_v61, 0.0 }
 0x20a   :  { %v3200_v63 = vmax.f32 %v3168_v0, 0.0  ;;  %v3201_v1 = vmax.f32 %v3169_v12, 0.0  ;;  %v1525_v2 = vpop.f32.mrb[16].mxu1  ;;  %v3071_v3 = vpop.f32.mrb[16].mxu0 }
 0x20b   :  { %v3224_v4 = vadd.f32 %v3223_v47, %v3198_v14  ;;  %v3298_v5 = vmul.f32 %v3198_v14, %v3198_v14  ;;  %v3245_v15 = vadd.f32 %v3244_v52, %v3199_v13  ;;  %v3299_v17 = vmul.f32 %v3199_v13, %v3199_v13  ;;  %v1527_v16 = vpop.f32.mrb[17].mxu1  ;;  %v3073_v18 = vpop.f32.mrb[17].mxu0 }
 0x20c   :  { %v3808_v19 = vpack.c.bf16 %v3199_v13, %v3198_v14  ;;  %v3300_v21 = vmul.f32 %v3200_v63, %v3200_v63  ;;  %v3301_v6 = vmul.f32 %v3201_v1, %v3201_v1  ;;  %v3809_v23 = vpack.c.bf16 %v3201_v1, %v3200_v63  ;;  %v1529_v24 = vpop.f32.mrb[18].mxu1  ;;  %v3075_v25 = vpop.f32.mrb[18].mxu0 }
 0x20d   :  { %v3323_v26 = vadd.f32 %v3322_v56, %v3298_v5  ;;  %v3344_v27 = vadd.f32 %v3343_v59, %v3299_v17  ;;  %v3225_v28 = vadd.f32 %v3224_v4, %v3200_v63  ;;  %v3246_v29 = vadd.f32 %v3245_v15, %v3201_v1  ;;  %v1531_v30 = vpop.f32.mrb[19].mxu1  ;;  %v3077_v31 = vpop.f32.mrb[19].mxu0 }
 0x20e   :  { %3482 = vst [vmem:[%s5204_s6 + $0x30] sm:$0xff] %v3808_v19  ;;  %3483 = vst [vmem:[%s5204_s6 + $0x38] sm:$0xff] %v3809_v23  ;;  %v3842_v32 = vadd.f32 %v3071_v3, %v1525_v2  ;;  %v3843_v33 = vadd.f32 %v3073_v18, %v1527_v16  ;;  %v3844_v7 = vadd.f32 %v3075_v25, %v1529_v24 }
 0x20f   :  { %v3845_v34 = vadd.f32 %v3077_v31, %v1531_v30  ;;  %v3324_v35 = vadd.f32 %v3323_v26, %v3300_v21  ;;  %v3345_v36 = vadd.f32 %v3344_v27, %v3301_v6 }
 0x210   :  { %v3170_v37 = vadd.f32 %v3842_v32, %v5089_v20  ;;  %v3171_v38 = vadd.f32 %v3843_v33, %v5091_v22  ;;  %v3172_v39 = vadd.f32 %v3844_v7, %v5089_v20 }
 0x211   :  { %v3173_v8 = vadd.f32 %v3845_v34, %v5091_v22 }
 0x212   :  { %v3202_v40 = vmax.f32 %v3170_v37, 0.0  ;;  %v3203_v9 = vmax.f32 %v3171_v38, 0.0  ;;  %v3204_v41 = vmax.f32 %v3172_v39, 0.0  ;;  %v1535_v43 = vpop.f32.mrb[20].mxu1  ;;  %v3081_v44 = vpop.f32.mrb[20].mxu0 }
 0x213   :  { %v3205_v42 = vmax.f32 %v3173_v8, 0.0  ;;  %v3846_v45 = vadd.f32 %v3081_v44, %v1535_v43  ;;  %v1537_v46 = vpop.f32.mrb[21].mxu1  ;;  %v3083_v47 = vpop.f32.mrb[21].mxu0 }
 0x214   :  { %v3226_v10 = vadd.f32 %v3225_v28, %v3202_v40  ;;  %v3302_v48 = vmul.f32 %v3202_v40, %v3202_v40  ;;  %v3247_v49 = vadd.f32 %v3246_v29, %v3203_v9  ;;  %v3303_v50 = vmul.f32 %v3203_v9, %v3203_v9  ;;  %v1539_v51 = vpop.f32.mrb[22].mxu1  ;;  %v3085_v52 = vpop.f32.mrb[22].mxu0 }
 0x215   :  { %v3810_v53 = vpack.c.bf16 %v3203_v9, %v3202_v40  ;;  %v3304_v54 = vmul.f32 %v3204_v41, %v3204_v41  ;;  %v3305_v55 = vmul.f32 %v3205_v42, %v3205_v42  ;;  %v3811_v56 = vpack.c.bf16 %v3205_v42, %v3204_v41  ;;  %v1541_v57 = vpop.f32.mrb[23].mxu1  ;;  %v3087_v58 = vpop.f32.mrb[23].mxu0 }
 0x216   :  { %v3325_v59 = vadd.f32 %v3324_v35, %v3302_v48  ;;  %v3346_v60 = vadd.f32 %v3345_v36, %v3303_v50  ;;  %v3227_v61 = vadd.f32 %v3226_v10, %v3204_v41  ;;  %v3248_v0 = vadd.f32 %v3247_v49, %v3205_v42 }
 0x217   :  { %3484 = vst [vmem:[%s5204_s6 + $0x40] sm:$0xff] %v3810_v53  ;;  %3485 = vst [vmem:[%s5204_s6 + $0x48] sm:$0xff] %v3811_v56  ;;  %v3174_v12 = vadd.f32 %v3846_v45, %v5089_v20  ;;  %v3847_v14 = vadd.f32 %v3083_v47, %v1537_v46  ;;  %v3848_v13 = vadd.f32 %v3085_v52, %v1539_v51 }
 0x218   :  { %v3849_v63 = vadd.f32 %v3087_v58, %v1541_v57  ;;  %v3326_v1 = vadd.f32 %v3325_v59, %v3304_v54  ;;  %v3347_v2 = vadd.f32 %v3346_v60, %v3305_v55 }
 0x219   :  { %v3206_v3 = vmax.f32 %v3174_v12, 0.0  ;;  %v3175_v4 = vadd.f32 %v3847_v14, %v5091_v22  ;;  %v3176_v5 = vadd.f32 %v3848_v13, %v5089_v20 }
 0x21a   :  { %v3177_v15 = vadd.f32 %v3849_v63, %v5091_v22  ;;  %v1545_v17 = vpop.f32.mrb[24].mxu1  ;;  %v3091_v16 = vpop.f32.mrb[24].mxu0 }
 0x21b   :  { %v3228_v18 = vadd.f32 %v3227_v61, %v3206_v3  ;;  %v3306_v19 = vmul.f32 %v3206_v3, %v3206_v3  ;;  %v3207_v21 = vmax.f32 %v3175_v4, 0.0  ;;  %v3208_v6 = vmax.f32 %v3176_v5, 0.0  ;;  %v1547_v23 = vpop.f32.mrb[25].mxu1  ;;  %v3093_v24 = vpop.f32.mrb[25].mxu0 }
 0x21c   :  { %v3209_v25 = vmax.f32 %v3177_v15, 0.0  ;;  %v3850_v26 = vadd.f32 %v3091_v16, %v1545_v17  ;;  %v3851_v27 = vadd.f32 %v3093_v24, %v1547_v23  ;;  %v1549_v28 = vpop.f32.mrb[26].mxu1  ;;  %v3095_v29 = vpop.f32.mrb[26].mxu0 }
 0x21d   :  { %v3327_v30 = vadd.f32 %v3326_v1, %v3306_v19  ;;  %v3249_v31 = vadd.f32 %v3248_v0, %v3207_v21  ;;  %v3307_v32 = vmul.f32 %v3207_v21, %v3207_v21  ;;  %v3812_v33 = vpack.c.bf16 %v3207_v21, %v3206_v3  ;;  %v1551_v7 = vpop.f32.mrb[27].mxu1  ;;  %v3097_v34 = vpop.f32.mrb[27].mxu0 }
 0x21e   :  { %v3229_v35 = vadd.f32 %v3228_v18, %v3208_v6  ;;  %v3308_v36 = vmul.f32 %v3208_v6, %v3208_v6  ;;  %v3309_v37 = vmul.f32 %v3209_v25, %v3209_v25  ;;  %v3813_v38 = vpack.c.bf16 %v3209_v25, %v3208_v6 }
 0x21f   :  { %v3348_v39 = vadd.f32 %v3347_v2, %v3307_v32  ;;  %3486 = vst [vmem:[%s5204_s6 + $0x50] sm:$0xff] %v3812_v33  ;;  %v3250_v8 = vadd.f32 %v3249_v31, %v3209_v25  ;;  %v3178_v40 = vadd.f32 %v3850_v26, %v5089_v20  ;;  %v3179_v9 = vadd.f32 %v3851_v27, %v5091_v22 }
 0x220   :  { %v3328_v41 = vadd.f32 %v3327_v30, %v3308_v36  ;;  %3487 = vst [vmem:[%s5204_s6 + $0x58] sm:$0xff] %v3813_v38  ;;  %v3852_v42 = vadd.f32 %v3095_v29, %v1549_v28  ;;  %v3853_v43 = vadd.f32 %v3097_v34, %v1551_v7 }
 0x221   :  { %v3349_v44 = vadd.f32 %v3348_v39, %v3309_v37  ;;  %v3210_v45 = vmax.f32 %v3178_v40, 0.0  ;;  %v3211_v46 = vmax.f32 %v3179_v9, 0.0 }
 0x222   :  { %v3180_v47 = vadd.f32 %v3852_v42, %v5089_v20  ;;  %v3181_v10 = vadd.f32 %v3853_v43, %v5091_v22  ;;  %v1555_v48 = vpop.f32.mrb[28].mxu1  ;;  %v3101_v49 = vpop.f32.mrb[28].mxu0  ;;  %v4307_v42 = vmov 1966171168  }
 0x223   :  { %v3230_v50 = vadd.f32 %v3229_v35, %v3210_v45  ;;  %v3310_v51 = vmul.f32 %v3210_v45, %v3210_v45  ;;  %v3251_v52 = vadd.f32 %v3250_v8, %v3211_v46  ;;  %v3311_v53 = vmul.f32 %v3211_v46, %v3211_v46  ;;  %v1557_v54 = vpop.f32.mrb[29].mxu1  ;;  %v3103_v55 = vpop.f32.mrb[29].mxu0 }
 0x224   :  { %v3814_v56 = vpack.c.bf16 %v3211_v46, %v3210_v45  ;;  %v3212_v57 = vmax.f32 %v3180_v47, 0.0  ;;  %v3213_v58 = vmax.f32 %v3181_v10, 0.0  ;;  %v3854_v59 = vadd.f32 %v3101_v49, %v1555_v48  ;;  %v1559_v60 = vpop.f32.mrb[30].mxu1  ;;  %v3105_v61 = vpop.f32.mrb[30].mxu0 }
 0x225   :  { %v3329_v0 = vadd.f32 %v3328_v41, %v3310_v51  ;;  %v3350_v12 = vadd.f32 %v3349_v44, %v3311_v53  ;;  %v3855_v14 = vadd.f32 %v3103_v55, %v1557_v54  ;;  %v3856_v13 = vadd.f32 %v3105_v61, %v1559_v60  ;;  %v1561_v63 = vpop.f32.mrb[31].mxu1  ;;  %v3107_v1 = vpop.f32.mrb[31].mxu0 }
 0x226   :  { %3488 = vst [vmem:[%s5204_s6 + $0x60] sm:$0xff] %v3814_v56  ;;  %v3231_v2 = vadd.f32 %v3230_v50, %v3212_v57  ;;  %v3312_v3 = vmul.f32 %v3212_v57, %v3212_v57  ;;  %v3252_v4 = vadd.f32 %v3251_v52, %v3213_v58  ;;  %v3313_v5 = vmul.f32 %v3213_v58, %v3213_v58 }
 0x227   :  { %v3815_v15 = vpack.c.bf16 %v3213_v58, %v3212_v57  ;;  %v3182_v17 = vadd.f32 %v3854_v59, %v5089_v20  ;;  %v3183_v16 = vadd.f32 %v3855_v14, %v5091_v22  ;;  %v3184_v18 = vadd.f32 %v3856_v13, %v5089_v20 }
 0x228   :  { %v3330_v19 = vadd.f32 %v3329_v0, %v3312_v3  ;;  %v3351_v21 = vadd.f32 %v3350_v12, %v3313_v5  ;;  %v3857_v6 = vadd.f32 %v3107_v1, %v1561_v63  ;;  %v3265_v43 = vunpack.c.l.s4 %v4307_v42  ;;  %v3218_v1 = vld [vmem:[%s5205_s7] sm:$0x3] }
 0x229   :  { %3489 = vst [vmem:[%s5204_s6 + $0x68] sm:$0xff] %v3815_v15  ;;  %v3214_v23 = vmax.f32 %v3182_v17, 0.0  ;;  %v3215_v24 = vmax.f32 %v3183_v16, 0.0  ;;  %v3216_v25 = vmax.f32 %v3184_v18, 0.0 }
 0x22a   :  { %v3185_v26 = vadd.f32 %v3857_v6, %v5091_v22  ;;  %v3266_v51 = vunpack.c.0.s8 %v3265_v43 }
 0x22b   :  { %v3232_v27 = vadd.f32 %v3231_v2, %v3214_v23  ;;  %v3314_v28 = vmul.f32 %v3214_v23, %v3214_v23  ;;  %v3253_v29 = vadd.f32 %v3252_v4, %v3215_v24  ;;  %v3315_v30 = vmul.f32 %v3215_v24, %v3215_v24  ;;  %v3285_v4 = vld [vmem:[%s5206_s8] sm:$0x3] }
 0x22c   :  { %v3816_v31 = vpack.c.bf16 %v3215_v24, %v3214_v23  ;;  %v3316_v32 = vmul.f32 %v3216_v25, %v3216_v25  ;;  %v3217_v33 = vmax.f32 %v3185_v26, 0.0  ;;  %v3269_v60 = vsub.s32 %v3266_v51, %v5077_v11 }
 0x22d   :  { %v3331_v20 = vadd.f32 %v3330_v19, %v3314_v28  ;;  %v3352_v7 = vadd.f32 %v3351_v21, %v3315_v30  ;;  %v3233_v34 = vadd.f32 %v3232_v27, %v3216_v25 }
 0x22e   :  { %3490 = vst [vmem:[%s5204_s6 + $0x70] sm:$0xff] %v3816_v31  ;;  %v3254_v35 = vadd.f32 %v3253_v29, %v3217_v33  ;;  %v3317_v36 = vmul.f32 %v3217_v33, %v3217_v33  ;;  %v3817_v37 = vpack.c.bf16 %v3217_v33, %v3216_v25 }
 0x22f   :  { %v3234_v38 = vrot.slane %v3233_v34, 4  ;;  %v3332_v39 = vadd.f32 %v3331_v20, %v3316_v32 }
 0x230   :  { %v3255_v22 = vrot.slane %v3254_v35, 4  ;;  %v3353_v8 = vadd.f32 %v3352_v7, %v3317_v36  ;;  %3491 = vst [vmem:[%s5204_s6 + $0x78] sm:$0xff] %v3817_v37 }
 0x231   :  { %v3235_v40 = vadd.f32 %v3234_v38, %v3233_v34  ;;  %v3333_v9 = vrot.slane %v3332_v39, 4 }
 0x232   :  { %v3256_v41 = vadd.f32 %v3255_v22, %v3254_v35  ;;  %v3354_v44 = vrot.slane %v3353_v8, 4 }
 0x233   :  { %v3236_v45 = vrot.slane %v3235_v40, 2  ;;  %v3334_v46 = vadd.f32 %v3333_v9, %v3332_v39 }
 0x234   :  { %v3257_v47 = vrot.slane %v3256_v41, 2  ;;  %v3355_v10 = vadd.f32 %v3354_v44, %v3353_v8 }
 0x235   :  { %v3237_v48 = vadd.f32 %v3236_v45, %v3235_v40  ;;  %v3335_v49 = vrot.slane %v3334_v46, 2 }
 0x236   :  { %v3258_v50 = vadd.f32 %v3257_v47, %v3256_v41  ;;  %v3356_v52 = vrot.slane %v3355_v10, 2 }
 0x237   :  { %v3238_v53 = vrot.slane %v3237_v48, 1  ;;  %v3336_v54 = vadd.f32 %v3335_v49, %v3334_v46 }
 0x238   :  { %v3259_v55 = vrot.slane %v3258_v50, 1  ;;  %v3357_v56 = vadd.f32 %v3356_v52, %v3355_v10 }
 0x239   :  { %v3239_v57 = vadd.f32 %v3238_v53, %v3237_v48  ;;  %v3337_v58 = vrot.slane %v3336_v54, 1 }
 0x23a   :  { %v3260_v59 = vadd.f32 %v3259_v55, %v3258_v50  ;;  %v3358_v61 = vrot.slane %v3357_v56, 1 }
 0x23b   :  { %v3338_v0 = vadd.f32 %v3337_v58, %v3336_v54 }
 0x23c   :  { %v3263_v12 = vcombine.low %v3239_v57, %v3260_v59  ;;  %v3359_v14 = vadd.f32 %v3358_v61, %v3357_v56 }
 0x23e   :  { %v3270_v13 = vrot.slane %v3263_v12, %v3269_v60  ;;  %v3362_v63 = vcombine.low %v3338_v0, %v3359_v14 }
 0x240   :  { %v3277_v2 = vrot.slane %v3270_v13, %v3269_v60  ;;  %v3369_v3 = vrot.slane %v3362_v63, %v3269_v60 }
 0x242   :  { %v3279_v5 = vadd.f32 %v3277_v2, %v3218_v1  ;;  %v3376_v15 = vrot.slane %v3369_v3, %v3269_v60 }
 0x244   :  { %3284 = vst.msk [vmem:[%s5205_s7] sm:$0x3] %vm5055_vm4, %v3279_v5  ;;  %v3378_v11 = vadd.f32 %v3376_v15, %v3285_v4 }
 0x246   :  { %3379 = vst.msk [vmem:[%s5206_s8] sm:$0x3] %vm5055_vm4, %v3378_v11 }
 0x247   :  { %3504 = vsyncpa [#allocation3], 1 }
 0x248   :  { %3505 = vsyncpa [#allocation5], 1 }

// kernel: hebb3ff_forward.5
= control target key start
LH: loop header
LB: loop body
LE: loop exit
PB: predicated region body
PF: predicated region fallthrough
CT: control target
= control target key end

     0   :  { %10 = vsyncpa [#allocation4], 0  ;;  %s9166_s18 = smov 0   ;;  %s10187_s0 = inlined_call_operand.vmem [shape: bf16[2,16384], index: 0, kind: input, shape index: {}]   ;;  %s10188_s1 = inlined_call_operand.vmem [shape: f32[1,16384], index: 1, kind: input, shape index: {}]   ;;  %s10189_s2 = inlined_call_operand.vmem [shape: f32[1,16384], index: 2, kind: input, shape index: {}]   ;;  %s10190_s3 = inlined_call_operand.vmem [shape: bf16[16384,128], index: 3, kind: input, shape index: {}]   ;;  %s10191_s4 = inlined_call_operand.vmem [shape: f32[1,128], index: 4, kind: input, shape index: {}]   ;;  %s10192_s5 = inlined_call_operand.hbm [shape: f32[2,128], index: 5, kind: output, shape index: {}]  }
   0x1 LB: > { %s9172_s19 = sadd.s32 4294967295, %s9131_s18   ;;  %p7337_p0 = scmp.ge.s32.totalorder %s9131_s18, 1  ;;  %s9131_s18 = sphi %s9166_s18, %s16_s18  }
   0x2   : > { %p214_p1 = scmp.lt.s32.totalorder %s9131_s18, 3 }
   0x4   : > { %p215_p2 = pnand %p7337_p0, %p214_p1 }
   0x5   : > { %s7338_s20 = sshll.u32 (!%p215_p2), %s9172_s19, 6  ;;  %s7341_s21 = sshll.u32 (!%p215_p2), %s9172_s19, 10 }
   0x6   : > { %218 = sbr.rel (%p215_p2) target bundleno = 797 (0x31d), region = 40  ;;  %p250_p3 = scmp.lt.s32.totalorder (!%p215_p2), %s7338_s20, 127 }
   0x7   : > { %p265_p4 = scmp.lt.s32.totalorder (!%p215_p2), %s7341_s21, 2047  ;;  %p7343_p5 = scmp.ne.s32.totalorder (!%p215_p2), %s9172_s19, 0 }
   0xd   : > { %s10194_s20 = smov (!%p250_p3, %s7338_s20), 127  ;;  %s10196_s21 = smov (!%p265_p4, %s7341_s21), 2047 }
   0xe   : > { %s9181_s24 = scalar_lea.vmem %s10187_s0, %s10194_s20  ;;  %s9186_s27 = scalar_lea.vmem %s10188_s1, %s10194_s20  ;;  %v9133_v0 = vmov (!%p7343_p5), 0.0  }
   0xf   : > { %s9191_s30 = scalar_lea.vmem %s10189_s2, %s10194_s20  ;;  %s7342_s6 = sshll.u32 %s10196_s21, 2  ;;  %275 = vst [vmem:[#allocation2] sm:$0x3] (!%p7343_p5), %v9133_v0 }
  0x10   : > { %s9196_s9 = scalar_lea.vmem %s10190_s3, %s7342_s6  ;;  %274 = sbr.rel (%p7343_p5) target bundleno = 23 (0x17), region = 44 }
  0x17 PF: > { %v8583_v1 = vld [vmem:[%s9196_s9 + $0x40] sm:$0xff]   ;;  %v8587_v5 = vld [vmem:[%s9196_s9 + $0x48] sm:$0xff]   ;;  %v8591_v9 = vld [vmem:[%s9196_s9 + $0x50] sm:$0xff]   ;;  %v316_v20 = vlaneseq  ;;  %v9134_v52 = vmov 1983009808   ;;  %p7856_p6 = scmp.ne.s32.totalorder %s9172_s19, 1 }
  0x18   : > { %v8584_v2 = vld [vmem:[%s9196_s9 + $0xc0] sm:$0xff]   ;;  %7862 = vmatprep.subr.bf16.mxu0 %v8583_v1  ;;  %v8588_v6 = vld [vmem:[%s9196_s9 + $0xc8] sm:$0xff]   ;;  %v8592_v10 = vld [vmem:[%s9196_s9 + $0xd0] sm:$0xff]   ;;  %v575_v53 = vunpack.c.l.s4 %v9134_v52 }
  0x19   : > { %v8585_v3 = vld [vmem:[%s9196_s9] sm:$0xff]   ;;  %7884 = vmatprep.subr.bf16.mxu1 %v8584_v2  ;;  %v8589_v7 = vld [vmem:[%s9196_s9 + $0x8] sm:$0xff]   ;;  %v8593_v11 = vld [vmem:[%s9196_s9 + $0x10] sm:$0xff]   ;;  %v317_v25 = vshrl.u32 %v316_v20, 7 }
  0x1a   : > { %v8586_v4 = vld [vmem:[%s9196_s9 + $0x80] sm:$0xff]   ;;  %7863 = vmatpush3.bf16.msra.mxu0 %v8585_v3  ;;  %v8590_v8 = vld [vmem:[%s9196_s9 + $0x88] sm:$0xff]   ;;  %v8594_v12 = vld [vmem:[%s9196_s9 + $0x90] sm:$0xff]   ;;  %v576_v61 = vunpack.c.0.s8 %v575_v53 }
  0x1b   : > { %7885 = vmatpush3.bf16.msra.mxu1 %v8586_v4  ;;  %7864 = vmatprep.subr.bf16.mxu0 %v8587_v5  ;;  %v8595_v13 = vld [vmem:[%s9196_s9 + $0x58] sm:$0xff]   ;;  %v8599_v17 = vld [vmem:[%s9196_s9 + $0x60] sm:$0xff]   ;;  %v8603_v22 = vld [vmem:[%s9196_s9 + $0x68] sm:$0xff]   ;;  %v9226_v30 = vsub.s32 0, %v317_v25  ;;  %v9229_v32 = vsub.s32 1, %v317_v25  ;;  %v9232_v34 = vsub.s32 2, %v317_v25 }
  0x1c   : > { %7886 = vmatprep.subr.bf16.mxu1 %v8588_v6  ;;  %v8596_v14 = vld [vmem:[%s9196_s9 + $0xd8] sm:$0xff]   ;;  %v8600_v18 = vld [vmem:[%s9196_s9 + $0xe0] sm:$0xff]   ;;  %v8604_v23 = vld [vmem:[%s9196_s9 + $0xe8] sm:$0xff]   ;;  %v9235_v36 = vsub.s32 3, %v317_v25  ;;  %v9238_v38 = vsub.s32 4, %v317_v25  ;;  %v9241_v40 = vsub.s32 5, %v317_v25  ;;  %v9264_v4 = vsub.s32 %v576_v61, %v317_v25 }
  0x1d   : > { %v8597_v15 = vld [vmem:[%s9196_s9 + $0x18] sm:$0xff]   ;;  %v8601_v19 = vld [vmem:[%s9196_s9 + $0x20] sm:$0xff]   ;;  %v8605_v24 = vld [vmem:[%s9196_s9 + $0x28] sm:$0xff]   ;;  %v9246_v44 = vsub.s32 6, %v317_v25  ;;  %v9251_v49 = vsub.s32 7, %v317_v25 }
  0x1e   : > { %7865 = vmatpush3.bf16.msra.mxu0 %v8589_v7  ;;  %v8598_v16 = vld [vmem:[%s9196_s9 + $0x98] sm:$0xff]   ;;  %v8602_v21 = vld [vmem:[%s9196_s9 + $0xa0] sm:$0xff]   ;;  %v8606_v26 = vld [vmem:[%s9196_s9 + $0xa8] sm:$0xff]  }
  0x1f   : > { %7887 = vmatpush3.bf16.msra.mxu1 %v8590_v8  ;;  %7866 = vmatprep.subr.bf16.mxu0 %v8591_v9  ;;  %v8607_v27 = vld [vmem:[%s9196_s9 + $0x70] sm:$0xff]   ;;  %v8611_v33 = vld [vmem:[%s9196_s9 + $0x78] sm:$0xff]   ;;  %v276_v41 = vld [vmem:[%s9181_s24] sm:$0xff] }
  0x20   : > { %7888 = vmatprep.subr.bf16.mxu1 %v8592_v10  ;;  %v8608_v28 = vld [vmem:[%s9196_s9 + $0xf0] sm:$0xff]   ;;  %v8612_v35 = vld [vmem:[%s9196_s9 + $0xf8] sm:$0xff]   ;;  %v300_v42 = vld [vmem:[%s9186_s27] sm:$0xff]  ;;  %v284_v45 = vunpack.c.l.bf16 %v276_v41  ;;  %v285_v8 = vunpack.c.h.bf16 %v276_v41 }
  0x21   : > { %v8609_v29 = vld [vmem:[%s9196_s9 + $0x30] sm:$0xff]   ;;  %v8613_v37 = vld [vmem:[%s9196_s9 + $0x38] sm:$0xff]   ;;  %v876_v43 = vld [vmem:[%s9191_s30] sm:$0xff]  ;;  %v319_v46 = vrot.slane %v300_v42, %v9226_v30  ;;  %v323_v47 = vrot.slane %v300_v42, %v9229_v32  ;;  %v327_v50 = vrot.slane %v300_v42, %v9232_v34  ;;  %v331_v51 = vrot.slane %v300_v42, %v9235_v36 }
  0x22   : > { %7867 = vmatpush3.bf16.msra.mxu0 %v8593_v11  ;;  %v8610_v31 = vld [vmem:[%s9196_s9 + $0xb0] sm:$0xff]   ;;  %v8614_v39 = vld [vmem:[%s9196_s9 + $0xb8] sm:$0xff]   ;;  %v8615_v48 = vld [vmem:[%s9196_s9 + $0x140] sm:$0xff]   ;;  %v895_v54 = vrot.slane %v876_v43, %v9226_v30  ;;  %v899_v57 = vrot.slane %v876_v43, %v9229_v32  ;;  %v903_v58 = vrot.slane %v876_v43, %v9232_v34  ;;  %v907_v59 = vrot.slane %v876_v43, %v9235_v36 }
  0x23   : > { %7889 = vmatpush3.bf16.msra.mxu1 %v8594_v12  ;;  %7868 = vmatprep.subr.bf16.mxu0 %v8595_v13  ;;  %v8616_v55 = vld [vmem:[%s9196_s9 + $0x1c0] sm:$0xff]   ;;  %v572_v56 = vcombine.low %v319_v46, %v323_v47  ;;  %v573_v60 = vcombine.low %v327_v50, %v331_v51  ;;  %v335_v62 = vrot.slane %v300_v42, %v9238_v38  ;;  %v8619_v52 = vld [vmem:[%s9196_s9 + $0x148] sm:$0xff]   ;;  %v8624_v61 = vld [vmem:[%s9196_s9 + $0x1d0] sm:$0xff]  }
  0x24   : > { %7890 = vmatprep.subr.bf16.mxu1 %v8596_v14  ;;  %v339_v63 = vrot.slane %v300_v42, %v9241_v40  ;;  %v1148_v0 = vcombine.low %v895_v54, %v899_v57  ;;  %v1149_v1 = vcombine.low %v903_v58, %v907_v59  ;;  %v343_v2 = vrot.slane %v300_v42, %v9246_v44  ;;  %v8618_v50 = vld [vmem:[%s9196_s9 + $0x180] sm:$0xff]   ;;  %v8621_v57 = vld [vmem:[%s9196_s9 + $0x108] sm:$0xff]  }
  0x25   : > { %v347_v3 = vrot.slane %v300_v42, %v9251_v49  ;;  %v911_v6 = vrot.slane %v876_v43, %v9238_v38  ;;  %v915_v7 = vrot.slane %v876_v43, %v9241_v40  ;;  %v919_v10 = vrot.slane %v876_v43, %v9246_v44  ;;  %v8622_v59 = vld [vmem:[%s9196_s9 + $0x188] sm:$0xff]  }
  0x26   : > { %7869 = vmatpush3.bf16.msra.mxu0 %v8597_v15  ;;  %v589_v5 = vcombine.low %v335_v62, %v339_v63  ;;  %v923_v11 = vrot.slane %v876_v43, %v9251_v49  ;;  %v580_v12 = vrot.slane %v572_v56, %v9264_v4  ;;  %v587_v13 = vrot.slane %v573_v60, %v9264_v4  ;;  %v8617_v43 = vld [vmem:[%s9196_s9 + $0x100] sm:$0xff]   ;;  %v8623_v60 = vld [vmem:[%s9196_s9 + $0x150] sm:$0xff]  }
  0x27   : > { %7891 = vmatpush3.bf16.msra.mxu1 %v8598_v16  ;;  %7870 = vmatprep.subr.bf16.mxu0 %v8599_v17  ;;  %v590_v9 = vcombine.low %v343_v2, %v347_v3  ;;  %v1156_v14 = vrot.slane %v1148_v0, %v9264_v4  ;;  %v1163_v15 = vrot.slane %v1149_v1, %v9264_v4  ;;  %v8625_v62 = vld [vmem:[%s9196_s9 + $0x110] sm:$0xff]   ;;  %v8627_v0 = vld [vmem:[%s9196_s9 + $0x158] sm:$0xff]  }
  0x28   : > { %7892 = vmatprep.subr.bf16.mxu1 %v8600_v18  ;;  %v597_v16 = vrot.slane %v589_v5, %v9264_v4  ;;  %v1165_v18 = vcombine.low %v911_v6, %v915_v7  ;;  %v588_v20 = vcombine.low %v580_v12, %v587_v13  ;;  %v8626_v63 = vld [vmem:[%s9196_s9 + $0x190] sm:$0xff]   ;;  %v8628_v1 = vld [vmem:[%s9196_s9 + $0x1d8] sm:$0xff]   ;;  %v8631_v5 = vld [vmem:[%s9196_s9 + $0x160] sm:$0xff]  }
  0x29   : > { %v604_v17 = vrot.slane %v590_v9, %v9264_v4  ;;  %v8629_v2 = vld [vmem:[%s9196_s9 + $0x118] sm:$0xff]   ;;  %v8632_v6 = vld [vmem:[%s9196_s9 + $0x1e0] sm:$0xff]   ;;  %v8635_v9 = vld [vmem:[%s9196_s9 + $0x168] sm:$0xff]  }
  0x2a   : > { %7871 = vmatpush3.bf16.msra.mxu0 %v8601_v19  ;;  %v1166_v19 = vcombine.low %v919_v10, %v923_v11  ;;  %v860_v25 = vmul.f32 %v588_v20, %v284_v45  ;;  %v8630_v3 = vld [vmem:[%s9196_s9 + $0x198] sm:$0xff]   ;;  %v8633_v7 = vld [vmem:[%s9196_s9 + $0x120] sm:$0xff]   ;;  %v8636_v10 = vld [vmem:[%s9196_s9 + $0x1e8] sm:$0xff]  }
  0x2b   : > { %7893 = vmatpush3.bf16.msra.mxu1 %v8602_v21  ;;  %7872 = vmatprep.subr.bf16.mxu0 %v8603_v22  ;;  %v1164_v21 = vcombine.low %v1156_v14, %v1163_v15  ;;  %v605_v22 = vcombine.low %v597_v16, %v604_v17  ;;  %v8637_v11 = vld [vmem:[%s9196_s9 + $0x128] sm:$0xff]   ;;  %v8639_v13 = vld [vmem:[%s9196_s9 + $0x170] sm:$0xff]   ;;  %v8643_v17 = vld [vmem:[%s9196_s9 + $0x178] sm:$0xff]  }
  0x2c   : > { %7894 = vmatprep.subr.bf16.mxu1 %v8604_v23  ;;  %v1173_v23 = vrot.slane %v1165_v18, %v9264_v4  ;;  %v8638_v12 = vld [vmem:[%s9196_s9 + $0x1a8] sm:$0xff]   ;;  %v8640_v14 = vld [vmem:[%s9196_s9 + $0x1f0] sm:$0xff]   ;;  %v8644_v18 = vld [vmem:[%s9196_s9 + $0x1f8] sm:$0xff]  }
  0x2d   : > { %v8641_v15 = vld [vmem:[%s9196_s9 + $0x130] sm:$0xff]   ;;  %v8646_v20 = vld [vmem:[%s9196_s9 + $0x1b8] sm:$0xff]  }
  0x2e   : > { %7873 = vmatpush3.bf16.msra.mxu0 %v8605_v24  ;;  %v1180_v24 = vrot.slane %v1166_v19, %v9264_v4  ;;  %v8642_v16 = vld [vmem:[%s9196_s9 + $0x1b0] sm:$0xff]   ;;  %v8645_v19 = vld [vmem:[%s9196_s9 + $0x138] sm:$0xff]  }
  0x2f   : > { %7895 = vmatpush3.bf16.msra.mxu1 %v8606_v26  ;;  %7874 = vmatprep.subr.bf16.mxu0 %v8607_v27  ;;  %v861_v26 = vmul.f32 %v605_v22, %v285_v8  ;;  %v8634_v8 = vld [vmem:[%s9196_s9 + $0x1a0] sm:$0xff]  }
  0x30   : > { %7896 = vmatprep.subr.bf16.mxu1 %v8608_v28  ;;  %v1181_v27 = vcombine.low %v1173_v23, %v1180_v24  ;;  %v1436_v28 = vadd.f32 %v1164_v21, %v860_v25  ;;  %v8647_v21 = vld [vmem:[%s9196_s9 + $0x240] sm:$0xff]  }
  0x31   : > { %v8648_v22 = vld [vmem:[%s9196_s9 + $0x2c0] sm:$0xff]  }
  0x32   : > { %7875 = vmatpush3.bf16.msra.mxu0 %v8609_v29  ;;  %v1437_v29 = vadd.f32 %v1181_v27, %v861_v26  ;;  %v8649_v24 = vld [vmem:[%s9196_s9 + $0x200] sm:$0xff]   ;;  %v8651_v27 = vld [vmem:[%s9196_s9 + $0x248] sm:$0xff]  }
  0x33   : > { %7897 = vmatpush3.bf16.msra.mxu1 %v8610_v31  ;;  %7876 = vmatprep.subr.bf16.mxu0 %v8611_v33  ;;  %v1475_v31 = vrot.slane %v1436_v28, %v9264_v4  ;;  %v1468_v33 = vcombine.high %v1436_v28, %v1436_v28  ;;  %v8650_v25 = vld [vmem:[%s9196_s9 + $0x280] sm:$0xff]   ;;  %v8652_v28 = vld [vmem:[%s9196_s9 + $0x2c8] sm:$0xff]  }
  0x34   : > { %7898 = vmatprep.subr.bf16.mxu1 %v8612_v35  ;;  %v9280_v35 = vrot.slane %v1437_v29, %v9264_v4 }
  0x35   : > { %v1482_v41 = vrot.slane %v1468_v33, %v9264_v4  ;;  %v1804_v42 = vpack.c.bf16 %v1475_v31, %v1475_v31  ;;  %v8655_v33 = vld [vmem:[%s9196_s9 + $0x250] sm:$0xff]  }
  0x36   : > { %7877 = vmatpush3.bf16.msra.mxu0 %v8613_v37  ;;  %v1485_v37 = vcombine.high %v1437_v29, %v1437_v29  ;;  %v1500_v45 = vcombine.high %v9280_v35, %v9280_v35  ;;  %v1808_v23 = vpack.c.bf16 %v9280_v35, %v9280_v35  ;;  %v8653_v29 = vld [vmem:[%s9196_s9 + $0x208] sm:$0xff]   ;;  %v8656_v35 = vld [vmem:[%s9196_s9 + $0x2d0] sm:$0xff]  }
  0x37   : > { %7899 = vmatpush3.bf16.msra.mxu1 %v8614_v39  ;;  %7906 = vmatprep.subr.bf16.mxu0 %v8615_v48  ;;  %v1483_v39 = vcombine.high %v1475_v31, %v1475_v31  ;;  %v1484_v48 = vcombine.high %v1482_v41, %v1482_v41  ;;  %v1806_v51 = vpack.c.bf16 %v1482_v41, %v1482_v41  ;;  %v8654_v31 = vld [vmem:[%s9196_s9 + $0x288] sm:$0xff]   ;;  %v8659_v41 = vld [vmem:[%s9196_s9 + $0x258] sm:$0xff]  }
  0x38   : > { %7928 = vmatprep.subr.bf16.mxu1 %v8616_v55  ;;  %v9287_v46 = vrot.slane %v1485_v37, %v9264_v4  ;;  %v8620_v55 = vld [vmem:[%s9196_s9 + $0x1c8] sm:$0xff]   ;;  %v1809_v56 = vpack.c.bf16 %v1500_v45, %v1500_v45  ;;  %v8657_v37 = vld [vmem:[%s9196_s9 + $0x210] sm:$0xff]   ;;  %v8662_v45 = vld [vmem:[%s9196_s9 + $0x298] sm:$0xff]  }
  0x39   : > { %v1805_v47 = vpack.c.bf16 %v1483_v39, %v1483_v39  ;;  %v1807_v54 = vpack.c.bf16 %v1484_v48, %v1484_v48  ;;  %v8658_v39 = vld [vmem:[%s9196_s9 + $0x290] sm:$0xff]   ;;  %v301_v48 = vld [vmem:[%s9186_s27 + $0x8] sm:$0xff] }
  0x3a   : > { %v1501_v53 = vcombine.high %v9287_v46, %v9287_v46  ;;  %v1810_v26 = vpack.c.bf16 %v9287_v46, %v9287_v46  ;;  %v8663_v46 = vld [vmem:[%s9196_s9 + $0x260] sm:$0xff]  }
  0x3b   : > { %5997 = vmatprep.mubr.bf16.mxu0 %v1805_v47  ;;  %6037 = vmatprep.mubr.bf16.mxu1 %v1807_v54  ;;  %v9342_v47 = vld [vmem:[%s9181_s24 + $0x8] sm:$0xff]  ;;  %v359_v54 = vrot.slane %v301_v48, %v9232_v34 }
  0x3c   : > { %5998 = vmatmul.mubr.bf16.vlgmr.msra.gmra.mrb[0].mxu0 %v1804_v42  ;;  %v1811_v58 = vpack.c.bf16 %v1501_v53, %v1501_v53  ;;  %6038 = vmatmul.mubr.bf16.vlgmr.msra.gmra.mrb[0].mxu1 %v1806_v51  ;;  %v8660_v42 = vld [vmem:[%s9196_s9 + $0x2d8] sm:$0xff]   ;;  %v8664_v51 = vld [vmem:[%s9196_s9 + $0x2e0] sm:$0xff]   ;;  %v355_v53 = vrot.slane %v301_v48, %v9229_v32 }
  0x3d   : > { %7907 = vmatpush3.bf16.msra.mxu0 %v8617_v43  ;;  %7929 = vmatpush3.bf16.msra.mxu1 %v8618_v50  ;;  %v8661_v43 = vld [vmem:[%s9196_s9 + $0x218] sm:$0xff]   ;;  %v877_v50 = vld [vmem:[%s9191_s30 + $0x8] sm:$0xff] }
  0x3e   : > { %7908 = vmatprep.subr.bf16.mxu0 %v8619_v52  ;;  %6077 = vmatprep.mubr.bf16.mxu0 %v1809_v56  ;;  %v351_v52 = vrot.slane %v301_v48, %v9226_v30  ;;  %v363_v56 = vrot.slane %v301_v48, %v9235_v36 }
  0x3f   : > { %7930 = vmatprep.subr.bf16.mxu1 %v8620_v55  ;;  %6117 = vmatprep.mubr.bf16.mxu1 %v1811_v58  ;;  %v8665_v55 = vld [vmem:[%s9196_s9 + $0x220] sm:$0xff]   ;;  %v931_v58 = vrot.slane %v877_v50, %v9229_v32 }
  0x41   : > { %7909 = vmatpush3.bf16.msra.mxu0 %v8621_v57  ;;  %7931 = vmatpush3.bf16.msra.mxu1 %v8622_v59  ;;  %v927_v57 = vrot.slane %v877_v50, %v9226_v30  ;;  %v935_v59 = vrot.slane %v877_v50, %v9232_v34 }
  0x42   : > { %7910 = vmatprep.subr.bf16.mxu0 %v8623_v60  ;;  %7932 = vmatprep.subr.bf16.mxu1 %v8624_v61  ;;  %v8666_v60 = vld [vmem:[%s9196_s9 + $0x2a0] sm:$0xff]   ;;  %v286_v61 = vunpack.c.l.bf16 %v9342_v47 }
  0x45   : > { %7911 = vmatpush3.bf16.msra.mxu0 %v8625_v62  ;;  %7933 = vmatpush3.bf16.msra.mxu1 %v8626_v63  ;;  %v606_v62 = vcombine.low %v351_v52, %v355_v53  ;;  %v939_v63 = vrot.slane %v877_v50, %v9235_v36  ;;  %v8678_v53 = vld [vmem:[%s9196_s9 + $0x2b8] sm:$0xff]  }
  0x46   : > { %7912 = vmatprep.subr.bf16.mxu0 %v8627_v0  ;;  %7934 = vmatprep.subr.bf16.mxu1 %v8628_v1  ;;  %v367_v0 = vrot.slane %v301_v48, %v9238_v38  ;;  %v8667_v1 = vld [vmem:[%s9196_s9 + $0x268] sm:$0xff]  }
  0x49   : > { %7913 = vmatpush3.bf16.msra.mxu0 %v8629_v2  ;;  %7935 = vmatpush3.bf16.msra.mxu1 %v8630_v3  ;;  %v607_v2 = vcombine.low %v359_v54, %v363_v56  ;;  %v1182_v3 = vcombine.low %v927_v57, %v931_v58  ;;  %v8679_v57 = vld [vmem:[%s9196_s9 + $0x340] sm:$0xff]  }
  0x4a   : > { %7914 = vmatprep.subr.bf16.mxu0 %v8631_v5  ;;  %7936 = vmatprep.subr.bf16.mxu1 %v8632_v6  ;;  %v371_v5 = vrot.slane %v301_v48, %v9241_v40  ;;  %v375_v6 = vrot.slane %v301_v48, %v9246_v44  ;;  %v8680_v58 = vld [vmem:[%s9196_s9 + $0x3c0] sm:$0xff]  }
  0x4d   : > { %7915 = vmatpush3.bf16.msra.mxu0 %v8633_v7  ;;  %7937 = vmatpush3.bf16.msra.mxu1 %v8634_v8  ;;  %v8668_v7 = vld [vmem:[%s9196_s9 + $0x2e8] sm:$0xff]   ;;  %v614_v8 = vrot.slane %v606_v62, %v9264_v4 }
  0x4e   : > { %7916 = vmatprep.subr.bf16.mxu0 %v8635_v9  ;;  %7938 = vmatprep.subr.bf16.mxu1 %v8636_v10  ;;  %v1183_v9 = vcombine.low %v935_v59, %v939_v63  ;;  %v379_v10 = vrot.slane %v301_v48, %v9251_v49 }
  0x51   : > { %7917 = vmatpush3.bf16.msra.mxu0 %v8637_v11  ;;  %7939 = vmatpush3.bf16.msra.mxu1 %v8638_v12  ;;  %v943_v11 = vrot.slane %v877_v50, %v9238_v38  ;;  %v8669_v12 = vld [vmem:[%s9196_s9 + $0x228] sm:$0xff]  }
  0x52   : > { %7918 = vmatprep.subr.bf16.mxu0 %v8639_v13  ;;  %7940 = vmatprep.subr.bf16.mxu1 %v8640_v14  ;;  %v621_v13 = vrot.slane %v607_v2, %v9264_v4  ;;  %v1190_v14 = vrot.slane %v1182_v3, %v9264_v4 }
  0x55   : > { %7919 = vmatpush3.bf16.msra.mxu0 %v8641_v15  ;;  %7941 = vmatpush3.bf16.msra.mxu1 %v8642_v16  ;;  %v623_v15 = vcombine.low %v367_v0, %v371_v5  ;;  %v947_v16 = vrot.slane %v877_v50, %v9241_v40  ;;  %v8681_v0 = vld [vmem:[%s9196_s9 + $0x300] sm:$0xff]  }
  0x56   : > { %7920 = vmatprep.subr.bf16.mxu0 %v8643_v17  ;;  %7942 = vmatprep.subr.bf16.mxu1 %v8644_v18  ;;  %v8670_v17 = vld [vmem:[%s9196_s9 + $0x2a8] sm:$0xff]   ;;  %v1197_v18 = vrot.slane %v1183_v9, %v9264_v4 }
  0x59   : > { %7921 = vmatpush3.bf16.msra.mxu0 %v8645_v19  ;;  %7943 = vmatpush3.bf16.msra.mxu1 %v8646_v20  ;;  %v624_v19 = vcombine.low %v375_v6, %v379_v10  ;;  %v951_v20 = vrot.slane %v877_v50, %v9246_v44 }
  0x5a   : > { %7950 = vmatprep.subr.bf16.mxu0 %v8647_v21  ;;  %7972 = vmatprep.subr.bf16.mxu1 %v8648_v22  ;;  %v955_v21 = vrot.slane %v877_v50, %v9251_v49  ;;  %v8671_v22 = vld [vmem:[%s9196_s9 + $0x270] sm:$0xff]   ;;  %v8677_v50 = vld [vmem:[%s9196_s9 + $0x238] sm:$0xff]  }
  0x5c   : > { %6078 = vmatmul.mubr.bf16.vlgmr.msra.gmra.mrb[4].mxu0 %v1808_v23  ;;  %6118 = vmatmul.mubr.bf16.vlgmr.msra.gmra.mrb[4].mxu1 %v1810_v26  ;;  %v622_v23 = vcombine.low %v614_v8, %v621_v13  ;;  %v8672_v26 = vld [vmem:[%s9196_s9 + $0x2f0] sm:$0xff]   ;;  %v8684_v8 = vld [vmem:[%s9196_s9 + $0x3c8] sm:$0xff]  }
  0x5d   : > { %7951 = vmatpush3.bf16.msra.mxu0 %v8649_v24  ;;  %7973 = vmatpush3.bf16.msra.mxu1 %v8650_v25  ;;  %v631_v24 = vrot.slane %v623_v15, %v9264_v4  ;;  %v1199_v25 = vcombine.low %v943_v11, %v947_v16  ;;  %v8685_v11 = vld [vmem:[%s9196_s9 + $0x308] sm:$0xff]   ;;  %v8688_v15 = vld [vmem:[%s9196_s9 + $0x3d0] sm:$0xff]  }
  0x5e   : > { %7952 = vmatprep.subr.bf16.mxu0 %v8651_v27  ;;  %7974 = vmatprep.subr.bf16.mxu1 %v8652_v28  ;;  %v1198_v27 = vcombine.low %v1190_v14, %v1197_v18  ;;  %v287_v28 = vunpack.c.h.bf16 %v9342_v47  ;;  %v8687_v14 = vld [vmem:[%s9196_s9 + $0x350] sm:$0xff]   ;;  %v8691_v18 = vld [vmem:[%s9196_s9 + $0x358] sm:$0xff]  }
  0x5f   : > { %v8689_v16 = vld [vmem:[%s9196_s9 + $0x310] sm:$0xff]  }
  0x61   : > { %7953 = vmatpush3.bf16.msra.mxu0 %v8653_v29  ;;  %7975 = vmatpush3.bf16.msra.mxu1 %v8654_v31  ;;  %v638_v29 = vrot.slane %v624_v19, %v9264_v4  ;;  %v1200_v31 = vcombine.low %v951_v20, %v955_v21  ;;  %v8692_v19 = vld [vmem:[%s9196_s9 + $0x3d8] sm:$0xff]  }
  0x62   : > { %7954 = vmatprep.subr.bf16.mxu0 %v8655_v33  ;;  %7976 = vmatprep.subr.bf16.mxu1 %v8656_v35  ;;  %v8673_v33 = vld [vmem:[%s9196_s9 + $0x230] sm:$0xff]   ;;  %v862_v35 = vmul.f32 %v622_v23, %v286_v61  ;;  %v8693_v20 = vld [vmem:[%s9196_s9 + $0x318] sm:$0xff]   ;;  %v8696_v23 = vld [vmem:[%s9196_s9 + $0x3e0] sm:$0xff]  }
  0x63   : > { %v8694_v21 = vld [vmem:[%s9196_s9 + $0x398] sm:$0xff]  }
  0x65   : > { %7955 = vmatpush3.bf16.msra.mxu0 %v8657_v37  ;;  %7977 = vmatpush3.bf16.msra.mxu1 %v8658_v39  ;;  %v1207_v37 = vrot.slane %v1199_v25, %v9264_v4  ;;  %v8674_v39 = vld [vmem:[%s9196_s9 + $0x2b0] sm:$0xff]   ;;  %v8698_v25 = vld [vmem:[%s9196_s9 + $0x3a0] sm:$0xff]  }
  0x66   : > { %7956 = vmatprep.subr.bf16.mxu0 %v8659_v41  ;;  %7978 = vmatprep.subr.bf16.mxu1 %v8660_v42  ;;  %v639_v41 = vcombine.low %v631_v24, %v638_v29  ;;  %v1214_v42 = vrot.slane %v1200_v31, %v9264_v4  ;;  %v8697_v24 = vld [vmem:[%s9196_s9 + $0x320] sm:$0xff]   ;;  %v8702_v29 = vld [vmem:[%s9196_s9 + $0x3a8] sm:$0xff]   ;;  %v8703_v31 = vld [vmem:[%s9196_s9 + $0x370] sm:$0xff]  }
  0x68   : > { %v863_v47 = vmul.f32 %v639_v41, %v287_v28  ;;  %v1215_v48 = vcombine.low %v1207_v37, %v1214_v42  ;;  %v8701_v28 = vld [vmem:[%s9196_s9 + $0x328] sm:$0xff]   ;;  %v8706_v37 = vld [vmem:[%s9196_s9 + $0x3b0] sm:$0xff]   ;;  %v8708_v41 = vld [vmem:[%s9196_s9 + $0x3f8] sm:$0xff]  }
  0x69   : > { %7957 = vmatpush3.bf16.msra.mxu0 %v8661_v43  ;;  %7979 = vmatpush3.bf16.msra.mxu1 %v8662_v45  ;;  %v8675_v43 = vld [vmem:[%s9196_s9 + $0x278] sm:$0xff]   ;;  %v1438_v45 = vadd.f32 %v1198_v27, %v862_v35  ;;  %v8700_v27 = vld [vmem:[%s9196_s9 + $0x3e8] sm:$0xff]   ;;  %v8705_v35 = vld [vmem:[%s9196_s9 + $0x330] sm:$0xff]  }
  0x6a   : > { %7958 = vmatprep.subr.bf16.mxu0 %v8663_v46  ;;  %7980 = vmatprep.subr.bf16.mxu1 %v8664_v51  ;;  %v8676_v46 = vld [vmem:[%s9196_s9 + $0x2f8] sm:$0xff]   ;;  %v1439_v54 = vadd.f32 %v1215_v48, %v863_v47  ;;  %v8713_v48 = vld [vmem:[%s9196_s9 + $0x400] sm:$0xff]  }
  0x6b   : > { %v1509_v51 = vrot.slane %v1438_v45, %v9264_v4  ;;  %v1502_v52 = vcombine.high %v1438_v45, %v1438_v45  ;;  %v8709_v42 = vld [vmem:[%s9196_s9 + $0x338] sm:$0xff]   ;;  %v8711_v45 = vld [vmem:[%s9196_s9 + $0x440] sm:$0xff]  }
  0x6c   : > { %v9392_v59 = vrot.slane %v1439_v54, %v9264_v4 }
  0x6d   : > { %7959 = vmatpush3.bf16.msra.mxu0 %v8665_v55  ;;  %7981 = vmatpush3.bf16.msra.mxu1 %v8666_v60  ;;  %v1517_v55 = vcombine.high %v1509_v51, %v1509_v51  ;;  %v1516_v56 = vrot.slane %v1502_v52, %v9264_v4  ;;  %v1519_v60 = vcombine.high %v1439_v54, %v1439_v54  ;;  %v8715_v52 = vld [vmem:[%s9196_s9 + $0x448] sm:$0xff]  }
  0x6e   : > { %7960 = vmatprep.subr.bf16.mxu0 %v8667_v1  ;;  %7982 = vmatprep.subr.bf16.mxu1 %v8668_v7  ;;  %v1812_v63 = vpack.c.bf16 %v1509_v51, %v1509_v51  ;;  %v8682_v1 = vld [vmem:[%s9196_s9 + $0x380] sm:$0xff]   ;;  %v1534_v2 = vcombine.high %v9392_v59, %v9392_v59  ;;  %v8683_v7 = vld [vmem:[%s9196_s9 + $0x348] sm:$0xff]   ;;  %v1816_v47 = vpack.c.bf16 %v9392_v59, %v9392_v59  ;;  %v8722_v59 = vld [vmem:[%s9196_s9 + $0x490] sm:$0xff]  }
  0x6f   : > { %v1813_v61 = vpack.c.bf16 %v1517_v55, %v1517_v55  ;;  %v1518_v62 = vcombine.high %v1516_v56, %v1516_v56  ;;  %v9399_v3 = vrot.slane %v1519_v60, %v9264_v4  ;;  %v1814_v6 = vpack.c.bf16 %v1516_v56, %v1516_v56  ;;  %v8717_v54 = vld [vmem:[%s9196_s9 + $0x408] sm:$0xff]   ;;  %v8719_v56 = vld [vmem:[%s9196_s9 + $0x450] sm:$0xff]   ;;  %v8723_v60 = vld [vmem:[%s9196_s9 + $0x458] sm:$0xff]  }
  0x70   : > { %v1817_v9 = vpack.c.bf16 %v1534_v2, %v1534_v2  ;;  %v8718_v55 = vld [vmem:[%s9196_s9 + $0x488] sm:$0xff]   ;;  %v9454_v2 = vld [vmem:[%s9181_s24 + $0x10] sm:$0xff] }
  0x71   : > { %7961 = vmatpush3.bf16.msra.mxu0 %v8669_v12  ;;  %7983 = vmatpush3.bf16.msra.mxu1 %v8670_v17  ;;  %v1815_v5 = vpack.c.bf16 %v1518_v62, %v1518_v62  ;;  %v1535_v10 = vcombine.high %v9399_v3, %v9399_v3  ;;  %v8686_v12 = vld [vmem:[%s9196_s9 + $0x388] sm:$0xff]   ;;  %v8690_v17 = vld [vmem:[%s9196_s9 + $0x390] sm:$0xff]   ;;  %v1818_v51 = vpack.c.bf16 %v9399_v3, %v9399_v3  ;;  %v8725_v62 = vld [vmem:[%s9196_s9 + $0x418] sm:$0xff]  }
  0x72   : > { %7962 = vmatprep.subr.bf16.mxu0 %v8671_v22  ;;  %7984 = vmatprep.subr.bf16.mxu1 %v8672_v26  ;;  %v8695_v22 = vld [vmem:[%s9196_s9 + $0x360] sm:$0xff]   ;;  %v8699_v26 = vld [vmem:[%s9196_s9 + $0x368] sm:$0xff]   ;;  %v302_v3 = vld [vmem:[%s9186_s27 + $0x10] sm:$0xff] }
  0x73   : > { %6157 = vmatprep.mubr.bf16.mxu0 %v1813_v61  ;;  %6197 = vmatprep.mubr.bf16.mxu1 %v1815_v5  ;;  %v1819_v13 = vpack.c.bf16 %v1535_v10, %v1535_v10  ;;  %v8724_v61 = vld [vmem:[%s9196_s9 + $0x4d8] sm:$0xff]   ;;  %v878_v5 = vld [vmem:[%s9191_s30 + $0x10] sm:$0xff]  ;;  %v8730_v10 = vld [vmem:[%s9196_s9 + $0x4a0] sm:$0xff]  }
  0x75   : > { %7963 = vmatpush3.bf16.msra.mxu0 %v8673_v33  ;;  %7985 = vmatpush3.bf16.msra.mxu1 %v8674_v39  ;;  %v8704_v33 = vld [vmem:[%s9196_s9 + $0x3f0] sm:$0xff]   ;;  %v8707_v39 = vld [vmem:[%s9196_s9 + $0x378] sm:$0xff]  }
  0x76   : > { %7964 = vmatprep.subr.bf16.mxu0 %v8675_v43  ;;  %7986 = vmatprep.subr.bf16.mxu1 %v8676_v46  ;;  %v8710_v43 = vld [vmem:[%s9196_s9 + $0x3b8] sm:$0xff]   ;;  %v8712_v46 = vld [vmem:[%s9196_s9 + $0x4c0] sm:$0xff]  }
  0x79   : > { %7965 = vmatpush3.bf16.msra.mxu0 %v8677_v50  ;;  %7987 = vmatpush3.bf16.msra.mxu1 %v8678_v53  ;;  %v8714_v50 = vld [vmem:[%s9196_s9 + $0x480] sm:$0xff]   ;;  %v8716_v53 = vld [vmem:[%s9196_s9 + $0x4c8] sm:$0xff]  }
  0x7a   : > { %7994 = vmatprep.subr.bf16.mxu0 %v8679_v57  ;;  %8016 = vmatprep.subr.bf16.mxu1 %v8680_v58  ;;  %v8720_v57 = vld [vmem:[%s9196_s9 + $0x4d0] sm:$0xff]  }
  0x7b   : > { %v8721_v58 = vld [vmem:[%s9196_s9 + $0x410] sm:$0xff]  }
  0x7c   : > { %6158 = vmatmul.mubr.bf16.vlgmr.msra.gmra.mrb[8].mxu0 %v1812_v63  ;;  %6198 = vmatmul.mubr.bf16.vlgmr.msra.gmra.mrb[8].mxu1 %v1814_v6  ;;  %v8726_v63 = vld [vmem:[%s9196_s9 + $0x498] sm:$0xff]   ;;  %v8729_v6 = vld [vmem:[%s9196_s9 + $0x420] sm:$0xff]  }
  0x7d   : > { %7995 = vmatpush3.bf16.msra.mxu0 %v8681_v0  ;;  %8017 = vmatpush3.bf16.msra.mxu1 %v8682_v1  ;;  %v8727_v0 = vld [vmem:[%s9196_s9 + $0x460] sm:$0xff]  }
  0x7e   : > { %7996 = vmatprep.subr.bf16.mxu0 %v8683_v7  ;;  %6237 = vmatprep.mubr.bf16.mxu0 %v1817_v9  ;;  %v8728_v1 = vld [vmem:[%s9196_s9 + $0x4e0] sm:$0xff]   ;;  %v383_v7 = vrot.slane %v302_v3, %v9226_v30  ;;  %v391_v9 = vrot.slane %v302_v3, %v9232_v34 }
  0x7f   : > { %8018 = vmatprep.subr.bf16.mxu1 %v8684_v8  ;;  %6277 = vmatprep.mubr.bf16.mxu1 %v1819_v13  ;;  %v387_v8 = vrot.slane %v302_v3, %v9229_v32  ;;  %v963_v13 = vrot.slane %v878_v5, %v9229_v32 }
  0x81   : > { %7997 = vmatpush3.bf16.msra.mxu0 %v8685_v11  ;;  %8019 = vmatpush3.bf16.msra.mxu1 %v8686_v12  ;;  %v395_v11 = vrot.slane %v302_v3, %v9235_v36  ;;  %v959_v12 = vrot.slane %v878_v5, %v9226_v30 }
  0x82   : > { %7998 = vmatprep.subr.bf16.mxu0 %v8687_v14  ;;  %8020 = vmatprep.subr.bf16.mxu1 %v8688_v15  ;;  %v967_v14 = vrot.slane %v878_v5, %v9232_v34  ;;  %v8731_v15 = vld [vmem:[%s9196_s9 + $0x468] sm:$0xff]  }
  0x85   : > { %7999 = vmatpush3.bf16.msra.mxu0 %v8689_v16  ;;  %8021 = vmatpush3.bf16.msra.mxu1 %v8690_v17  ;;  %v288_v16 = vunpack.c.l.bf16 %v9454_v2  ;;  %v640_v17 = vcombine.low %v383_v7, %v387_v8  ;;  %v8743_v8 = vld [vmem:[%s9196_s9 + $0x540] sm:$0xff]  }
  0x86   : > { %8000 = vmatprep.subr.bf16.mxu0 %v8691_v18  ;;  %8022 = vmatprep.subr.bf16.mxu1 %v8692_v19  ;;  %v971_v18 = vrot.slane %v878_v5, %v9235_v36  ;;  %v399_v19 = vrot.slane %v302_v3, %v9238_v38 }
  0x89   : > { %8001 = vmatpush3.bf16.msra.mxu0 %v8693_v20  ;;  %8023 = vmatpush3.bf16.msra.mxu1 %v8694_v21  ;;  %v8732_v20 = vld [vmem:[%s9196_s9 + $0x4e8] sm:$0xff]   ;;  %v641_v21 = vcombine.low %v391_v9, %v395_v11 }
  0x8a   : > { %8002 = vmatprep.subr.bf16.mxu0 %v8695_v22  ;;  %8024 = vmatprep.subr.bf16.mxu1 %v8696_v23  ;;  %v1216_v22 = vcombine.low %v959_v12, %v963_v13  ;;  %v403_v23 = vrot.slane %v302_v3, %v9241_v40  ;;  %v8744_v12 = vld [vmem:[%s9196_s9 + $0x5c0] sm:$0xff]  }
  0x8d   : > { %8003 = vmatpush3.bf16.msra.mxu0 %v8697_v24  ;;  %8025 = vmatpush3.bf16.msra.mxu1 %v8698_v25  ;;  %v407_v24 = vrot.slane %v302_v3, %v9246_v44  ;;  %v8733_v25 = vld [vmem:[%s9196_s9 + $0x428] sm:$0xff]  }
  0x8e   : > { %8004 = vmatprep.subr.bf16.mxu0 %v8699_v26  ;;  %8026 = vmatprep.subr.bf16.mxu1 %v8700_v27  ;;  %v648_v26 = vrot.slane %v640_v17, %v9264_v4  ;;  %v1217_v27 = vcombine.low %v967_v14, %v971_v18  ;;  %v8745_v14 = vld [vmem:[%s9196_s9 + $0x500] sm:$0xff]  }
  0x91   : > { %8005 = vmatpush3.bf16.msra.mxu0 %v8701_v28  ;;  %8027 = vmatpush3.bf16.msra.mxu1 %v8702_v29  ;;  %v411_v28 = vrot.slane %v302_v3, %v9251_v49  ;;  %v975_v29 = vrot.slane %v878_v5, %v9238_v38 }
  0x92   : > { %8006 = vmatprep.subr.bf16.mxu0 %v8703_v31  ;;  %8028 = vmatprep.subr.bf16.mxu1 %v8704_v33  ;;  %v8734_v31 = vld [vmem:[%s9196_s9 + $0x4a8] sm:$0xff]   ;;  %v655_v33 = vrot.slane %v641_v21, %v9264_v4 }
  0x93   : > { %v8747_v21 = vld [vmem:[%s9196_s9 + $0x548] sm:$0xff]  }
  0x95   : > { %8007 = vmatpush3.bf16.msra.mxu0 %v8705_v35  ;;  %8029 = vmatpush3.bf16.msra.mxu1 %v8706_v37  ;;  %v1224_v35 = vrot.slane %v1216_v22, %v9264_v4  ;;  %v657_v37 = vcombine.low %v399_v19, %v403_v23  ;;  %v8746_v19 = vld [vmem:[%s9196_s9 + $0x580] sm:$0xff]  }
  0x96   : > { %8008 = vmatprep.subr.bf16.mxu0 %v8707_v39  ;;  %8030 = vmatprep.subr.bf16.mxu1 %v8708_v41  ;;  %v979_v39 = vrot.slane %v878_v5, %v9241_v40  ;;  %v8735_v41 = vld [vmem:[%s9196_s9 + $0x470] sm:$0xff]  }
  0x99   : > { %8009 = vmatpush3.bf16.msra.mxu0 %v8709_v42  ;;  %8031 = vmatpush3.bf16.msra.mxu1 %v8710_v43  ;;  %v1231_v42 = vrot.slane %v1217_v27, %v9264_v4  ;;  %v658_v43 = vcombine.low %v407_v24, %v411_v28 }
  0x9a   : > { %8038 = vmatprep.subr.bf16.mxu0 %v8711_v45  ;;  %8060 = vmatprep.subr.bf16.mxu1 %v8712_v46  ;;  %v983_v45 = vrot.slane %v878_v5, %v9246_v44  ;;  %v987_v46 = vrot.slane %v878_v5, %v9251_v49  ;;  %v8742_v5 = vld [vmem:[%s9196_s9 + $0x4b8] sm:$0xff]  }
  0x9c   : > { %6238 = vmatmul.mubr.bf16.vlgmr.msra.gmra.mrb[12].mxu0 %v1816_v47  ;;  %6278 = vmatmul.mubr.bf16.vlgmr.msra.gmra.mrb[12].mxu1 %v1818_v51  ;;  %v8736_v47 = vld [vmem:[%s9196_s9 + $0x4f0] sm:$0xff]   ;;  %v1233_v51 = vcombine.low %v975_v29, %v979_v39  ;;  %v8750_v29 = vld [vmem:[%s9196_s9 + $0x588] sm:$0xff]  }
  0x9d   : > { %8039 = vmatpush3.bf16.msra.mxu0 %v8713_v48  ;;  %8061 = vmatpush3.bf16.msra.mxu1 %v8714_v50  ;;  %v656_v48 = vcombine.low %v648_v26, %v655_v33  ;;  %v665_v50 = vrot.slane %v657_v37, %v9264_v4  ;;  %v8749_v26 = vld [vmem:[%s9196_s9 + $0x508] sm:$0xff]   ;;  %v8753_v37 = vld [vmem:[%s9196_s9 + $0x510] sm:$0xff]  }
  0x9e   : > { %8040 = vmatprep.subr.bf16.mxu0 %v8715_v52  ;;  %8062 = vmatprep.subr.bf16.mxu1 %v8716_v53  ;;  %v8737_v52 = vld [vmem:[%s9196_s9 + $0x430] sm:$0xff]   ;;  %v1232_v53 = vcombine.low %v1224_v35, %v1231_v42  ;;  %v8756_v42 = vld [vmem:[%s9196_s9 + $0x5d8] sm:$0xff]  }
  0x9f   : > { %v8752_v35 = vld [vmem:[%s9196_s9 + $0x5d0] sm:$0xff]  }
  0xa0   : > { %v8754_v39 = vld [vmem:[%s9196_s9 + $0x590] sm:$0xff]  }
  0xa1   : > { %8041 = vmatpush3.bf16.msra.mxu0 %v8717_v54  ;;  %8063 = vmatpush3.bf16.msra.mxu1 %v8718_v55  ;;  %v289_v54 = vunpack.c.h.bf16 %v9454_v2  ;;  %v672_v55 = vrot.slane %v658_v43, %v9264_v4  ;;  %v8757_v43 = vld [vmem:[%s9196_s9 + $0x518] sm:$0xff]  }
  0xa2   : > { %8042 = vmatprep.subr.bf16.mxu0 %v8719_v56  ;;  %8064 = vmatprep.subr.bf16.mxu1 %v8720_v57  ;;  %v1234_v56 = vcombine.low %v983_v45, %v987_v46  ;;  %v8738_v57 = vld [vmem:[%s9196_s9 + $0x4b0] sm:$0xff]   ;;  %v8758_v45 = vld [vmem:[%s9196_s9 + $0x598] sm:$0xff]   ;;  %v8759_v46 = vld [vmem:[%s9196_s9 + $0x560] sm:$0xff]  }
  0xa5   : > { %8043 = vmatpush3.bf16.msra.mxu0 %v8721_v58  ;;  %8065 = vmatpush3.bf16.msra.mxu1 %v8722_v59  ;;  %v864_v58 = vmul.f32 %v656_v48, %v288_v16  ;;  %v1241_v59 = vrot.slane %v1233_v51, %v9264_v4  ;;  %v8761_v48 = vld [vmem:[%s9196_s9 + $0x520] sm:$0xff]   ;;  %v8763_v51 = vld [vmem:[%s9196_s9 + $0x568] sm:$0xff]  }
  0xa6   : > { %8044 = vmatprep.subr.bf16.mxu0 %v8723_v60  ;;  %8066 = vmatprep.subr.bf16.mxu1 %v8724_v61  ;;  %v8739_v60 = vld [vmem:[%s9196_s9 + $0x478] sm:$0xff]   ;;  %v673_v61 = vcombine.low %v665_v50, %v672_v55  ;;  %v8762_v50 = vld [vmem:[%s9196_s9 + $0x5a0] sm:$0xff]   ;;  %v8767_v55 = vld [vmem:[%s9196_s9 + $0x570] sm:$0xff]  }
  0xa8   : > { %v865_v2 = vmul.f32 %v673_v61, %v289_v54  ;;  %v8766_v54 = vld [vmem:[%s9196_s9 + $0x5a8] sm:$0xff]   ;;  %v8773_v61 = vld [vmem:[%s9196_s9 + $0x538] sm:$0xff]  }
  0xa9   : > { %8045 = vmatpush3.bf16.msra.mxu0 %v8725_v62  ;;  %8067 = vmatpush3.bf16.msra.mxu1 %v8726_v63  ;;  %v1248_v62 = vrot.slane %v1234_v56, %v9264_v4  ;;  %v8740_v63 = vld [vmem:[%s9196_s9 + $0x4f8] sm:$0xff]   ;;  %v8768_v56 = vld [vmem:[%s9196_s9 + $0x5f0] sm:$0xff]  }
  0xaa   : > { %8046 = vmatprep.subr.bf16.mxu0 %v8727_v0  ;;  %8068 = vmatprep.subr.bf16.mxu1 %v8728_v1  ;;  %v1440_v0 = vadd.f32 %v1232_v53, %v864_v58  ;;  %v8741_v1 = vld [vmem:[%s9196_s9 + $0x438] sm:$0xff]   ;;  %v8765_v53 = vld [vmem:[%s9196_s9 + $0x528] sm:$0xff]   ;;  %v8770_v58 = vld [vmem:[%s9196_s9 + $0x5b0] sm:$0xff]  }
  0xab   : > { %v1249_v3 = vcombine.low %v1241_v59, %v1248_v62  ;;  %v8771_v59 = vld [vmem:[%s9196_s9 + $0x578] sm:$0xff]  }
  0xac   : > { %v1536_v7 = vcombine.high %v1440_v0, %v1440_v0  ;;  %v8774_v62 = vld [vmem:[%s9196_s9 + $0x5b8] sm:$0xff]  }
  0xad   : > { %8047 = vmatpush3.bf16.msra.mxu0 %v8729_v6  ;;  %8069 = vmatpush3.bf16.msra.mxu1 %v8730_v10  ;;  %v1543_v6 = vrot.slane %v1440_v0, %v9264_v4  ;;  %v1441_v9 = vadd.f32 %v1249_v3, %v865_v2  ;;  %v8776_v0 = vld [vmem:[%s9196_s9 + $0x6c0] sm:$0xff]  }
  0xae   : > { %8048 = vmatprep.subr.bf16.mxu0 %v8731_v15  ;;  %8070 = vmatprep.subr.bf16.mxu1 %v8732_v20  ;;  %v1550_v11 = vrot.slane %v1536_v7, %v9264_v4  ;;  %v8777_v2 = vld [vmem:[%s9196_s9 + $0x600] sm:$0xff]   ;;  %v8780_v7 = vld [vmem:[%s9196_s9 + $0x6c8] sm:$0xff]  }
  0xaf   : > { %v1551_v10 = vcombine.high %v1543_v6, %v1543_v6  ;;  %v1820_v13 = vpack.c.bf16 %v1543_v6, %v1543_v6  ;;  %v9504_v15 = vrot.slane %v1441_v9, %v9264_v4  ;;  %v1553_v16 = vcombine.high %v1441_v9, %v1441_v9  ;;  %v8778_v3 = vld [vmem:[%s9196_s9 + $0x680] sm:$0xff]   ;;  %v8779_v6 = vld [vmem:[%s9196_s9 + $0x648] sm:$0xff]  }
  0xb0   : > { %v1552_v18 = vcombine.high %v1550_v11, %v1550_v11  ;;  %v1822_v20 = vpack.c.bf16 %v1550_v11, %v1550_v11  ;;  %v8782_v9 = vld [vmem:[%s9196_s9 + $0x688] sm:$0xff]   ;;  %v8784_v11 = vld [vmem:[%s9196_s9 + $0x6d0] sm:$0xff]  }
  0xb1   : > { %8049 = vmatpush3.bf16.msra.mxu0 %v8733_v25  ;;  %8071 = vmatpush3.bf16.msra.mxu1 %v8734_v31  ;;  %v1821_v17 = vpack.c.bf16 %v1551_v10, %v1551_v10  ;;  %v1568_v22 = vcombine.high %v9504_v15, %v9504_v15  ;;  %v9511_v23 = vrot.slane %v1553_v16, %v9264_v4  ;;  %v8748_v25 = vld [vmem:[%s9196_s9 + $0x5c8] sm:$0xff]   ;;  %v8751_v31 = vld [vmem:[%s9196_s9 + $0x550] sm:$0xff]   ;;  %v8789_v16 = vld [vmem:[%s9196_s9 + $0x618] sm:$0xff]  }
  0xb2   : > { %8050 = vmatprep.subr.bf16.mxu0 %v8735_v41  ;;  %8072 = vmatprep.subr.bf16.mxu1 %v8736_v47  ;;  %v1823_v24 = vpack.c.bf16 %v1552_v18, %v1552_v18  ;;  %v8755_v41 = vld [vmem:[%s9196_s9 + $0x558] sm:$0xff]   ;;  %v8760_v47 = vld [vmem:[%s9196_s9 + $0x5e0] sm:$0xff]   ;;  %v8783_v10 = vld [vmem:[%s9196_s9 + $0x650] sm:$0xff]  }
  0xb3   : > { %6317 = vmatprep.mubr.bf16.mxu0 %v1821_v17  ;;  %v1825_v27 = vpack.c.bf16 %v1568_v22, %v1568_v22  ;;  %v1569_v28 = vcombine.high %v9511_v23, %v9511_v23  ;;  %v8790_v17 = vld [vmem:[%s9196_s9 + $0x698] sm:$0xff]   ;;  %v8791_v18 = vld [vmem:[%s9196_s9 + $0x660] sm:$0xff]  }
  0xb4   : > { %6357 = vmatprep.mubr.bf16.mxu1 %v1823_v24  ;;  %v879_v22 = vld [vmem:[%s9191_s30 + $0x18] sm:$0xff] }
  0xb5   : > { %8051 = vmatpush3.bf16.msra.mxu0 %v8737_v52  ;;  %8073 = vmatpush3.bf16.msra.mxu1 %v8738_v57  ;;  %v1827_v33 = vpack.c.bf16 %v1569_v28, %v1569_v28  ;;  %v8764_v52 = vld [vmem:[%s9196_s9 + $0x5e8] sm:$0xff]   ;;  %v8769_v57 = vld [vmem:[%s9196_s9 + $0x530] sm:$0xff]  }
  0xb6   : > { %8052 = vmatprep.subr.bf16.mxu0 %v8739_v60  ;;  %8074 = vmatprep.subr.bf16.mxu1 %v8740_v63  ;;  %v8772_v60 = vld [vmem:[%s9196_s9 + $0x5f8] sm:$0xff]   ;;  %v8775_v63 = vld [vmem:[%s9196_s9 + $0x640] sm:$0xff]  }
  0xb9   : > { %8053 = vmatpush3.bf16.msra.mxu0 %v8741_v1  ;;  %8075 = vmatpush3.bf16.msra.mxu1 %v8742_v5  ;;  %v1824_v1 = vpack.c.bf16 %v9504_v15, %v9504_v15  ;;  %v1826_v5 = vpack.c.bf16 %v9511_v23, %v9511_v23  ;;  %v8788_v15 = vld [vmem:[%s9196_s9 + $0x6d8] sm:$0xff]   ;;  %v8793_v23 = vld [vmem:[%s9196_s9 + $0x620] sm:$0xff]  }
  0xba   : > { %8082 = vmatprep.subr.bf16.mxu0 %v8743_v8  ;;  %8104 = vmatprep.subr.bf16.mxu1 %v8744_v12  ;;  %v8781_v8 = vld [vmem:[%s9196_s9 + $0x608] sm:$0xff]   ;;  %v8785_v12 = vld [vmem:[%s9196_s9 + $0x610] sm:$0xff]  }
  0xbc   : > { %6318 = vmatmul.mubr.bf16.vlgmr.msra.gmra.mrb[16].mxu0 %v1820_v13  ;;  %6358 = vmatmul.mubr.bf16.vlgmr.msra.gmra.mrb[16].mxu1 %v1822_v20  ;;  %v8786_v13 = vld [vmem:[%s9196_s9 + $0x690] sm:$0xff]   ;;  %v9565_v20 = vld [vmem:[%s9181_s24 + $0x18] sm:$0xff] }
  0xbd   : > { %8083 = vmatpush3.bf16.msra.mxu0 %v8745_v14  ;;  %8105 = vmatpush3.bf16.msra.mxu1 %v8746_v19  ;;  %v8787_v14 = vld [vmem:[%s9196_s9 + $0x658] sm:$0xff]   ;;  %v8792_v19 = vld [vmem:[%s9196_s9 + $0x6e0] sm:$0xff]  }
  0xbe   : > { %8084 = vmatprep.subr.bf16.mxu0 %v8747_v21  ;;  %6397 = vmatprep.mubr.bf16.mxu0 %v1825_v27  ;;  %v303_v21 = vld [vmem:[%s9186_s27 + $0x18] sm:$0xff]  ;;  %v8795_v27 = vld [vmem:[%s9196_s9 + $0x668] sm:$0xff]  }
  0xbf   : > { %8106 = vmatprep.subr.bf16.mxu1 %v8748_v25  ;;  %6437 = vmatprep.mubr.bf16.mxu1 %v1827_v33  ;;  %v415_v24 = vrot.slane %v303_v21, %v9226_v30  ;;  %v419_v25 = vrot.slane %v303_v21, %v9229_v32  ;;  %v427_v28 = vrot.slane %v303_v21, %v9235_v36 }
  0xc0   : > { %v999_v33 = vrot.slane %v879_v22, %v9232_v34 }
  0xc1   : > { %8085 = vmatpush3.bf16.msra.mxu0 %v8749_v26  ;;  %8107 = vmatpush3.bf16.msra.mxu1 %v8750_v29  ;;  %v423_v26 = vrot.slane %v303_v21, %v9232_v34  ;;  %v991_v29 = vrot.slane %v879_v22, %v9226_v30 }
  0xc2   : > { %8086 = vmatprep.subr.bf16.mxu0 %v8751_v31  ;;  %8108 = vmatprep.subr.bf16.mxu1 %v8752_v35  ;;  %v995_v31 = vrot.slane %v879_v22, %v9229_v32  ;;  %v8794_v35 = vld [vmem:[%s9196_s9 + $0x6a0] sm:$0xff]  }
  0xc5   : > { %8087 = vmatpush3.bf16.msra.mxu0 %v8753_v37  ;;  %8109 = vmatpush3.bf16.msra.mxu1 %v8754_v39  ;;  %v290_v37 = vunpack.c.l.bf16 %v9565_v20  ;;  %v674_v39 = vcombine.low %v415_v24, %v419_v25  ;;  %v8807_v24 = vld [vmem:[%s9196_s9 + $0x740] sm:$0xff]   ;;  %v8806_v25 = vld [vmem:[%s9196_s9 + $0x6b8] sm:$0xff]  }
  0xc6   : > { %8088 = vmatprep.subr.bf16.mxu0 %v8755_v41  ;;  %8110 = vmatprep.subr.bf16.mxu1 %v8756_v42  ;;  %v1003_v41 = vrot.slane %v879_v22, %v9235_v36  ;;  %v431_v42 = vrot.slane %v303_v21, %v9238_v38 }
  0xc9   : > { %8089 = vmatpush3.bf16.msra.mxu0 %v8757_v43  ;;  %8111 = vmatpush3.bf16.msra.mxu1 %v8758_v45  ;;  %v8796_v43 = vld [vmem:[%s9196_s9 + $0x6e8] sm:$0xff]   ;;  %v675_v45 = vcombine.low %v423_v26, %v427_v28 }
  0xca   : > { %8090 = vmatprep.subr.bf16.mxu0 %v8759_v46  ;;  %8112 = vmatprep.subr.bf16.mxu1 %v8760_v47  ;;  %v1250_v46 = vcombine.low %v991_v29, %v995_v31  ;;  %v435_v47 = vrot.slane %v303_v21, %v9241_v40  ;;  %v8808_v29 = vld [vmem:[%s9196_s9 + $0x7c0] sm:$0xff]  }
  0xcd   : > { %8091 = vmatpush3.bf16.msra.mxu0 %v8761_v48  ;;  %8113 = vmatpush3.bf16.msra.mxu1 %v8762_v50  ;;  %v439_v48 = vrot.slane %v303_v21, %v9246_v44  ;;  %v8797_v50 = vld [vmem:[%s9196_s9 + $0x628] sm:$0xff]  }
  0xce   : > { %8092 = vmatprep.subr.bf16.mxu0 %v8763_v51  ;;  %8114 = vmatprep.subr.bf16.mxu1 %v8764_v52  ;;  %v682_v51 = vrot.slane %v674_v39, %v9264_v4  ;;  %v1251_v52 = vcombine.low %v999_v33, %v1003_v41  ;;  %v8809_v33 = vld [vmem:[%s9196_s9 + $0x700] sm:$0xff]  }
  0xd1   : > { %8093 = vmatpush3.bf16.msra.mxu0 %v8765_v53  ;;  %8115 = vmatpush3.bf16.msra.mxu1 %v8766_v54  ;;  %v443_v53 = vrot.slane %v303_v21, %v9251_v49  ;;  %v1007_v54 = vrot.slane %v879_v22, %v9238_v38 }
  0xd2   : > { %8094 = vmatprep.subr.bf16.mxu0 %v8767_v55  ;;  %8116 = vmatprep.subr.bf16.mxu1 %v8768_v56  ;;  %v8799_v55 = vld [vmem:[%s9196_s9 + $0x670] sm:$0xff]   ;;  %v689_v56 = vrot.slane %v675_v45, %v9264_v4  ;;  %v8811_v45 = vld [vmem:[%s9196_s9 + $0x748] sm:$0xff]  }
  0xd5   : > { %8095 = vmatpush3.bf16.msra.mxu0 %v8769_v57  ;;  %8117 = vmatpush3.bf16.msra.mxu1 %v8770_v58  ;;  %v1258_v57 = vrot.slane %v1250_v46, %v9264_v4  ;;  %v691_v58 = vcombine.low %v431_v42, %v435_v47  ;;  %v8810_v42 = vld [vmem:[%s9196_s9 + $0x780] sm:$0xff]  }
  0xd6   : > { %8096 = vmatprep.subr.bf16.mxu0 %v8771_v59  ;;  %8118 = vmatprep.subr.bf16.mxu1 %v8772_v60  ;;  %v1011_v59 = vrot.slane %v879_v22, %v9241_v40  ;;  %v8798_v60 = vld [vmem:[%s9196_s9 + $0x6a8] sm:$0xff]  }
  0xd9   : > { %8097 = vmatpush3.bf16.msra.mxu0 %v8773_v61  ;;  %8119 = vmatpush3.bf16.msra.mxu1 %v8774_v62  ;;  %v1265_v61 = vrot.slane %v1251_v52, %v9264_v4  ;;  %v692_v62 = vcombine.low %v439_v48, %v443_v53 }
  0xda   : > { %8126 = vmatprep.subr.bf16.mxu0 %v8775_v63  ;;  %8148 = vmatprep.subr.bf16.mxu1 %v8776_v0  ;;  %v1015_v63 = vrot.slane %v879_v22, %v9246_v44  ;;  %v1019_v0 = vrot.slane %v879_v22, %v9251_v49 }
  0xdc   : > { %6398 = vmatmul.mubr.bf16.vlgmr.msra.gmra.mrb[20].mxu0 %v1824_v1  ;;  %6438 = vmatmul.mubr.bf16.vlgmr.msra.gmra.mrb[20].mxu1 %v1826_v5  ;;  %v8800_v1 = vld [vmem:[%s9196_s9 + $0x6f0] sm:$0xff]   ;;  %v1267_v5 = vcombine.low %v1007_v54, %v1011_v59  ;;  %v8814_v54 = vld [vmem:[%s9196_s9 + $0x788] sm:$0xff]  }
  0xdd   : > { %8127 = vmatpush3.bf16.msra.mxu0 %v8777_v2  ;;  %8149 = vmatpush3.bf16.msra.mxu1 %v8778_v3  ;;  %v690_v2 = vcombine.low %v682_v51, %v689_v56  ;;  %v699_v3 = vrot.slane %v691_v58, %v9264_v4  ;;  %v8813_v51 = vld [vmem:[%s9196_s9 + $0x708] sm:$0xff]   ;;  %v8817_v58 = vld [vmem:[%s9196_s9 + $0x710] sm:$0xff]  }
  0xde   : > { %8128 = vmatprep.subr.bf16.mxu0 %v8779_v6  ;;  %8150 = vmatprep.subr.bf16.mxu1 %v8780_v7  ;;  %v8801_v6 = vld [vmem:[%s9196_s9 + $0x630] sm:$0xff]   ;;  %v1266_v7 = vcombine.low %v1258_v57, %v1265_v61  ;;  %v8820_v61 = vld [vmem:[%s9196_s9 + $0x7d8] sm:$0xff]  }
  0xdf   : > { %v8816_v57 = vld [vmem:[%s9196_s9 + $0x7d0] sm:$0xff]  }
  0xe0   : > { %v8818_v59 = vld [vmem:[%s9196_s9 + $0x790] sm:$0xff]  }
  0xe1   : > { %8129 = vmatpush3.bf16.msra.mxu0 %v8781_v8  ;;  %8151 = vmatpush3.bf16.msra.mxu1 %v8782_v9  ;;  %v291_v8 = vunpack.c.h.bf16 %v9565_v20  ;;  %v706_v9 = vrot.slane %v692_v62, %v9264_v4  ;;  %v8821_v62 = vld [vmem:[%s9196_s9 + $0x718] sm:$0xff]  }
  0xe2   : > { %8130 = vmatprep.subr.bf16.mxu0 %v8783_v10  ;;  %8152 = vmatprep.subr.bf16.mxu1 %v8784_v11  ;;  %v1268_v10 = vcombine.low %v1015_v63, %v1019_v0  ;;  %v8803_v11 = vld [vmem:[%s9196_s9 + $0x678] sm:$0xff]   ;;  %v8823_v0 = vld [vmem:[%s9196_s9 + $0x760] sm:$0xff]  }
  0xe3   : > { %v8822_v63 = vld [vmem:[%s9196_s9 + $0x798] sm:$0xff]  }
  0xe5   : > { %8131 = vmatpush3.bf16.msra.mxu0 %v8785_v12  ;;  %8153 = vmatpush3.bf16.msra.mxu1 %v8786_v13  ;;  %v866_v12 = vmul.f32 %v690_v2, %v290_v37  ;;  %v1275_v13 = vrot.slane %v1267_v5, %v9264_v4  ;;  %v8825_v2 = vld [vmem:[%s9196_s9 + $0x720] sm:$0xff]   ;;  %v8827_v5 = vld [vmem:[%s9196_s9 + $0x768] sm:$0xff]  }
  0xe6   : > { %8132 = vmatprep.subr.bf16.mxu0 %v8787_v14  ;;  %8154 = vmatprep.subr.bf16.mxu1 %v8788_v15  ;;  %v8802_v14 = vld [vmem:[%s9196_s9 + $0x6b0] sm:$0xff]   ;;  %v707_v15 = vcombine.low %v699_v3, %v706_v9  ;;  %v8826_v3 = vld [vmem:[%s9196_s9 + $0x7a0] sm:$0xff]  }
  0xe7   : > { %v8831_v9 = vld [vmem:[%s9196_s9 + $0x770] sm:$0xff]  }
  0xe8   : > { %v867_v20 = vmul.f32 %v707_v15, %v291_v8  ;;  %v8830_v8 = vld [vmem:[%s9196_s9 + $0x7a8] sm:$0xff]  }
  0xe9   : > { %8133 = vmatpush3.bf16.msra.mxu0 %v8789_v16  ;;  %8155 = vmatpush3.bf16.msra.mxu1 %v8790_v17  ;;  %v1282_v16 = vrot.slane %v1268_v10, %v9264_v4  ;;  %v8804_v17 = vld [vmem:[%s9196_s9 + $0x6f8] sm:$0xff]  }
  0xea   : > { %8134 = vmatprep.subr.bf16.mxu0 %v8791_v18  ;;  %8156 = vmatprep.subr.bf16.mxu1 %v8792_v19  ;;  %v1442_v18 = vadd.f32 %v1266_v7, %v866_v12  ;;  %v8805_v19 = vld [vmem:[%s9196_s9 + $0x638] sm:$0xff]   ;;  %v8829_v7 = vld [vmem:[%s9196_s9 + $0x728] sm:$0xff]  }
  0xeb   : > { %v1283_v21 = vcombine.low %v1275_v13, %v1282_v16  ;;  %v8833_v13 = vld [vmem:[%s9196_s9 + $0x730] sm:$0xff]  }
  0xec   : > { %v1577_v22 = vrot.slane %v1442_v18, %v9264_v4 }
  0xed   : > { %8135 = vmatpush3.bf16.msra.mxu0 %v8793_v23  ;;  %8157 = vmatpush3.bf16.msra.mxu1 %v8794_v35  ;;  %v1570_v23 = vcombine.high %v1442_v18, %v1442_v18  ;;  %v1443_v26 = vadd.f32 %v1283_v21, %v867_v20  ;;  %v8835_v20 = vld [vmem:[%s9196_s9 + $0x778] sm:$0xff]  }
  0xee   : > { %8136 = vmatprep.subr.bf16.mxu0 %v8795_v27  ;;  %8158 = vmatprep.subr.bf16.mxu1 %v8796_v43  ;;  %v1585_v27 = vcombine.high %v1577_v22, %v1577_v22  ;;  %v1828_v31 = vpack.c.bf16 %v1577_v22, %v1577_v22 }
  0xef   : > { %v1584_v28 = vrot.slane %v1570_v23, %v9264_v4  ;;  %v9615_v35 = vrot.slane %v1443_v26, %v9264_v4  ;;  %v1587_v37 = vcombine.high %v1443_v26, %v1443_v26  ;;  %v8836_v23 = vld [vmem:[%s9196_s9 + $0x7f8] sm:$0xff]  }
  0xf0   : > { %v1829_v39 = vpack.c.bf16 %v1585_v27, %v1585_v27  ;;  %v8838_v27 = vld [vmem:[%s9196_s9 + $0x7b8] sm:$0xff]  }
  0xf1   : > { %8137 = vmatpush3.bf16.msra.mxu0 %v8797_v50  ;;  %8159 = vmatpush3.bf16.msra.mxu1 %v8798_v60  ;;  %v1586_v41 = vcombine.high %v1584_v28, %v1584_v28  ;;  %v1830_v43 = vpack.c.bf16 %v1584_v28, %v1584_v28  ;;  %v1602_v46 = vcombine.high %v9615_v35, %v9615_v35  ;;  %v8812_v50 = vld [vmem:[%s9196_s9 + $0x7c8] sm:$0xff]   ;;  %v8819_v60 = vld [vmem:[%s9196_s9 + $0x758] sm:$0xff]   ;;  %v8839_v28 = vld [vmem:[%s9196_s9 + $0x840] sm:$0xff]  }
  0xf2   : > { %8138 = vmatprep.subr.bf16.mxu0 %v8799_v55  ;;  %8160 = vmatprep.subr.bf16.mxu1 %v8800_v1  ;;  %v9622_v47 = vrot.slane %v1587_v37, %v9264_v4  ;;  %v8815_v55 = vld [vmem:[%s9196_s9 + $0x750] sm:$0xff]   ;;  %v8824_v1 = vld [vmem:[%s9196_s9 + $0x7e0] sm:$0xff]  }
  0xf3   : > { %6477 = vmatprep.mubr.bf16.mxu0 %v1829_v39  ;;  %v1831_v48 = vpack.c.bf16 %v1586_v41, %v1586_v41  ;;  %v1833_v52 = vpack.c.bf16 %v1602_v46, %v1602_v46  ;;  %v8842_v37 = vld [vmem:[%s9196_s9 + $0x880] sm:$0xff]   ;;  %v8843_v41 = vld [vmem:[%s9196_s9 + $0x848] sm:$0xff]   ;;  %v8848_v46 = vld [vmem:[%s9196_s9 + $0x8d0] sm:$0xff]  }
  0xf4   : > { %v1603_v53 = vcombine.high %v9622_v47, %v9622_v47  ;;  %v1834_v39 = vpack.c.bf16 %v9622_v47, %v9622_v47  ;;  %v8849_v47 = vld [vmem:[%s9196_s9 + $0x810] sm:$0xff]  }
  0xf5   : > { %8139 = vmatpush3.bf16.msra.mxu0 %v8801_v6  ;;  %8161 = vmatpush3.bf16.msra.mxu1 %v8802_v14  ;;  %v8828_v6 = vld [vmem:[%s9196_s9 + $0x7e8] sm:$0xff]  }
  0xf6   : > { %8140 = vmatprep.subr.bf16.mxu0 %v8803_v11  ;;  %8162 = vmatprep.subr.bf16.mxu1 %v8804_v17  ;;  %v1835_v56 = vpack.c.bf16 %v1603_v53, %v1603_v53  ;;  %v8832_v11 = vld [vmem:[%s9196_s9 + $0x7f0] sm:$0xff]   ;;  %v8854_v53 = vld [vmem:[%s9196_s9 + $0x898] sm:$0xff]  }
  0xf7   : > { %6517 = vmatprep.mubr.bf16.mxu1 %v1831_v48  ;;  %v8850_v48 = vld [vmem:[%s9196_s9 + $0x890] sm:$0xff]  }
  0xf9   : > { %8141 = vmatpush3.bf16.msra.mxu0 %v8805_v19  ;;  %8163 = vmatpush3.bf16.msra.mxu1 %v8806_v25  ;;  %v8834_v19 = vld [vmem:[%s9196_s9 + $0x7b0] sm:$0xff]   ;;  %v8837_v25 = vld [vmem:[%s9196_s9 + $0x738] sm:$0xff]  }
  0xfa   : > { %8170 = vmatprep.subr.bf16.mxu0 %v8807_v24  ;;  %8192 = vmatprep.subr.bf16.mxu1 %v8808_v29  ;;  %v8840_v29 = vld [vmem:[%s9196_s9 + $0x8c0] sm:$0xff]  }
  0xfc   : > { %6478 = vmatmul.mubr.bf16.vlgmr.msra.gmra.mrb[24].mxu0 %v1828_v31  ;;  %6518 = vmatmul.mubr.bf16.vlgmr.msra.gmra.mrb[24].mxu1 %v1830_v43  ;;  %v1832_v31 = vpack.c.bf16 %v9615_v35, %v9615_v35  ;;  %v8845_v43 = vld [vmem:[%s9196_s9 + $0x808] sm:$0xff]  }
  0xfd   : > { %8171 = vmatpush3.bf16.msra.mxu0 %v8809_v33  ;;  %8193 = vmatpush3.bf16.msra.mxu1 %v8810_v42  ;;  %v8841_v33 = vld [vmem:[%s9196_s9 + $0x800] sm:$0xff]   ;;  %v8844_v42 = vld [vmem:[%s9196_s9 + $0x8c8] sm:$0xff]  }
  0xfe   : > { %8172 = vmatprep.subr.bf16.mxu0 %v8811_v45  ;;  %6557 = vmatprep.mubr.bf16.mxu0 %v1833_v52  ;;  %v8846_v35 = vld [vmem:[%s9196_s9 + $0x888] sm:$0xff]   ;;  %v8847_v45 = vld [vmem:[%s9196_s9 + $0x850] sm:$0xff]   ;;  %v8853_v52 = vld [vmem:[%s9196_s9 + $0x818] sm:$0xff]  }
  0xff   : > { %8194 = vmatprep.subr.bf16.mxu1 %v8812_v50  ;;  %6597 = vmatprep.mubr.bf16.mxu1 %v1835_v56  ;;  %v8851_v50 = vld [vmem:[%s9196_s9 + $0x858] sm:$0xff]   ;;  %v8857_v56 = vld [vmem:[%s9196_s9 + $0x820] sm:$0xff]  }
 0x101   : > { %8173 = vmatpush3.bf16.msra.mxu0 %v8813_v51  ;;  %8195 = vmatpush3.bf16.msra.mxu1 %v8814_v54  ;;  %v8852_v51 = vld [vmem:[%s9196_s9 + $0x8d8] sm:$0xff]   ;;  %v8855_v54 = vld [vmem:[%s9196_s9 + $0x860] sm:$0xff]  }
 0x102   : > { %8174 = vmatprep.subr.bf16.mxu0 %v8815_v55  ;;  %8196 = vmatprep.subr.bf16.mxu1 %v8816_v57  ;;  %v8856_v55 = vld [vmem:[%s9196_s9 + $0x8e0] sm:$0xff]  }
 0x103   : > { %v9679_v57 = vld [vmem:[%s9181_s24 + $0x20] sm:$0xff] }
 0x105   : > { %8175 = vmatpush3.bf16.msra.mxu0 %v8817_v58  ;;  %8197 = vmatpush3.bf16.msra.mxu1 %v8818_v59  ;;  %v304_v58 = vld [vmem:[%s9186_s27 + $0x20] sm:$0xff] }
 0x106   : > { %8176 = vmatprep.subr.bf16.mxu0 %v8819_v60  ;;  %8198 = vmatprep.subr.bf16.mxu1 %v8820_v61  ;;  %v447_v59 = vrot.slane %v304_v58, %v9226_v30  ;;  %v451_v60 = vrot.slane %v304_v58, %v9229_v32  ;;  %v455_v61 = vrot.slane %v304_v58, %v9232_v34 }
 0x109   : > { %8177 = vmatpush3.bf16.msra.mxu0 %v8821_v62  ;;  %8199 = vmatpush3.bf16.msra.mxu1 %v8822_v63  ;;  %v880_v62 = vld [vmem:[%s9191_s30 + $0x20] sm:$0xff]  ;;  %v8859_v63 = vld [vmem:[%s9196_s9 + $0x868] sm:$0xff]  }
 0x10a   : > { %8178 = vmatprep.subr.bf16.mxu0 %v8823_v0  ;;  %8200 = vmatprep.subr.bf16.mxu1 %v8824_v1  ;;  %v459_v0 = vrot.slane %v304_v58, %v9235_v36  ;;  %v1023_v1 = vrot.slane %v880_v62, %v9226_v30 }
 0x10d   : > { %8179 = vmatpush3.bf16.msra.mxu0 %v8825_v2  ;;  %8201 = vmatpush3.bf16.msra.mxu1 %v8826_v3  ;;  %v1027_v2 = vrot.slane %v880_v62, %v9229_v32  ;;  %v1031_v3 = vrot.slane %v880_v62, %v9232_v34 }
 0x10e   : > { %8180 = vmatprep.subr.bf16.mxu0 %v8827_v5  ;;  %8202 = vmatprep.subr.bf16.mxu1 %v8828_v6  ;;  %v8858_v5 = vld [vmem:[%s9196_s9 + $0x8a0] sm:$0xff]   ;;  %v292_v6 = vunpack.c.l.bf16 %v9679_v57 }
 0x10f   : > { %v7878_v10 = vpop.f32.mrb[0].mxu0  ;;  %v7900_v14 = vpop.f32.mrb[0].mxu1 }
 0x110   : > { %v7879_v12 = vpop.f32.mrb[1].mxu0  ;;  %v7901_v17 = vpop.f32.mrb[1].mxu1 }
 0x111   : > { %v7880_v15 = vadd.f32 %v7879_v12, %v7878_v10  ;;  %v7881_v16 = vpop.f32.mrb[2].mxu0  ;;  %8181 = vmatpush3.bf16.msra.mxu0 %v8829_v7  ;;  %v7902_v21 = vadd.f32 %v7901_v17, %v7900_v14  ;;  %v7903_v22 = vpop.f32.mrb[2].mxu1  ;;  %8203 = vmatpush3.bf16.msra.mxu1 %v8830_v8  ;;  %v708_v7 = vcombine.low %v447_v59, %v451_v60  ;;  %v8860_v10 = vld [vmem:[%s9196_s9 + $0x8e8] sm:$0xff]   ;;  %v8867_v59 = vld [vmem:[%s9196_s9 + $0x878] sm:$0xff]  }
 0x112   : > { %v7882_v18 = vpop.f32.mrb[3].mxu0  ;;  %8182 = vmatprep.subr.bf16.mxu0 %v8831_v9  ;;  %v7904_v24 = vpop.f32.mrb[3].mxu1  ;;  %8204 = vmatprep.subr.bf16.mxu1 %v8832_v11  ;;  %v1035_v8 = vrot.slane %v880_v62, %v9235_v36  ;;  %v463_v9 = vrot.slane %v304_v58, %v9238_v38  ;;  %v709_v11 = vcombine.low %v455_v61, %v459_v0 }
 0x113   : > { %v9652_v26 = vadd.f32 %v7902_v21, %v7880_v15  ;;  %v1284_v12 = vcombine.low %v1023_v1, %v1027_v2  ;;  %v471_v14 = vrot.slane %v304_v58, %v9246_v44  ;;  %v8861_v15 = vld [vmem:[%s9196_s9 + $0x828] sm:$0xff]   ;;  %v716_v16 = vrot.slane %v708_v7, %v9264_v4  ;;  %v8863_v21 = vld [vmem:[%s9196_s9 + $0x870] sm:$0xff]  }
 0x114   : > { %v1285_v17 = vcombine.low %v1031_v3, %v1035_v8  ;;  %v475_v18 = vrot.slane %v304_v58, %v9251_v49  ;;  %v723_v22 = vrot.slane %v709_v11, %v9264_v4  ;;  %v8869_v3 = vld [vmem:[%s9196_s9 + $0x838] sm:$0xff]  }
 0x115   : > { %8183 = vmatpush3.bf16.msra.mxu0 %v8833_v13  ;;  %8205 = vmatpush3.bf16.msra.mxu1 %v8834_v19  ;;  %v467_v13 = vrot.slane %v304_v58, %v9241_v40  ;;  %v1039_v19 = vrot.slane %v880_v62, %v9238_v38 }
 0x116   : > { %8184 = vmatprep.subr.bf16.mxu0 %v8835_v20  ;;  %8206 = vmatprep.subr.bf16.mxu1 %v8836_v23  ;;  %v1292_v23 = vrot.slane %v1284_v12, %v9264_v4 }
 0x117   : > { %v725_v24 = vcombine.low %v463_v9, %v467_v13  ;;  %v8871_v9 = vld [vmem:[%s9196_s9 + $0x940] sm:$0xff]  }
 0x119   : > { %8185 = vmatpush3.bf16.msra.mxu0 %v8837_v25  ;;  %8207 = vmatpush3.bf16.msra.mxu1 %v8838_v27  ;;  %v1043_v25 = vrot.slane %v880_v62, %v9241_v40 }
 0x11a   : > { %8214 = vmatprep.subr.bf16.mxu0 %v8839_v28  ;;  %8236 = vmatprep.subr.bf16.mxu1 %v8840_v29  ;;  %v8862_v28 = vld [vmem:[%s9196_s9 + $0x8a8] sm:$0xff]   ;;  %v1299_v29 = vrot.slane %v1285_v17, %v9264_v4 }
 0x11c   : > { %6558 = vmatmul.mubr.bf16.vlgmr.msra.gmra.mrb[28].mxu0 %v1832_v31  ;;  %6598 = vmatmul.mubr.bf16.vlgmr.msra.gmra.mrb[28].mxu1 %v1834_v39  ;;  %v726_v31 = vcombine.low %v471_v14, %v475_v18  ;;  %v8872_v14 = vld [vmem:[%s9196_s9 + $0x9c0] sm:$0xff]  }
 0x11d   : > { %8215 = vmatpush3.bf16.msra.mxu0 %v8841_v33  ;;  %8237 = vmatpush3.bf16.msra.mxu1 %v8842_v37  ;;  %v1047_v33 = vrot.slane %v880_v62, %v9246_v44  ;;  %v1051_v37 = vrot.slane %v880_v62, %v9251_v49 }
 0x11e   : > { %8216 = vmatprep.subr.bf16.mxu0 %v8843_v41  ;;  %8238 = vmatprep.subr.bf16.mxu1 %v8844_v42 }
 0x121   : > { %8217 = vmatpush3.bf16.msra.mxu0 %v8845_v43  ;;  %8239 = vmatpush3.bf16.msra.mxu1 %v8846_v35  ;;  %v8864_v43 = vld [vmem:[%s9196_s9 + $0x8f0] sm:$0xff]  }
 0x122   : > { %8218 = vmatprep.subr.bf16.mxu0 %v8847_v45  ;;  %8240 = vmatprep.subr.bf16.mxu1 %v8848_v46  ;;  %v8865_v35 = vld [vmem:[%s9196_s9 + $0x830] sm:$0xff]   ;;  %v724_v45 = vcombine.low %v716_v16, %v723_v22  ;;  %v733_v46 = vrot.slane %v725_v24, %v9264_v4  ;;  %v8873_v16 = vld [vmem:[%s9196_s9 + $0x900] sm:$0xff]  }
 0x124   : > { %v868_v60 = vmul.f32 %v724_v45, %v292_v6  ;;  %v8883_v45 = vld [vmem:[%s9196_s9 + $0x958] sm:$0xff]  }
 0x125   : > { %8219 = vmatpush3.bf16.msra.mxu0 %v8849_v47  ;;  %8241 = vmatpush3.bf16.msra.mxu1 %v8850_v48  ;;  %v1301_v47 = vcombine.low %v1039_v19, %v1043_v25 }
 0x126   : > { %8220 = vmatprep.subr.bf16.mxu0 %v8851_v50  ;;  %8242 = vmatprep.subr.bf16.mxu1 %v8852_v51  ;;  %v1300_v51 = vcombine.low %v1292_v23, %v1299_v29  ;;  %v8875_v23 = vld [vmem:[%s9196_s9 + $0x948] sm:$0xff]  }
 0x127   : > { %v1309_v61 = vrot.slane %v1301_v47, %v9264_v4  ;;  %v8877_v29 = vld [vmem:[%s9196_s9 + $0x908] sm:$0xff]   ;;  %v8885_v47 = vld [vmem:[%s9196_s9 + $0x918] sm:$0xff]  }
 0x128   : > { %v1444_v2 = vadd.f32 %v1300_v51, %v868_v60  ;;  %v8888_v51 = vld [vmem:[%s9196_s9 + $0x9e0] sm:$0xff]  }
 0x129   : > { %8221 = vmatpush3.bf16.msra.mxu0 %v8853_v52  ;;  %8243 = vmatpush3.bf16.msra.mxu1 %v8854_v53  ;;  %v293_v52 = vunpack.c.h.bf16 %v9679_v57  ;;  %v740_v53 = vrot.slane %v726_v31, %v9264_v4 }
 0x12a   : > { %8222 = vmatprep.subr.bf16.mxu0 %v8855_v54  ;;  %8244 = vmatprep.subr.bf16.mxu1 %v8856_v55  ;;  %v1302_v54 = vcombine.low %v1047_v33, %v1051_v37  ;;  %v1611_v7 = vrot.slane %v1444_v2, %v9264_v4  ;;  %v1604_v8 = vcombine.high %v1444_v2, %v1444_v2  ;;  %v8878_v37 = vld [vmem:[%s9196_s9 + $0x988] sm:$0xff]  }
 0x12b   : > { %v741_v57 = vcombine.low %v733_v46, %v740_v53  ;;  %v8884_v46 = vld [vmem:[%s9196_s9 + $0x9d8] sm:$0xff]   ;;  %v8890_v53 = vld [vmem:[%s9196_s9 + $0x9a0] sm:$0xff]  }
 0x12c   : > { %v1316_v0 = vrot.slane %v1302_v54, %v9264_v4  ;;  %v1619_v12 = vcombine.high %v1611_v7, %v1611_v7  ;;  %v1618_v13 = vrot.slane %v1604_v8, %v9264_v4  ;;  %v8891_v54 = vld [vmem:[%s9196_s9 + $0x968] sm:$0xff]   ;;  %v8898_v8 = vld [vmem:[%s9196_s9 + $0x9b0] sm:$0xff]  }
 0x12d   : > { %8223 = vmatpush3.bf16.msra.mxu0 %v8857_v56  ;;  %8245 = vmatpush3.bf16.msra.mxu1 %v8858_v5  ;;  %v869_v5 = vmul.f32 %v741_v57, %v293_v52  ;;  %v8889_v52 = vld [vmem:[%s9196_s9 + $0x920] sm:$0xff]  }
 0x12e   : > { %8224 = vmatprep.subr.bf16.mxu0 %v8859_v63  ;;  %8246 = vmatprep.subr.bf16.mxu1 %v8860_v10  ;;  %v8866_v63 = vld [vmem:[%s9196_s9 + $0x8b0] sm:$0xff]   ;;  %v1317_v6 = vcombine.low %v1309_v61, %v1316_v0  ;;  %v8870_v10 = vld [vmem:[%s9196_s9 + $0x8b8] sm:$0xff]   ;;  %v1837_v19 = vpack.c.bf16 %v1619_v12, %v1619_v12  ;;  %v1838_v22 = vpack.c.bf16 %v1618_v13, %v1618_v13 }
 0x12f   : > { %v7922_v20 = vpop.f32.mrb[4].mxu0  ;;  %v7944_v39 = vpop.f32.mrb[4].mxu1  ;;  %v8895_v61 = vld [vmem:[%s9196_s9 + $0x970] sm:$0xff]   ;;  %v8900_v12 = vld [vmem:[%s9196_s9 + $0x9f8] sm:$0xff]  }
 0x130   : > { %v7923_v27 = vpop.f32.mrb[5].mxu0  ;;  %v7945_v48 = vpop.f32.mrb[5].mxu1  ;;  %v1445_v11 = vadd.f32 %v1317_v6, %v869_v5  ;;  %6637 = vmatprep.mubr.bf16.mxu0 %v1837_v19  ;;  %v8896_v0 = vld [vmem:[%s9196_s9 + $0x9f0] sm:$0xff]   ;;  %v8906_v19 = vld [vmem:[%s9196_s9 + $0xa80] sm:$0xff]  }
 0x131   : > { %v7924_v41 = vadd.f32 %v7923_v27, %v7922_v20  ;;  %v7925_v42 = vpop.f32.mrb[6].mxu0  ;;  %8225 = vmatpush3.bf16.msra.mxu0 %v8861_v15  ;;  %v7946_v56 = vadd.f32 %v7945_v48, %v7944_v39  ;;  %v7947_v58 = vpop.f32.mrb[6].mxu1  ;;  %8247 = vmatpush3.bf16.msra.mxu1 %v8862_v28  ;;  %v1836_v15 = vpack.c.bf16 %v1611_v7, %v1611_v7  ;;  %v8876_v28 = vld [vmem:[%s9196_s9 + $0x9c8] sm:$0xff]   ;;  %v8879_v39 = vld [vmem:[%s9196_s9 + $0x950] sm:$0xff]   ;;  %v8886_v48 = vld [vmem:[%s9196_s9 + $0x998] sm:$0xff]  }
 0x132   : > { %v7926_v50 = vpop.f32.mrb[7].mxu0  ;;  %8226 = vmatprep.subr.bf16.mxu0 %v8863_v21  ;;  %v7948_v62 = vpop.f32.mrb[7].mxu1  ;;  %8248 = vmatprep.subr.bf16.mxu1 %v8864_v43  ;;  %v9731_v17 = vrot.slane %v1445_v11, %v9264_v4  ;;  %v1621_v18 = vcombine.high %v1445_v11, %v1445_v11  ;;  %v1620_v20 = vcombine.high %v1618_v13, %v1618_v13  ;;  %v8874_v21 = vld [vmem:[%s9196_s9 + $0x980] sm:$0xff]   ;;  %v8880_v42 = vld [vmem:[%s9196_s9 + $0x9d0] sm:$0xff]   ;;  %v8901_v13 = vld [vmem:[%s9196_s9 + $0x938] sm:$0xff]  }
 0x133   : > { %v6080_v55 = vadd.f32 %v7924_v41, %v9652_v26  ;;  %v8868_v26 = vld [vmem:[%s9196_s9 + $0x8f8] sm:$0xff]   ;;  %v8881_v43 = vld [vmem:[%s9196_s9 + $0x910] sm:$0xff]   ;;  %v8887_v50 = vld [vmem:[%s9196_s9 + $0x960] sm:$0xff]  }
 0x134   : > { %v1636_v24 = vcombine.high %v9731_v17, %v9731_v17  ;;  %v9738_v25 = vrot.slane %v1621_v18, %v9264_v4  ;;  %v1839_v27 = vpack.c.bf16 %v1620_v20, %v1620_v20  ;;  %v8905_v18 = vld [vmem:[%s9196_s9 + $0xa00] sm:$0xff]  }
 0x135   : > { %v9720_v1 = vadd.f32 %v7946_v56, %v6080_v55  ;;  %8227 = vmatpush3.bf16.msra.mxu0 %v8865_v35  ;;  %8249 = vmatpush3.bf16.msra.mxu1 %v8866_v63  ;;  %v8882_v35 = vld [vmem:[%s9196_s9 + $0x990] sm:$0xff]   ;;  %v8892_v55 = vld [vmem:[%s9196_s9 + $0x9e8] sm:$0xff]  }
 0x136   : > { %8228 = vmatprep.subr.bf16.mxu0 %v8867_v59  ;;  %8250 = vmatprep.subr.bf16.mxu1 %v8868_v26  ;;  %v1841_v31 = vpack.c.bf16 %v1636_v24, %v1636_v24  ;;  %v1637_v33 = vcombine.high %v9738_v25, %v9738_v25  ;;  %v8893_v56 = vld [vmem:[%s9196_s9 + $0x928] sm:$0xff]   ;;  %v8897_v26 = vld [vmem:[%s9196_s9 + $0x930] sm:$0xff]   ;;  %v1842_v20 = vpack.c.bf16 %v9738_v25, %v9738_v25 }
 0x137   : > { %6677 = vmatprep.mubr.bf16.mxu1 %v1839_v27  ;;  %v8894_v59 = vld [vmem:[%s9196_s9 + $0x9a8] sm:$0xff]   ;;  %v8911_v24 = vld [vmem:[%s9196_s9 + $0xa50] sm:$0xff]  }
 0x138   : > { %v1843_v41 = vpack.c.bf16 %v1637_v33, %v1637_v33  ;;  %v8912_v25 = vld [vmem:[%s9196_s9 + $0xad0] sm:$0xff]   ;;  %v8917_v33 = vld [vmem:[%s9196_s9 + $0xa18] sm:$0xff]  }
 0x139   : > { %8229 = vmatpush3.bf16.msra.mxu0 %v8869_v3  ;;  %8251 = vmatpush3.bf16.msra.mxu1 %v8870_v10  ;;  %v8899_v10 = vld [vmem:[%s9196_s9 + $0x978] sm:$0xff]   ;;  %v8913_v27 = vld [vmem:[%s9196_s9 + $0xa10] sm:$0xff]  }
 0x13a   : > { %8258 = vmatprep.subr.bf16.mxu0 %v8871_v9  ;;  %8280 = vmatprep.subr.bf16.mxu1 %v8872_v14  ;;  %v8903_v14 = vld [vmem:[%s9196_s9 + $0xa40] sm:$0xff]  }
 0x13c   : > { %6638 = vmatmul.mubr.bf16.vlgmr.msra.gmra.mrb[32].mxu0 %v1836_v15  ;;  %6678 = vmatmul.mubr.bf16.vlgmr.msra.gmra.mrb[32].mxu1 %v1838_v22  ;;  %v8904_v15 = vld [vmem:[%s9196_s9 + $0xac0] sm:$0xff]   ;;  %v8908_v22 = vld [vmem:[%s9196_s9 + $0xac8] sm:$0xff]  }
 0x13d   : > { %8259 = vmatpush3.bf16.msra.mxu0 %v8873_v16  ;;  %8281 = vmatpush3.bf16.msra.mxu1 %v8874_v21  ;;  %v1840_v16 = vpack.c.bf16 %v9731_v17, %v9731_v17  ;;  %v8907_v21 = vld [vmem:[%s9196_s9 + $0xa48] sm:$0xff]  }
 0x13e   : > { %8260 = vmatprep.subr.bf16.mxu0 %v8875_v23  ;;  %6717 = vmatprep.mubr.bf16.mxu0 %v1841_v31  ;;  %v8909_v23 = vld [vmem:[%s9196_s9 + $0xa08] sm:$0xff]   ;;  %v8916_v31 = vld [vmem:[%s9196_s9 + $0xad8] sm:$0xff]  }
 0x13f   : > { %8282 = vmatprep.subr.bf16.mxu1 %v8876_v28  ;;  %6757 = vmatprep.mubr.bf16.mxu1 %v1843_v41  ;;  %v8910_v17 = vld [vmem:[%s9196_s9 + $0xa88] sm:$0xff]   ;;  %v8914_v28 = vld [vmem:[%s9196_s9 + $0xa90] sm:$0xff]   ;;  %v8920_v41 = vld [vmem:[%s9196_s9 + $0xae0] sm:$0xff]  }
 0x141   : > { %8261 = vmatpush3.bf16.msra.mxu0 %v8877_v29  ;;  %8283 = vmatpush3.bf16.msra.mxu1 %v8878_v37  ;;  %v8915_v29 = vld [vmem:[%s9196_s9 + $0xa58] sm:$0xff]  }
 0x142   : > { %8262 = vmatprep.subr.bf16.mxu0 %v8879_v39  ;;  %8284 = vmatprep.subr.bf16.mxu1 %v8880_v42  ;;  %v8918_v37 = vld [vmem:[%s9196_s9 + $0xa98] sm:$0xff]   ;;  %v8919_v39 = vld [vmem:[%s9196_s9 + $0xa60] sm:$0xff]  }
 0x143   : > { %v8921_v42 = vld [vmem:[%s9196_s9 + $0xa20] sm:$0xff]  }
 0x145   : > { %8263 = vmatpush3.bf16.msra.mxu0 %v8881_v43  ;;  %8285 = vmatpush3.bf16.msra.mxu1 %v8882_v35  ;;  %v8922_v43 = vld [vmem:[%s9196_s9 + $0xaa0] sm:$0xff]   ;;  %v9797_v35 = vld [vmem:[%s9181_s24 + $0x28] sm:$0xff] }
 0x146   : > { %8264 = vmatprep.subr.bf16.mxu0 %v8883_v45  ;;  %8286 = vmatprep.subr.bf16.mxu1 %v8884_v46  ;;  %v305_v45 = vld [vmem:[%s9186_s27 + $0x28] sm:$0xff] }
 0x147   : > { %v9801_v46 = vld [vmem:[%s9191_s30 + $0x28] sm:$0xff] }
 0x149   : > { %8265 = vmatpush3.bf16.msra.mxu0 %v8885_v47  ;;  %8287 = vmatpush3.bf16.msra.mxu1 %v8886_v48  ;;  %v8923_v47 = vld [vmem:[%s9196_s9 + $0xa68] sm:$0xff]   ;;  %v294_v48 = vunpack.c.l.bf16 %v9797_v35 }
 0x14a   : > { %8266 = vmatprep.subr.bf16.mxu0 %v8887_v50  ;;  %8288 = vmatprep.subr.bf16.mxu1 %v8888_v51  ;;  %v479_v50 = vrot.slane %v305_v45, %v9226_v30  ;;  %v483_v51 = vrot.slane %v305_v45, %v9229_v32 }
 0x14d   : > { %8267 = vmatpush3.bf16.msra.mxu0 %v8889_v52  ;;  %8289 = vmatpush3.bf16.msra.mxu1 %v8890_v53  ;;  %v487_v52 = vrot.slane %v305_v45, %v9232_v34  ;;  %v8924_v53 = vld [vmem:[%s9196_s9 + $0xae8] sm:$0xff]  }
 0x14e   : > { %8268 = vmatprep.subr.bf16.mxu0 %v8891_v54  ;;  %8290 = vmatprep.subr.bf16.mxu1 %v8892_v55  ;;  %v491_v54 = vrot.slane %v305_v45, %v9235_v36  ;;  %v1055_v55 = vrot.slane %v9801_v46, %v9226_v30 }
 0x14f   : > { %v7966_v58 = vpop.f32.mrb[8].mxu0  ;;  %v7988_v62 = vpop.f32.mrb[8].mxu1 }
 0x150   : > { %v7967_v60 = vpop.f32.mrb[9].mxu0  ;;  %v7989_v2 = vpop.f32.mrb[9].mxu1 }
 0x151   : > { %v7968_v63 = vadd.f32 %v7967_v60, %v7966_v58  ;;  %v7969_v57 = vpop.f32.mrb[10].mxu0  ;;  %v7990_v6 = vadd.f32 %v7989_v2, %v7988_v62  ;;  %v7991_v7 = vpop.f32.mrb[10].mxu1  ;;  %8269 = vmatpush3.bf16.msra.mxu0 %v8893_v56  ;;  %8291 = vmatpush3.bf16.msra.mxu1 %v8894_v59  ;;  %v1059_v56 = vrot.slane %v9801_v46, %v9229_v32  ;;  %v8925_v59 = vld [vmem:[%s9196_s9 + $0xa28] sm:$0xff]   ;;  %v295_v62 = vunpack.c.h.bf16 %v9797_v35 }
 0x152   : > { %v7970_v3 = vpop.f32.mrb[11].mxu0  ;;  %v7992_v9 = vpop.f32.mrb[11].mxu1  ;;  %8270 = vmatprep.subr.bf16.mxu0 %v8895_v61  ;;  %8292 = vmatprep.subr.bf16.mxu1 %v8896_v0  ;;  %v1063_v58 = vrot.slane %v9801_v46, %v9232_v34  ;;  %v742_v60 = vcombine.low %v479_v50, %v483_v51  ;;  %v1067_v61 = vrot.slane %v9801_v46, %v9235_v36  ;;  %v8926_v0 = vld [vmem:[%s9196_s9 + $0xaa8] sm:$0xff]   ;;  %v8927_v7 = vld [vmem:[%s9196_s9 + $0xa70] sm:$0xff]   ;;  %v8932_v50 = vld [vmem:[%s9196_s9 + $0xaf8] sm:$0xff]  }
 0x153   : > { %v6160_v5 = vadd.f32 %v7968_v63, %v9720_v1  ;;  %v8902_v1 = vld [vmem:[%s9196_s9 + $0x9b8] sm:$0xff]   ;;  %v495_v63 = vrot.slane %v305_v45, %v9238_v38  ;;  %v1318_v2 = vcombine.low %v1055_v55, %v1059_v56  ;;  %v499_v3 = vrot.slane %v305_v45, %v9241_v40  ;;  %v8935_v56 = vld [vmem:[%s9196_s9 + $0xb40] sm:$0xff]  }
 0x154   : > { %v1319_v9 = vcombine.low %v1063_v58, %v1067_v61  ;;  %v1083_v35 = vrot.slane %v9801_v46, %v9251_v49  ;;  %v8936_v61 = vld [vmem:[%s9196_s9 + $0xbc0] sm:$0xff]  }
 0x155   : > { %v9767_v11 = vadd.f32 %v7990_v6, %v6160_v5  ;;  %8271 = vmatpush3.bf16.msra.mxu0 %v8897_v26  ;;  %8293 = vmatpush3.bf16.msra.mxu1 %v8898_v8  ;;  %v743_v26 = vcombine.low %v487_v52, %v491_v54  ;;  %v503_v5 = vrot.slane %v305_v45, %v9246_v44  ;;  %v8933_v54 = vld [vmem:[%s9196_s9 + $0xa38] sm:$0xff]  }
 0x156   : > { %8272 = vmatprep.subr.bf16.mxu0 %v8899_v10  ;;  %8294 = vmatprep.subr.bf16.mxu1 %v8900_v12  ;;  %v750_v8 = vrot.slane %v742_v60, %v9264_v4  ;;  %v507_v10 = vrot.slane %v305_v45, %v9251_v49  ;;  %v1071_v12 = vrot.slane %v9801_v46, %v9238_v38 }
 0x159   : > { %8273 = vmatpush3.bf16.msra.mxu0 %v8901_v13  ;;  %8295 = vmatpush3.bf16.msra.mxu1 %v8902_v1 }
 0x15a   : > { %8302 = vmatprep.subr.bf16.mxu0 %v8903_v14  ;;  %8324 = vmatprep.subr.bf16.mxu1 %v8904_v15  ;;  %v757_v15 = vrot.slane %v743_v26, %v9264_v4 }
 0x15c   : > { %6718 = vmatmul.mubr.bf16.vlgmr.msra.gmra.mrb[36].mxu0 %v1840_v16  ;;  %6758 = vmatmul.mubr.bf16.vlgmr.msra.gmra.mrb[36].mxu1 %v1842_v20  ;;  %v1326_v16 = vrot.slane %v1318_v2, %v9264_v4 }
 0x15d   : > { %8303 = vmatpush3.bf16.msra.mxu0 %v8905_v18  ;;  %8325 = vmatpush3.bf16.msra.mxu1 %v8906_v19  ;;  %v759_v18 = vcombine.low %v495_v63, %v499_v3 }
 0x15e   : > { %8304 = vmatprep.subr.bf16.mxu0 %v8907_v21  ;;  %8326 = vmatprep.subr.bf16.mxu1 %v8908_v22  ;;  %v8928_v21 = vld [vmem:[%s9196_s9 + $0xaf0] sm:$0xff]  }
 0x15f   : > { %v8929_v22 = vld [vmem:[%s9196_s9 + $0xa30] sm:$0xff]  }
 0x161   : > { %8305 = vmatpush3.bf16.msra.mxu0 %v8909_v23  ;;  %8327 = vmatpush3.bf16.msra.mxu1 %v8910_v17  ;;  %v1333_v23 = vrot.slane %v1319_v9, %v9264_v4  ;;  %v760_v17 = vcombine.low %v503_v5, %v507_v10 }
 0x162   : > { %8306 = vmatprep.subr.bf16.mxu0 %v8911_v24  ;;  %8328 = vmatprep.subr.bf16.mxu1 %v8912_v25  ;;  %v1075_v24 = vrot.slane %v9801_v46, %v9241_v40  ;;  %v1079_v25 = vrot.slane %v9801_v46, %v9246_v44 }
 0x164   : > { %v1336_v52 = vcombine.low %v1079_v25, %v1083_v35  ;;  %v8948_v25 = vld [vmem:[%s9196_s9 + $0xbd8] sm:$0xff]   ;;  %v8957_v35 = vld [vmem:[%s9196_s9 + $0xb28] sm:$0xff]  }
 0x165   : > { %8307 = vmatpush3.bf16.msra.mxu0 %v8913_v27  ;;  %8329 = vmatpush3.bf16.msra.mxu1 %v8914_v28 }
 0x166   : > { %8308 = vmatprep.subr.bf16.mxu0 %v8915_v29  ;;  %8330 = vmatprep.subr.bf16.mxu1 %v8916_v31  ;;  %v8930_v31 = vld [vmem:[%s9196_s9 + $0xab0] sm:$0xff]   ;;  %v1350_v58 = vrot.slane %v1336_v52, %v9264_v4 }
 0x167   : > { %v8959_v52 = vld [vmem:[%s9196_s9 + $0xb70] sm:$0xff]  }
 0x169   : > { %8309 = vmatpush3.bf16.msra.mxu0 %v8917_v33  ;;  %8331 = vmatpush3.bf16.msra.mxu1 %v8918_v37  ;;  %v758_v33 = vcombine.low %v750_v8, %v757_v15  ;;  %v767_v37 = vrot.slane %v759_v18, %v9264_v4  ;;  %v8939_v8 = vld [vmem:[%s9196_s9 + $0xb48] sm:$0xff]   ;;  %v8943_v18 = vld [vmem:[%s9196_s9 + $0xb50] sm:$0xff]  }
 0x16a   : > { %8310 = vmatprep.subr.bf16.mxu0 %v8919_v39  ;;  %8332 = vmatprep.subr.bf16.mxu1 %v8920_v41  ;;  %v8931_v41 = vld [vmem:[%s9196_s9 + $0xa78] sm:$0xff]  }
 0x16d   : > { %8311 = vmatpush3.bf16.msra.mxu0 %v8921_v42  ;;  %8333 = vmatpush3.bf16.msra.mxu1 %v8922_v43  ;;  %v1334_v42 = vcombine.low %v1326_v16, %v1333_v23  ;;  %v774_v43 = vrot.slane %v760_v17, %v9264_v4  ;;  %v8942_v16 = vld [vmem:[%s9196_s9 + $0xb88] sm:$0xff]   ;;  %v8946_v17 = vld [vmem:[%s9196_s9 + $0xb90] sm:$0xff]  }
 0x16e   : > { %8312 = vmatprep.subr.bf16.mxu0 %v8923_v47  ;;  %8334 = vmatprep.subr.bf16.mxu1 %v8924_v53  ;;  %v870_v47 = vmul.f32 %v758_v33, %v294_v48  ;;  %v8953_v33 = vld [vmem:[%s9196_s9 + $0xb20] sm:$0xff]  }
 0x16f   : > { %v8010_v57 = vpop.f32.mrb[12].mxu0  ;;  %v8032_v13 = vpop.f32.mrb[12].mxu1  ;;  %v775_v51 = vcombine.low %v767_v37, %v774_v43  ;;  %v8954_v37 = vld [vmem:[%s9196_s9 + $0xba0] sm:$0xff]  }
 0x170   : > { %v8011_v6 = vpop.f32.mrb[13].mxu0  ;;  %v8033_v19 = vpop.f32.mrb[13].mxu1  ;;  %v1446_v55 = vadd.f32 %v1334_v42, %v870_v47  ;;  %v8956_v42 = vld [vmem:[%s9196_s9 + $0xbe8] sm:$0xff]  }
 0x171   : > { %v8012_v1 = vadd.f32 %v8011_v6, %v8010_v57  ;;  %v8013_v14 = vpop.f32.mrb[14].mxu0  ;;  %v8034_v28 = vadd.f32 %v8033_v19, %v8032_v13  ;;  %v8035_v29 = vpop.f32.mrb[14].mxu1  ;;  %8313 = vmatpush3.bf16.msra.mxu0 %v8925_v59  ;;  %8335 = vmatpush3.bf16.msra.mxu1 %v8926_v0  ;;  %v871_v46 = vmul.f32 %v775_v51, %v295_v62  ;;  %v8934_v59 = vld [vmem:[%s9196_s9 + $0xab8] sm:$0xff]   ;;  %v8937_v62 = vld [vmem:[%s9196_s9 + $0xb00] sm:$0xff]   ;;  %v8940_v13 = vld [vmem:[%s9196_s9 + $0xbc8] sm:$0xff]  }
 0x172   : > { %v8014_v20 = vpop.f32.mrb[15].mxu0  ;;  %v8036_v39 = vpop.f32.mrb[15].mxu1  ;;  %8314 = vmatprep.subr.bf16.mxu0 %v8927_v7  ;;  %8336 = vmatprep.subr.bf16.mxu1 %v8928_v21  ;;  %v1645_v48 = vrot.slane %v1446_v55, %v9264_v4  ;;  %v1638_v60 = vcombine.high %v1446_v55, %v1446_v55  ;;  %v8938_v6 = vld [vmem:[%s9196_s9 + $0xb80] sm:$0xff]   ;;  %v8944_v21 = vld [vmem:[%s9196_s9 + $0xbd0] sm:$0xff]   ;;  %v8958_v51 = vld [vmem:[%s9196_s9 + $0xba8] sm:$0xff]  }
 0x173   : > { %v6240_v27 = vadd.f32 %v8012_v1, %v9767_v11  ;;  %v1335_v11 = vcombine.low %v1071_v12, %v1075_v24  ;;  %v8941_v1 = vld [vmem:[%s9196_s9 + $0xb08] sm:$0xff]   ;;  %v8947_v24 = vld [vmem:[%s9196_s9 + $0xb58] sm:$0xff]   ;;  %v8951_v29 = vld [vmem:[%s9196_s9 + $0xb60] sm:$0xff]  }
 0x174   : > { %v1653_v57 = vcombine.high %v1645_v48, %v1645_v48  ;;  %v1652_v0 = vrot.slane %v1638_v60, %v9264_v4  ;;  %v1844_v26 = vpack.c.bf16 %v1645_v48, %v1645_v48  ;;  %v8955_v39 = vld [vmem:[%s9196_s9 + $0xb68] sm:$0xff]   ;;  %v8961_v48 = vld [vmem:[%s9196_s9 + $0xb30] sm:$0xff]  }
 0x175   : > { %v9845_v45 = vadd.f32 %v8034_v28, %v6240_v27  ;;  %v1343_v53 = vrot.slane %v1335_v11, %v9264_v4  ;;  %8315 = vmatpush3.bf16.msra.mxu0 %v8929_v22  ;;  %8337 = vmatpush3.bf16.msra.mxu1 %v8930_v31  ;;  %v8945_v22 = vld [vmem:[%s9196_s9 + $0xb10] sm:$0xff]   ;;  %v8949_v27 = vld [vmem:[%s9196_s9 + $0xb18] sm:$0xff]   ;;  %v8952_v31 = vld [vmem:[%s9196_s9 + $0xbe0] sm:$0xff]  }
 0x176   : > { %8316 = vmatprep.subr.bf16.mxu0 %v8931_v41  ;;  %8338 = vmatprep.subr.bf16.mxu1 %v8932_v50  ;;  %v1845_v3 = vpack.c.bf16 %v1653_v57, %v1653_v57  ;;  %v1654_v5 = vcombine.high %v1652_v0, %v1652_v0  ;;  %v1846_v7 = vpack.c.bf16 %v1652_v0, %v1652_v0  ;;  %v8950_v28 = vld [vmem:[%s9196_s9 + $0xb98] sm:$0xff]  }
 0x177   : > { %v1351_v63 = vcombine.low %v1343_v53, %v1350_v58  ;;  %v8960_v58 = vld [vmem:[%s9196_s9 + $0xbf0] sm:$0xff]   ;;  %v8964_v57 = vld [vmem:[%s9196_s9 + $0xbf8] sm:$0xff]  }
 0x178   : > { %6797 = vmatprep.mubr.bf16.mxu0 %v1845_v3  ;;  %v1847_v12 = vpack.c.bf16 %v1654_v5, %v1654_v5  ;;  %v8966_v0 = vld [vmem:[%s9196_s9 + $0xbb8] sm:$0xff]   ;;  %v8969_v3 = vld [vmem:[%s9196_s9 + $0xc00] sm:$0xff]  }
 0x179   : > { %8317 = vmatpush3.bf16.msra.mxu0 %v8933_v54  ;;  %v1447_v2 = vadd.f32 %v1351_v63, %v871_v46  ;;  %8339 = vmatpush3.bf16.msra.mxu1 %v8934_v59  ;;  %v8963_v63 = vld [vmem:[%s9196_s9 + $0xb78] sm:$0xff]   ;;  %v8970_v5 = vld [vmem:[%s9196_s9 + $0xc80] sm:$0xff]  }
 0x17a   : > { %8346 = vmatprep.subr.bf16.mxu0 %v8935_v56  ;;  %8368 = vmatprep.subr.bf16.mxu1 %v8936_v61  ;;  %v8962_v61 = vld [vmem:[%s9196_s9 + $0xbb0] sm:$0xff]  }
 0x17b   : > { %v9860_v9 = vrot.slane %v1447_v2, %v9264_v4  ;;  %v1655_v10 = vcombine.high %v1447_v2, %v1447_v2  ;;  %6837 = vmatprep.mubr.bf16.mxu1 %v1847_v12  ;;  %v8975_v12 = vld [vmem:[%s9196_s9 + $0xc50] sm:$0xff]  }
 0x17c   : > { %6798 = vmatmul.mubr.bf16.vlgmr.msra.gmra.mrb[40].mxu0 %v1844_v26  ;;  %6838 = vmatmul.mubr.bf16.vlgmr.msra.gmra.mrb[40].mxu1 %v1846_v7  ;;  %v8967_v26 = vld [vmem:[%s9196_s9 + $0xc40] sm:$0xff]   ;;  %v8971_v7 = vld [vmem:[%s9196_s9 + $0xc48] sm:$0xff]  }
 0x17d   : > { %v1670_v14 = vcombine.high %v9860_v9, %v9860_v9  ;;  %v9867_v15 = vrot.slane %v1655_v10, %v9264_v4  ;;  %8347 = vmatpush3.bf16.msra.mxu0 %v8937_v62  ;;  %8369 = vmatpush3.bf16.msra.mxu1 %v8938_v6  ;;  %v8968_v62 = vld [vmem:[%s9196_s9 + $0xcc0] sm:$0xff]   ;;  %v1848_v2 = vpack.c.bf16 %v9860_v9, %v9860_v9  ;;  %v8973_v10 = vld [vmem:[%s9196_s9 + $0xc08] sm:$0xff]  }
 0x17e   : > { %8348 = vmatprep.subr.bf16.mxu0 %v8939_v8  ;;  %8370 = vmatprep.subr.bf16.mxu1 %v8940_v13  ;;  %v8972_v8 = vld [vmem:[%s9196_s9 + $0xcc8] sm:$0xff]   ;;  %v8976_v13 = vld [vmem:[%s9196_s9 + $0xcd0] sm:$0xff]  }
 0x17f   : > { %v1849_v19 = vpack.c.bf16 %v1670_v14, %v1670_v14  ;;  %v1671_v20 = vcombine.high %v9867_v15, %v9867_v15  ;;  %v1850_v6 = vpack.c.bf16 %v9867_v15, %v9867_v15  ;;  %v8974_v9 = vld [vmem:[%s9196_s9 + $0xc88] sm:$0xff]   ;;  %v8978_v14 = vld [vmem:[%s9196_s9 + $0xc90] sm:$0xff]   ;;  %v8979_v15 = vld [vmem:[%s9196_s9 + $0xc58] sm:$0xff]  }
 0x181   : > { %6877 = vmatprep.mubr.bf16.mxu0 %v1849_v19  ;;  %v1851_v23 = vpack.c.bf16 %v1671_v20, %v1671_v20  ;;  %8349 = vmatpush3.bf16.msra.mxu0 %v8941_v1  ;;  %v8977_v1 = vld [vmem:[%s9196_s9 + $0xc10] sm:$0xff]   ;;  %v8982_v19 = vld [vmem:[%s9196_s9 + $0xc98] sm:$0xff]   ;;  %v8983_v20 = vld [vmem:[%s9196_s9 + $0xc60] sm:$0xff]  }
 0x182   : > { %8350 = vmatprep.subr.bf16.mxu0 %v8943_v18  ;;  %8371 = vmatpush3.bf16.msra.mxu1 %v8942_v16  ;;  %v8980_v16 = vld [vmem:[%s9196_s9 + $0xcd8] sm:$0xff]  }
 0x183   : > { %6917 = vmatprep.mubr.bf16.mxu1 %v1851_v23  ;;  %8372 = vmatprep.subr.bf16.mxu1 %v8944_v21  ;;  %v8981_v18 = vld [vmem:[%s9196_s9 + $0xc18] sm:$0xff]   ;;  %v8984_v21 = vld [vmem:[%s9196_s9 + $0xce0] sm:$0xff]   ;;  %v9923_v23 = vld [vmem:[%s9181_s24 + $0x30] sm:$0xff] }
 0x185   : > { %8351 = vmatpush3.bf16.msra.mxu0 %v8945_v22  ;;  %v8985_v22 = vld [vmem:[%s9196_s9 + $0xc20] sm:$0xff]  }
 0x186   : > { %8352 = vmatprep.subr.bf16.mxu0 %v8947_v24  ;;  %8373 = vmatpush3.bf16.msra.mxu1 %v8946_v17  ;;  %v296_v17 = vunpack.c.l.bf16 %v9923_v23  ;;  %v306_v24 = vld [vmem:[%s9186_s27 + $0x30] sm:$0xff] }
 0x187   : > { %8374 = vmatprep.subr.bf16.mxu1 %v8948_v25  ;;  %v9928_v25 = vld [vmem:[%s9191_s30 + $0x30] sm:$0xff] }
 0x189   : > { %8353 = vmatpush3.bf16.msra.mxu0 %v8949_v27  ;;  %v8987_v27 = vld [vmem:[%s9196_s9 + $0xc68] sm:$0xff]  }
 0x18a   : > { %8354 = vmatprep.subr.bf16.mxu0 %v8951_v29  ;;  %8375 = vmatpush3.bf16.msra.mxu1 %v8950_v28  ;;  %v511_v28 = vrot.slane %v306_v24, %v9226_v30  ;;  %v515_v29 = vrot.slane %v306_v24, %v9229_v32 }
 0x18b   : > { %8376 = vmatprep.subr.bf16.mxu1 %v8952_v31  ;;  %v519_v31 = vrot.slane %v306_v24, %v9232_v34 }
 0x18d   : > { %8355 = vmatpush3.bf16.msra.mxu0 %v8953_v33  ;;  %v523_v33 = vrot.slane %v306_v24, %v9235_v36 }
 0x18e   : > { %8356 = vmatprep.subr.bf16.mxu0 %v8955_v39  ;;  %8377 = vmatpush3.bf16.msra.mxu1 %v8954_v37  ;;  %v8986_v37 = vld [vmem:[%s9196_s9 + $0xca0] sm:$0xff]  }
 0x18f   : > { %v8054_v41 = vpop.f32.mrb[16].mxu0  ;;  %v8076_v11 = vpop.f32.mrb[16].mxu1  ;;  %8378 = vmatprep.subr.bf16.mxu1 %v8956_v42  ;;  %v1091_v42 = vrot.slane %v9928_v25, %v9229_v32 }
 0x190   : > { %v8055_v43 = vpop.f32.mrb[17].mxu0  ;;  %v8077_v53 = vpop.f32.mrb[17].mxu1 }
 0x191   : > { %v8056_v47 = vadd.f32 %v8055_v43, %v8054_v41  ;;  %v8057_v50 = vpop.f32.mrb[18].mxu0  ;;  %v8078_v56 = vadd.f32 %v8077_v53, %v8076_v11  ;;  %v8079_v46 = vpop.f32.mrb[18].mxu1  ;;  %8357 = vmatpush3.bf16.msra.mxu0 %v8957_v35  ;;  %v1087_v41 = vrot.slane %v9928_v25, %v9226_v30  ;;  %v1095_v43 = vrot.slane %v9928_v25, %v9232_v34 }
 0x192   : > { %v8058_v54 = vpop.f32.mrb[19].mxu0  ;;  %v8080_v59 = vpop.f32.mrb[19].mxu1  ;;  %8358 = vmatprep.subr.bf16.mxu0 %v8959_v52  ;;  %8379 = vmatpush3.bf16.msra.mxu1 %v8958_v51  ;;  %v1099_v35 = vrot.slane %v9928_v25, %v9235_v36  ;;  %v776_v50 = vcombine.low %v511_v28, %v515_v29  ;;  %v777_v51 = vcombine.low %v519_v31, %v523_v33  ;;  %v8989_v46 = vld [vmem:[%s9196_s9 + $0xc28] sm:$0xff]   ;;  %v8994_v28 = vld [vmem:[%s9196_s9 + $0xcb0] sm:$0xff]   ;;  %v8996_v31 = vld [vmem:[%s9196_s9 + $0xcf8] sm:$0xff]  }
 0x193   : > { %v6320_v55 = vadd.f32 %v8056_v47, %v9845_v45  ;;  %8380 = vmatprep.subr.bf16.mxu1 %v8960_v58  ;;  %v8965_v45 = vld [vmem:[%s9196_s9 + $0xb38] sm:$0xff]   ;;  %v8988_v47 = vld [vmem:[%s9196_s9 + $0xce8] sm:$0xff]   ;;  %v527_v52 = vrot.slane %v306_v24, %v9238_v38  ;;  %v531_v53 = vrot.slane %v306_v24, %v9241_v40  ;;  %v8991_v58 = vld [vmem:[%s9196_s9 + $0xc70] sm:$0xff]   ;;  %v1352_v59 = vcombine.low %v1087_v41, %v1091_v42 }
 0x195   : > { %v9892_v60 = vadd.f32 %v8078_v56, %v6320_v55  ;;  %8359 = vmatpush3.bf16.msra.mxu0 %v8961_v48  ;;  %v1353_v48 = vcombine.low %v1095_v43, %v1099_v35 }
 0x196   : > { %8360 = vmatprep.subr.bf16.mxu0 %v8963_v63  ;;  %8381 = vmatpush3.bf16.msra.mxu1 %v8962_v61  ;;  %v535_v61 = vrot.slane %v306_v24, %v9246_v44 }
 0x197   : > { %8382 = vmatprep.subr.bf16.mxu1 %v8964_v57 }
 0x199   : > { %8361 = vmatpush3.bf16.msra.mxu0 %v8965_v45  ;;  %v784_v45 = vrot.slane %v776_v50, %v9264_v4 }
 0x19a   : > { %8390 = vmatprep.subr.bf16.mxu0 %v8967_v26  ;;  %8383 = vmatpush3.bf16.msra.mxu1 %v8966_v0  ;;  %v791_v0 = vrot.slane %v777_v51, %v9264_v4  ;;  %v539_v26 = vrot.slane %v306_v24, %v9251_v49  ;;  %v9000_v51 = vld [vmem:[%s9196_s9 + $0xdc0] sm:$0xff]  }
 0x19b   : > { %8412 = vmatprep.subr.bf16.mxu1 %v8968_v62  ;;  %v793_v62 = vcombine.low %v527_v52, %v531_v53 }
 0x19c   : > { %6878 = vmatmul.mubr.bf16.vlgmr.msra.gmra.mrb[44].mxu0 %v1848_v2 }
 0x19d   : > { %8391 = vmatpush3.bf16.msra.mxu0 %v8969_v3  ;;  %6918 = vmatmul.mubr.bf16.vlgmr.msra.gmra.mrb[44].mxu1 %v1850_v6  ;;  %v8990_v6 = vld [vmem:[%s9196_s9 + $0xca8] sm:$0xff]  }
 0x19e   : > { %8392 = vmatprep.subr.bf16.mxu0 %v8971_v7  ;;  %8413 = vmatpush3.bf16.msra.mxu1 %v8970_v5  ;;  %v1360_v7 = vrot.slane %v1352_v59, %v9264_v4 }
 0x19f   : > { %8414 = vmatprep.subr.bf16.mxu1 %v8972_v8  ;;  %v1367_v8 = vrot.slane %v1353_v48, %v9264_v4  ;;  %v9003_v48 = vld [vmem:[%s9196_s9 + $0xd48] sm:$0xff]  }
 0x1a1   : > { %8393 = vmatpush3.bf16.msra.mxu0 %v8973_v10 }
 0x1a2   : > { %8394 = vmatprep.subr.bf16.mxu0 %v8975_v12  ;;  %8415 = vmatpush3.bf16.msra.mxu1 %v8974_v9  ;;  %v8992_v9 = vld [vmem:[%s9196_s9 + $0xcf0] sm:$0xff]   ;;  %v792_v12 = vcombine.low %v784_v45, %v791_v0  ;;  %v9005_v0 = vld [vmem:[%s9196_s9 + $0xd08] sm:$0xff]  }
 0x1a3   : > { %8416 = vmatprep.subr.bf16.mxu1 %v8976_v13  ;;  %v794_v13 = vcombine.low %v535_v61, %v539_v26  ;;  %v9006_v26 = vld [vmem:[%s9196_s9 + $0xd88] sm:$0xff]  }
 0x1a5   : > { %8395 = vmatpush3.bf16.msra.mxu0 %v8977_v1  ;;  %v801_v1 = vrot.slane %v793_v62, %v9264_v4  ;;  %v808_v24 = vrot.slane %v794_v13, %v9264_v4  ;;  %v9012_v13 = vld [vmem:[%s9196_s9 + $0xdd8] sm:$0xff]  }
 0x1a6   : > { %8396 = vmatprep.subr.bf16.mxu0 %v8979_v15  ;;  %8417 = vmatpush3.bf16.msra.mxu1 %v8978_v14  ;;  %v1103_v14 = vrot.slane %v9928_v25, %v9238_v38  ;;  %v8993_v15 = vld [vmem:[%s9196_s9 + $0xc30] sm:$0xff]  }
 0x1a7   : > { %8418 = vmatprep.subr.bf16.mxu1 %v8980_v16  ;;  %v1368_v16 = vcombine.low %v1360_v7, %v1367_v8  ;;  %v9009_v8 = vld [vmem:[%s9196_s9 + $0xd10] sm:$0xff]  }
 0x1a9   : > { %8397 = vmatpush3.bf16.msra.mxu0 %v8981_v18  ;;  %v1107_v18 = vrot.slane %v9928_v25, %v9241_v40 }
 0x1aa   : > { %8398 = vmatprep.subr.bf16.mxu0 %v8983_v20  ;;  %8419 = vmatpush3.bf16.msra.mxu1 %v8982_v19  ;;  %v1111_v19 = vrot.slane %v9928_v25, %v9246_v44  ;;  %v8995_v20 = vld [vmem:[%s9196_s9 + $0xc78] sm:$0xff]  }
 0x1ab   : > { %8420 = vmatprep.subr.bf16.mxu1 %v8984_v21  ;;  %v872_v21 = vmul.f32 %v792_v12, %v296_v17  ;;  %v1369_v29 = vcombine.low %v1103_v14, %v1107_v18  ;;  %v8997_v17 = vld [vmem:[%s9196_s9 + $0xc38] sm:$0xff]   ;;  %v9017_v18 = vld [vmem:[%s9196_s9 + $0xd20] sm:$0xff]  }
 0x1ac   : > { %v9011_v12 = vld [vmem:[%s9196_s9 + $0xd58] sm:$0xff]  }
 0x1ad   : > { %8399 = vmatpush3.bf16.msra.mxu0 %v8985_v22  ;;  %v297_v22 = vunpack.c.h.bf16 %v9923_v23  ;;  %v1448_v33 = vadd.f32 %v1368_v16, %v872_v21  ;;  %v1377_v23 = vrot.slane %v1369_v29, %v9264_v4  ;;  %v9014_v14 = vld [vmem:[%s9196_s9 + $0xd98] sm:$0xff]   ;;  %v9016_v16 = vld [vmem:[%s9196_s9 + $0xde0] sm:$0xff]  }
 0x1ae   : > { %8400 = vmatprep.subr.bf16.mxu0 %v8987_v27  ;;  %8421 = vmatpush3.bf16.msra.mxu1 %v8986_v37  ;;  %v1115_v27 = vrot.slane %v9928_v25, %v9251_v49  ;;  %v809_v37 = vcombine.low %v801_v1, %v808_v24  ;;  %v8999_v25 = vld [vmem:[%s9196_s9 + $0xd40] sm:$0xff]   ;;  %v9013_v1 = vld [vmem:[%s9196_s9 + $0xd18] sm:$0xff]  }
 0x1af   : > { %v8098_v39 = vpop.f32.mrb[20].mxu0  ;;  %v8120_v54 = vpop.f32.mrb[20].mxu1  ;;  %8422 = vmatprep.subr.bf16.mxu1 %v8988_v47  ;;  %v1679_v41 = vrot.slane %v1448_v33, %v9264_v4  ;;  %v1672_v42 = vcombine.high %v1448_v33, %v1448_v33 }
 0x1b0   : > { %v8099_v11 = vpop.f32.mrb[21].mxu0  ;;  %v8121_v63 = vpop.f32.mrb[21].mxu1  ;;  %v873_v43 = vmul.f32 %v809_v37, %v297_v22  ;;  %v9020_v22 = vld [vmem:[%s9196_s9 + $0xde8] sm:$0xff]  }
 0x1b1   : > { %v8100_v55 = vadd.f32 %v8099_v11, %v8098_v39  ;;  %v8101_v56 = vpop.f32.mrb[22].mxu0  ;;  %v8122_v3 = vadd.f32 %v8121_v63, %v8120_v54  ;;  %v8123_v5 = vpop.f32.mrb[22].mxu1  ;;  %8401 = vmatpush3.bf16.msra.mxu0 %v8989_v46  ;;  %v1370_v39 = vcombine.low %v1111_v19, %v1115_v27  ;;  %v8998_v11 = vld [vmem:[%s9196_s9 + $0xcb8] sm:$0xff]   ;;  %v1687_v47 = vcombine.high %v1679_v41, %v1679_v41  ;;  %v9001_v54 = vld [vmem:[%s9196_s9 + $0xd00] sm:$0xff]   ;;  %v9004_v63 = vld [vmem:[%s9196_s9 + $0xdc8] sm:$0xff]  }
 0x1b2   : > { %v8102_v57 = vpop.f32.mrb[23].mxu0  ;;  %v8124_v10 = vpop.f32.mrb[23].mxu1  ;;  %8402 = vmatprep.subr.bf16.mxu0 %v8991_v58  ;;  %8423 = vmatpush3.bf16.msra.mxu1 %v8990_v6  ;;  %v1686_v50 = vrot.slane %v1672_v42, %v9264_v4  ;;  %v1852_v53 = vpack.c.bf16 %v1679_v41, %v1679_v41  ;;  %v9002_v46 = vld [vmem:[%s9196_s9 + $0xd80] sm:$0xff]   ;;  %v9008_v5 = vld [vmem:[%s9196_s9 + $0xdd0] sm:$0xff]   ;;  %v9021_v27 = vld [vmem:[%s9196_s9 + $0xd28] sm:$0xff]  }
 0x1b3   : > { %v6400_v2 = vadd.f32 %v8100_v55, %v9892_v60  ;;  %8424 = vmatprep.subr.bf16.mxu1 %v8992_v9  ;;  %v1384_v35 = vrot.slane %v1370_v39, %v9264_v4  ;;  %v1853_v55 = vpack.c.bf16 %v1687_v47, %v1687_v47  ;;  %v9010_v10 = vld [vmem:[%s9196_s9 + $0xd90] sm:$0xff]   ;;  %v9018_v19 = vld [vmem:[%s9196_s9 + $0xda0] sm:$0xff]   ;;  %v9022_v37 = vld [vmem:[%s9196_s9 + $0xda8] sm:$0xff]  }
 0x1b4   : > { %v1688_v56 = vcombine.high %v1686_v50, %v1686_v50  ;;  %v1854_v59 = vpack.c.bf16 %v1686_v50, %v1686_v50  ;;  %v9026_v47 = vld [vmem:[%s9196_s9 + $0xdb0] sm:$0xff]   ;;  %v9027_v50 = vld [vmem:[%s9196_s9 + $0xd78] sm:$0xff]  }
 0x1b5   : > { %v9961_v60 = vadd.f32 %v8122_v3, %v6400_v2  ;;  %8403 = vmatpush3.bf16.msra.mxu0 %v8993_v15  ;;  %v1385_v52 = vcombine.low %v1377_v23, %v1384_v35  ;;  %6957 = vmatprep.mubr.bf16.mxu0 %v1853_v55  ;;  %v9007_v3 = vld [vmem:[%s9196_s9 + $0xd50] sm:$0xff]   ;;  %v9015_v15 = vld [vmem:[%s9196_s9 + $0xd60] sm:$0xff]  }
 0x1b6   : > { %8404 = vmatprep.subr.bf16.mxu0 %v8995_v20  ;;  %8425 = vmatpush3.bf16.msra.mxu1 %v8994_v28  ;;  %v1855_v61 = vpack.c.bf16 %v1688_v56, %v1688_v56  ;;  %v9019_v20 = vld [vmem:[%s9196_s9 + $0xd68] sm:$0xff]   ;;  %v9025_v35 = vld [vmem:[%s9196_s9 + $0xd30] sm:$0xff]   ;;  %v9033_v56 = vld [vmem:[%s9196_s9 + $0xe00] sm:$0xff]  }
 0x1b7   : > { %8426 = vmatprep.subr.bf16.mxu1 %v8996_v31  ;;  %v1449_v58 = vadd.f32 %v1385_v52, %v873_v43  ;;  %v9030_v52 = vld [vmem:[%s9196_s9 + $0xdb8] sm:$0xff]  }
 0x1b8   : > { %6997 = vmatprep.mubr.bf16.mxu1 %v1855_v61  ;;  %v9037_v61 = vld [vmem:[%s9196_s9 + $0xe08] sm:$0xff]  }
 0x1b9   : > { %8405 = vmatpush3.bf16.msra.mxu0 %v8997_v17  ;;  %v9988_v57 = vrot.slane %v1449_v58, %v9264_v4  ;;  %v1689_v45 = vcombine.high %v1449_v58, %v1449_v58  ;;  %v9023_v17 = vld [vmem:[%s9196_s9 + $0xd70] sm:$0xff]  }
 0x1ba   : > { %8434 = vmatprep.subr.bf16.mxu0 %v8999_v25  ;;  %8427 = vmatpush3.bf16.msra.mxu1 %v8998_v11  ;;  %v9024_v25 = vld [vmem:[%s9196_s9 + $0xdf0] sm:$0xff]  }
 0x1bb   : > { %8456 = vmatprep.subr.bf16.mxu1 %v9000_v51  ;;  %v1704_v62 = vcombine.high %v9988_v57, %v9988_v57  ;;  %v9995_v2 = vrot.slane %v1689_v45, %v9264_v4  ;;  %v9028_v51 = vld [vmem:[%s9196_s9 + $0xdf8] sm:$0xff]   ;;  %v1856_v55 = vpack.c.bf16 %v9988_v57, %v9988_v57  ;;  %v9039_v57 = vld [vmem:[%s9196_s9 + $0xe50] sm:$0xff]  }
 0x1bc   : > { %6958 = vmatmul.mubr.bf16.vlgmr.msra.gmra.mrb[48].mxu0 %v1852_v53  ;;  %v9031_v53 = vld [vmem:[%s9196_s9 + $0xe40] sm:$0xff]   ;;  %v9040_v45 = vld [vmem:[%s9196_s9 + $0xed0] sm:$0xff]  }
 0x1bd   : > { %8435 = vmatpush3.bf16.msra.mxu0 %v9001_v54  ;;  %6998 = vmatmul.mubr.bf16.vlgmr.msra.gmra.mrb[48].mxu1 %v1854_v59  ;;  %v1857_v6 = vpack.c.bf16 %v1704_v62, %v1704_v62  ;;  %v1705_v7 = vcombine.high %v9995_v2, %v9995_v2  ;;  %v9032_v54 = vld [vmem:[%s9196_s9 + $0xec0] sm:$0xff]   ;;  %v1858_v58 = vpack.c.bf16 %v9995_v2, %v9995_v2  ;;  %v9035_v59 = vld [vmem:[%s9196_s9 + $0xe48] sm:$0xff]   ;;  %v9043_v62 = vld [vmem:[%s9196_s9 + $0xe58] sm:$0xff]  }
 0x1be   : > { %8436 = vmatprep.subr.bf16.mxu0 %v9003_v48  ;;  %8457 = vmatpush3.bf16.msra.mxu1 %v9002_v46  ;;  %v9034_v46 = vld [vmem:[%s9196_s9 + $0xe80] sm:$0xff]   ;;  %v9036_v48 = vld [vmem:[%s9196_s9 + $0xec8] sm:$0xff]   ;;  %v9044_v2 = vld [vmem:[%s9196_s9 + $0xed8] sm:$0xff]  }
 0x1bf   : > { %8458 = vmatprep.subr.bf16.mxu1 %v9004_v63  ;;  %7037 = vmatprep.mubr.bf16.mxu0 %v1857_v6  ;;  %v1859_v9 = vpack.c.bf16 %v1705_v7, %v1705_v7  ;;  %v9038_v63 = vld [vmem:[%s9196_s9 + $0xe88] sm:$0xff]   ;;  %v9047_v6 = vld [vmem:[%s9196_s9 + $0xe60] sm:$0xff]  }
 0x1c0   : > { %v9048_v7 = vld [vmem:[%s9196_s9 + $0xee0] sm:$0xff]  }
 0x1c1   : > { %8437 = vmatpush3.bf16.msra.mxu0 %v9005_v0  ;;  %7077 = vmatprep.mubr.bf16.mxu1 %v1859_v9  ;;  %v9041_v0 = vld [vmem:[%s9196_s9 + $0xe10] sm:$0xff]   ;;  %v10051_v9 = vld [vmem:[%s9181_s24 + $0x38] sm:$0xff] }
 0x1c2   : > { %8438 = vmatprep.subr.bf16.mxu0 %v9007_v3  ;;  %8459 = vmatpush3.bf16.msra.mxu1 %v9006_v26  ;;  %v9042_v26 = vld [vmem:[%s9196_s9 + $0xe90] sm:$0xff]   ;;  %v9045_v3 = vld [vmem:[%s9196_s9 + $0xe18] sm:$0xff]  }
 0x1c3   : > { %8460 = vmatprep.subr.bf16.mxu1 %v9008_v5  ;;  %v9046_v5 = vld [vmem:[%s9196_s9 + $0xe98] sm:$0xff]  }
 0x1c5   : > { %8439 = vmatpush3.bf16.msra.mxu0 %v9009_v8  ;;  %v9049_v8 = vld [vmem:[%s9196_s9 + $0xe20] sm:$0xff]  }
 0x1c6   : > { %8440 = vmatprep.subr.bf16.mxu0 %v9011_v12  ;;  %8461 = vmatpush3.bf16.msra.mxu1 %v9010_v10  ;;  %v9051_v10 = vld [vmem:[%s9196_s9 + $0xe68] sm:$0xff]   ;;  %v307_v12 = vld [vmem:[%s9186_s27 + $0x38] sm:$0xff] }
 0x1c7   : > { %8462 = vmatprep.subr.bf16.mxu1 %v9012_v13  ;;  %v298_v13 = vunpack.c.l.bf16 %v10051_v9 }
 0x1c9   : > { %8441 = vmatpush3.bf16.msra.mxu0 %v9013_v1  ;;  %v543_v1 = vrot.slane %v307_v12, %v9226_v30 }
 0x1ca   : > { %8442 = vmatprep.subr.bf16.mxu0 %v9015_v15  ;;  %8463 = vmatpush3.bf16.msra.mxu1 %v9014_v14  ;;  %v547_v14 = vrot.slane %v307_v12, %v9229_v32  ;;  %v551_v15 = vrot.slane %v307_v12, %v9232_v34 }
 0x1cb   : > { %8464 = vmatprep.subr.bf16.mxu1 %v9016_v16  ;;  %v10059_v16 = vld [vmem:[%s9191_s30 + $0x38] sm:$0xff] }
 0x1cd   : > { %8443 = vmatpush3.bf16.msra.mxu0 %v9017_v18  ;;  %v9050_v18 = vld [vmem:[%s9196_s9 + $0xea0] sm:$0xff]  }
 0x1ce   : > { %8444 = vmatprep.subr.bf16.mxu0 %v9019_v20  ;;  %8465 = vmatpush3.bf16.msra.mxu1 %v9018_v19  ;;  %v555_v20 = vrot.slane %v307_v12, %v9235_v36 }
 0x1cf   : > { %v8142_v21 = vpop.f32.mrb[24].mxu0  ;;  %v8164_v28 = vpop.f32.mrb[24].mxu1  ;;  %8466 = vmatprep.subr.bf16.mxu1 %v9020_v22  ;;  %v1123_v22 = vrot.slane %v10059_v16, %v9229_v32  ;;  %v9055_v32 = vld [vmem:[%s9196_s9 + $0xe70] sm:$0xff]  }
 0x1d0   : > { %v8143_v24 = vpop.f32.mrb[25].mxu0  ;;  %v8165_v33 = vpop.f32.mrb[25].mxu1 }
 0x1d1   : > { %v8144_v29 = vadd.f32 %v8143_v24, %v8142_v21  ;;  %v8145_v31 = vpop.f32.mrb[26].mxu0  ;;  %v8166_v41 = vadd.f32 %v8165_v33, %v8164_v28  ;;  %v8167_v42 = vpop.f32.mrb[26].mxu1  ;;  %8445 = vmatpush3.bf16.msra.mxu0 %v9021_v27  ;;  %v1119_v21 = vrot.slane %v10059_v16, %v9226_v30  ;;  %v1127_v24 = vrot.slane %v10059_v16, %v9232_v34  ;;  %v9052_v28 = vld [vmem:[%s9196_s9 + $0xee8] sm:$0xff]  }
 0x1d2   : > { %v8146_v39 = vpop.f32.mrb[27].mxu0  ;;  %v8168_v43 = vpop.f32.mrb[27].mxu1  ;;  %8446 = vmatprep.subr.bf16.mxu0 %v9023_v17  ;;  %8467 = vmatpush3.bf16.msra.mxu1 %v9022_v37  ;;  %v1131_v31 = vrot.slane %v10059_v16, %v9235_v36  ;;  %v299_v33 = vunpack.c.h.bf16 %v10051_v9  ;;  %v559_v37 = vrot.slane %v307_v12, %v9238_v38  ;;  %v563_v42 = vrot.slane %v307_v12, %v9241_v40  ;;  %v9062_v9 = vld [vmem:[%s9196_s9 + $0xeb8] sm:$0xff]  }
 0x1d3   : > { %v6480_v23 = vadd.f32 %v8144_v29, %v9961_v60  ;;  %8468 = vmatprep.subr.bf16.mxu1 %v9024_v25  ;;  %v9029_v60 = vld [vmem:[%s9196_s9 + $0xd38] sm:$0xff]   ;;  %v810_v29 = vcombine.low %v543_v1, %v547_v14  ;;  %v1386_v34 = vcombine.low %v1119_v21, %v1123_v22  ;;  %v9063_v14 = vld [vmem:[%s9196_s9 + $0xf40] sm:$0xff]  }
 0x1d5   : > { %v10019_v11 = vadd.f32 %v8166_v41, %v6480_v23  ;;  %8447 = vmatpush3.bf16.msra.mxu0 %v9025_v35  ;;  %v9053_v23 = vld [vmem:[%s9196_s9 + $0xe28] sm:$0xff]   ;;  %v811_v41 = vcombine.low %v551_v15, %v555_v20  ;;  %v818_v36 = vrot.slane %v810_v29, %v9264_v4  ;;  %v1387_v35 = vcombine.low %v1127_v24, %v1131_v31  ;;  %v9065_v29 = vld [vmem:[%s9196_s9 + $0xf00] sm:$0xff]  }
 0x1d6   : > { %8448 = vmatprep.subr.bf16.mxu0 %v9027_v50  ;;  %8469 = vmatpush3.bf16.msra.mxu1 %v9026_v47  ;;  %v567_v47 = vrot.slane %v307_v12, %v9246_v44  ;;  %v571_v50 = vrot.slane %v307_v12, %v9251_v49 }
 0x1d7   : > { %8470 = vmatprep.subr.bf16.mxu1 %v9028_v51 }
 0x1d9   : > { %8449 = vmatpush3.bf16.msra.mxu0 %v9029_v60 }
 0x1da   : > { %8478 = vmatprep.subr.bf16.mxu0 %v9031_v53  ;;  %8471 = vmatpush3.bf16.msra.mxu1 %v9030_v52  ;;  %v9054_v53 = vld [vmem:[%s9196_s9 + $0xea8] sm:$0xff]  }
 0x1db   : > { %8500 = vmatprep.subr.bf16.mxu1 %v9032_v54  ;;  %v825_v54 = vrot.slane %v811_v41, %v9264_v4 }
 0x1dc   : > { %7038 = vmatmul.mubr.bf16.vlgmr.msra.gmra.mrb[52].mxu0 %v1856_v55  ;;  %v1394_v55 = vrot.slane %v1386_v34, %v9264_v4  ;;  %v9069_v34 = vld [vmem:[%s9196_s9 + $0xf08] sm:$0xff]  }
 0x1dd   : > { %8479 = vmatpush3.bf16.msra.mxu0 %v9033_v56  ;;  %7078 = vmatmul.mubr.bf16.vlgmr.msra.gmra.mrb[52].mxu1 %v1858_v58  ;;  %v1401_v58 = vrot.slane %v1387_v35, %v9264_v4 }
 0x1de   : > { %8480 = vmatprep.subr.bf16.mxu0 %v9035_v59  ;;  %8501 = vmatpush3.bf16.msra.mxu1 %v9034_v46  ;;  %v9056_v46 = vld [vmem:[%s9196_s9 + $0xef0] sm:$0xff]   ;;  %v827_v59 = vcombine.low %v559_v37, %v563_v42 }
 0x1df   : > { %8502 = vmatprep.subr.bf16.mxu1 %v9036_v48  ;;  %v828_v48 = vcombine.low %v567_v47, %v571_v50  ;;  %v9071_v42 = vld [vmem:[%s9196_s9 + $0xf50] sm:$0xff]   ;;  %v9075_v50 = vld [vmem:[%s9196_s9 + $0xf58] sm:$0xff]  }
 0x1e0   : > { %v9073_v47 = vld [vmem:[%s9196_s9 + $0xf10] sm:$0xff]  }
 0x1e1   : > { %8481 = vmatpush3.bf16.msra.mxu0 %v9037_v61  ;;  %v1135_v61 = vrot.slane %v10059_v16, %v9238_v38  ;;  %v842_v38 = vrot.slane %v828_v48, %v9264_v4 }
 0x1e2   : > { %8482 = vmatprep.subr.bf16.mxu0 %v9039_v57  ;;  %8503 = vmatpush3.bf16.msra.mxu1 %v9038_v63  ;;  %v9057_v63 = vld [vmem:[%s9196_s9 + $0xe30] sm:$0xff]   ;;  %v826_v57 = vcombine.low %v818_v36, %v825_v54  ;;  %v9070_v36 = vld [vmem:[%s9196_s9 + $0xf88] sm:$0xff]   ;;  %v9078_v54 = vld [vmem:[%s9196_s9 + $0xf98] sm:$0xff]  }
 0x1e3   : > { %8504 = vmatprep.subr.bf16.mxu1 %v9040_v45  ;;  %v1139_v45 = vrot.slane %v10059_v16, %v9241_v40 }
 0x1e4   : > { %v874_v40 = vmul.f32 %v826_v57, %v298_v13  ;;  %v9084_v57 = vld [vmem:[%s9196_s9 + $0xfe8] sm:$0xff]  }
 0x1e5   : > { %8483 = vmatpush3.bf16.msra.mxu0 %v9041_v0  ;;  %v1143_v0 = vrot.slane %v10059_v16, %v9246_v44  ;;  %v9060_v44 = vld [vmem:[%s9196_s9 + $0xef8] sm:$0xff]  }
 0x1e6   : > { %8484 = vmatprep.subr.bf16.mxu0 %v9043_v62  ;;  %8505 = vmatpush3.bf16.msra.mxu1 %v9042_v26  ;;  %v9059_v26 = vld [vmem:[%s9196_s9 + $0xe78] sm:$0xff]   ;;  %v1402_v62 = vcombine.low %v1394_v55, %v1401_v58  ;;  %v9080_v55 = vld [vmem:[%s9196_s9 + $0xfe0] sm:$0xff]   ;;  %v9083_v58 = vld [vmem:[%s9196_s9 + $0xf68] sm:$0xff]  }
 0x1e7   : > { %8506 = vmatprep.subr.bf16.mxu1 %v9044_v2  ;;  %v835_v2 = vrot.slane %v827_v59, %v9264_v4  ;;  %v9082_v59 = vld [vmem:[%s9196_s9 + $0xfa0] sm:$0xff]  }
 0x1e8   : > { %v1450_v12 = vadd.f32 %v1402_v62, %v874_v40  ;;  %v9086_v40 = vld [vmem:[%s9196_s9 + $0xfa8] sm:$0xff]  }
 0x1e9   : > { %8485 = vmatpush3.bf16.msra.mxu0 %v9045_v3  ;;  %v1147_v3 = vrot.slane %v10059_v16, %v9251_v49 }
 0x1ea   : > { %8486 = vmatprep.subr.bf16.mxu0 %v9047_v6  ;;  %8507 = vmatpush3.bf16.msra.mxu1 %v9046_v5  ;;  %v9058_v5 = vld [vmem:[%s9196_s9 + $0xeb0] sm:$0xff]   ;;  %v1403_v6 = vcombine.low %v1135_v61, %v1139_v45  ;;  %v1713_v13 = vrot.slane %v1450_v12, %v9264_v4  ;;  %v1706_v16 = vcombine.high %v1450_v12, %v1450_v12  ;;  %v9092_v12 = vld [vmem:[%s9196_s9 + $0xff8] sm:$0xff]  }
 0x1eb   : > { %8508 = vmatprep.subr.bf16.mxu1 %v9048_v7  ;;  %v843_v7 = vcombine.low %v835_v2, %v842_v38 }
 0x1ec   : > { %v1411_v1 = vrot.slane %v1403_v6, %v9264_v4  ;;  %v1721_v20 = vcombine.high %v1713_v13, %v1713_v13  ;;  %v1720_v21 = vrot.slane %v1706_v16, %v9264_v4  ;;  %v1860_v22 = vpack.c.bf16 %v1713_v13, %v1713_v13 }
 0x1ed   : > { %8487 = vmatpush3.bf16.msra.mxu0 %v9049_v8  ;;  %v1404_v8 = vcombine.low %v1143_v0, %v1147_v3  ;;  %v875_v49 = vmul.f32 %v843_v7, %v299_v33  ;;  %v9067_v33 = vld [vmem:[%s9196_s9 + $0xf48] sm:$0xff]   ;;  %v9088_v7 = vld [vmem:[%s9196_s9 + $0xff0] sm:$0xff]  }
 0x1ee   : > { %8488 = vmatprep.subr.bf16.mxu0 %v9051_v10  ;;  %8509 = vmatpush3.bf16.msra.mxu1 %v9050_v18  ;;  %v9061_v10 = vld [vmem:[%s9196_s9 + $0xe38] sm:$0xff]   ;;  %v9064_v18 = vld [vmem:[%s9196_s9 + $0xfc0] sm:$0xff]   ;;  %v1862_v31 = vpack.c.bf16 %v1720_v21, %v1720_v21 }
 0x1ef   : > { %v8186_v19 = vpop.f32.mrb[28].mxu0  ;;  %v8208_v39 = vpop.f32.mrb[28].mxu1  ;;  %8510 = vmatprep.subr.bf16.mxu1 %v9052_v28  ;;  %v1418_v15 = vrot.slane %v1404_v8, %v9264_v4  ;;  %v1722_v28 = vcombine.high %v1720_v21, %v1720_v21  ;;  %v9089_v8 = vld [vmem:[%s9196_s9 + $0xf30] sm:$0xff]  }
 0x1f0   : > { %v8187_v27 = vpop.f32.mrb[29].mxu0  ;;  %v8209_v25 = vpop.f32.mrb[29].mxu1 }
 0x1f1   : > { %v8188_v30 = vadd.f32 %v8187_v27, %v8186_v19  ;;  %v8189_v17 = vpop.f32.mrb[30].mxu0  ;;  %v8210_v60 = vadd.f32 %v8209_v25, %v8208_v39  ;;  %v8211_v52 = vpop.f32.mrb[30].mxu1  ;;  %8489 = vmatpush3.bf16.msra.mxu0 %v9053_v23  ;;  %v1419_v19 = vcombine.low %v1411_v1, %v1418_v15  ;;  %v1861_v27 = vpack.c.bf16 %v1721_v20, %v1721_v20  ;;  %v9068_v23 = vld [vmem:[%s9196_s9 + $0xfc8] sm:$0xff]   ;;  %v9093_v1 = vld [vmem:[%s9196_s9 + $0xf38] sm:$0xff]  }
 0x1f2   : > { %v8190_v43 = vpop.f32.mrb[31].mxu0  ;;  %v8212_v56 = vpop.f32.mrb[31].mxu1  ;;  %8490 = vmatprep.subr.bf16.mxu0 %v9055_v32  ;;  %8511 = vmatpush3.bf16.msra.mxu1 %v9054_v53  ;;  %v9066_v17 = vld [vmem:[%s9196_s9 + $0xf80] sm:$0xff]   ;;  %v9077_v52 = vld [vmem:[%s9196_s9 + $0xf18] sm:$0xff]  }
 0x1f3   : > { %v6560_v51 = vadd.f32 %v8188_v30, %v10019_v11  ;;  %8512 = vmatprep.subr.bf16.mxu1 %v9056_v46  ;;  %v1451_v24 = vadd.f32 %v1419_v19, %v875_v49  ;;  %7117 = vmatprep.mubr.bf16.mxu0 %v1861_v27  ;;  %v1863_v30 = vpack.c.bf16 %v1722_v28, %v1722_v28  ;;  %v9079_v53 = vld [vmem:[%s9196_s9 + $0xf60] sm:$0xff]  }
 0x1f4   : > { %v9081_v56 = vld [vmem:[%s9196_s9 + $0xf20] sm:$0xff]  }
 0x1f5   : > { %v10088_v11 = vadd.f32 %v8210_v60, %v6560_v51  ;;  %8491 = vmatpush3.bf16.msra.mxu0 %v9057_v63  ;;  %v10115_v37 = vrot.slane %v1451_v24, %v9264_v4  ;;  %v1723_v39 = vcombine.high %v1451_v24, %v1451_v24  ;;  %7157 = vmatprep.mubr.bf16.mxu1 %v1863_v30  ;;  %v9074_v51 = vld [vmem:[%s9196_s9 + $0xf90] sm:$0xff]   ;;  %v9076_v60 = vld [vmem:[%s9196_s9 + $0xfd8] sm:$0xff]  }
 0x1f6   : > { %8492 = vmatprep.subr.bf16.mxu0 %v9059_v26  ;;  %8513 = vmatpush3.bf16.msra.mxu1 %v9058_v5  ;;  %v9085_v26 = vld [vmem:[%s9196_s9 + $0xf28] sm:$0xff]   ;;  %v9087_v5 = vld [vmem:[%s9196_s9 + $0xf70] sm:$0xff]  }
 0x1f7   : > { %8514 = vmatprep.subr.bf16.mxu1 %v9060_v44  ;;  %v1738_v32 = vcombine.high %v10115_v37, %v10115_v37  ;;  %v10122_v41 = vrot.slane %v1723_v39, %v9264_v4  ;;  %v9072_v4 = vld [vmem:[%s9196_s9 + $0xfd0] sm:$0xff]   ;;  %v1864_v49 = vpack.c.bf16 %v10115_v37, %v10115_v37 }
 0x1f9   : > { %8493 = vmatpush3.bf16.msra.mxu0 %v9061_v10  ;;  %v1865_v25 = vpack.c.bf16 %v1738_v32, %v1738_v32  ;;  %v1739_v43 = vcombine.high %v10122_v41, %v10122_v41  ;;  %v9091_v10 = vld [vmem:[%s9196_s9 + $0xf78] sm:$0xff]   ;;  %v1866_v15 = vpack.c.bf16 %v10122_v41, %v10122_v41 }
 0x1fa   : > { %8522 = vmatprep.subr.bf16.mxu0 %v9063_v14  ;;  %8515 = vmatpush3.bf16.msra.mxu1 %v9062_v9  ;;  %v9094_v14 = vld [vmem:[%s9196_s9 + $0xfb8] sm:$0xff]  }
 0x1fb   : > { %8544 = vmatprep.subr.bf16.mxu1 %v9064_v18  ;;  %v1867_v35 = vpack.c.bf16 %v1739_v43, %v1739_v43 }
 0x1fc   : > { %7118 = vmatmul.mubr.bf16.vlgmr.msra.gmra.mrb[56].mxu0 %v1860_v22 }
 0x1fd   : > { %8523 = vmatpush3.bf16.msra.mxu0 %v9065_v29  ;;  %7158 = vmatmul.mubr.bf16.vlgmr.msra.gmra.mrb[56].mxu1 %v1862_v31 }
 0x1fe   : > { %8524 = vmatprep.subr.bf16.mxu0 %v9067_v33  ;;  %8545 = vmatpush3.bf16.msra.mxu1 %v9066_v17 }
 0x1ff   : > { %8546 = vmatprep.subr.bf16.mxu1 %v9068_v23  ;;  %7197 = vmatprep.mubr.bf16.mxu0 %v1865_v25 }
 0x200   : > { %7237 = vmatprep.mubr.bf16.mxu1 %v1867_v35 }
 0x201   : > { %8525 = vmatpush3.bf16.msra.mxu0 %v9069_v34 }
 0x202   : > { %8526 = vmatprep.subr.bf16.mxu0 %v9071_v42  ;;  %8547 = vmatpush3.bf16.msra.mxu1 %v9070_v36 }
 0x203   : > { %8548 = vmatprep.subr.bf16.mxu1 %v9072_v4 }
 0x205   : > { %8527 = vmatpush3.bf16.msra.mxu0 %v9073_v47 }
 0x206   : > { %8528 = vmatprep.subr.bf16.mxu0 %v9075_v50  ;;  %8549 = vmatpush3.bf16.msra.mxu1 %v9074_v51 }
 0x207   : > { %8550 = vmatprep.subr.bf16.mxu1 %v9076_v60 }
 0x209   : > { %8529 = vmatpush3.bf16.msra.mxu0 %v9077_v52 }
 0x20a   : > { %8530 = vmatprep.subr.bf16.mxu0 %v9079_v53  ;;  %8551 = vmatpush3.bf16.msra.mxu1 %v9078_v54 }
 0x20b   : > { %8552 = vmatprep.subr.bf16.mxu1 %v9080_v55 }
 0x20d   : > { %8531 = vmatpush3.bf16.msra.mxu0 %v9081_v56 }
 0x20e   : > { %8532 = vmatprep.subr.bf16.mxu0 %v9083_v58  ;;  %8553 = vmatpush3.bf16.msra.mxu1 %v9082_v59 }
 0x20f   : > { %v8230_v46 = vpop.f32.mrb[32].mxu0  ;;  %v8252_v61 = vpop.f32.mrb[32].mxu1  ;;  %8554 = vmatprep.subr.bf16.mxu1 %v9084_v57 }
 0x210   : > { %v8231_v48 = vpop.f32.mrb[33].mxu0  ;;  %v8253_v0 = vpop.f32.mrb[33].mxu1 }
 0x211   : > { %v8232_v63 = vadd.f32 %v8231_v48, %v8230_v46  ;;  %v8233_v45 = vpop.f32.mrb[34].mxu0  ;;  %v8254_v38 = vadd.f32 %v8253_v0, %v8252_v61  ;;  %v8255_v3 = vpop.f32.mrb[34].mxu1  ;;  %8533 = vmatpush3.bf16.msra.mxu0 %v9085_v26 }
 0x212   : > { %v8234_v62 = vpop.f32.mrb[35].mxu0  ;;  %v8256_v6 = vpop.f32.mrb[35].mxu1  ;;  %8534 = vmatprep.subr.bf16.mxu0 %v9087_v5  ;;  %8555 = vmatpush3.bf16.msra.mxu1 %v9086_v40 }
 0x213   : > { %v6640_v2 = vadd.f32 %v8232_v63, %v10088_v11  ;;  %v9090_v11 = vld [vmem:[%s9196_s9 + $0xfb0] sm:$0xff]   ;;  %8556 = vmatprep.subr.bf16.mxu1 %v9088_v7 }
 0x215   : > { %v6680_v44 = vadd.f32 %v8254_v38, %v6640_v2  ;;  %8535 = vmatpush3.bf16.msra.mxu0 %v9089_v8 }
 0x216   : > { %8536 = vmatprep.subr.bf16.mxu0 %v9091_v10  ;;  %8557 = vmatpush3.bf16.msra.mxu1 %v9090_v11 }
 0x217   : > { %8558 = vmatprep.subr.bf16.mxu1 %v9092_v12 }
 0x219   : > { %8537 = vmatpush3.bf16.msra.mxu0 %v9093_v1 }
 0x21a   : > { %8559 = vmatpush3.bf16.msra.mxu1 %v9094_v14 }
 0x21c   : > { %7198 = vmatmul.mubr.bf16.vlgmr.msra.gmra.mrb[60].mxu0 %v1864_v49 }
 0x21d   : > { %7238 = vmatmul.mubr.bf16.vlgmr.msra.gmra.mrb[60].mxu1 %v1866_v15 }
 0x22f   : > { %v8274_v9 = vpop.f32.mrb[36].mxu0  ;;  %v8296_v16 = vpop.f32.mrb[36].mxu1 }
 0x230   : > { %v8275_v13 = vpop.f32.mrb[37].mxu0  ;;  %v8297_v20 = vpop.f32.mrb[37].mxu1 }
 0x231   : > { %v8276_v18 = vadd.f32 %v8275_v13, %v8274_v9  ;;  %v8277_v19 = vpop.f32.mrb[38].mxu0  ;;  %v8298_v24 = vadd.f32 %v8297_v20, %v8296_v16  ;;  %v8299_v27 = vpop.f32.mrb[38].mxu1 }
 0x232   : > { %v8278_v21 = vpop.f32.mrb[39].mxu0  ;;  %v8300_v28 = vpop.f32.mrb[39].mxu1 }
 0x233   : > { %v6720_v22 = vadd.f32 %v8276_v18, %v6680_v44 }
 0x235   : > { %v6760_v29 = vadd.f32 %v8298_v24, %v6720_v22 }
 0x24f   : > { %v8318_v31 = vpop.f32.mrb[40].mxu0  ;;  %v8340_v37 = vpop.f32.mrb[40].mxu1 }
 0x250   : > { %v8319_v33 = vpop.f32.mrb[41].mxu0  ;;  %v8341_v17 = vpop.f32.mrb[41].mxu1 }
 0x251   : > { %v8320_v39 = vadd.f32 %v8319_v33, %v8318_v31  ;;  %v8321_v30 = vpop.f32.mrb[42].mxu0  ;;  %v8342_v41 = vadd.f32 %v8341_v17, %v8340_v37  ;;  %v8343_v34 = vpop.f32.mrb[42].mxu1 }
 0x252   : > { %v8322_v23 = vpop.f32.mrb[43].mxu0  ;;  %v8344_v42 = vpop.f32.mrb[43].mxu1 }
 0x253   : > { %v6800_v32 = vadd.f32 %v8320_v39, %v6760_v29  ;;  %v1868_v23 = vld [vmem:[#allocation2] sm:$0x3] }
 0x255   : > { %v6840_v25 = vadd.f32 %v8342_v41, %v6800_v32 }
 0x26f   : > { %v8362_v43 = vpop.f32.mrb[44].mxu0 }
 0x270   : > { %v8363_v36 = vpop.f32.mrb[45].mxu0  ;;  %v8384_v4 = vpop.f32.mrb[44].mxu1 }
 0x271   : > { %v8364_v35 = vadd.f32 %v8363_v36, %v8362_v43  ;;  %v8365_v47 = vpop.f32.mrb[46].mxu0  ;;  %v8385_v50 = vpop.f32.mrb[45].mxu1 }
 0x272   : > { %v8366_v51 = vpop.f32.mrb[47].mxu0  ;;  %v8386_v52 = vadd.f32 %v8385_v50, %v8384_v4  ;;  %v8387_v53 = vpop.f32.mrb[46].mxu1 }
 0x273   : > { %v6880_v60 = vadd.f32 %v8364_v35, %v6840_v25  ;;  %v8388_v54 = vpop.f32.mrb[47].mxu1  ;;  %v7857_v25 = vld [vmem:[%s10191_s4] ss:$0 sm:$0xff] (!%p7856_p6) }
 0x275   : > { %v6920_v55 = vadd.f32 %v8386_v52, %v6880_v60 }
 0x28f   : > { %v8406_v56 = vpop.f32.mrb[48].mxu0 }
 0x290   : > { %v8407_v46 = vpop.f32.mrb[49].mxu0  ;;  %v8428_v58 = vpop.f32.mrb[48].mxu1 }
 0x291   : > { %v8408_v59 = vadd.f32 %v8407_v46, %v8406_v56  ;;  %v8409_v48 = vpop.f32.mrb[50].mxu0  ;;  %v8429_v61 = vpop.f32.mrb[49].mxu1 }
 0x292   : > { %v8410_v63 = vpop.f32.mrb[51].mxu0  ;;  %v8430_v45 = vadd.f32 %v8429_v61, %v8428_v58  ;;  %v8431_v0 = vpop.f32.mrb[50].mxu1 }
 0x293   : > { %v6960_v57 = vadd.f32 %v8408_v59, %v6920_v55  ;;  %v8432_v26 = vpop.f32.mrb[51].mxu1 }
 0x295   : > { %v7000_v62 = vadd.f32 %v8430_v45, %v6960_v57 }
 0x2af   : > { %v8450_v2 = vpop.f32.mrb[52].mxu0 }
 0x2b0   : > { %v8451_v38 = vpop.f32.mrb[53].mxu0  ;;  %v8472_v3 = vpop.f32.mrb[52].mxu1 }
 0x2b1   : > { %v8452_v5 = vadd.f32 %v8451_v38, %v8450_v2  ;;  %v8453_v40 = vpop.f32.mrb[54].mxu0  ;;  %v8473_v6 = vpop.f32.mrb[53].mxu1 }
 0x2b2   : > { %v8454_v44 = vpop.f32.mrb[55].mxu0  ;;  %v8474_v8 = vadd.f32 %v8473_v6, %v8472_v3  ;;  %v8475_v10 = vpop.f32.mrb[54].mxu1 }
 0x2b3   : > { %v7040_v7 = vadd.f32 %v8452_v5, %v7000_v62  ;;  %v8476_v11 = vpop.f32.mrb[55].mxu1 }
 0x2b5   : > { %v7080_v12 = vadd.f32 %v8474_v8, %v7040_v7 }
 0x2cf   : > { %v8494_v1 = vpop.f32.mrb[56].mxu0 }
 0x2d0   : > { %v8495_v14 = vpop.f32.mrb[57].mxu0  ;;  %v8516_v49 = vpop.f32.mrb[56].mxu1 }
 0x2d1   : > { %v8496_v15 = vadd.f32 %v8495_v14, %v8494_v1  ;;  %v8497_v9 = vpop.f32.mrb[58].mxu0  ;;  %v8517_v13 = vpop.f32.mrb[57].mxu1 }
 0x2d2   : > { %v8498_v16 = vpop.f32.mrb[59].mxu0  ;;  %v8518_v19 = vadd.f32 %v8517_v13, %v8516_v49  ;;  %v8519_v20 = vpop.f32.mrb[58].mxu1 }
 0x2d3   : > { %v7120_v18 = vadd.f32 %v8496_v15, %v7080_v12  ;;  %v8520_v21 = vpop.f32.mrb[59].mxu1 }
 0x2d5   : > { %v7160_v22 = vadd.f32 %v8518_v19, %v7120_v18 }
 0x2ef   : > { %v8538_v24 = vpop.f32.mrb[60].mxu0 }
 0x2f0   : > { %v8539_v27 = vpop.f32.mrb[61].mxu0  ;;  %v8560_v28 = vpop.f32.mrb[60].mxu1 }
 0x2f1   : > { %v8540_v29 = vadd.f32 %v8539_v27, %v8538_v24  ;;  %v8541_v31 = vpop.f32.mrb[62].mxu0  ;;  %v8561_v33 = vpop.f32.mrb[61].mxu1 }
 0x2f2   : > { %v8542_v37 = vpop.f32.mrb[63].mxu0  ;;  %v8562_v30 = vadd.f32 %v8561_v33, %v8560_v28  ;;  %v8563_v17 = vpop.f32.mrb[62].mxu1 }
 0x2f3   : > { %v7200_v39 = vadd.f32 %v8540_v29, %v7160_v22  ;;  %v8564_v32 = vpop.f32.mrb[63].mxu1  ;;  %7250 = sbr.rel (%p7856_p6) target bundleno = 772 (0x304), region = 48 }
 0x2f5   : > { %v7240_v41 = vadd.f32 %v8562_v30, %v7200_v39 }
 0x2f7   : > { %v7245_v34 = vadd.f32 %v7240_v41, %v1868_v23 }
 0x2f9   : > { %7246 = vst [vmem:[#allocation2] sm:$0x3] %v7245_v34 }
 0x300   : > { %v7251_v42 = vld [vmem:[#allocation2] sm:$0x3] }
 0x301   : > { %v7259_v43 = vadd.f32 %v7857_v25, %v7251_v42 }
 0x303   : > { %7260 = vst [vmem:[#allocation3] sm:$0x3] %v7259_v43 }
 0x304 PF: > { %p8570_p7 = scmp.eq.s32.totalorder %s9172_s19, 1  ;;  %s9135_s12 = smov [#allocation3]  }
 0x305   : > { %s7268_s13 = sshll.u32 %s9135_s12, 4  ;;  %s7269_s13 = int_to_ptr.vmem [resolvable:$true] %s7268_s13 }
 0x306   : > { %s9095_s14 = scalar_lea.vmem %s7269_s13, 32  ;;  %p9102_p11 = scmp.lt.s32.totalorder %s7269_s13, %s7269_s13 }
 0x307   : > { %p9096_p8 = scmp.ne.s32.totalorder %s7269_s13, %s9095_s14  ;;  %p9103_p12 = scmp.lt.s32.totalorder %s9095_s14, %s9095_s14 }
 0x309   : > { %p9097_p9 = pnand %p9096_p8, %p8570_p7  ;;  %p9104_p13 = por %p9103_p12, %p9102_p11 }
 0x30b   : > { %p9098_p10 = pneg %p9097_p9 }
 0x30d   : > { %p9105_p0 = pnand %p9104_p13, %p9098_p10 }
 0x30f   : > { %9108 = shalt.err (!%p9105_p0)
}
 0x310   : > { %s9109_s17 = scalar_lea.hbm %s10192_s5, 32 }
 0x311   : > { %p9110_p1 = scmp.ne.s32.totalorder %s10192_s5, %s9109_s17  ;;  %p9115_p4 = scmp.lt.u32.totalorder %s9109_s17, %s10192_s5 }
 0x313   : > { %p9111_p2 = pnand %p9110_p1, %p8570_p7 }
 0x315   : > { %p9112_p3 = pneg %p9111_p2 }
 0x317   : > { %p9117_p5 = pnand %p9115_p4, %p9112_p3 }
 0x319   : > { %9120 = shalt.err (!%p9117_p5)
}
 0x31a   : > { %8567 = dma.vmem_to_hbm [thread:$0]  (%p8570_p7), %s7269_s13, 32, %s10192_s5, [#allocation4]  }
 0x31b   : > { %9126 = dma.done.wait (%p8570_p7), [#allocation4], 32  }
 0x31c   : > { %9128 = vsyncadd (%p8570_p7), [#allocation4], 4294967264 }
 0x31d PF: > { %s16_s18 = sadd.s32 1, %s9131_s18  }
 0x31e   : > { %p13_p6 = scmp.ge.s32.totalorder %s16_s18, 4  }
 0x320   :  { %15 = sbr.rel (!%p13_p6) target bundleno = 1 (0x1), region = 84 }
 0x327   :  { %7281 = vsyncpa [#allocation4], 1 }
 0x328   :  { %7283 = vsyncpa [#allocation4 + $0x1], 1 }

</bundles_post_ra>
